<compile_context>
chip_gen: v7x
topology: tpu7x:2x2x1
jax: 0.10.0
libtpu: 0.0.40
codegen_flags: <defaults>
</compile_context>

<pallas_src>
import jax
import jax.numpy as jnp
from jax.experimental import pallas as pl
from jax.experimental.pallas import tpu as pltpu

KSIZE = 28                 # conv kernel size
PAD = KSIZE // 2           # 14, circular padding
IMG = 28                   # input spatial size
OUT_HW = 29                # conv output spatial size (29x29 = 841)
POOL_IN = OUT_HW * OUT_HW  # 841
UNIQ = IMG                 # unique conv output rows/cols (row/col 28 == row/col 0)
PIX = IMG * IMG            # 784
N_CLASSES = 10
NCLS_PAD = 128             # classes padded to a full lane tile
B_TILE = 8                 # batch elements per grid step


def _fused_kernel(x2_ref, wcol_ref, cb_ref, pwf_ref, g_ref, clw_ref, clb_ref,
                  out_ref, lhs_scr):
    # x2_ref : (B_TILE, 2*784) f32   flat image duplicated along lanes
    # wcol_ref: (784, 28*Hp) bf16    column-circulant conv weights
    # cb_ref : (1, 28*Hp)   f32      conv bias tiled over ox
    # pwf_ref: (28*B_TILE, 28*Hp) f32 folded pooling weights, pre-tiled
    # g_ref  : (B_TILE, 28*B_TILE) f32 group-sum-over-oy matrix
    # clw_ref: (28*Hp, 128) f32      classifier weights tiled over ox (padded)
    # clb_ref: (1, 128)     f32      classifier bias (+ folded pooling bias)
    # out_ref: (B_TILE, 128) f32
    # lhs_scr: (28*B_TILE, 784) f32  on-chip patch block (built from shifts)
    x2 = x2_ref[...]
    # Row oy of the unique conv output uses the image circularly shifted by
    # (oy + 14) rows == a lane shift of 28*(oy+14) of the flat image, which is
    # a plain static slice of the lane-doubled image.
    for oy in range(UNIQ):
        start = IMG * ((oy + PAD) % IMG)
        lhs_scr[oy * B_TILE:(oy + 1) * B_TILE, :] = x2[:, start:start + PIX]

    lhs = lhs_scr[...].astype(jnp.bfloat16)                       # (224, 784)
    conv = jnp.dot(lhs, wcol_ref[...],
                   preferred_element_type=jnp.float32)            # (224, 28*Hp)
    conv = jnp.maximum(conv + cb_ref[...], 0.0)                   # bias + ReLU
    weighted = conv * pwf_ref[...]                                # pooling weights
    pooled = jnp.dot(g_ref[...], weighted,
                     preferred_element_type=jnp.float32)          # (B_TILE, 28*Hp)
    out_ref[...] = (jnp.dot(pooled, clw_ref[...],
                            preferred_element_type=jnp.float32)
                    + clb_ref[...])                               # (B_TILE, 128)


def simple_conv_linear_pooling(x, conv_w, conv_b, pool_w, pool_b, cls_w, cls_b):
    """Forward pass. x: (N, 1, 28, 28) -> (N, 10)."""
    n = x.shape[0]
    H = conv_w.shape[0]
    Hp = ((H + 31) // 32) * 32          # 28*Hp is a multiple of 128 (lane dense)
    NW = UNIQ * Hp

    n_pad = ((n + B_TILE - 1) // B_TILE) * B_TILE
    xflat = x.reshape(n, PIX).astype(jnp.float32)
    xflat = jnp.pad(xflat, ((0, n_pad - n), (0, 0)))
    x2 = jnp.concatenate([xflat, xflat], axis=1)                  # (n_pad, 1568)

    # Column-circulant conv weights: Wcol[ky*28+c, ox*Hp+h] = w[h, ky, (c-ox-14)%28]
    w4 = conv_w.reshape(H, KSIZE, KSIZE).astype(jnp.float32)
    w4 = jnp.pad(w4, ((0, Hp - H), (0, 0), (0, 0)))
    cc = jnp.arange(IMG)
    kx_map = (cc[:, None] - cc[None, :] - PAD) % IMG              # [c, ox] -> kx
    wcol = w4[:, :, kx_map]                                       # (Hp, ky, c, ox)
    wcol = jnp.transpose(wcol, (1, 2, 3, 0)).reshape(PIX, NW).astype(jnp.bfloat16)

    cb_big = jnp.tile(jnp.pad(conv_b.astype(jnp.float32), (0, Hp - H)),
                      UNIQ).reshape(1, NW)

    # Fold pooling weights: output row/col 28 duplicate row/col 0.
    pw2 = pool_w.reshape(OUT_HW, OUT_HW).astype(jnp.float32)
    pwf = pw2[:IMG, :IMG]
    pwf = pwf.at[0, :].add(pw2[IMG, :IMG])
    pwf = pwf.at[:, 0].add(pw2[:IMG, IMG])
    pwf = pwf.at[0, 0].add(pw2[IMG, IMG])
    pwf_tiled = jnp.repeat(jnp.repeat(pwf, B_TILE, axis=0), Hp, axis=1)  # (224, NW)

    g = jnp.tile(jnp.eye(B_TILE, dtype=jnp.float32), (1, UNIQ))   # (B_TILE, 224)

    clsw = cls_w.astype(jnp.float32)                              # (10, H)
    clsw_p = jnp.pad(clsw, ((0, NCLS_PAD - N_CLASSES), (0, Hp - H)))  # (128, Hp)
    clw_big = jnp.tile(clsw_p.T, (UNIQ, 1))                       # (NW, 128)
    clb_adj = (pool_b.astype(jnp.float32)[0] * clsw.sum(axis=1)
               + cls_b.astype(jnp.float32))                       # fold pool bias
    clb_adj = jnp.pad(clb_adj, (0, NCLS_PAD - N_CLASSES)).reshape(1, NCLS_PAD)

    out = pl.pallas_call(
        _fused_kernel,
        out_shape=jax.ShapeDtypeStruct((n_pad, NCLS_PAD), jnp.float32),
        grid_spec=pltpu.PrefetchScalarGridSpec(
            num_scalar_prefetch=0,
            grid=(n_pad // B_TILE,),
            in_specs=[
                pl.BlockSpec((B_TILE, 2 * PIX), lambda i: (i, 0)),
                pl.BlockSpec((PIX, NW), lambda i: (0, 0)),
                pl.BlockSpec((1, NW), lambda i: (0, 0)),
                pl.BlockSpec((UNIQ * B_TILE, NW), lambda i: (0, 0)),
                pl.BlockSpec((B_TILE, UNIQ * B_TILE), lambda i: (0, 0)),
                pl.BlockSpec((NW, NCLS_PAD), lambda i: (0, 0)),
                pl.BlockSpec((1, NCLS_PAD), lambda i: (0, 0)),
            ],
            out_specs=pl.BlockSpec((B_TILE, NCLS_PAD), lambda i: (i, 0)),
            scratch_shapes=[pltpu.VMEM((UNIQ * B_TILE, PIX), jnp.float32)],
        ),
        compiler_params=pltpu.CompilerParams(
            dimension_semantics=("parallel",),
            vmem_limit_bytes=32 * 1024 * 1024,
        ),
    )(x2, wcol, cb_big, pwf_tiled, g, clw_big, clb_adj)
    return out[:n, :N_CLASSES]


simple_conv_linear_pooling = jax.jit(simple_conv_linear_pooling)


def _reference(x, conv_w, conv_b, pool_w, pool_b, cls_w, cls_b):
    """Plain-JAX f32 reference matching the PyTorch forward."""
    n = x.shape[0]
    H = conv_w.shape[0]
    xpad = jnp.pad(x.astype(jnp.float32),
                   ((0, 0), (0, 0), (PAD, PAD), (PAD, PAD)), mode="wrap")[:, 0]
    oy = jnp.arange(OUT_HW)
    ky = jnp.arange(KSIZE)
    Y = oy[:, None, None, None] + ky[None, None, :, None]
    X = oy[None, :, None, None] + ky[None, None, None, :]
    patches = xpad[:, Y, X].reshape(n, POOL_IN, PIX)
    conv = patches @ conv_w.reshape(H, PIX).T.astype(jnp.float32) + conv_b
    conv = jnp.maximum(conv, 0.0)
    conv = jnp.transpose(conv, (0, 2, 1))                         # (n, H, 841)
    pooled = conv @ pool_w.reshape(POOL_IN).astype(jnp.float32) + pool_b
    return pooled @ cls_w.T.astype(jnp.float32) + cls_b


def _xavier_uniform(key, shape):
    fan_out, fan_in = shape
    bound = jnp.sqrt(6.0 / (fan_in + fan_out))
    return jax.random.uniform(key, shape, jnp.float32, -bound, bound)


if __name__ == "__main__":
    n_hidden = 32
    batch = 2

    key = jax.random.PRNGKey(0)
    kx, kcw, kcb, kpw, kpb, kclw, kclb = jax.random.split(key, 7)

    x = jax.random.normal(kx, (batch, 1, 28, 28), jnp.float32)
    fan_in_conv = 1 * KSIZE * KSIZE
    bnd = 1.0 / jnp.sqrt(fan_in_conv)
    conv_w = jax.random.uniform(kcw, (n_hidden, 1, KSIZE, KSIZE),
                                jnp.float32, -bnd, bnd)
    conv_b = jax.random.uniform(kcb, (n_hidden,), jnp.float32, -bnd, bnd)
    pool_w = _xavier_uniform(kpw, (1, POOL_IN))
    pool_b = jax.random.uniform(kpb, (1,), jnp.float32,
                                -1.0 / jnp.sqrt(POOL_IN), 1.0 / jnp.sqrt(POOL_IN))
    cls_w = _xavier_uniform(kclw, (N_CLASSES, n_hidden))
    cls_b = jax.random.uniform(kclb, (N_CLASSES,), jnp.float32,
                               -1.0 / jnp.sqrt(n_hidden), 1.0 / jnp.sqrt(n_hidden))

    out = simple_conv_linear_pooling(x, conv_w, conv_b, pool_w, pool_b,
                                     cls_w, cls_b)
    out = jax.block_until_ready(out)

    ref = _reference(x, conv_w, conv_b, pool_w, pool_b, cls_w, cls_b)
    assert out.shape == (batch, N_CLASSES)
    # bf16 conv matmul (f32 accumulation) -> relaxed tolerance vs f32 reference.
    assert jnp.allclose(out, ref, atol=5e-2, rtol=5e-2), (
        f"max abs err {jnp.max(jnp.abs(out - ref))}")
    print("KERNEL_OK")
</pallas_src>

<mosaic_0001>
module attributes {stable_mosaic.version = 11 : i64} {
  func.func @_fused_kernel(%arg0: i32, %arg1: memref<8x1568xf32, #tpu.memory_space<vmem>>, %arg2: memref<784x896xbf16, #tpu.memory_space<vmem>>, %arg3: memref<1x896xf32, #tpu.memory_space<vmem>>, %arg4: memref<224x896xf32, #tpu.memory_space<vmem>>, %arg5: memref<8x224xf32, #tpu.memory_space<vmem>>, %arg6: memref<896x128xf32, #tpu.memory_space<vmem>>, %arg7: memref<1x128xf32, #tpu.memory_space<vmem>>, %arg8: memref<8x128xf32, #tpu.memory_space<vmem>>, %arg9: memref<224x784xf32, #tpu.memory_space<vmem>>) attributes {dimension_semantics = [#tpu.dimension_semantics<parallel>], iteration_bounds = array<i64: 1>, scalar_prefetch = 0 : i64, scratch_operands = 1 : i64, tpu.core_type = #tpu.core_type<tc>, window_params = [{transform_indices = @transform_0, window_bounds = array<i64: 8, 1568>}, {pipeline_mode = #tpu.pipeline_mode<synchronous>, transform_indices = @transform_1, window_bounds = array<i64: 784, 896>}, {pipeline_mode = #tpu.pipeline_mode<synchronous>, transform_indices = @transform_2, window_bounds = array<i64: 1, 896>}, {pipeline_mode = #tpu.pipeline_mode<synchronous>, transform_indices = @transform_3, window_bounds = array<i64: 224, 896>}, {pipeline_mode = #tpu.pipeline_mode<synchronous>, transform_indices = @transform_4, window_bounds = array<i64: 8, 224>}, {pipeline_mode = #tpu.pipeline_mode<synchronous>, transform_indices = @transform_5, window_bounds = array<i64: 896, 128>}, {pipeline_mode = #tpu.pipeline_mode<synchronous>, transform_indices = @transform_6, window_bounds = array<i64: 1, 128>}, {transform_indices = @transform_7, window_bounds = array<i64: 8, 128>}]} {
    %c0 = arith.constant 0 : index
    %c0_0 = arith.constant 0 : index
    %0 = vector.load %arg1[%c0, %c0_0] : memref<8x1568xf32, #tpu.memory_space<vmem>>, vector<8x1568xf32>
    %1 = vector.extract_strided_slice %0 {offsets = [0, 392], sizes = [8, 784], strides = [1, 1]} : vector<8x1568xf32> to vector<8x784xf32>
    %c0_1 = arith.constant 0 : index
    %c0_2 = arith.constant 0 : index
    %2 = vector.load %arg9[%c0_1, %c0_2] : memref<224x784xf32, #tpu.memory_space<vmem>>, vector<8x784xf32>
    tpu.vector_store %arg9[%c0_1, %c0_2], %1 {strides = array<i32>} : memref<224x784xf32, #tpu.memory_space<vmem>>, vector<8x784xf32>,
    %3 = vector.extract_strided_slice %0 {offsets = [0, 420], sizes = [8, 784], strides = [1, 1]} : vector<8x1568xf32> to vector<8x784xf32>
    %c8 = arith.constant 8 : index
    %c0_3 = arith.constant 0 : index
    %4 = vector.load %arg9[%c8, %c0_3] : memref<224x784xf32, #tpu.memory_space<vmem>>, vector<8x784xf32>
    tpu.vector_store %arg9[%c8, %c0_3], %3 {strides = array<i32>} : memref<224x784xf32, #tpu.memory_space<vmem>>, vector<8x784xf32>,
    %5 = vector.extract_strided_slice %0 {offsets = [0, 448], sizes = [8, 784], strides = [1, 1]} : vector<8x1568xf32> to vector<8x784xf32>
    %c16 = arith.constant 16 : index
    %c0_4 = arith.constant 0 : index
    %6 = vector.load %arg9[%c16, %c0_4] : memref<224x784xf32, #tpu.memory_space<vmem>>, vector<8x784xf32>
    tpu.vector_store %arg9[%c16, %c0_4], %5 {strides = array<i32>} : memref<224x784xf32, #tpu.memory_space<vmem>>, vector<8x784xf32>,
    %7 = vector.extract_strided_slice %0 {offsets = [0, 476], sizes = [8, 784], strides = [1, 1]} : vector<8x1568xf32> to vector<8x784xf32>
    %c24 = arith.constant 24 : index
    %c0_5 = arith.constant 0 : index
    %8 = vector.load %arg9[%c24, %c0_5] : memref<224x784xf32, #tpu.memory_space<vmem>>, vector<8x784xf32>
    tpu.vector_store %arg9[%c24, %c0_5], %7 {strides = array<i32>} : memref<224x784xf32, #tpu.memory_space<vmem>>, vector<8x784xf32>,
    %9 = vector.extract_strided_slice %0 {offsets = [0, 504], sizes = [8, 784], strides = [1, 1]} : vector<8x1568xf32> to vector<8x784xf32>
    %c32 = arith.constant 32 : index
    %c0_6 = arith.constant 0 : index
    %10 = vector.load %arg9[%c32, %c0_6] : memref<224x784xf32, #tpu.memory_space<vmem>>, vector<8x784xf32>
    tpu.vector_store %arg9[%c32, %c0_6], %9 {strides = array<i32>} : memref<224x784xf32, #tpu.memory_space<vmem>>, vector<8x784xf32>,
    %11 = vector.extract_strided_slice %0 {offsets = [0, 532], sizes = [8, 784], strides = [1, 1]} : vector<8x1568xf32> to vector<8x784xf32>
    %c40 = arith.constant 40 : index
    %c0_7 = arith.constant 0 : index
    %12 = vector.load %arg9[%c40, %c0_7] : memref<224x784xf32, #tpu.memory_space<vmem>>, vector<8x784xf32>
    tpu.vector_store %arg9[%c40, %c0_7], %11 {strides = array<i32>} : memref<224x784xf32, #tpu.memory_space<vmem>>, vector<8x784xf32>,
    %13 = vector.extract_strided_slice %0 {offsets = [0, 560], sizes = [8, 784], strides = [1, 1]} : vector<8x1568xf32> to vector<8x784xf32>
    %c48 = arith.constant 48 : index
    %c0_8 = arith.constant 0 : index
    %14 = vector.load %arg9[%c48, %c0_8] : memref<224x784xf32, #tpu.memory_space<vmem>>, vector<8x784xf32>
    tpu.vector_store %arg9[%c48, %c0_8], %13 {strides = array<i32>} : memref<224x784xf32, #tpu.memory_space<vmem>>, vector<8x784xf32>,
    %15 = vector.extract_strided_slice %0 {offsets = [0, 588], sizes = [8, 784], strides = [1, 1]} : vector<8x1568xf32> to vector<8x784xf32>
    %c56 = arith.constant 56 : index
    %c0_9 = arith.constant 0 : index
    %16 = vector.load %arg9[%c56, %c0_9] : memref<224x784xf32, #tpu.memory_space<vmem>>, vector<8x784xf32>
    tpu.vector_store %arg9[%c56, %c0_9], %15 {strides = array<i32>} : memref<224x784xf32, #tpu.memory_space<vmem>>, vector<8x784xf32>,
    %17 = vector.extract_strided_slice %0 {offsets = [0, 616], sizes = [8, 784], strides = [1, 1]} : vector<8x1568xf32> to vector<8x784xf32>
    %c64 = arith.constant 64 : index
    %c0_10 = arith.constant 0 : index
    %18 = vector.load %arg9[%c64, %c0_10] : memref<224x784xf32, #tpu.memory_space<vmem>>, vector<8x784xf32>
    tpu.vector_store %arg9[%c64, %c0_10], %17 {strides = array<i32>} : memref<224x784xf32, #tpu.memory_space<vmem>>, vector<8x784xf32>,
    %19 = vector.extract_strided_slice %0 {offsets = [0, 644], sizes = [8, 784], strides = [1, 1]} : vector<8x1568xf32> to vector<8x784xf32>
    %c72 = arith.constant 72 : index
    %c0_11 = arith.constant 0 : index
    %20 = vector.load %arg9[%c72, %c0_11] : memref<224x784xf32, #tpu.memory_space<vmem>>, vector<8x784xf32>
    tpu.vector_store %arg9[%c72, %c0_11], %19 {strides = array<i32>} : memref<224x784xf32, #tpu.memory_space<vmem>>, vector<8x784xf32>,
    %21 = vector.extract_strided_slice %0 {offsets = [0, 672], sizes = [8, 784], strides = [1, 1]} : vector<8x1568xf32> to vector<8x784xf32>
    %c80 = arith.constant 80 : index
    %c0_12 = arith.constant 0 : index
    %22 = vector.load %arg9[%c80, %c0_12] : memref<224x784xf32, #tpu.memory_space<vmem>>, vector<8x784xf32>
    tpu.vector_store %arg9[%c80, %c0_12], %21 {strides = array<i32>} : memref<224x784xf32, #tpu.memory_space<vmem>>, vector<8x784xf32>,
    %23 = vector.extract_strided_slice %0 {offsets = [0, 700], sizes = [8, 784], strides = [1, 1]} : vector<8x1568xf32> to vector<8x784xf32>
    %c88 = arith.constant 88 : index
    %c0_13 = arith.constant 0 : index
    %24 = vector.load %arg9[%c88, %c0_13] : memref<224x784xf32, #tpu.memory_space<vmem>>, vector<8x784xf32>
    tpu.vector_store %arg9[%c88, %c0_13], %23 {strides = array<i32>} : memref<224x784xf32, #tpu.memory_space<vmem>>, vector<8x784xf32>,
    %25 = vector.extract_strided_slice %0 {offsets = [0, 728], sizes = [8, 784], strides = [1, 1]} : vector<8x1568xf32> to vector<8x784xf32>
    %c96 = arith.constant 96 : index
    %c0_14 = arith.constant 0 : index
    %26 = vector.load %arg9[%c96, %c0_14] : memref<224x784xf32, #tpu.memory_space<vmem>>, vector<8x784xf32>
    tpu.vector_store %arg9[%c96, %c0_14], %25 {strides = array<i32>} : memref<224x784xf32, #tpu.memory_space<vmem>>, vector<8x784xf32>,
    %27 = vector.extract_strided_slice %0 {offsets = [0, 756], sizes = [8, 784], strides = [1, 1]} : vector<8x1568xf32> to vector<8x784xf32>
    %c104 = arith.constant 104 : index
    %c0_15 = arith.constant 0 : index
    %28 = vector.load %arg9[%c104, %c0_15] : memref<224x784xf32, #tpu.memory_space<vmem>>, vector<8x784xf32>
    tpu.vector_store %arg9[%c104, %c0_15], %27 {strides = array<i32>} : memref<224x784xf32, #tpu.memory_space<vmem>>, vector<8x784xf32>,
    %29 = vector.extract_strided_slice %0 {offsets = [0, 0], sizes = [8, 784], strides = [1, 1]} : vector<8x1568xf32> to vector<8x784xf32>
    %c112 = arith.constant 112 : index
    %c0_16 = arith.constant 0 : index
    %30 = vector.load %arg9[%c112, %c0_16] : memref<224x784xf32, #tpu.memory_space<vmem>>, vector<8x784xf32>
    tpu.vector_store %arg9[%c112, %c0_16], %29 {strides = array<i32>} : memref<224x784xf32, #tpu.memory_space<vmem>>, vector<8x784xf32>,
    %31 = vector.extract_strided_slice %0 {offsets = [0, 28], sizes = [8, 784], strides = [1, 1]} : vector<8x1568xf32> to vector<8x784xf32>
    %c120 = arith.constant 120 : index
    %c0_17 = arith.constant 0 : index
    %32 = vector.load %arg9[%c120, %c0_17] : memref<224x784xf32, #tpu.memory_space<vmem>>, vector<8x784xf32>
    tpu.vector_store %arg9[%c120, %c0_17], %31 {strides = array<i32>} : memref<224x784xf32, #tpu.memory_space<vmem>>, vector<8x784xf32>,
    %33 = vector.extract_strided_slice %0 {offsets = [0, 56], sizes = [8, 784], strides = [1, 1]} : vector<8x1568xf32> to vector<8x784xf32>
    %c128 = arith.constant 128 : index
    %c0_18 = arith.constant 0 : index
    %34 = vector.load %arg9[%c128, %c0_18] : memref<224x784xf32, #tpu.memory_space<vmem>>, vector<8x784xf32>
    tpu.vector_store %arg9[%c128, %c0_18], %33 {strides = array<i32>} : memref<224x784xf32, #tpu.memory_space<vmem>>, vector<8x784xf32>,
    %35 = vector.extract_strided_slice %0 {offsets = [0, 84], sizes = [8, 784], strides = [1, 1]} : vector<8x1568xf32> to vector<8x784xf32>
    %c136 = arith.constant 136 : index
    %c0_19 = arith.constant 0 : index
    %36 = vector.load %arg9[%c136, %c0_19] : memref<224x784xf32, #tpu.memory_space<vmem>>, vector<8x784xf32>
    tpu.vector_store %arg9[%c136, %c0_19], %35 {strides = array<i32>} : memref<224x784xf32, #tpu.memory_space<vmem>>, vector<8x784xf32>,
    %37 = vector.extract_strided_slice %0 {offsets = [0, 112], sizes = [8, 784], strides = [1, 1]} : vector<8x1568xf32> to vector<8x784xf32>
    %c144 = arith.constant 144 : index
    %c0_20 = arith.constant 0 : index
    %38 = vector.load %arg9[%c144, %c0_20] : memref<224x784xf32, #tpu.memory_space<vmem>>, vector<8x784xf32>
    tpu.vector_store %arg9[%c144, %c0_20], %37 {strides = array<i32>} : memref<224x784xf32, #tpu.memory_space<vmem>>, vector<8x784xf32>,
    %39 = vector.extract_strided_slice %0 {offsets = [0, 140], sizes = [8, 784], strides = [1, 1]} : vector<8x1568xf32> to vector<8x784xf32>
    %c152 = arith.constant 152 : index
    %c0_21 = arith.constant 0 : index
    %40 = vector.load %arg9[%c152, %c0_21] : memref<224x784xf32, #tpu.memory_space<vmem>>, vector<8x784xf32>
    tpu.vector_store %arg9[%c152, %c0_21], %39 {strides = array<i32>} : memref<224x784xf32, #tpu.memory_space<vmem>>, vector<8x784xf32>,
    %41 = vector.extract_strided_slice %0 {offsets = [0, 168], sizes = [8, 784], strides = [1, 1]} : vector<8x1568xf32> to vector<8x784xf32>
    %c160 = arith.constant 160 : index
    %c0_22 = arith.constant 0 : index
    %42 = vector.load %arg9[%c160, %c0_22] : memref<224x784xf32, #tpu.memory_space<vmem>>, vector<8x784xf32>
    tpu.vector_store %arg9[%c160, %c0_22], %41 {strides = array<i32>} : memref<224x784xf32, #tpu.memory_space<vmem>>, vector<8x784xf32>,
    %43 = vector.extract_strided_slice %0 {offsets = [0, 196], sizes = [8, 784], strides = [1, 1]} : vector<8x1568xf32> to vector<8x784xf32>
    %c168 = arith.constant 168 : index
    %c0_23 = arith.constant 0 : index
    %44 = vector.load %arg9[%c168, %c0_23] : memref<224x784xf32, #tpu.memory_space<vmem>>, vector<8x784xf32>
    tpu.vector_store %arg9[%c168, %c0_23], %43 {strides = array<i32>} : memref<224x784xf32, #tpu.memory_space<vmem>>, vector<8x784xf32>,
    %45 = vector.extract_strided_slice %0 {offsets = [0, 224], sizes = [8, 784], strides = [1, 1]} : vector<8x1568xf32> to vector<8x784xf32>
    %c176 = arith.constant 176 : index
    %c0_24 = arith.constant 0 : index
    %46 = vector.load %arg9[%c176, %c0_24] : memref<224x784xf32, #tpu.memory_space<vmem>>, vector<8x784xf32>
    tpu.vector_store %arg9[%c176, %c0_24], %45 {strides = array<i32>} : memref<224x784xf32, #tpu.memory_space<vmem>>, vector<8x784xf32>,
    %47 = vector.extract_strided_slice %0 {offsets = [0, 252], sizes = [8, 784], strides = [1, 1]} : vector<8x1568xf32> to vector<8x784xf32>
    %c184 = arith.constant 184 : index
    %c0_25 = arith.constant 0 : index
    %48 = vector.load %arg9[%c184, %c0_25] : memref<224x784xf32, #tpu.memory_space<vmem>>, vector<8x784xf32>
    tpu.vector_store %arg9[%c184, %c0_25], %47 {strides = array<i32>} : memref<224x784xf32, #tpu.memory_space<vmem>>, vector<8x784xf32>,
    %49 = vector.extract_strided_slice %0 {offsets = [0, 280], sizes = [8, 784], strides = [1, 1]} : vector<8x1568xf32> to vector<8x784xf32>
    %c192 = arith.constant 192 : index
    %c0_26 = arith.constant 0 : index
    %50 = vector.load %arg9[%c192, %c0_26] : memref<224x784xf32, #tpu.memory_space<vmem>>, vector<8x784xf32>
    tpu.vector_store %arg9[%c192, %c0_26], %49 {strides = array<i32>} : memref<224x784xf32, #tpu.memory_space<vmem>>, vector<8x784xf32>,
    %51 = vector.extract_strided_slice %0 {offsets = [0, 308], sizes = [8, 784], strides = [1, 1]} : vector<8x1568xf32> to vector<8x784xf32>
    %c200 = arith.constant 200 : index
    %c0_27 = arith.constant 0 : index
    %52 = vector.load %arg9[%c200, %c0_27] : memref<224x784xf32, #tpu.memory_space<vmem>>, vector<8x784xf32>
    tpu.vector_store %arg9[%c200, %c0_27], %51 {strides = array<i32>} : memref<224x784xf32, #tpu.memory_space<vmem>>, vector<8x784xf32>,
    %53 = vector.extract_strided_slice %0 {offsets = [0, 336], sizes = [8, 784], strides = [1, 1]} : vector<8x1568xf32> to vector<8x784xf32>
    %c208 = arith.constant 208 : index
    %c0_28 = arith.constant 0 : index
    %54 = vector.load %arg9[%c208, %c0_28] : memref<224x784xf32, #tpu.memory_space<vmem>>, vector<8x784xf32>
    tpu.vector_store %arg9[%c208, %c0_28], %53 {strides = array<i32>} : memref<224x784xf32, #tpu.memory_space<vmem>>, vector<8x784xf32>,
    %55 = vector.extract_strided_slice %0 {offsets = [0, 364], sizes = [8, 784], strides = [1, 1]} : vector<8x1568xf32> to vector<8x784xf32>
    %c216 = arith.constant 216 : index
    %c0_29 = arith.constant 0 : index
    %56 = vector.load %arg9[%c216, %c0_29] : memref<224x784xf32, #tpu.memory_space<vmem>>, vector<8x784xf32>
    tpu.vector_store %arg9[%c216, %c0_29], %55 {strides = array<i32>} : memref<224x784xf32, #tpu.memory_space<vmem>>, vector<8x784xf32>,
    %c0_30 = arith.constant 0 : index
    %c0_31 = arith.constant 0 : index
    %57 = vector.load %arg9[%c0_30, %c0_31] : memref<224x784xf32, #tpu.memory_space<vmem>>, vector<224x784xf32>
    %58 = arith.truncf %57 : vector<224x784xf32> to vector<224x784xbf16>
    %c0_32 = arith.constant 0 : index
    %c0_33 = arith.constant 0 : index
    %59 = vector.load %arg2[%c0_32, %c0_33] : memref<784x896xbf16, #tpu.memory_space<vmem>>, vector<784x896xbf16>
    %cst = arith.constant dense<0.000000e+00> : vector<224x896xf32>
    %60 = tpu.matmul %58, %59, %cst {dimension_numbers = #tpu.dot_dimension_numbers<[1], [0], [0], [1], [0, 0, 1, 1], [], []>} : vector<224x784xbf16>, vector<784x896xbf16>, vector<224x896xf32> -> vector<224x896xf32>
    %c0_34 = arith.constant 0 : index
    %c0_35 = arith.constant 0 : index
    %61 = vector.load %arg3[%c0_34, %c0_35] : memref<1x896xf32, #tpu.memory_space<vmem>>, vector<1x896xf32>
    %62 = vector.broadcast %61 : vector<1x896xf32> to vector<224x896xf32>
    %63 = arith.addf %60, %62 : vector<224x896xf32>
    %cst_36 = arith.constant 0.000000e+00 : f32
    %64 = vector.broadcast %cst_36 : f32 to vector<224x896xf32>
    %65 = arith.maximumf %63, %64 : vector<224x896xf32>
    %c0_37 = arith.constant 0 : index
    %c0_38 = arith.constant 0 : index
    %66 = vector.load %arg4[%c0_37, %c0_38] : memref<224x896xf32, #tpu.memory_space<vmem>>, vector<224x896xf32>
    %67 = arith.mulf %65, %66 : vector<224x896xf32>
    %c0_39 = arith.constant 0 : index
    %c0_40 = arith.constant 0 : index
    %68 = vector.load %arg5[%c0_39, %c0_40] : memref<8x224xf32, #tpu.memory_space<vmem>>, vector<8x224xf32>
    %cst_41 = arith.constant dense<0.000000e+00> : vector<8x896xf32>
    %69 = tpu.matmul %68, %67, %cst_41 {dimension_numbers = #tpu.dot_dimension_numbers<[1], [0], [0], [1], [0, 0, 1, 1], [], []>} : vector<8x224xf32>, vector<224x896xf32>, vector<8x896xf32> -> vector<8x896xf32>
    %c0_42 = arith.constant 0 : index
    %c0_43 = arith.constant 0 : index
    %70 = vector.load %arg6[%c0_42, %c0_43] : memref<896x128xf32, #tpu.memory_space<vmem>>, vector<896x128xf32>
    %cst_44 = arith.constant dense<0.000000e+00> : vector<8x128xf32>
    %71 = tpu.matmul %69, %70, %cst_44 {dimension_numbers = #tpu.dot_dimension_numbers<[1], [0], [0], [1], [0, 0, 1, 1], [], []>} : vector<8x896xf32>, vector<896x128xf32>, vector<8x128xf32> -> vector<8x128xf32>
    %c0_45 = arith.constant 0 : index
    %c0_46 = arith.constant 0 : index
    %72 = vector.load %arg7[%c0_45, %c0_46] : memref<1x128xf32, #tpu.memory_space<vmem>>, vector<1x128xf32>
    %73 = vector.broadcast %72 : vector<1x128xf32> to vector<8x128xf32>
    %74 = arith.addf %71, %73 : vector<8x128xf32>
    %c0_47 = arith.constant 0 : index
    %c0_48 = arith.constant 0 : index
    %75 = vector.load %arg8[%c0_47, %c0_48] : memref<8x128xf32, #tpu.memory_space<vmem>>, vector<8x128xf32>
    tpu.vector_store %arg8[%c0_47, %c0_48], %74 {strides = array<i32>} : memref<8x128xf32, #tpu.memory_space<vmem>>, vector<8x128xf32>,
    return
  }
  func.func @transform_0(%arg0: i32) -> (i32, i32) {
    %c0_i32 = arith.constant 0 : i32
    %c0_i32_0 = arith.constant 0 : i32
    return %arg0, %c0_i32 : i32, i32
  }
  func.func @transform_1(%arg0: i32) -> (i32, i32) {
    %c0_i32 = arith.constant 0 : i32
    %c0_i32_0 = arith.constant 0 : i32
    %c0_i32_1 = arith.constant 0 : i32
    return %c0_i32, %c0_i32_0 : i32, i32
  }
  func.func @transform_2(%arg0: i32) -> (i32, i32) {
    %c0_i32 = arith.constant 0 : i32
    %c0_i32_0 = arith.constant 0 : i32
    %c0_i32_1 = arith.constant 0 : i32
    return %c0_i32, %c0_i32_0 : i32, i32
  }
  func.func @transform_3(%arg0: i32) -> (i32, i32) {
    %c0_i32 = arith.constant 0 : i32
    %c0_i32_0 = arith.constant 0 : i32
    %c0_i32_1 = arith.constant 0 : i32
    return %c0_i32, %c0_i32_0 : i32, i32
  }
  func.func @transform_4(%arg0: i32) -> (i32, i32) {
    %c0_i32 = arith.constant 0 : i32
    %c0_i32_0 = arith.constant 0 : i32
    %c0_i32_1 = arith.constant 0 : i32
    return %c0_i32, %c0_i32_0 : i32, i32
  }
  func.func @transform_5(%arg0: i32) -> (i32, i32) {
    %c0_i32 = arith.constant 0 : i32
    %c0_i32_0 = arith.constant 0 : i32
    %c0_i32_1 = arith.constant 0 : i32
    return %c0_i32, %c0_i32_0 : i32, i32
  }
  func.func @transform_6(%arg0: i32) -> (i32, i32) {
    %c0_i32 = arith.constant 0 : i32
    %c0_i32_0 = arith.constant 0 : i32
    %c0_i32_1 = arith.constant 0 : i32
    return %c0_i32, %c0_i32_0 : i32, i32
  }
  func.func @transform_7(%arg0: i32) -> (i32, i32) {
    %c0_i32 = arith.constant 0 : i32
    %c0_i32_0 = arith.constant 0 : i32
    return %arg0, %c0_i32 : i32, i32
  }
}

</mosaic_0001>

<bundles_post_ra>
// kernel: tile.18
= control target key start
LH: loop header
LB: loop body
LE: loop exit
PB: predicated region body
PF: predicated region fallthrough
CT: control target
= control target key end

     0   :  { %s40_s0 = inlined_call_operand.vmem [shape: f32[32], index: 0, kind: input, shape index: {}]   ;;  %s41_s1 = inlined_call_operand.vmem [shape: f32[28,32], index: 1, kind: output, shape index: {}]  }
   0x1   :  { %v4_v0 = vld [vmem:[%s40_s0] ss:$0 sm:$0xff] }
   0x2   :  { %5 = vst [vmem:[%s41_s1] sm:$0xff] %v4_v0  ;;  %12 = vst [vmem:[%s41_s1 + $0x8] sm:$0xff] %v4_v0 }
   0x3   :  { %13 = vst [vmem:[%s41_s1 + $0x10] sm:$0xff] %v4_v0  ;;  %14 = vst [vmem:[%s41_s1 + $0x18] sm:$0xff] %v4_v0 }

// kernel: tile.19
= control target key start
LH: loop header
LB: loop body
LE: loop exit
PB: predicated region body
PF: predicated region fallthrough
CT: control target
= control target key end

     0   :  { %s85_s8 = smov 96   ;;  %vm3_vm0 = vcmask 261120   ;;  %s87_s15 = smov 64   ;;  %vm10_vm1 = vcmask 1048320   ;;  %vm17_vm2 = vcmask 785920   ;;  %vm24_vm3 = vcmask 523520   ;;  %s131_s0 = inlined_call_operand.vmem [shape: f32[28,32], index: 0, kind: input, shape index: {}]   ;;  %s132_s1 = inlined_call_operand.vmem [shape: f32[1,896], index: 1, kind: output, shape index: {}]  }
   0x1   :  { %v73_v0 = vld [vmem:[%s131_s0 + $0x3] ss:$4 sm:$0x7f]   ;;  %v74_v1 = vld [vmem:[%s131_s0 + $0x2] ss:$4 sm:$0x7f]  }
   0x2   :  { %8 = vrot.lane.b32.xlu0 %v73_v0, %s85_s8  ;;  %v75_v2 = vld [vmem:[%s131_s0 + $0x1] ss:$4 sm:$0x7f]   ;;  %v2_v3 = vld [vmem:[%s131_s0] ss:$4 sm:$0x7f]  }
   0x3   :  { %s86_s0 = smov 32   ;;  %4 = vst.msk [vmem:[#allocation0] ss:$8 sm:$0xf] %vm3_vm0, %v2_v3  }
   0x4   :  { %22 = vrot.lane.b32.xlu1 %v75_v2, %s86_s0  ;;  %5 = vst.msk [vmem:[#allocation0] ss:$8 sm:$0x70] %vm3_vm0, %v2_v3  }
   0x6   :  { %15 = vrot.lane.b32.xlu0 %v74_v1, %s87_s15 }
  0x74   :  { %v9_v4 = vpop.permute.xlu0 %8  }
  0x75   :  { %11 = vst.msk [vmem:[#allocation0] ss:$8 sm:$0xf] %vm10_vm1, %v9_v4   ;;  %12 = vst.msk [vmem:[#allocation0] ss:$8 sm:$0x70] %vm10_vm1, %v9_v4  }
  0x76   :  { %v23_v5 = vpop.permute.xlu1 %22  }
  0x78   :  { %v16_v6 = vpop.permute.xlu0 %15  }
  0x79   :  { %18 = vst.msk [vmem:[#allocation0] ss:$8 sm:$0xf] %vm17_vm2, %v16_v6   ;;  %19 = vst.msk [vmem:[#allocation0] ss:$8 sm:$0x70] %vm17_vm2, %v16_v6  }
  0x7a   :  { %25 = vst.msk [vmem:[#allocation0] ss:$8 sm:$0xf] %vm24_vm3, %v23_v5   ;;  %26 = vst.msk [vmem:[#allocation0] ss:$8 sm:$0x70] %vm24_vm3, %v23_v5  }
  0x81   :  { %v30_v7 = vld [vmem:[#allocation0] sm:$0x1]  ;;  %v34_v8 = vld [vmem:[#allocation0 + $0x8] sm:$0x1]  ;;  %v39_v9 = vld [vmem:[#allocation0 + $0x10] sm:$0x1] }
  0x82   :  { %32 = vst [vmem:[%s132_s1] sm:$0x1] %v30_v7  ;;  %76 = vst [vmem:[%s132_s1 + $0x1] sm:$0x1] %v34_v8  ;;  %v45_v10 = vld [vmem:[#allocation0 + $0x18] sm:$0x1] }
  0x83   :  { %77 = vst [vmem:[%s132_s1 + $0x2] sm:$0x1] %v39_v9  ;;  %v51_v11 = vld [vmem:[#allocation0 + $0x20] sm:$0x1]  ;;  %v57_v12 = vld [vmem:[#allocation0 + $0x28] sm:$0x1] }
  0x84   :  { %78 = vst [vmem:[%s132_s1 + $0x3] sm:$0x1] %v45_v10  ;;  %79 = vst [vmem:[%s132_s1 + $0x4] sm:$0x1] %v51_v11  ;;  %v63_v13 = vld [vmem:[#allocation0 + $0x30] sm:$0x1] }
  0x85   :  { %80 = vst [vmem:[%s132_s1 + $0x5] sm:$0x1] %v57_v12  ;;  %81 = vst [vmem:[%s132_s1 + $0x6] sm:$0x1] %v63_v13 }

// kernel: tile.24
= control target key start
LH: loop header
LB: loop body
LE: loop exit
PB: predicated region body
PF: predicated region fallthrough
CT: control target
= control target key end

     0   :  { %vm55_vm0 = vcmask 1041409   ;;  %vm59_vm1 = vcmask 1042434   ;;  %vm63_vm2 = vcmask 1043459   ;;  %vm67_vm3 = vcmask 1044484   ;;  %s1191_s25 = smov 104   ;;  %s1192_s9 = smov 120   ;;  %s2162_s0 = inlined_call_operand.vmem [shape: f32[8,28,8], index: 0, kind: input, shape index: {}]   ;;  %s2163_s1 = inlined_call_operand.vmem [shape: f32[8,224], index: 1, kind: output, shape index: {}]  }
   0x1   :  { %vm71_vm4 = vcmask 1045509   ;;  %vm75_vm5 = vcmask 1046534   ;;  %v973_v0 = vld [vmem:[%s2162_s0 + $0xd] sm:$0x1]   ;;  %vm79_vm6 = vcmask 1047559   ;;  %s1193_s26 = smov 96  }
   0x2   :  { %v974_v1 = vld [vmem:[%s2162_s0 + $0x2c] sm:$0x2]   ;;  %v957_v9 = vld [vmem:[%s2162_s0 + $0xf] sm:$0x1]   ;;  %v981_v23 = vld [vmem:[%s2162_s0 + $0xc] sm:$0x1]  }
   0x3   :  { %v975_v2 = vld [vmem:[%s2162_s0 + $0x4b] sm:$0x4]   ;;  %v124_v4 = vsel %vm55_vm0, %v974_v1, %v973_v0  ;;  %v958_v10 = vld [vmem:[%s2162_s0 + $0x2e] sm:$0x2]   ;;  %v982_v24 = vld [vmem:[%s2162_s0 + $0x2b] sm:$0x2]  }
   0x4   :  { %v976_v3 = vld [vmem:[%s2162_s0 + $0x6a] sm:$0x8]   ;;  %v128_v7 = vsel %vm59_vm1, %v975_v2, %v124_v4  ;;  %v56_v12 = vsel %vm55_vm0, %v958_v10, %v957_v9  ;;  %v959_v13 = vld [vmem:[%s2162_s0 + $0x4d] sm:$0x4]   ;;  %v983_v25 = vld [vmem:[%s2162_s0 + $0x4a] sm:$0x4]   ;;  %v158_v29 = vsel %vm55_vm0, %v982_v24, %v981_v23 }
   0x5   :  { %v977_v5 = vld [vmem:[%s2162_s0 + $0x89] sm:$0x10]   ;;  %v132_v11 = vsel %vm63_vm2, %v976_v3, %v128_v7  ;;  %v960_v14 = vld [vmem:[%s2162_s0 + $0x6c] sm:$0x8]   ;;  %v60_v18 = vsel %vm59_vm1, %v959_v13, %v56_v12  ;;  %v984_v30 = vld [vmem:[%s2162_s0 + $0x69] sm:$0x8]   ;;  %v162_v34 = vsel %vm59_vm1, %v983_v25, %v158_v29 }
   0x6   :  { %v978_v6 = vld [vmem:[%s2162_s0 + $0xa8] sm:$0x20]   ;;  %v961_v15 = vld [vmem:[%s2162_s0 + $0x8b] sm:$0x10]   ;;  %v136_v16 = vsel %vm67_vm3, %v977_v5, %v132_v11  ;;  %v64_v22 = vsel %vm63_vm2, %v960_v14, %v60_v18  ;;  %v985_v31 = vld [vmem:[%s2162_s0 + $0x88] sm:$0x10]   ;;  %v166_v39 = vsel %vm63_vm2, %v984_v30, %v162_v34 }
   0x7   :  { %v979_v8 = vld [vmem:[%s2162_s0 + $0xc7] sm:$0x40]   ;;  %v962_v19 = vld [vmem:[%s2162_s0 + $0xaa] sm:$0x20]   ;;  %v140_v21 = vsel %vm71_vm4, %v978_v6, %v136_v16  ;;  %v68_v27 = vsel %vm67_vm3, %v961_v15, %v64_v22  ;;  %v986_v35 = vld [vmem:[%s2162_s0 + $0xa7] sm:$0x20]   ;;  %v170_v44 = vsel %vm67_vm3, %v985_v31, %v166_v39 }
   0x8   :  { %v980_v17 = vld [vmem:[%s2162_s0 + $0xe6] sm:$0x80]   ;;  %v963_v20 = vld [vmem:[%s2162_s0 + $0xc9] sm:$0x40]   ;;  %v144_v26 = vsel %vm75_vm5, %v979_v8, %v140_v21  ;;  %v72_v33 = vsel %vm71_vm4, %v962_v19, %v68_v27  ;;  %v987_v36 = vld [vmem:[%s2162_s0 + $0xc6] sm:$0x40]   ;;  %v174_v49 = vsel %vm71_vm4, %v986_v35, %v170_v44 }
   0x9   :  { %v964_v28 = vld [vmem:[%s2162_s0 + $0xe8] sm:$0x80]   ;;  %v148_v32 = vsel %vm79_vm6, %v980_v17, %v144_v26  ;;  %v965_v37 = vld [vmem:[%s2162_s0 + $0xe] sm:$0x1]   ;;  %v76_v38 = vsel %vm75_vm5, %v963_v20, %v72_v33  ;;  %v988_v45 = vld [vmem:[%s2162_s0 + $0xe5] sm:$0x80]   ;;  %v178_v54 = vsel %vm75_vm5, %v987_v36, %v174_v49 }
   0xa   :  { %149 = vrot.lane.b32.xlu1 %v148_v32, %s1191_s25  ;;  %v966_v40 = vld [vmem:[%s2162_s0 + $0x2d] sm:$0x2]   ;;  %v80_v43 = vsel %vm79_vm6, %v964_v28, %v76_v38  ;;  %v997_v53 = vld [vmem:[%s2162_s0 + $0x1b] sm:$0x1]   ;;  %v182_v59 = vsel %vm79_vm6, %v988_v45, %v178_v54  ;;  %v989_v3 = vld [vmem:[%s2162_s0 + $0xb] sm:$0x1]  }
   0xb   :  { %v967_v41 = vld [vmem:[%s2162_s0 + $0x4c] sm:$0x4]   ;;  %v90_v46 = vsel %vm55_vm0, %v966_v40, %v965_v37  ;;  %81 = vrot.lane.b32.xlu0 %v80_v43, %s1192_s9  ;;  %v998_v56 = vld [vmem:[%s2162_s0 + $0x3a] sm:$0x2]   ;;  %v990_v4 = vld [vmem:[%s2162_s0 + $0x2a] sm:$0x2]  }
   0xc   :  { %v968_v42 = vld [vmem:[%s2162_s0 + $0x6b] sm:$0x8]   ;;  %v94_v50 = vsel %vm59_vm1, %v967_v41, %v90_v46  ;;  %v999_v57 = vld [vmem:[%s2162_s0 + $0x59] sm:$0x4]   ;;  %v226_v61 = vsel %vm55_vm0, %v998_v56, %v997_v53  ;;  %v192_v7 = vsel %vm55_vm0, %v990_v4, %v989_v3  ;;  %v991_v8 = vld [vmem:[%s2162_s0 + $0x49] sm:$0x4]  }
   0xd   :  { %v969_v47 = vld [vmem:[%s2162_s0 + $0x8a] sm:$0x10]   ;;  %v98_v55 = vsel %vm63_vm2, %v968_v42, %v94_v50  ;;  %v1000_v58 = vld [vmem:[%s2162_s0 + $0x78] sm:$0x8]   ;;  %v230_v1 = vsel %vm59_vm1, %v999_v57, %v226_v61  ;;  %v992_v9 = vld [vmem:[%s2162_s0 + $0x68] sm:$0x8]   ;;  %v196_v14 = vsel %vm59_vm1, %v991_v8, %v192_v7 }
   0xe   :  { %v970_v48 = vld [vmem:[%s2162_s0 + $0xa9] sm:$0x20]   ;;  %v102_v60 = vsel %vm67_vm3, %v969_v47, %v98_v55  ;;  %v1001_v62 = vld [vmem:[%s2162_s0 + $0x97] sm:$0x10]   ;;  %183 = vrot.lane.b32.xlu1 %v182_v59, %s1193_s26  ;;  %v234_v6 = vsel %vm63_vm2, %v1000_v58, %v230_v1  ;;  %v993_v10 = vld [vmem:[%s2162_s0 + $0x87] sm:$0x10]   ;;  %v200_v18 = vsel %vm63_vm2, %v992_v9, %v196_v14 }
   0xf   :  { %v971_v51 = vld [vmem:[%s2162_s0 + $0xc8] sm:$0x40]   ;;  %v1002_v63 = vld [vmem:[%s2162_s0 + $0xb6] sm:$0x20]   ;;  %v106_v0 = vsel %vm71_vm4, %v970_v48, %v102_v60  ;;  %v238_v12 = vsel %vm67_vm3, %v1001_v62, %v234_v6  ;;  %v994_v15 = vld [vmem:[%s2162_s0 + $0xa6] sm:$0x20]   ;;  %v204_v23 = vsel %vm67_vm3, %v993_v10, %v200_v18 }
  0x10   :  { %v972_v52 = vld [vmem:[%s2162_s0 + $0xe7] sm:$0x80]   ;;  %v1003_v2 = vld [vmem:[%s2162_s0 + $0xd5] sm:$0x40]   ;;  %v110_v5 = vsel %vm75_vm5, %v971_v51, %v106_v0  ;;  %v995_v16 = vld [vmem:[%s2162_s0 + $0xc5] sm:$0x40]   ;;  %v242_v17 = vsel %vm71_vm4, %v1002_v63, %v238_v12  ;;  %v208_v29 = vsel %vm71_vm4, %v994_v15, %v204_v23 }
  0x11   :  { %v114_v11 = vsel %vm79_vm6, %v972_v52, %v110_v5  ;;  %v1004_v13 = vld [vmem:[%s2162_s0 + $0xf4] sm:$0x80]   ;;  %s1194_s16 = smov 112   ;;  %v996_v19 = vld [vmem:[%s2162_s0 + $0xe4] sm:$0x80]   ;;  %v246_v22 = vsel %vm75_vm5, %v1003_v2, %v242_v17  ;;  %s1195_s4 = smov 88   ;;  %v212_v33 = vsel %vm75_vm5, %v995_v16, %v208_v29 }
  0x12   :  { %115 = vrot.lane.b32.xlu0 %v114_v11, %s1194_s16  ;;  %v1014_v20 = vld [vmem:[%s2162_s0 + $0x1a] sm:$0x1]   ;;  %v250_v28 = vsel %vm79_vm6, %v1004_v13, %v246_v22  ;;  %v1006_v35 = vld [vmem:[%s2162_s0 + $0xa] sm:$0x1]   ;;  %v216_v38 = vsel %vm79_vm6, %v996_v19, %v212_v33  ;;  %v1031_v48 = vld [vmem:[%s2162_s0 + $0x19] sm:$0x1]  }
  0x13   :  { %v1015_v21 = vld [vmem:[%s2162_s0 + $0x39] sm:$0x2]   ;;  %251 = vrot.lane.b32.xlu1 %v250_v28, %s1195_s4  ;;  %v1007_v36 = vld [vmem:[%s2162_s0 + $0x29] sm:$0x2]   ;;  %v1032_v51 = vld [vmem:[%s2162_s0 + $0x38] sm:$0x2]  }
  0x14   :  { %v295_v24 = vsel %vm55_vm0, %v1015_v21, %v1014_v20  ;;  %v1016_v25 = vld [vmem:[%s2162_s0 + $0x58] sm:$0x4]   ;;  %v1008_v37 = vld [vmem:[%s2162_s0 + $0x48] sm:$0x4]   ;;  %v261_v41 = vsel %vm55_vm0, %v1007_v36, %v1006_v35  ;;  %v1033_v52 = vld [vmem:[%s2162_s0 + $0x57] sm:$0x4]   ;;  %v364_v57 = vsel %vm55_vm0, %v1032_v51, %v1031_v48 }
  0x15   :  { %v1017_v26 = vld [vmem:[%s2162_s0 + $0x77] sm:$0x8]   ;;  %v299_v30 = vsel %vm59_vm1, %v1016_v25, %v295_v24  ;;  %v1009_v42 = vld [vmem:[%s2162_s0 + $0x67] sm:$0x8]   ;;  %v265_v45 = vsel %vm59_vm1, %v1008_v37, %v261_v41  ;;  %v1034_v53 = vld [vmem:[%s2162_s0 + $0x76] sm:$0x8]   ;;  %v368_v61 = vsel %vm59_vm1, %v1033_v52, %v364_v57 }
  0x16   :  { %v1018_v27 = vld [vmem:[%s2162_s0 + $0x96] sm:$0x10]   ;;  %v303_v34 = vsel %vm63_vm2, %v1017_v26, %v299_v30  ;;  %v1010_v43 = vld [vmem:[%s2162_s0 + $0x86] sm:$0x10]   ;;  %217 = vrot.lane.b32.xlu0 %v216_v38, %s1195_s4  ;;  %v269_v50 = vsel %vm63_vm2, %v1009_v42, %v265_v45  ;;  %v1035_v58 = vld [vmem:[%s2162_s0 + $0x95] sm:$0x10]   ;;  %v372_v2 = vsel %vm63_vm2, %v1034_v53, %v368_v61 }
  0x17   :  { %v1019_v31 = vld [vmem:[%s2162_s0 + $0xb5] sm:$0x20]   ;;  %v307_v39 = vsel %vm67_vm3, %v1018_v27, %v303_v34  ;;  %v1011_v46 = vld [vmem:[%s2162_s0 + $0xa5] sm:$0x20]   ;;  %v273_v55 = vsel %vm67_vm3, %v1010_v43, %v269_v50  ;;  %v1036_v59 = vld [vmem:[%s2162_s0 + $0xb4] sm:$0x20]   ;;  %v376_v8 = vsel %vm67_vm3, %v1035_v58, %v372_v2 }
  0x18   :  { %v1020_v32 = vld [vmem:[%s2162_s0 + $0xd4] sm:$0x40]   ;;  %v311_v44 = vsel %vm71_vm4, %v1019_v31, %v307_v39  ;;  %v1012_v47 = vld [vmem:[%s2162_s0 + $0xc4] sm:$0x40]   ;;  %s1196_s6 = smov 80   ;;  %v277_v60 = vsel %vm71_vm4, %v1011_v46, %v273_v55  ;;  %v380_v13 = vsel %vm71_vm4, %v1036_v59, %v376_v8  ;;  %s1197_s12 = smov 72  }
  0x19   :  { %v1021_v40 = vld [vmem:[%s2162_s0 + $0xf3] sm:$0x80]   ;;  %v315_v49 = vsel %vm75_vm5, %v1020_v32, %v311_v44  ;;  %v1013_v56 = vld [vmem:[%s2162_s0 + $0xe3] sm:$0x80]   ;;  %v1037_v62 = vld [vmem:[%s2162_s0 + $0xd3] sm:$0x40]   ;;  %v281_v1 = vsel %vm75_vm5, %v1012_v47, %v277_v60 }
  0x1a   :  { %v319_v54 = vsel %vm79_vm6, %v1021_v40, %v315_v49  ;;  %v1023_v63 = vld [vmem:[%s2162_s0 + $0x9] sm:$0x1]   ;;  %v285_v7 = vsel %vm79_vm6, %v1013_v56, %v281_v1  ;;  %v1038_v9 = vld [vmem:[%s2162_s0 + $0xf2] sm:$0x80]   ;;  %v1048_v16 = vld [vmem:[%s2162_s0 + $0x18] sm:$0x1]   ;;  %v384_v18 = vsel %vm75_vm5, %v1037_v62, %v380_v13 }
  0x1b   :  { %320 = vrot.lane.b32.xlu1 %v319_v54, %s1196_s6  ;;  %v1024_v0 = vld [vmem:[%s2162_s0 + $0x28] sm:$0x2]   ;;  %286 = vrot.lane.b32.xlu0 %v285_v7, %s1196_s6  ;;  %v1049_v17 = vld [vmem:[%s2162_s0 + $0x37] sm:$0x2]   ;;  %v388_v24 = vsel %vm79_vm6, %v1038_v9, %v384_v18  ;;  %s1198_s14 = smov 64   ;;  %s1199_s20 = smov 56  }
  0x1c   :  { %v330_v3 = vsel %vm55_vm0, %v1024_v0, %v1023_v63  ;;  %v1025_v4 = vld [vmem:[%s2162_s0 + $0x47] sm:$0x4]   ;;  %v433_v20 = vsel %vm55_vm0, %v1049_v17, %v1048_v16  ;;  %v1050_v21 = vld [vmem:[%s2162_s0 + $0x56] sm:$0x4]   ;;  %v1040_v31 = vld [vmem:[%s2162_s0 + $0x8] sm:$0x1]  }
  0x1d   :  { %v1026_v5 = vld [vmem:[%s2162_s0 + $0x66] sm:$0x8]   ;;  %v334_v10 = vsel %vm59_vm1, %v1025_v4, %v330_v3  ;;  %v1051_v22 = vld [vmem:[%s2162_s0 + $0x75] sm:$0x8]   ;;  %v437_v26 = vsel %vm59_vm1, %v1050_v21, %v433_v20  ;;  %v1041_v32 = vld [vmem:[%s2162_s0 + $0x27] sm:$0x2]  }
  0x1e   :  { %v1027_v6 = vld [vmem:[%s2162_s0 + $0x85] sm:$0x10]   ;;  %v338_v14 = vsel %vm63_vm2, %v1026_v5, %v334_v10  ;;  %v1052_v23 = vld [vmem:[%s2162_s0 + $0x94] sm:$0x10]   ;;  %v441_v30 = vsel %vm63_vm2, %v1051_v22, %v437_v26  ;;  %v1042_v33 = vld [vmem:[%s2162_s0 + $0x46] sm:$0x4]   ;;  %v399_v37 = vsel %vm55_vm0, %v1041_v32, %v1040_v31 }
  0x1f   :  { %v1028_v11 = vld [vmem:[%s2162_s0 + $0xa4] sm:$0x20]   ;;  %v342_v19 = vsel %vm67_vm3, %v1027_v6, %v338_v14  ;;  %v1053_v27 = vld [vmem:[%s2162_s0 + $0xb3] sm:$0x20]   ;;  %389 = vrot.lane.b32.xlu1 %v388_v24, %s1197_s12  ;;  %v445_v35 = vsel %vm67_vm3, %v1052_v23, %v441_v30  ;;  %v1043_v38 = vld [vmem:[%s2162_s0 + $0x65] sm:$0x8]   ;;  %v403_v41 = vsel %vm59_vm1, %v1042_v33, %v399_v37 }
  0x20   :  { %v1029_v12 = vld [vmem:[%s2162_s0 + $0xc3] sm:$0x40]   ;;  %v346_v25 = vsel %vm71_vm4, %v1028_v11, %v342_v19  ;;  %v1054_v28 = vld [vmem:[%s2162_s0 + $0xd2] sm:$0x40]   ;;  %v1044_v39 = vld [vmem:[%s2162_s0 + $0x84] sm:$0x10]   ;;  %v449_v40 = vsel %vm71_vm4, %v1053_v27, %v445_v35  ;;  %v407_v46 = vsel %vm63_vm2, %v1043_v38, %v403_v41 }
  0x21   :  { %v1030_v15 = vld [vmem:[%s2162_s0 + $0xe2] sm:$0x80]   ;;  %v350_v29 = vsel %vm75_vm5, %v1029_v12, %v346_v25  ;;  %v1055_v36 = vld [vmem:[%s2162_s0 + $0xf1] sm:$0x80]   ;;  %v1045_v42 = vld [vmem:[%s2162_s0 + $0xa3] sm:$0x20]   ;;  %v453_v45 = vsel %vm75_vm5, %v1054_v28, %v449_v40  ;;  %v411_v51 = vsel %vm67_vm3, %v1044_v39, %v407_v46 }
  0x22   :  { %v354_v34 = vsel %vm79_vm6, %v1030_v15, %v350_v29  ;;  %v1046_v43 = vld [vmem:[%s2162_s0 + $0xc2] sm:$0x40]   ;;  %v1065_v44 = vld [vmem:[%s2162_s0 + $0x17] sm:$0x1]   ;;  %v457_v50 = vsel %vm79_vm6, %v1055_v36, %v453_v45  ;;  %v415_v56 = vsel %vm71_vm4, %v1045_v42, %v411_v51  ;;  %v1057_v59 = vld [vmem:[%s2162_s0 + $0x7] sm:$0x1]  }
  0x23   :  { %355 = vrot.lane.b32.xlu0 %v354_v34, %s1197_s12  ;;  %v1066_v47 = vld [vmem:[%s2162_s0 + $0x36] sm:$0x2]   ;;  %v1047_v52 = vld [vmem:[%s2162_s0 + $0xe1] sm:$0x80]   ;;  %458 = vrot.lane.b32.xlu1 %v457_v50, %s1198_s14  ;;  %v419_v61 = vsel %vm75_vm5, %v1046_v43, %v415_v56  ;;  %s1200_s22 = smov 48   ;;  %s1201_s28 = smov 40  }
  0x24   :  { %v1067_v48 = vld [vmem:[%s2162_s0 + $0x55] sm:$0x4]   ;;  %v502_v53 = vsel %vm55_vm0, %v1066_v47, %v1065_v44  ;;  %v1058_v60 = vld [vmem:[%s2162_s0 + $0x26] sm:$0x2]   ;;  %v423_v3 = vsel %vm79_vm6, %v1047_v52, %v419_v61  ;;  %v1082_v12 = vld [vmem:[%s2162_s0 + $0x16] sm:$0x1]  }
  0x25   :  { %v1068_v49 = vld [vmem:[%s2162_s0 + $0x74] sm:$0x8]   ;;  %v506_v57 = vsel %vm59_vm1, %v1067_v48, %v502_v53  ;;  %v468_v63 = vsel %vm55_vm0, %v1058_v60, %v1057_v59  ;;  %v1059_v0 = vld [vmem:[%s2162_s0 + $0x45] sm:$0x4]   ;;  %v1083_v13 = vld [vmem:[%s2162_s0 + $0x35] sm:$0x2]  }
  0x26   :  { %v1069_v54 = vld [vmem:[%s2162_s0 + $0x93] sm:$0x10]   ;;  %v510_v62 = vsel %vm63_vm2, %v1068_v49, %v506_v57  ;;  %v1060_v1 = vld [vmem:[%s2162_s0 + $0x64] sm:$0x8]   ;;  %v472_v6 = vsel %vm59_vm1, %v1059_v0, %v468_v63  ;;  %v571_v16 = vsel %vm55_vm0, %v1083_v13, %v1082_v12  ;;  %v1084_v17 = vld [vmem:[%s2162_s0 + $0x54] sm:$0x4]  }
  0x27   :  { %v1070_v55 = vld [vmem:[%s2162_s0 + $0xb2] sm:$0x20]   ;;  %v1061_v2 = vld [vmem:[%s2162_s0 + $0x83] sm:$0x10]   ;;  %v514_v4 = vsel %vm67_vm3, %v1069_v54, %v510_v62  ;;  %424 = vrot.lane.b32.xlu0 %v423_v3, %s1198_s14  ;;  %v476_v10 = vsel %vm63_vm2, %v1060_v1, %v472_v6  ;;  %v1085_v18 = vld [vmem:[%s2162_s0 + $0x73] sm:$0x8]   ;;  %v575_v22 = vsel %vm59_vm1, %v1084_v17, %v571_v16 }
  0x28   :  { %v1071_v58 = vld [vmem:[%s2162_s0 + $0xd1] sm:$0x40]   ;;  %v1062_v7 = vld [vmem:[%s2162_s0 + $0xa2] sm:$0x20]   ;;  %v518_v9 = vsel %vm71_vm4, %v1070_v55, %v514_v4  ;;  %v480_v15 = vsel %vm67_vm3, %v1061_v2, %v476_v10  ;;  %v1086_v19 = vld [vmem:[%s2162_s0 + $0x92] sm:$0x10]   ;;  %v579_v26 = vsel %vm63_vm2, %v1085_v18, %v575_v22 }
  0x29   :  { %v1072_v5 = vld [vmem:[%s2162_s0 + $0xf0] sm:$0x80]   ;;  %v1063_v8 = vld [vmem:[%s2162_s0 + $0xc1] sm:$0x40]   ;;  %v522_v14 = vsel %vm75_vm5, %v1071_v58, %v518_v9  ;;  %v484_v21 = vsel %vm71_vm4, %v1062_v7, %v480_v15  ;;  %v1087_v23 = vld [vmem:[%s2162_s0 + $0xb1] sm:$0x20]   ;;  %v583_v31 = vsel %vm67_vm3, %v1086_v19, %v579_v26 }
  0x2a   :  { %v1064_v11 = vld [vmem:[%s2162_s0 + $0xe0] sm:$0x80]   ;;  %v526_v20 = vsel %vm79_vm6, %v1072_v5, %v522_v14  ;;  %v1088_v24 = vld [vmem:[%s2162_s0 + $0xd0] sm:$0x40]   ;;  %v488_v25 = vsel %vm75_vm5, %v1063_v8, %v484_v21  ;;  %v1074_v27 = vld [vmem:[%s2162_s0 + $0x6] sm:$0x1]   ;;  %v587_v36 = vsel %vm71_vm4, %v1087_v23, %v583_v31 }
  0x2b   :  { %527 = vrot.lane.b32.xlu1 %v526_v20, %s1199_s20  ;;  %v1075_v28 = vld [vmem:[%s2162_s0 + $0x25] sm:$0x2]   ;;  %v492_v30 = vsel %vm79_vm6, %v1064_v11, %v488_v25  ;;  %v1089_v32 = vld [vmem:[%s2162_s0 + $0xef] sm:$0x80]   ;;  %v1099_v40 = vld [vmem:[%s2162_s0 + $0x15] sm:$0x1]   ;;  %v591_v41 = vsel %vm75_vm5, %v1088_v24, %v587_v36 }
  0x2c   :  { %v1076_v29 = vld [vmem:[%s2162_s0 + $0x44] sm:$0x4]   ;;  %v537_v33 = vsel %vm55_vm0, %v1075_v28, %v1074_v27  ;;  %493 = vrot.lane.b32.xlu0 %v492_v30, %s1199_s20  ;;  %v1100_v43 = vld [vmem:[%s2162_s0 + $0x34] sm:$0x2]   ;;  %v595_v46 = vsel %vm79_vm6, %v1089_v32, %v591_v41  ;;  %v1091_v55 = vld [vmem:[%s2162_s0 + $0x5] sm:$0x1]  }
  0x2d   :  { %v1077_v34 = vld [vmem:[%s2162_s0 + $0x63] sm:$0x8]   ;;  %v541_v37 = vsel %vm59_vm1, %v1076_v29, %v537_v33  ;;  %v1101_v44 = vld [vmem:[%s2162_s0 + $0x53] sm:$0x4]   ;;  %v640_v49 = vsel %vm55_vm0, %v1100_v43, %v1099_v40  ;;  %v1092_v56 = vld [vmem:[%s2162_s0 + $0x24] sm:$0x2]  }
  0x2e   :  { %v1078_v35 = vld [vmem:[%s2162_s0 + $0x82] sm:$0x10]   ;;  %v545_v42 = vsel %vm63_vm2, %v1077_v34, %v541_v37  ;;  %v1102_v45 = vld [vmem:[%s2162_s0 + $0x72] sm:$0x8]   ;;  %v644_v53 = vsel %vm59_vm1, %v1101_v44, %v640_v49  ;;  %v606_v59 = vsel %vm55_vm0, %v1092_v56, %v1091_v55  ;;  %v1093_v60 = vld [vmem:[%s2162_s0 + $0x43] sm:$0x4]  }
  0x2f   :  { %v1079_v38 = vld [vmem:[%s2162_s0 + $0xa1] sm:$0x20]   ;;  %v549_v47 = vsel %vm67_vm3, %v1078_v35, %v545_v42  ;;  %v1103_v50 = vld [vmem:[%s2162_s0 + $0x91] sm:$0x10]   ;;  %596 = vrot.lane.b32.xlu1 %v595_v46, %s1200_s22  ;;  %v648_v58 = vsel %vm63_vm2, %v1102_v45, %v644_v53  ;;  %v1094_v61 = vld [vmem:[%s2162_s0 + $0x62] sm:$0x8]   ;;  %v610_v2 = vsel %vm59_vm1, %v1093_v60, %v606_v59 }
  0x30   :  { %v1080_v39 = vld [vmem:[%s2162_s0 + $0xc0] sm:$0x40]   ;;  %v1104_v51 = vld [vmem:[%s2162_s0 + $0xb0] sm:$0x20]   ;;  %v553_v52 = vsel %vm71_vm4, %v1079_v38, %v549_v47  ;;  %v1095_v62 = vld [vmem:[%s2162_s0 + $0x81] sm:$0x10]   ;;  %v652_v0 = vsel %vm67_vm3, %v1103_v50, %v648_v58  ;;  %v614_v6 = vsel %vm63_vm2, %v1094_v61, %v610_v2 }
  0x31   :  { %v1081_v48 = vld [vmem:[%s2162_s0 + $0xdf] sm:$0x80]   ;;  %v1105_v54 = vld [vmem:[%s2162_s0 + $0xcf] sm:$0x40]   ;;  %v557_v57 = vsel %vm75_vm5, %v1080_v39, %v553_v52  ;;  %v1096_v3 = vld [vmem:[%s2162_s0 + $0xa0] sm:$0x20]   ;;  %v656_v5 = vsel %vm71_vm4, %v1104_v51, %v652_v0  ;;  %v618_v11 = vsel %vm67_vm3, %v1095_v62, %v614_v6 }
  0x32   :  { %v561_v63 = vsel %vm79_vm6, %v1081_v48, %v557_v57  ;;  %v1106_v1 = vld [vmem:[%s2162_s0 + $0xee] sm:$0x80]   ;;  %v1097_v4 = vld [vmem:[%s2162_s0 + $0xbf] sm:$0x40]   ;;  %v1116_v8 = vld [vmem:[%s2162_s0 + $0x14] sm:$0x1]   ;;  %v660_v10 = vsel %vm75_vm5, %v1105_v54, %v656_v5  ;;  %v622_v17 = vsel %vm71_vm4, %v1096_v3, %v618_v11 }
  0x33   :  { %562 = vrot.lane.b32.xlu0 %v561_v63, %s1200_s22  ;;  %v1098_v7 = vld [vmem:[%s2162_s0 + $0xde] sm:$0x80]   ;;  %v1117_v9 = vld [vmem:[%s2162_s0 + $0x33] sm:$0x2]   ;;  %v664_v16 = vsel %vm79_vm6, %v1106_v1, %v660_v10  ;;  %v626_v21 = vsel %vm75_vm5, %v1097_v4, %v622_v17  ;;  %v1108_v23 = vld [vmem:[%s2162_s0 + $0x4] sm:$0x1]  }
  0x34   :  { %v709_v12 = vsel %vm55_vm0, %v1117_v9, %v1116_v8  ;;  %v1118_v13 = vld [vmem:[%s2162_s0 + $0x52] sm:$0x4]   ;;  %665 = vrot.lane.b32.xlu1 %v664_v16, %s1201_s28  ;;  %v1109_v24 = vld [vmem:[%s2162_s0 + $0x23] sm:$0x2]   ;;  %v630_v26 = vsel %vm79_vm6, %v1098_v7, %v626_v21  ;;  %v1133_v36 = vld [vmem:[%s2162_s0 + $0x13] sm:$0x1]  }
  0x35   :  { %v1119_v14 = vld [vmem:[%s2162_s0 + $0x71] sm:$0x8]   ;;  %v713_v18 = vsel %vm59_vm1, %v1118_v13, %v709_v12  ;;  %v1110_v25 = vld [vmem:[%s2162_s0 + $0x42] sm:$0x4]   ;;  %v675_v29 = vsel %vm55_vm0, %v1109_v24, %v1108_v23  ;;  %v1134_v39 = vld [vmem:[%s2162_s0 + $0x32] sm:$0x2]  }
  0x36   :  { %v1120_v15 = vld [vmem:[%s2162_s0 + $0x90] sm:$0x10]   ;;  %v717_v22 = vsel %vm63_vm2, %v1119_v14, %v713_v18  ;;  %v1111_v30 = vld [vmem:[%s2162_s0 + $0x61] sm:$0x8]   ;;  %v679_v33 = vsel %vm59_vm1, %v1110_v25, %v675_v29  ;;  %v1135_v40 = vld [vmem:[%s2162_s0 + $0x51] sm:$0x4]   ;;  %v778_v45 = vsel %vm55_vm0, %v1134_v39, %v1133_v36 }
  0x37   :  { %v1121_v19 = vld [vmem:[%s2162_s0 + $0xaf] sm:$0x20]   ;;  %v721_v27 = vsel %vm67_vm3, %v1120_v15, %v717_v22  ;;  %v1112_v31 = vld [vmem:[%s2162_s0 + $0x80] sm:$0x10]   ;;  %631 = vrot.lane.b32.xlu0 %v630_v26, %s1201_s28  ;;  %v683_v38 = vsel %vm63_vm2, %v1111_v30, %v679_v33  ;;  %v1136_v41 = vld [vmem:[%s2162_s0 + $0x70] sm:$0x8]   ;;  %v782_v49 = vsel %vm59_vm1, %v1135_v40, %v778_v45 }
  0x38   :  { %v1122_v20 = vld [vmem:[%s2162_s0 + $0xce] sm:$0x40]   ;;  %v725_v32 = vsel %vm71_vm4, %v1121_v19, %v721_v27  ;;  %v1113_v34 = vld [vmem:[%s2162_s0 + $0x9f] sm:$0x20]   ;;  %v687_v43 = vsel %vm67_vm3, %v1112_v31, %v683_v38  ;;  %v1137_v46 = vld [vmem:[%s2162_s0 + $0x8f] sm:$0x10]   ;;  %v786_v54 = vsel %vm63_vm2, %v1136_v41, %v782_v49 }
  0x39   :  { %v1123_v28 = vld [vmem:[%s2162_s0 + $0xed] sm:$0x80]   ;;  %v1114_v35 = vld [vmem:[%s2162_s0 + $0xbe] sm:$0x40]   ;;  %v729_v37 = vsel %vm75_vm5, %v1122_v20, %v725_v32  ;;  %v1138_v47 = vld [vmem:[%s2162_s0 + $0xae] sm:$0x20]   ;;  %v691_v48 = vsel %vm71_vm4, %v1113_v34, %v687_v43  ;;  %v790_v60 = vsel %vm67_vm3, %v1137_v46, %v786_v54 }
  0x3a   :  { %v733_v42 = vsel %vm79_vm6, %v1123_v28, %v729_v37  ;;  %v1115_v44 = vld [vmem:[%s2162_s0 + $0xdd] sm:$0x80]   ;;  %s1202_s30 = smov 32   ;;  %v1139_v50 = vld [vmem:[%s2162_s0 + $0xcd] sm:$0x40]   ;;  %v695_v53 = vsel %vm75_vm5, %v1114_v35, %v691_v48  ;;  %v794_v1 = vsel %vm71_vm4, %v1138_v47, %v790_v60  ;;  %s1203_s7 = smov 24  }
  0x3b   :  { %734 = vrot.lane.b32.xlu1 %v733_v42, %s1202_s30  ;;  %v1125_v51 = vld [vmem:[%s2162_s0 + $0x3] sm:$0x1]   ;;  %v699_v59 = vsel %vm79_vm6, %v1115_v44, %v695_v53  ;;  %v1140_v61 = vld [vmem:[%s2162_s0 + $0xec] sm:$0x80]   ;;  %v1150_v4 = vld [vmem:[%s2162_s0 + $0x12] sm:$0x1]   ;;  %v798_v6 = vsel %vm75_vm5, %v1139_v50, %v794_v1 }
  0x3c   :  { %v1126_v52 = vld [vmem:[%s2162_s0 + $0x22] sm:$0x2]   ;;  %700 = vrot.lane.b32.xlu0 %v699_v59, %s1202_s30  ;;  %v1151_v5 = vld [vmem:[%s2162_s0 + $0x31] sm:$0x2]   ;;  %v802_v12 = vsel %vm79_vm6, %v1140_v61, %v798_v6  ;;  %v1142_v19 = vld [vmem:[%s2162_s0 + $0x2] sm:$0x1]  }
  0x3d   :  { %v744_v55 = vsel %vm55_vm0, %v1126_v52, %v1125_v51  ;;  %v1127_v56 = vld [vmem:[%s2162_s0 + $0x41] sm:$0x4]   ;;  %v847_v8 = vsel %vm55_vm0, %v1151_v5, %v1150_v4  ;;  %v1152_v9 = vld [vmem:[%s2162_s0 + $0x50] sm:$0x4]   ;;  %v1143_v20 = vld [vmem:[%s2162_s0 + $0x21] sm:$0x2]  }
  0x3e   :  { %v1128_v57 = vld [vmem:[%s2162_s0 + $0x60] sm:$0x8]   ;;  %v748_v62 = vsel %vm59_vm1, %v1127_v56, %v744_v55  ;;  %v1153_v10 = vld [vmem:[%s2162_s0 + $0x6f] sm:$0x8]   ;;  %v851_v14 = vsel %vm59_vm1, %v1152_v9, %v847_v8  ;;  %v1144_v21 = vld [vmem:[%s2162_s0 + $0x40] sm:$0x4]   ;;  %v813_v25 = vsel %vm55_vm0, %v1143_v20, %v1142_v19 }
  0x3f   :  { %v1129_v58 = vld [vmem:[%s2162_s0 + $0x7f] sm:$0x10]   ;;  %v752_v2 = vsel %vm63_vm2, %v1128_v57, %v748_v62  ;;  %v1154_v11 = vld [vmem:[%s2162_s0 + $0x8e] sm:$0x10]   ;;  %803 = vrot.lane.b32.xlu1 %v802_v12, %s1203_s7  ;;  %v855_v18 = vsel %vm63_vm2, %v1153_v10, %v851_v14  ;;  %v1145_v26 = vld [vmem:[%s2162_s0 + $0x5f] sm:$0x8]   ;;  %v817_v29 = vsel %vm59_vm1, %v1144_v21, %v813_v25 }
  0x40   :  { %v1130_v63 = vld [vmem:[%s2162_s0 + $0x9e] sm:$0x20]   ;;  %v756_v7 = vsel %vm67_vm3, %v1129_v58, %v752_v2  ;;  %v1155_v15 = vld [vmem:[%s2162_s0 + $0xad] sm:$0x20]   ;;  %v859_v23 = vsel %vm67_vm3, %v1154_v11, %v855_v18  ;;  %v1146_v27 = vld [vmem:[%s2162_s0 + $0x7e] sm:$0x10]   ;;  %v821_v34 = vsel %vm63_vm2, %v1145_v26, %v817_v29 }
  0x41   :  { %v1131_v0 = vld [vmem:[%s2162_s0 + $0xbd] sm:$0x40]   ;;  %v760_v13 = vsel %vm71_vm4, %v1130_v63, %v756_v7  ;;  %v1156_v16 = vld [vmem:[%s2162_s0 + $0xcc] sm:$0x40]   ;;  %v863_v28 = vsel %vm71_vm4, %v1155_v15, %v859_v23  ;;  %v1147_v30 = vld [vmem:[%s2162_s0 + $0x9d] sm:$0x20]   ;;  %v825_v39 = vsel %vm67_vm3, %v1146_v27, %v821_v34 }
  0x42   :  { %v1132_v3 = vld [vmem:[%s2162_s0 + $0xdc] sm:$0x80]   ;;  %v764_v17 = vsel %vm75_vm5, %v1131_v0, %v760_v13  ;;  %v1157_v24 = vld [vmem:[%s2162_s0 + $0xeb] sm:$0x80]   ;;  %v1148_v31 = vld [vmem:[%s2162_s0 + $0xbc] sm:$0x40]   ;;  %v867_v33 = vsel %vm75_vm5, %v1156_v16, %v863_v28  ;;  %v829_v44 = vsel %vm71_vm4, %v1147_v30, %v825_v39 }
  0x43   :  { %v768_v22 = vsel %vm79_vm6, %v1132_v3, %v764_v17  ;;  %v1167_v32 = vld [vmem:[%s2162_s0 + $0x11] sm:$0x1]   ;;  %v871_v38 = vsel %vm79_vm6, %v1157_v24, %v867_v33  ;;  %v1149_v40 = vld [vmem:[%s2162_s0 + $0xdb] sm:$0x80]   ;;  %s1204_s9 = smov 16   ;;  %v833_v49 = vsel %vm75_vm5, %v1148_v31, %v829_v44  ;;  %s2_s30 = smov 3 }
  0x44   :  { %769 = vrot.lane.b32.xlu0 %v768_v22, %s1203_s7  ;;  %v1168_v35 = vld [vmem:[%s2162_s0 + $0x30] sm:$0x2]   ;;  %872 = vrot.lane.b32.xlu1 %v871_v38, %s1204_s9  ;;  %v1159_v47 = vld [vmem:[%s2162_s0 + $0x1] sm:$0x1]   ;;  %v837_v55 = vsel %vm79_vm6, %v1149_v40, %v833_v49  ;;  %s4_s2 = smov 12  ;;  %vm6_vm7 = vcmask 1043458  }
  0x45   :  { %v1169_v36 = vld [vmem:[%s2162_s0 + $0x4f] sm:$0x4]   ;;  %v916_v41 = vsel %vm55_vm0, %v1168_v35, %v1167_v32  ;;  %v1160_v48 = vld [vmem:[%s2162_s0 + $0x20] sm:$0x2]   ;;  %s8_s3 = smov 48  ;;  %vm10_vm8 = vcmask 1045508  }
  0x46   :  { %v1170_v37 = vld [vmem:[%s2162_s0 + $0x6e] sm:$0x8]   ;;  %v920_v45 = vsel %vm59_vm1, %v1169_v36, %v916_v41  ;;  %v882_v51 = vsel %vm55_vm0, %v1160_v48, %v1159_v47  ;;  %v1161_v52 = vld [vmem:[%s2162_s0 + $0x3f] sm:$0x4]   ;;  %s12_s4 = smov 192  ;;  %vm14_vm9 = vcmask 1047558  }
  0x47   :  { %v1171_v42 = vld [vmem:[%s2162_s0 + $0x8d] sm:$0x10]   ;;  %v924_v50 = vsel %vm63_vm2, %v1170_v37, %v920_v45  ;;  %v1162_v53 = vld [vmem:[%s2162_s0 + $0x5e] sm:$0x8]   ;;  %v886_v58 = vsel %vm59_vm1, %v1161_v52, %v882_v51  ;;  %v3_v2 = vld [vmem:[%s2162_s0] ss:$16 sm:%s2_s30]  }
  0x48   :  { %v1172_v43 = vld [vmem:[%s2162_s0 + $0xac] sm:$0x20]   ;;  %v1163_v54 = vld [vmem:[%s2162_s0 + $0x7d] sm:$0x10]   ;;  %v928_v56 = vsel %vm67_vm3, %v1171_v42, %v924_v50  ;;  %838 = vrot.lane.b32.xlu0 %v837_v55, %s1204_s9  ;;  %v890_v61 = vsel %vm63_vm2, %v1162_v53, %v886_v58  ;;  %s25_s7 = smov 3  ;;  %s28_s8 = smov 12 }
  0x49   :  { %v1173_v46 = vld [vmem:[%s2162_s0 + $0xcb] sm:$0x40]   ;;  %v1164_v59 = vld [vmem:[%s2162_s0 + $0x9c] sm:$0x20]   ;;  %v932_v60 = vsel %vm71_vm4, %v1172_v43, %v928_v56  ;;  %v894_v1 = vsel %vm67_vm3, %v1163_v54, %v890_v61  ;;  %v5_v5 = vld [vmem:[%s2162_s0] ss:$16 sm:%s4_s2]  }
  0x4a   :  { %v1174_v57 = vld [vmem:[%s2162_s0 + $0xea] sm:$0x80]   ;;  %v1165_v62 = vld [vmem:[%s2162_s0 + $0xbb] sm:$0x40]   ;;  %v936_v0 = vsel %vm75_vm5, %v1173_v46, %v932_v60  ;;  %v898_v4 = vsel %vm71_vm4, %v1164_v59, %v894_v1  ;;  %s1205_s11 = smov 8   ;;  %vm16_vm10 = vcmask 64512   ;;  %v7_v7 = vsel %vm6_vm7, %v5_v5, %v3_v2 }
  0x4b   :  { %v1166_v63 = vld [vmem:[%s2162_s0 + $0xda] sm:$0x80]   ;;  %v940_v3 = vsel %vm79_vm6, %v1174_v57, %v936_v0  ;;  %v902_v6 = vsel %vm75_vm5, %v1165_v62, %v898_v4  ;;  %s33_s12 = smov 48  ;;  %s38_s13 = smov 192  ;;  %v9_v8 = vld [vmem:[%s2162_s0] ss:$16 sm:%s8_s3]  }
  0x4c   :  { %941 = vrot.lane.b32.xlu1 %v940_v3, %s1205_s11  ;;  %v906_v9 = vsel %vm79_vm6, %v1166_v63, %v902_v6  ;;  %v11_v10 = vsel %vm10_vm8, %v9_v8, %v7_v7  ;;  %v13_v11 = vld [vmem:[%s2162_s0] ss:$16 sm:%s12_s4]   ;;  %vm83_vm11 = vcmask 1048512   ;;  %vm117_vm12 = vcmask 982912  }
  0x4d   :  { %v949_v12 = vld [vmem:[%s2162_s0 + $0x80] ss:$16 sm:%s25_s7]   ;;  %907 = vrot.lane.b32.xlu0 %v906_v9, %s1205_s11  ;;  %v15_v13 = vsel %vm14_vm9, %v13_v11, %v11_v10  ;;  %vm151_vm13 = vcmask 917312   ;;  %vm185_vm14 = vcmask 851712   ;;  %vm219_vm15 = vcmask 786112  }
  0x4e   :  { %v950_v14 = vld [vmem:[%s2162_s0 + $0x80] ss:$16 sm:%s28_s8]   ;;  %17 = vst.msk [vmem:[%s2163_s1] ss:$8 sm:$0x3] %vm16_vm10, %v15_v13   ;;  %vm288_vm0 = vcmask 720512  }
  0x4f   :  { %946 = vst.msk [vmem:[%s2163_s1 - $0xf] ss:$8 sm:$0xc] %vm16_vm10, %v15_v13   ;;  %947 = vst.msk [vmem:[%s2163_s1 - $0x1e] ss:$8 sm:$0x30] %vm16_vm10, %v15_v13   ;;  %v31_v15 = vsel %vm6_vm7, %v950_v14, %v949_v12 }
  0x50   :  { %948 = vst.msk [vmem:[%s2163_s1 - $0x2d] ss:$8 sm:$0xc0] %vm16_vm10, %v15_v13   ;;  %v951_v16 = vld [vmem:[%s2162_s0 + $0x80] ss:$16 sm:%s33_s12]   ;;  %vm357_vm1 = vcmask 654912  }
  0x51   :  { %v952_v17 = vld [vmem:[%s2162_s0 + $0x80] ss:$16 sm:%s38_s13]   ;;  %v36_v18 = vsel %vm10_vm8, %v951_v16, %v31_v15  ;;  %vm426_vm2 = vcmask 589312   ;;  %vm495_vm3 = vcmask 523712   ;;  %vm564_vm4 = vcmask 458112  }
  0x52   :  { %v41_v19 = vsel %vm14_vm9, %v952_v17, %v36_v18  ;;  %vm633_vm5 = vcmask 392512   ;;  %vm702_vm6 = vcmask 326912   ;;  %vm771_vm7 = vcmask 261312  }
  0x53   :  { %953 = vst.msk [vmem:[%s2163_s1 + $0x4] ss:$8 sm:$0x3] %vm16_vm10, %v41_v19   ;;  %954 = vst.msk [vmem:[%s2163_s1 - $0xb] ss:$8 sm:$0xc] %vm16_vm10, %v41_v19  }
  0x54   :  { %955 = vst.msk [vmem:[%s2163_s1 - $0x1a] ss:$8 sm:$0x30] %vm16_vm10, %v41_v19   ;;  %956 = vst.msk [vmem:[%s2163_s1 - $0x29] ss:$8 sm:$0xc0] %vm16_vm10, %v41_v19  }
  0x55   :  { %vm840_vm8 = vcmask 195712   ;;  %vm909_vm9 = vcmask 130112  }
  0x7c   :  { %v150_v20 = vpop.permute.xlu1 %149  }
  0x7d   :  { %v82_v21 = vpop.permute.xlu0 %81  }
  0x7e   :  { %84 = vst.msk [vmem:[%s2163_s1] sm:$0xff] %vm83_vm11, %v82_v21  }
  0x80   :  { %v184_v22 = vpop.permute.xlu1 %183  }
  0x84   :  { %v116_v23 = vpop.permute.xlu0 %115  }
  0x85   :  { %118 = vst.msk [vmem:[%s2163_s1] sm:$0xff] %vm117_vm12, %v116_v23   ;;  %v252_v24 = vpop.permute.xlu1 %251  }
  0x86   :  { %152 = vst.msk [vmem:[%s2163_s1] sm:$0xff] %vm151_vm13, %v150_v20  }
  0x87   :  { %186 = vst.msk [vmem:[%s2163_s1] sm:$0xff] %vm185_vm14, %v184_v22  }
  0x88   :  { %1005 = vst.msk [vmem:[%s2163_s1 + $0x8] sm:$0xff] %vm219_vm15, %v252_v24   ;;  %v218_v25 = vpop.permute.xlu0 %217  }
  0x89   :  { %220 = vst.msk [vmem:[%s2163_s1] sm:$0xff] %vm219_vm15, %v218_v25  }
  0x8d   :  { %v321_v26 = vpop.permute.xlu1 %320   ;;  %v287_v27 = vpop.permute.xlu0 %286  }
  0x8e   :  { %1022 = vst.msk [vmem:[%s2163_s1 + $0x8] sm:$0xff] %vm288_vm0, %v321_v26   ;;  %289 = vst.msk [vmem:[%s2163_s1] sm:$0xff] %vm288_vm0, %v287_v27  }
  0x91   :  { %v390_v28 = vpop.permute.xlu1 %389  }
  0x92   :  { %1039 = vst.msk [vmem:[%s2163_s1 + $0x8] sm:$0xff] %vm357_vm1, %v390_v28  }
  0x95   :  { %v356_v29 = vpop.permute.xlu0 %355   ;;  %v459_v30 = vpop.permute.xlu1 %458  }
  0x96   :  { %358 = vst.msk [vmem:[%s2163_s1] sm:$0xff] %vm357_vm1, %v356_v29  }
  0x97   :  { %1056 = vst.msk [vmem:[%s2163_s1 + $0x8] sm:$0xff] %vm426_vm2, %v459_v30  }
  0x99   :  { %v425_v31 = vpop.permute.xlu0 %424  }
  0x9a   :  { %427 = vst.msk [vmem:[%s2163_s1] sm:$0xff] %vm426_vm2, %v425_v31  }
  0x9d   :  { %v528_v32 = vpop.permute.xlu1 %527  }
  0x9e   :  { %1073 = vst.msk [vmem:[%s2163_s1 + $0x8] sm:$0xff] %vm495_vm3, %v528_v32   ;;  %v494_v33 = vpop.permute.xlu0 %493  }
  0x9f   :  { %496 = vst.msk [vmem:[%s2163_s1] sm:$0xff] %vm495_vm3, %v494_v33  }
  0xa1   :  { %v597_v34 = vpop.permute.xlu1 %596  }
  0xa2   :  { %1090 = vst.msk [vmem:[%s2163_s1 + $0x8] sm:$0xff] %vm564_vm4, %v597_v34  }
  0xa5   :  { %v563_v35 = vpop.permute.xlu0 %562  }
  0xa6   :  { %565 = vst.msk [vmem:[%s2163_s1] sm:$0xff] %vm564_vm4, %v563_v35   ;;  %v666_v36 = vpop.permute.xlu1 %665  }
  0xa7   :  { %1107 = vst.msk [vmem:[%s2163_s1 + $0x8] sm:$0xff] %vm633_vm5, %v666_v36  }
  0xa9   :  { %v632_v37 = vpop.permute.xlu0 %631  }
  0xaa   :  { %634 = vst.msk [vmem:[%s2163_s1] sm:$0xff] %vm633_vm5, %v632_v37  }
  0xad   :  { %v735_v38 = vpop.permute.xlu1 %734  }
  0xae   :  { %1124 = vst.msk [vmem:[%s2163_s1 + $0x8] sm:$0xff] %vm702_vm6, %v735_v38   ;;  %v701_v39 = vpop.permute.xlu0 %700  }
  0xaf   :  { %703 = vst.msk [vmem:[%s2163_s1] sm:$0xff] %vm702_vm6, %v701_v39  }
  0xb1   :  { %v804_v40 = vpop.permute.xlu1 %803  }
  0xb2   :  { %1141 = vst.msk [vmem:[%s2163_s1 + $0x8] sm:$0xff] %vm771_vm7, %v804_v40  }
  0xb6   :  { %v770_v41 = vpop.permute.xlu0 %769   ;;  %v873_v42 = vpop.permute.xlu1 %872  }
  0xb7   :  { %772 = vst.msk [vmem:[%s2163_s1] sm:$0xff] %vm771_vm7, %v770_v41  }
  0xb8   :  { %1158 = vst.msk [vmem:[%s2163_s1 + $0x8] sm:$0xff] %vm840_vm8, %v873_v42  }
  0xba   :  { %v839_v43 = vpop.permute.xlu0 %838  }
  0xbb   :  { %841 = vst.msk [vmem:[%s2163_s1] sm:$0xff] %vm840_vm8, %v839_v43  }
  0xbe   :  { %v942_v44 = vpop.permute.xlu1 %941  }
  0xbf   :  { %1175 = vst.msk [vmem:[%s2163_s1 + $0x8] sm:$0xff] %vm909_vm9, %v942_v44   ;;  %v908_v45 = vpop.permute.xlu0 %907  }
  0xc0   :  { %910 = vst.msk [vmem:[%s2163_s1] sm:$0xff] %vm909_vm9, %v908_v45  }

// kernel: simple_conv_linear_pooling.1
= control target key start
LH: loop header
LB: loop body
LE: loop exit
PB: predicated region body
PF: predicated region fallthrough
CT: control target
= control target key end

     0   :  { %s9919_s30 = smov 92   ;;  %s9920_s8 = smov 120   ;;  %vm14587_vm0 = vcmask 130048   ;;  %vm97_vm1 = vcmask 752640   ;;  %vm61_vm2 = vcmask 982016   ;;  %vm132_vm3 = vcmask 523264   ;;  %s14552_s0 = inlined_call_operand.vmem [shape: f32[8,1568], index: 0, kind: input, shape index: {}]   ;;  %s14553_s1 = inlined_call_operand.vmem [shape: bf16[784,896], index: 1, kind: input, shape index: {}]   ;;  %s14554_s2 = inlined_call_operand.vmem [shape: f32[1,896], index: 2, kind: input, shape index: {}]   ;;  %s14555_s3 = inlined_call_operand.vmem [shape: f32[224,896], index: 3, kind: input, shape index: {}]   ;;  %s14556_s4 = inlined_call_operand.vmem [shape: f32[8,224], index: 4, kind: input, shape index: {}]   ;;  %s14557_s5 = inlined_call_operand.vmem [shape: f32[896,128], index: 5, kind: input, shape index: {}]   ;;  %s14558_s6 = inlined_call_operand.vmem [shape: f32[1,128], index: 6, kind: input, shape index: {}]   ;;  %s14559_s7 = inlined_call_operand.vmem [shape: f32[8,128], index: 7, kind: output, shape index: {}]  }
   0x1   :  { %v9993_v0 = vld [vmem:[%s14552_s0 + $0x20] sm:$0xff]  ;;  %v9998_v1 = vld [vmem:[%s14552_s0 + $0x28] sm:$0xff]  ;;  %v10003_v2 = vld [vmem:[%s14552_s0 + $0x18] sm:$0xff]  ;;  %s9921_s16 = smov 64   ;;  %s9922_s29 = smov 36   ;;  %vm167_vm4 = vcmask 293888  }
   0x2   :  { %85 = vrot.lane.b32.xlu1 %v9993_v0, %s9919_s30  ;;  %551 = vst [vmem:[#allocation2 + $0x330] sm:$0xff] %v9993_v0  ;;  %49 = vrot.lane.b32.xlu0 %v9993_v0, %s9920_s8  ;;  %552 = vst [vmem:[#allocation2 + $0x338] sm:$0xff] %v9998_v1  ;;  %v9418_v3 = vld [vmem:[%s14553_s1 + $0x4] ss:$28 sps:$4 sm:$0xff]   ;;  %v9420_v4 = vld [vmem:[%s14553_s1 + $0xc] ss:$28 sps:$4 sm:$0xff]  }
   0x3   :  { %550 = vst [vmem:[#allocation2 + $0x328] sm:$0xff] %v10003_v2  ;;  %3543 = vmatprep.subr.bf16.mxu0 %v9418_v3  ;;  %v9422_v5 = vld [vmem:[%s14553_s1] ss:$28 sps:$4 sm:$0xff]   ;;  %v9423_v6 = vld [vmem:[%s14553_s1 + $0x8] ss:$28 sps:$4 sm:$0xff]   ;;  %4235 = vmatprep.subr.bf16.mxu1 %v9420_v4  ;;  %v10075_v19 = vld [vmem:[%s14552_s0 + $0x10] sm:$0xff] }
   0x4   :  { %3544 = vmatpush1.bf16.msra.mxu0 %v9422_v5  ;;  %v9424_v7 = vld [vmem:[%s14553_s1 + $0x3c] ss:$28 sps:$4 sm:$0xff]   ;;  %4236 = vmatpush1.bf16.msra.mxu1 %v9423_v6  ;;  %v9426_v8 = vld [vmem:[%s14553_s1 + $0x44] ss:$28 sps:$4 sm:$0xff]   ;;  %v9430_v11 = vld [vmem:[%s14553_s1 + $0x74] ss:$28 sps:$4 sm:$0xff]  }
   0x5   :  { %v9428_v9 = vld [vmem:[%s14553_s1 + $0x38] ss:$28 sps:$4 sm:$0xff]   ;;  %v9429_v10 = vld [vmem:[%s14553_s1 + $0x40] ss:$28 sps:$4 sm:$0xff]   ;;  %3545 = vmatprep.subr.bf16.mxu0 %v9424_v7  ;;  %4237 = vmatprep.subr.bf16.mxu1 %v9426_v8  ;;  %v9434_v13 = vld [vmem:[%s14553_s1 + $0x70] ss:$28 sps:$4 sm:$0xff]  }
   0x6   :  { %87 = vrot.lane.b32.xlu1 %v9998_v1, %s9919_s30  ;;  %51 = vrot.lane.b32.xlu0 %v9998_v1, %s9920_s8  ;;  %v9432_v12 = vld [vmem:[%s14553_s1 + $0x7c] ss:$28 sps:$4 sm:$0xff]   ;;  %v9436_v15 = vld [vmem:[%s14553_s1 + $0xac] ss:$28 sps:$4 sm:$0xff]   ;;  %549 = vst [vmem:[#allocation2 + $0x320] sm:$0xff] %v10075_v19  ;;  %s9923_s28 = smov 8  }
   0x7   :  { %v9435_v14 = vld [vmem:[%s14553_s1 + $0x78] ss:$28 sps:$4 sm:$0xff]   ;;  %v9440_v17 = vld [vmem:[%s14553_s1 + $0xa8] ss:$28 sps:$4 sm:$0xff]   ;;  %v9441_v18 = vld [vmem:[%s14553_s1 + $0xb0] ss:$28 sps:$4 sm:$0xff]  }
   0x8   :  { %3546 = vmatpush1.bf16.msra.mxu0 %v9428_v9  ;;  %4238 = vmatpush1.bf16.msra.mxu1 %v9429_v10  ;;  %v9438_v16 = vld [vmem:[%s14553_s1 + $0xb4] ss:$28 sps:$4 sm:$0xff]   ;;  %v10080_v20 = vld [vmem:[%s14552_s0 + $0x8] sm:$0xff]  ;;  %v9442_v21 = vld [vmem:[%s14553_s1 + $0xe4] ss:$28 sps:$4 sm:$0xff]   ;;  %s9924_s20 = smov 108  }
   0x9   :  { %3547 = vmatprep.subr.bf16.mxu0 %v9430_v11  ;;  %4239 = vmatprep.subr.bf16.mxu1 %v9432_v12  ;;  %548 = vst [vmem:[#allocation2 + $0x318] sm:$0xff] %v10080_v20  ;;  %v9444_v22 = vld [vmem:[%s14553_s1 + $0xec] ss:$28 sps:$4 sm:$0xff]   ;;  %v9446_v23 = vld [vmem:[%s14553_s1 + $0xe0] ss:$28 sps:$4 sm:$0xff]   ;;  %v10135_v32 = vld [vmem:[%s14552_s0 + $0x30] sm:$0xff] }
   0xa   :  { %83 = vrot.lane.b32.xlu1 %v10003_v2, %s9919_s30  ;;  %47 = vrot.lane.b32.xlu0 %v10003_v2, %s9920_s8  ;;  %v10100_v24 = vld [vmem:[%s14552_s0] sm:$0xff]  ;;  %v9448_v26 = vld [vmem:[%s14553_s1 + $0x11c] ss:$28 sps:$4 sm:$0xff]   ;;  %s9925_s19 = smov 80   ;;  %s9926_s10 = smov 52   ;;  %553 = vst.msk [vmem:[#allocation2 + $0x340] sm:$0xff] %vm14587_vm0, %v10135_v32 }
   0xb   :  { %v9447_v25 = vld [vmem:[%s14553_s1 + $0xe8] ss:$28 sps:$4 sm:$0xff]   ;;  %547 = vst [vmem:[#allocation2 + $0x310] sm:$0xff] %v10100_v24  ;;  %v9452_v28 = vld [vmem:[%s14553_s1 + $0x118] ss:$28 sps:$4 sm:$0xff]   ;;  %s14619_s17 = smov 24  }
   0xc   :  { %3548 = vmatpush1.bf16.msra.mxu0 %v9434_v13  ;;  %4240 = vmatpush1.bf16.msra.mxu1 %v9435_v14  ;;  %v9450_v27 = vld [vmem:[%s14553_s1 + $0x124] ss:$28 sps:$4 sm:$0xff]   ;;  %v9454_v30 = vld [vmem:[%s14553_s1 + $0x154] ss:$28 sps:$4 sm:$0xff]   ;;  %v9456_v31 = vld [vmem:[%s14553_s1 + $0x15c] ss:$28 sps:$4 sm:$0xff]  }
   0xd   :  { %3549 = vmatprep.subr.bf16.mxu0 %v9436_v15  ;;  %4241 = vmatprep.subr.bf16.mxu1 %v9438_v16  ;;  %v9453_v29 = vld [vmem:[%s14553_s1 + $0x120] ss:$28 sps:$4 sm:$0xff]   ;;  %v9458_v33 = vld [vmem:[%s14553_s1 + $0x150] ss:$28 sps:$4 sm:$0xff]   ;;  %v9459_v34 = vld [vmem:[%s14553_s1 + $0x158] ss:$28 sps:$4 sm:$0xff]  }
   0xe   :  { %122 = vrot.lane.b32.xlu1 %v9998_v1, %s9921_s16  ;;  %120 = vrot.lane.b32.xlu0 %v9993_v0, %s9921_s16  ;;  %v9460_v35 = vld [vmem:[%s14553_s1 + $0x18c] ss:$28 sps:$4 sm:$0xff]   ;;  %v9462_v36 = vld [vmem:[%s14553_s1 + $0x194] ss:$28 sps:$4 sm:$0xff]   ;;  %s14598_s9 = smov 124   ;;  %s14595_s14 = smov 96  }
   0xf   :  { %v9464_v37 = vld [vmem:[%s14553_s1 + $0x188] ss:$28 sps:$4 sm:$0xff]   ;;  %v9465_v38 = vld [vmem:[%s14553_s1 + $0x190] ss:$28 sps:$4 sm:$0xff]   ;;  %v9470_v41 = vld [vmem:[%s14553_s1 + $0x1c0] ss:$28 sps:$4 sm:$0xff]  }
  0x10   :  { %3550 = vmatpush1.bf16.msra.mxu0 %v9440_v17  ;;  %4242 = vmatpush1.bf16.msra.mxu1 %v9441_v18  ;;  %v9466_v39 = vld [vmem:[%s14553_s1 + $0x1c4] ss:$28 sps:$4 sm:$0xff]   ;;  %v9468_v40 = vld [vmem:[%s14553_s1 + $0x1cc] ss:$28 sps:$4 sm:$0xff]   ;;  %v9472_v43 = vld [vmem:[%s14553_s1 + $0x1fc] ss:$28 sps:$4 sm:$0xff]  }
  0x11   :  { %3551 = vmatprep.subr.bf16.mxu0 %v9442_v21  ;;  %4243 = vmatprep.subr.bf16.mxu1 %v9444_v22  ;;  %v9471_v42 = vld [vmem:[%s14553_s1 + $0x1c8] ss:$28 sps:$4 sm:$0xff]   ;;  %v9476_v45 = vld [vmem:[%s14553_s1 + $0x1f8] ss:$28 sps:$4 sm:$0xff]   ;;  %v9477_v46 = vld [vmem:[%s14553_s1 + $0x200] ss:$28 sps:$4 sm:$0xff]  }
  0x12   :  { %157 = vrot.lane.b32.xlu1 %v9998_v1, %s9922_s29  ;;  %155 = vrot.lane.b32.xlu0 %v9993_v0, %s9922_s29  ;;  %v9474_v44 = vld [vmem:[%s14553_s1 + $0x204] ss:$28 sps:$4 sm:$0xff]   ;;  %v9478_v47 = vld [vmem:[%s14553_s1 + $0x234] ss:$28 sps:$4 sm:$0xff]   ;;  %s14593_s23 = smov 68   ;;  %s14590_s24 = smov 40  }
  0x13   :  { %v9480_v48 = vld [vmem:[%s14553_s1 + $0x23c] ss:$28 sps:$4 sm:$0xff]   ;;  %v9482_v49 = vld [vmem:[%s14553_s1 + $0x230] ss:$28 sps:$4 sm:$0xff]   ;;  %v9488_v53 = vld [vmem:[%s14553_s1 + $0x268] ss:$28 sps:$4 sm:$0xff]  }
  0x14   :  { %3552 = vmatpush1.bf16.msra.mxu0 %v9446_v23  ;;  %4244 = vmatpush1.bf16.msra.mxu1 %v9447_v25  ;;  %v9483_v50 = vld [vmem:[%s14553_s1 + $0x238] ss:$28 sps:$4 sm:$0xff]   ;;  %v9484_v51 = vld [vmem:[%s14553_s1 + $0x26c] ss:$28 sps:$4 sm:$0xff]   ;;  %v9490_v55 = vld [vmem:[%s14553_s1 + $0x2a4] ss:$28 sps:$4 sm:$0xff]  }
  0x15   :  { %3553 = vmatprep.subr.bf16.mxu0 %v9448_v26  ;;  %4245 = vmatprep.subr.bf16.mxu1 %v9450_v27  ;;  %v9486_v52 = vld [vmem:[%s14553_s1 + $0x274] ss:$28 sps:$4 sm:$0xff]   ;;  %v9492_v56 = vld [vmem:[%s14553_s1 + $0x2ac] ss:$28 sps:$4 sm:$0xff]   ;;  %v34_v57 = vld [vmem:[%s14552_s0 + $0x38] sm:$0xff]  ;;  %s14582_s25 = smov 12  }
  0x16   :  { %153 = vrot.lane.b32.xlu1 %v10003_v2, %s9922_s29  ;;  %118 = vrot.lane.b32.xlu0 %v10003_v2, %s9921_s16  ;;  %v9489_v54 = vld [vmem:[%s14553_s1 + $0x270] ss:$28 sps:$4 sm:$0xff]   ;;  %v9494_v58 = vld [vmem:[%s14553_s1 + $0x2a0] ss:$28 sps:$4 sm:$0xff]   ;;  %s14572_s26 = smov 100   ;;  %s14568_s27 = smov 72  }
  0x17   :  { %v9495_v59 = vld [vmem:[%s14553_s1 + $0x2a8] ss:$28 sps:$4 sm:$0xff]   ;;  %v9496_v60 = vld [vmem:[%s14553_s1 + $0x2dc] ss:$28 sps:$4 sm:$0xff]   ;;  %v9502_v3 = vld [vmem:[%s14553_s1 + $0x314] ss:$28 sps:$4 sm:$0xff]  }
  0x18   :  { %3554 = vmatpush1.bf16.msra.mxu0 %v9452_v28  ;;  %4246 = vmatpush1.bf16.msra.mxu1 %v9453_v29  ;;  %v9498_v61 = vld [vmem:[%s14553_s1 + $0x2e4] ss:$28 sps:$4 sm:$0xff]   ;;  %v9500_v62 = vld [vmem:[%s14553_s1 + $0x2d8] ss:$28 sps:$4 sm:$0xff]   ;;  %v9506_v5 = vld [vmem:[%s14553_s1 + $0x310] ss:$28 sps:$4 sm:$0xff]  }
  0x19   :  { %3555 = vmatprep.subr.bf16.mxu0 %v9454_v30  ;;  %4247 = vmatprep.subr.bf16.mxu1 %v9456_v31  ;;  %v9501_v63 = vld [vmem:[%s14553_s1 + $0x2e0] ss:$28 sps:$4 sm:$0xff]   ;;  %v9507_v6 = vld [vmem:[%s14553_s1 + $0x318] ss:$28 sps:$4 sm:$0xff]   ;;  %v9508_v7 = vld [vmem:[%s14553_s1 + $0x34c] ss:$28 sps:$4 sm:$0xff]  }
  0x1a   :  { %193 = vrot.lane.b32.xlu1 %v9998_v1, %s9923_s28  ;;  %191 = vrot.lane.b32.xlu0 %v9993_v0, %s9923_s28  ;;  %v9504_v4 = vld [vmem:[%s14553_s1 + $0x31c] ss:$28 sps:$4 sm:$0xff]   ;;  %v9510_v8 = vld [vmem:[%s14553_s1 + $0x354] ss:$28 sps:$4 sm:$0xff]   ;;  %s14566_s11 = smov 44   ;;  %s14562_s15 = smov 16  }
  0x1b   :  { %v9513_v9 = vld [vmem:[%s14553_s1 + $0x350] ss:$28 sps:$4 sm:$0xff]   ;;  %v9516_v10 = vld [vmem:[%s14553_s1 + $0x384] ss:$28 sps:$4 sm:$0xff]   ;;  %s14560_s18 = smov 116   ;;  %s14564_s21 = smov 88  }
  0x1c   :  { %3556 = vmatpush1.bf16.msra.mxu0 %v9458_v33  ;;  %4248 = vmatpush1.bf16.msra.mxu1 %v9459_v34  ;;  %s14570_s22 = smov 60   ;;  %v9514_v18 = vld [vmem:[%s14553_s1 + $0x380] ss:$28 sps:$4 sm:$0xff]   ;;  %v9538_v23 = vld [vmem:[%s14553_s1 + $0x388] ss:$28 sps:$4 sm:$0xff]   ;;  %s14576_s13 = smov 104  }
  0x1d   :  { %3557 = vmatprep.subr.bf16.mxu0 %v9460_v35  ;;  %4249 = vmatprep.subr.bf16.mxu1 %v9462_v36  ;;  %v9519_v27 = vld [vmem:[%s14553_s1 + $0x3bc] ss:$28 sps:$4 sm:$0xff]   ;;  %v9543_v29 = vld [vmem:[%s14553_s1 + $0x3c4] ss:$28 sps:$4 sm:$0xff]   ;;  %v9522_v35 = vld [vmem:[%s14553_s1 + $0x3f4] ss:$28 sps:$4 sm:$0xff]  }
  0x1e   :  { %231 = vrot.lane.b32.xlu1 %v10135_v32, %s9924_s20  ;;  %229 = vrot.lane.b32.xlu0 %v9998_v1, %s9924_s20  ;;  %v9517_v28 = vld [vmem:[%s14553_s1 + $0x3b8] ss:$28 sps:$4 sm:$0xff]   ;;  %v9541_v33 = vld [vmem:[%s14553_s1 + $0x3c0] ss:$28 sps:$4 sm:$0xff]   ;;  %vm205_vm5 = vcmask 64512   ;;  %vm241_vm6 = vcmask 883712  }
  0x1f   :  { %v9520_v36 = vld [vmem:[%s14553_s1 + $0x3f0] ss:$28 sps:$4 sm:$0xff]   ;;  %vm276_vm7 = vcmask 654336   ;;  %vm311_vm8 = vcmask 424960   ;;  %vm346_vm9 = vcmask 195584   ;;  %vm382_vm10 = vcmask 1014784  }
  0x20   :  { %3558 = vmatpush1.bf16.msra.mxu0 %v9464_v37  ;;  %4250 = vmatpush1.bf16.msra.mxu1 %v9465_v38  ;;  %v9549_v37 = vld [vmem:[%s14553_s1 + $0x3fc] ss:$28 sps:$4 sm:$0xff]   ;;  %vm417_vm11 = vcmask 785408   ;;  %vm14645_vm12 = vcmask 556032   ;;  %vm14646_vm13 = vcmask 326656   ;;  %vm14584_vm14 = vcmask 97280  }
  0x21   :  { %3559 = vmatprep.subr.bf16.mxu0 %v9466_v39  ;;  %4251 = vmatprep.subr.bf16.mxu1 %v9468_v40  ;;  %v10419_v40 = vld [vmem:[#allocation2 + $0x328] sm:$0xff]  ;;  %vm14585_vm15 = vcmask 818176   ;;  %s14814_s12 = smov 100  }
  0x22   :  { %227 = vrot.lane.b32.xlu1 %v9993_v0, %s9924_s20  ;;  %189 = vrot.lane.b32.xlu0 %v10003_v2, %s9923_s28 }
  0x24   :  { %3560 = vmatpush1.bf16.msra.mxu0 %v9470_v41  ;;  %4252 = vmatpush1.bf16.msra.mxu1 %v9471_v42  ;;  %v9525_v42 = vld [vmem:[%s14553_s1 + $0x42c] ss:$28 sps:$4 sm:$0xff]  }
  0x25   :  { %3561 = vmatprep.subr.bf16.mxu0 %v9472_v43  ;;  %4253 = vmatprep.subr.bf16.mxu1 %v9474_v44  ;;  %v9523_v43 = vld [vmem:[%s14553_s1 + $0x428] ss:$28 sps:$4 sm:$0xff]   ;;  %v9552_v44 = vld [vmem:[%s14553_s1 + $0x434] ss:$28 sps:$4 sm:$0xff]  }
  0x26   :  { %266 = vrot.lane.b32.xlu1 %v10135_v32, %s9925_s19  ;;  %264 = vrot.lane.b32.xlu0 %v9998_v1, %s9925_s19 }
  0x28   :  { %3562 = vmatpush1.bf16.msra.mxu0 %v9476_v45  ;;  %4254 = vmatpush1.bf16.msra.mxu1 %v9477_v46 }
  0x29   :  { %3563 = vmatprep.subr.bf16.mxu0 %v9478_v47  ;;  %4255 = vmatprep.subr.bf16.mxu1 %v9480_v48  ;;  %v9550_v47 = vld [vmem:[%s14553_s1 + $0x430] ss:$28 sps:$4 sm:$0xff]  }
  0x2a   :  { %301 = vrot.lane.b32.xlu1 %v10135_v32, %s9926_s10  ;;  %299 = vrot.lane.b32.xlu0 %v9998_v1, %s9926_s10 }
  0x2c   :  { %3564 = vmatpush1.bf16.msra.mxu0 %v9482_v49  ;;  %4256 = vmatpush1.bf16.msra.mxu1 %v9483_v50 }
  0x2d   :  { %3565 = vmatprep.subr.bf16.mxu0 %v9484_v51  ;;  %4257 = vmatprep.subr.bf16.mxu1 %v9486_v52  ;;  %v9528_v51 = vld [vmem:[%s14553_s1 + $0x464] ss:$28 sps:$4 sm:$0xff]  }
  0x2e   :  { %297 = vrot.lane.b32.xlu1 %v9993_v0, %s9926_s10  ;;  %262 = vrot.lane.b32.xlu0 %v9993_v0, %s9925_s19  ;;  %v9526_v52 = vld [vmem:[%s14553_s1 + $0x460] ss:$28 sps:$4 sm:$0xff]  }
  0x30   :  { %3566 = vmatpush1.bf16.msra.mxu0 %v9488_v53  ;;  %4258 = vmatpush1.bf16.msra.mxu1 %v9489_v54  ;;  %v9558_v53 = vld [vmem:[%s14553_s1 + $0x46c] ss:$28 sps:$4 sm:$0xff]  }
  0x31   :  { %3567 = vmatprep.subr.bf16.mxu0 %v9490_v55  ;;  %4259 = vmatprep.subr.bf16.mxu1 %v9492_v56  ;;  %v9556_v55 = vld [vmem:[%s14553_s1 + $0x468] ss:$28 sps:$4 sm:$0xff]  }
  0x32   :  { %336 = vrot.lane.b32.xlu1 %v10135_v32, %s14619_s17  ;;  %334 = vrot.lane.b32.xlu0 %v9998_v1, %s14619_s17 }
  0x34   :  { %3568 = vmatpush1.bf16.msra.mxu0 %v9494_v58  ;;  %4260 = vmatpush1.bf16.msra.mxu1 %v9495_v59  ;;  %v10470_v58 = vld [vmem:[#allocation2 + $0x330] sm:$0xff] }
  0x35   :  { %3569 = vmatprep.subr.bf16.mxu0 %v9496_v60  ;;  %4261 = vmatprep.subr.bf16.mxu1 %v9498_v61  ;;  %v9529_v59 = vld [vmem:[%s14553_s1 + $0x498] ss:$28 sps:$4 sm:$0xff]   ;;  %v9561_v60 = vld [vmem:[%s14553_s1 + $0x4a4] ss:$28 sps:$4 sm:$0xff]  }
  0x36   :  { %372 = vrot.lane.b32.xlu1 %v34_v57, %s14598_s9  ;;  %370 = vrot.lane.b32.xlu0 %v10135_v32, %s14598_s9 }
  0x38   :  { %3570 = vmatpush1.bf16.msra.mxu0 %v9500_v62  ;;  %4262 = vmatpush1.bf16.msra.mxu1 %v9501_v63  ;;  %v9559_v63 = vld [vmem:[%s14553_s1 + $0x4a0] ss:$28 sps:$4 sm:$0xff]  }
  0x39   :  { %3571 = vmatprep.subr.bf16.mxu0 %v9502_v3  ;;  %4263 = vmatprep.subr.bf16.mxu1 %v9504_v4  ;;  %v10487_v4 = vld [vmem:[#allocation2 + $0x320] sm:$0xff] }
  0x3a   :  { %368 = vrot.lane.b32.xlu1 %v9998_v1, %s14598_s9  ;;  %332 = vrot.lane.b32.xlu0 %v9993_v0, %s14619_s17  ;;  %v9512_v0 = vld [vmem:[%s14553_s1 + $0x348] ss:$28 sps:$4 sm:$0xff]  }
  0x3c   :  { %3572 = vmatpush1.bf16.msra.mxu0 %v9506_v5  ;;  %4264 = vmatpush1.bf16.msra.mxu1 %v9507_v6  ;;  %v9534_v6 = vld [vmem:[%s14553_s1 + $0x4d4] ss:$28 sps:$4 sm:$0xff]  }
  0x3d   :  { %3573 = vmatprep.subr.bf16.mxu0 %v9508_v7  ;;  %4265 = vmatprep.subr.bf16.mxu1 %v9510_v8  ;;  %v9532_v7 = vld [vmem:[%s14553_s1 + $0x4d0] ss:$28 sps:$4 sm:$0xff]   ;;  %v9567_v8 = vld [vmem:[%s14553_s1 + $0x4dc] ss:$28 sps:$4 sm:$0xff]  }
  0x3e   :  { %407 = vrot.lane.b32.xlu1 %v34_v57, %s14595_s14  ;;  %405 = vrot.lane.b32.xlu0 %v10135_v32, %s14595_s14 }
  0x40   :  { %3574 = vmatpush1.bf16.msra.mxu0 %v9512_v0  ;;  %4266 = vmatpush1.bf16.msra.mxu1 %v9513_v9 }
  0x41   :  { %3716 = vmatprep.subr.bf16.mxu0 %v9516_v10  ;;  %v9565_v10 = vld [vmem:[%s14553_s1 + $0x4d8] ss:$28 sps:$4 sm:$0xff]  }
  0x42   :  { %442 = vrot.lane.b32.xlu1 %v34_v57, %s14593_s23  ;;  %440 = vrot.lane.b32.xlu0 %v10135_v32, %s14593_s23 }
  0x46   :  { %438 = vrot.lane.b32.xlu1 %v9998_v1, %s14593_s23  ;;  %403 = vrot.lane.b32.xlu0 %v9998_v1, %s14595_s14 }
  0x4a   :  { %477 = vrot.lane.b32.xlu1 %v34_v57, %s14590_s24  ;;  %475 = vrot.lane.b32.xlu0 %v10135_v32, %s14590_s24 }
  0x4e   :  { %513 = vrot.lane.b32.xlu1 %v34_v57, %s14582_s25  ;;  %511 = vrot.lane.b32.xlu0 %v10135_v32, %s14582_s25  ;;  %v9531_v57 = vld [vmem:[%s14553_s1 + $0x49c] ss:$28 sps:$4 sm:$0xff]  }
  0x52   :  { %509 = vrot.lane.b32.xlu1 %v9998_v1, %s14582_s25  ;;  %473 = vrot.lane.b32.xlu0 %v9998_v1, %s14590_s24  ;;  %v9540_v1 = vld [vmem:[%s14553_s1 + $0x38c] ss:$28 sps:$4 sm:$0xff]   ;;  %s14815_s25 = smov 72  }
  0x53   :  { %4408 = vmatprep.subr.bf16.mxu1 %v9540_v1 }
  0x56   :  { %561 = vrot.lane.b32.xlu1 %v10075_v19, %s14572_s26  ;;  %559 = vrot.lane.b32.xlu0 %v10080_v20, %s14572_s26 }
  0x5a   :  { %594 = vrot.lane.b32.xlu1 %v10080_v20, %s14568_s27  ;;  %557 = vrot.lane.b32.xlu0 %v10100_v24, %s14572_s26  ;;  %s14816_s26 = smov 44  }
  0x5e   :  { %629 = vrot.lane.b32.xlu1 %v10080_v20, %s14566_s11  ;;  %596 = vrot.lane.b32.xlu0 %v10075_v19, %s14568_s27 }
  0x62   :  { %592 = vrot.lane.b32.xlu1 %v10100_v24, %s14568_s27  ;;  %631 = vrot.lane.b32.xlu0 %v10075_v19, %s14566_s11  ;;  %s14578_s27 = smov 4  }
  0x66   :  { %664 = vrot.lane.b32.xlu1 %v10080_v20, %s14562_s15  ;;  %627 = vrot.lane.b32.xlu0 %v10100_v24, %s14566_s11  ;;  %s14817_s11 = smov 16  }
  0x6a   :  { %698 = vrot.lane.b32.xlu1 %v10075_v19, %s14560_s18  ;;  %666 = vrot.lane.b32.xlu0 %v10075_v19, %s14562_s15 }
  0x6e   :  { %662 = vrot.lane.b32.xlu1 %v10100_v24, %s14562_s15  ;;  %700 = vrot.lane.b32.xlu0 %v10003_v2, %s14560_s18  ;;  %s14617_s15 = smov 48  }
  0x72   :  { %733 = vrot.lane.b32.xlu1 %v10075_v19, %s14564_s21  ;;  %696 = vrot.lane.b32.xlu0 %v10080_v20, %s14560_s18  ;;  %s14613_s18 = smov 20  }
  0x74   :  { %v86_v11 = vpop.permute.xlu1 %85  ;;  %v50_v12 = vpop.permute.xlu0 %49 }
  0x76   :  { %768 = vrot.lane.b32.xlu1 %v10075_v19, %s14570_s22  ;;  %735 = vrot.lane.b32.xlu0 %v10003_v2, %s14564_s21 }
  0x78   :  { %v10349_v13 = vpop.permute.xlu1 %87  ;;  %v10351_v14 = vpop.permute.xlu0 %51 }
  0x79   :  { %v99_v15 = vsel %vm97_vm1, %v86_v11, %v10349_v13  ;;  %v63_v16 = vsel %vm61_vm2, %v50_v12, %v10351_v14 }
  0x7a   :  { %731 = vrot.lane.b32.xlu1 %v10080_v20, %s14564_s21  ;;  %770 = vrot.lane.b32.xlu0 %v10003_v2, %s14570_s22  ;;  %v10361_v17 = vpack.c.bf16 %v99_v15, %v63_v16  ;;  %s14574_s21 = smov 32   ;;  %v9537_v15 = vld [vmem:[%s14553_s1 + $0x50c] ss:$28 sps:$4 sm:$0xff]   ;;  %v9573_v16 = vld [vmem:[%s14553_s1 + $0x514] ss:$28 sps:$4 sm:$0xff]  }
  0x7c   :  { %v84_v21 = vpop.permute.xlu1 %83  ;;  %v48_v22 = vpop.permute.xlu0 %47  ;;  %3575 = vmatprep.mubr.bf16.mxu0 %v10361_v17  ;;  %4267 = vmatprep.mubr.bf16.mxu1 %v10361_v17 }
  0x7d   :  { %v98_v24 = vsel %vm97_vm1, %v84_v21, %v86_v11  ;;  %v62_v25 = vsel %vm61_vm2, %v48_v22, %v50_v12  ;;  %v9535_v22 = vld [vmem:[%s14553_s1 + $0x508] ss:$28 sps:$4 sm:$0xff]  }
  0x7e   :  { %803 = vrot.lane.b32.xlu1 %v10075_v19, %s14574_s21  ;;  %766 = vrot.lane.b32.xlu0 %v10080_v20, %s14570_s22  ;;  %v10377_v26 = vpack.c.bf16 %v98_v24, %v62_v25  ;;  %s14580_s22 = smov 76   ;;  %v9546_v25 = vld [vmem:[%s14553_s1 + $0x544] ss:$28 sps:$4 sm:$0xff]  }
  0x80   :  { %v10388_v30 = vpop.permute.xlu1 %122  ;;  %v121_v31 = vpop.permute.xlu0 %120  ;;  %3576 = vmatmul.mubr.bf16.vlgmr.msra.gmra.mrb[0].mxu0 %v10377_v26  ;;  %4268 = vmatmul.mubr.bf16.vlgmr.msra.gmra.mrb[0].mxu1 %v10377_v26 }
  0x81   :  { %v134_v34 = vsel %vm132_vm3, %v121_v31, %v10388_v30  ;;  %3717 = vmatpush1.bf16.msra.mxu0 %v9514_v18  ;;  %4409 = vmatpush1.bf16.msra.mxu1 %v9538_v23  ;;  %v9571_v23 = vld [vmem:[%s14553_s1 + $0x510] ss:$28 sps:$4 sm:$0xff]  }
  0x82   :  { %838 = vrot.lane.b32.xlu1 %v10075_v19, %s14578_s27  ;;  %805 = vrot.lane.b32.xlu0 %v10003_v2, %s14574_s21  ;;  %v9547_v19 = vld [vmem:[%s14553_s1 + $0x3f8] ss:$28 sps:$4 sm:$0xff]  }
  0x83   :  { %3718 = vmatprep.subr.bf16.mxu0 %v9519_v27  ;;  %4410 = vmatprep.subr.bf16.mxu1 %v9543_v29  ;;  %v9576_v27 = vld [vmem:[%s14553_s1 + $0x54c] ss:$28 sps:$4 sm:$0xff]  }
  0x84   :  { %v10410_v38 = vpop.permute.xlu1 %157  ;;  %v156_v39 = vpop.permute.xlu0 %155 }
  0x85   :  { %v169_v2 = vsel %vm167_vm4, %v156_v39, %v10410_v38  ;;  %3719 = vmatpush1.bf16.msra.mxu0 %v9517_v28  ;;  %4411 = vmatpush1.bf16.msra.mxu1 %v9541_v33  ;;  %v9574_v33 = vld [vmem:[%s14553_s1 + $0x548] ss:$28 sps:$4 sm:$0xff]  }
  0x86   :  { %801 = vrot.lane.b32.xlu1 %v10080_v20, %s14574_s21  ;;  %840 = vrot.lane.b32.xlu0 %v10419_v40, %s14578_s27  ;;  %v10423_v41 = vpack.c.bf16 %v169_v2, %v134_v34  ;;  %s14819_s21 = smov 116  }
  0x87   :  { %3720 = vmatprep.subr.bf16.mxu0 %v9522_v35  ;;  %4412 = vmatprep.subr.bf16.mxu1 %v9549_v37  ;;  %v9555_v35 = vld [vmem:[%s14553_s1 + $0x57c] ss:$28 sps:$4 sm:$0xff]  }
  0x88   :  { %v154_v45 = vpop.permute.xlu1 %153  ;;  %v119_v46 = vpop.permute.xlu0 %118  ;;  %3585 = vmatprep.mubr.bf16.mxu0 %v10423_v41  ;;  %4277 = vmatprep.mubr.bf16.mxu1 %v10423_v41 }
  0x89   :  { %v168_v48 = vsel %vm167_vm4, %v154_v45, %v156_v39  ;;  %v133_v49 = vsel %vm132_vm3, %v119_v46, %v121_v31  ;;  %3721 = vmatpush1.bf16.msra.mxu0 %v9520_v36  ;;  %4413 = vmatpush1.bf16.msra.mxu1 %v9547_v19  ;;  %v9544_v31 = vld [vmem:[%s14553_s1 + $0x540] ss:$28 sps:$4 sm:$0xff]   ;;  %v9553_v39 = vld [vmem:[%s14553_s1 + $0x578] ss:$28 sps:$4 sm:$0xff]  }
  0x8a   :  { %876 = vrot.lane.b32.xlu1 %v10419_v40, %s14576_s13  ;;  %836 = vrot.lane.b32.xlu0 %v10080_v20, %s14578_s27  ;;  %v10445_v50 = vpack.c.bf16 %v168_v48, %v133_v49  ;;  %v9582_v36 = vld [vmem:[%s14553_s1 + $0x584] ss:$28 sps:$4 sm:$0xff]   ;;  %v9564_v45 = vld [vmem:[%s14553_s1 + $0x5b4] ss:$28 sps:$4 sm:$0xff]   ;;  %s14820_s27 = smov 88  }
  0x8b   :  { %3722 = vmatprep.subr.bf16.mxu0 %v9525_v42  ;;  %4414 = vmatprep.subr.bf16.mxu1 %v9552_v44  ;;  %v9580_v19 = vld [vmem:[%s14553_s1 + $0x580] ss:$28 sps:$4 sm:$0xff]   ;;  %v9562_v48 = vld [vmem:[%s14553_s1 + $0x5b0] ss:$28 sps:$4 sm:$0xff]  }
  0x8c   :  { %v10456_v54 = vpop.permute.xlu1 %193  ;;  %v192_v20 = vpop.permute.xlu0 %191  ;;  %3586 = vmatmul.mubr.bf16.gmra.mrb[4].mxu0 %v10445_v50  ;;  %4278 = vmatmul.mubr.bf16.gmra.mrb[4].mxu1 %v10445_v50  ;;  %v9585_v46 = vld [vmem:[%s14553_s1 + $0x5bc] ss:$28 sps:$4 sm:$0xff]  }
  0x8d   :  { %v207_v56 = vsel %vm205_vm5, %v192_v20, %v10456_v54  ;;  %3723 = vmatpush1.bf16.msra.mxu0 %v9523_v43  ;;  %4415 = vmatpush1.bf16.msra.mxu1 %v9550_v47 }
  0x8e   :  { %911 = vrot.lane.b32.xlu1 %v10419_v40, %s14580_s22  ;;  %878 = vrot.lane.b32.xlu0 %v10470_v58, %s14576_s13 }
  0x8f   :  { %3724 = vmatprep.subr.bf16.mxu0 %v9528_v51  ;;  %4416 = vmatprep.subr.bf16.mxu1 %v9558_v53  ;;  %v9583_v53 = vld [vmem:[%s14553_s1 + $0x5b8] ss:$28 sps:$4 sm:$0xff]  }
  0x90   :  { %v10480_v61 = vpop.permute.xlu1 %231  ;;  %v230_v62 = vpop.permute.xlu0 %229 }
  0x91   :  { %v243_v3 = vsel %vm241_vm6, %v230_v62, %v10480_v61  ;;  %3725 = vmatpush1.bf16.msra.mxu0 %v9526_v52  ;;  %4417 = vmatpush1.bf16.msra.mxu1 %v9556_v55  ;;  %v9570_v55 = vld [vmem:[%s14553_s1 + $0x5ec] ss:$28 sps:$4 sm:$0xff]  }
  0x92   :  { %874 = vrot.lane.b32.xlu1 %v10487_v4, %s14576_s13  ;;  %913 = vrot.lane.b32.xlu0 %v10470_v58, %s14580_s22  ;;  %v10493_v5 = vpack.c.bf16 %v243_v3, %v207_v56  ;;  %v9591_v56 = vld [vmem:[%s14553_s1 + $0x5f4] ss:$28 sps:$4 sm:$0xff]   ;;  %v9579_v3 = vld [vmem:[%s14553_s1 + $0x624] ss:$28 sps:$4 sm:$0xff]   ;;  %s14822_s13 = smov 60  }
  0x93   :  { %3726 = vmatprep.subr.bf16.mxu0 %v9531_v57  ;;  %4418 = vmatprep.subr.bf16.mxu1 %v9561_v60  ;;  %v9568_v57 = vld [vmem:[%s14553_s1 + $0x5e8] ss:$28 sps:$4 sm:$0xff]  }
  0x94   :  { %v228_v0 = vpop.permute.xlu1 %227  ;;  %v190_v9 = vpop.permute.xlu0 %189  ;;  %3595 = vmatprep.mubr.bf16.mxu0 %v10493_v5  ;;  %4287 = vmatprep.mubr.bf16.mxu1 %v10493_v5 }
  0x95   :  { %v242_v1 = vsel %vm241_vm6, %v228_v0, %v230_v62  ;;  %v206_v11 = vsel %vm205_vm5, %v190_v9, %v192_v20  ;;  %3727 = vmatpush1.bf16.msra.mxu0 %v9529_v59  ;;  %4419 = vmatpush1.bf16.msra.mxu1 %v9559_v63  ;;  %v10606_v20 = vld [vmem:[%s14552_s0 + $0x38] sm:$0xff]  ;;  %v9589_v59 = vld [vmem:[%s14553_s1 + $0x5f0] ss:$28 sps:$4 sm:$0xff]  }
  0x96   :  { %946 = vrot.lane.b32.xlu1 %v10419_v40, %s14617_s15  ;;  %909 = vrot.lane.b32.xlu0 %v10487_v4, %s14580_s22  ;;  %v10515_v12 = vpack.c.bf16 %v242_v1, %v206_v11  ;;  %s14813_s22 = smov 12  }
  0x97   :  { %3728 = vmatprep.subr.bf16.mxu0 %v9534_v6  ;;  %4420 = vmatprep.subr.bf16.mxu1 %v9567_v8  ;;  %v9592_v8 = vld [vmem:[%s14553_s1 + $0x628] ss:$28 sps:$4 sm:$0xff]  }
  0x98   :  { %v10523_v18 = vpop.permute.xlu1 %266  ;;  %v265_v21 = vpop.permute.xlu0 %264  ;;  %3596 = vmatmul.mubr.bf16.gmra.mrb[8].mxu0 %v10515_v12  ;;  %4288 = vmatmul.mubr.bf16.gmra.mrb[8].mxu1 %v10515_v12 }
  0x99   :  { %v278_v24 = vsel %vm276_vm7, %v265_v21, %v10523_v18  ;;  %3729 = vmatpush1.bf16.msra.mxu0 %v9532_v7  ;;  %4421 = vmatpush1.bf16.msra.mxu1 %v9565_v10  ;;  %v9577_v7 = vld [vmem:[%s14553_s1 + $0x620] ss:$28 sps:$4 sm:$0xff]  }
  0x9a   :  { %981 = vrot.lane.b32.xlu1 %v10419_v40, %s14613_s18  ;;  %948 = vrot.lane.b32.xlu0 %v10470_v58, %s14617_s15 }
  0x9b   :  { %3730 = vmatprep.subr.bf16.mxu0 %v9537_v15  ;;  %4422 = vmatprep.subr.bf16.mxu1 %v9573_v16  ;;  %v9588_v15 = vld [vmem:[%s14553_s1 + $0x65c] ss:$28 sps:$4 sm:$0xff]   ;;  %v9600_v16 = vld [vmem:[%s14553_s1 + $0x664] ss:$28 sps:$4 sm:$0xff]  }
  0x9c   :  { %v10545_v28 = vpop.permute.xlu1 %301  ;;  %v300_v29 = vpop.permute.xlu0 %299 }
  0x9d   :  { %v313_v34 = vsel %vm311_vm8, %v300_v29, %v10545_v28  ;;  %3731 = vmatpush1.bf16.msra.mxu0 %v9535_v22  ;;  %4423 = vmatpush1.bf16.msra.mxu1 %v9571_v23  ;;  %v9598_v22 = vld [vmem:[%s14553_s1 + $0x660] ss:$28 sps:$4 sm:$0xff]  }
  0x9e   :  { %944 = vrot.lane.b32.xlu1 %v10487_v4, %s14617_s15  ;;  %983 = vrot.lane.b32.xlu0 %v10470_v58, %s14613_s18  ;;  %v10565_v37 = vpack.c.bf16 %v313_v34, %v278_v24 }
  0x9f   :  { %3732 = vmatprep.subr.bf16.mxu0 %v9546_v25  ;;  %4424 = vmatprep.subr.bf16.mxu1 %v9576_v27  ;;  %v9597_v27 = vld [vmem:[%s14553_s1 + $0x694] ss:$28 sps:$4 sm:$0xff]  }
  0xa0   :  { %v298_v2 = vpop.permute.xlu1 %297  ;;  %v263_v42 = vpop.permute.xlu0 %262  ;;  %3605 = vmatprep.mubr.bf16.mxu0 %v10565_v37  ;;  %4297 = vmatprep.mubr.bf16.mxu1 %v10565_v37 }
  0xa1   :  { %v312_v43 = vsel %vm311_vm8, %v298_v2, %v300_v29  ;;  %v277_v44 = vsel %vm276_vm7, %v263_v42, %v265_v21  ;;  %3733 = vmatpush1.bf16.msra.mxu0 %v9544_v31  ;;  %4425 = vmatpush1.bf16.msra.mxu1 %v9574_v33  ;;  %v9586_v21 = vld [vmem:[%s14553_s1 + $0x658] ss:$28 sps:$4 sm:$0xff]   ;;  %v9595_v31 = vld [vmem:[%s14553_s1 + $0x690] ss:$28 sps:$4 sm:$0xff]  }
  0xa2   :  { %53 = vrot.lane.b32.xlu1 %v10135_v32, %s9920_s8  ;;  %979 = vrot.lane.b32.xlu0 %v10487_v4, %s14613_s18  ;;  %v10587_v47 = vpack.c.bf16 %v312_v43, %v277_v44  ;;  %v9594_v4 = vld [vmem:[%s14553_s1 + $0x62c] ss:$28 sps:$4 sm:$0xff]   ;;  %v9606_v29 = vld [vmem:[%s14553_s1 + $0x69c] ss:$28 sps:$4 sm:$0xff]  }
  0xa3   :  { %3734 = vmatprep.subr.bf16.mxu0 %v9555_v35  ;;  %4426 = vmatprep.subr.bf16.mxu1 %v9582_v36  ;;  %v10692_v36 = vld [vmem:[%s14552_s0 + $0x40] sm:$0xff]  ;;  %v9603_v2 = vld [vmem:[%s14553_s1 + $0x6cc] ss:$28 sps:$4 sm:$0xff]   ;;  %v9609_v42 = vld [vmem:[%s14553_s1 + $0x6d4] ss:$28 sps:$4 sm:$0xff]  }
  0xa4   :  { %v10592_v49 = vpop.permute.xlu1 %336  ;;  %v335_v51 = vpop.permute.xlu0 %334  ;;  %3606 = vmatmul.mubr.bf16.gmra.mrb[12].mxu0 %v10587_v47  ;;  %4298 = vmatmul.mubr.bf16.gmra.mrb[12].mxu1 %v10587_v47  ;;  %v9601_v43 = vld [vmem:[%s14553_s1 + $0x6c8] ss:$28 sps:$4 sm:$0xff]   ;;  %v9607_v44 = vld [vmem:[%s14553_s1 + $0x6d0] ss:$28 sps:$4 sm:$0xff]  }
  0xa5   :  { %v348_v52 = vsel %vm346_vm9, %v335_v51, %v10592_v49  ;;  %3735 = vmatpush1.bf16.msra.mxu0 %v9553_v39  ;;  %4427 = vmatpush1.bf16.msra.mxu1 %v9580_v19  ;;  %v9604_v39 = vld [vmem:[%s14553_s1 + $0x698] ss:$28 sps:$4 sm:$0xff]  }
  0xa6   :  { %89 = vrot.lane.b32.xlu1 %v10135_v32, %s9919_s30  ;;  %55 = vrot.lane.b32.xlu0 %v10606_v20, %s9920_s8 }
  0xa7   :  { %3736 = vmatprep.subr.bf16.mxu0 %v9564_v45  ;;  %4428 = vmatprep.subr.bf16.mxu1 %v9585_v46 }
  0xa8   :  { %v10622_v60 = vpop.permute.xlu1 %372  ;;  %v371_v62 = vpop.permute.xlu0 %370 }
  0xa9   :  { %v384_v63 = vsel %vm382_vm10, %v371_v62, %v10622_v60  ;;  %3737 = vmatpush1.bf16.msra.mxu0 %v9562_v48  ;;  %4429 = vmatpush1.bf16.msra.mxu1 %v9583_v53 }
  0xaa   :  { %124 = vrot.lane.b32.xlu1 %v10135_v32, %s9921_s16  ;;  %91 = vrot.lane.b32.xlu0 %v10606_v20, %s9919_s30  ;;  %v10636_v6 = vpack.c.bf16 %v384_v63, %v348_v52  ;;  %v9612_v52 = vld [vmem:[%s14553_s1 + $0x704] ss:$28 sps:$4 sm:$0xff]  }
  0xab   :  { %3738 = vmatprep.subr.bf16.mxu0 %v9570_v55  ;;  %4430 = vmatprep.subr.bf16.mxu1 %v9591_v56 }
  0xac   :  { %v369_v0 = vpop.permute.xlu1 %368  ;;  %v333_v9 = vpop.permute.xlu0 %332  ;;  %3615 = vmatprep.mubr.bf16.mxu0 %v10636_v6  ;;  %4307 = vmatprep.mubr.bf16.mxu1 %v10636_v6 }
  0xad   :  { %v383_v10 = vsel %vm382_vm10, %v369_v0, %v371_v62  ;;  %v347_v1 = vsel %vm346_vm9, %v333_v9, %v335_v51  ;;  %3739 = vmatpush1.bf16.msra.mxu0 %v9568_v57  ;;  %4431 = vmatpush1.bf16.msra.mxu1 %v9589_v59  ;;  %v10761_v9 = vld [vmem:[%s14552_s0 + $0x48] sm:$0xff] }
  0xae   :  { %159 = vrot.lane.b32.xlu1 %v10135_v32, %s9922_s29  ;;  %126 = vrot.lane.b32.xlu0 %v10606_v20, %s9921_s16  ;;  %v10652_v11 = vpack.c.bf16 %v383_v10, %v347_v1 }
  0xaf   :  { %3740 = vmatprep.subr.bf16.mxu0 %v9579_v3  ;;  %4432 = vmatprep.subr.bf16.mxu1 %v9594_v4 }
  0xb0   :  { %v10666_v23 = vpop.permute.xlu1 %407  ;;  %v406_v24 = vpop.permute.xlu0 %405  ;;  %3616 = vmatmul.mubr.bf16.gmra.mrb[16].mxu0 %v10652_v11  ;;  %4308 = vmatmul.mubr.bf16.gmra.mrb[16].mxu1 %v10652_v11 }
  0xb1   :  { %v419_v25 = vsel %vm417_vm11, %v406_v24, %v10666_v23  ;;  %3741 = vmatpush1.bf16.msra.mxu0 %v9577_v7  ;;  %4433 = vmatpush1.bf16.msra.mxu1 %v9592_v8 }
  0xb2   :  { %195 = vrot.lane.b32.xlu1 %v10135_v32, %s9923_s28  ;;  %161 = vrot.lane.b32.xlu0 %v10606_v20, %s9922_s29 }
  0xb3   :  { %3742 = vmatprep.subr.bf16.mxu0 %v9588_v15  ;;  %4434 = vmatprep.subr.bf16.mxu1 %v9600_v16  ;;  %v9912_v16 = vld [vmem:[#allocation2 + $0x318] sm:$0xff] }
  0xb4   :  { %v10685_v33 = vpop.permute.xlu1 %442  ;;  %v441_v34 = vpop.permute.xlu0 %440 }
  0xb5   :  { %v454_v35 = vsel %vm14645_vm12, %v441_v34, %v10685_v33  ;;  %3743 = vmatpush1.bf16.msra.mxu0 %v9586_v21  ;;  %4435 = vmatpush1.bf16.msra.mxu1 %v9598_v22 }
  0xb6   :  { %233 = vrot.lane.b32.xlu1 %v10606_v20, %s9924_s20  ;;  %197 = vrot.lane.b32.xlu0 %v10606_v20, %s9923_s28  ;;  %v10701_v19 = vpack.c.bf16 %v454_v35, %v419_v25 }
  0xb7   :  { %3744 = vmatprep.subr.bf16.mxu0 %v9597_v27  ;;  %4436 = vmatprep.subr.bf16.mxu1 %v9606_v29  ;;  %v9913_v27 = vld [vmem:[#allocation2 + $0x310] sm:$0xff] }
  0xb8   :  { %v439_v45 = vpop.permute.xlu1 %438  ;;  %v404_v46 = vpop.permute.xlu0 %403  ;;  %3625 = vmatprep.mubr.bf16.mxu0 %v10701_v19  ;;  %4317 = vmatprep.mubr.bf16.mxu1 %v10701_v19 }
  0xb9   :  { %v453_v48 = vsel %vm14645_vm12, %v439_v45, %v441_v34  ;;  %v418_v51 = vsel %vm417_vm11, %v404_v46, %v406_v24  ;;  %3745 = vmatpush1.bf16.msra.mxu0 %v9595_v31  ;;  %4437 = vmatpush1.bf16.msra.mxu1 %v9604_v39  ;;  %v9636_v31 = vld [vmem:[%s14553_s1 + $0x70c] ss:$28 sps:$4 sm:$0xff]  }
  0xba   :  { %268 = vrot.lane.b32.xlu1 %v10606_v20, %s9925_s19  ;;  %235 = vrot.lane.b32.xlu0 %v10692_v36, %s9924_s20  ;;  %v10726_v53 = vpack.c.bf16 %v453_v48, %v418_v51 }
  0xbb   :  { %3746 = vmatprep.subr.bf16.mxu0 %v9603_v2  ;;  %4438 = vmatprep.subr.bf16.mxu1 %v9609_v42 }
  0xbc   :  { %v10728_v55 = vpop.permute.xlu1 %477  ;;  %v476_v56 = vpop.permute.xlu0 %475  ;;  %3626 = vmatmul.mubr.bf16.gmra.mrb[20].mxu0 %v10726_v53  ;;  %4318 = vmatmul.mubr.bf16.gmra.mrb[20].mxu1 %v10726_v53 }
  0xbd   :  { %v489_v57 = vsel %vm14646_vm13, %v476_v56, %v10728_v55  ;;  %3747 = vmatpush1.bf16.msra.mxu0 %v9601_v43  ;;  %4439 = vmatpush1.bf16.msra.mxu1 %v9607_v44 }
  0xbe   :  { %303 = vrot.lane.b32.xlu1 %v10606_v20, %s9926_s10  ;;  %270 = vrot.lane.b32.xlu0 %v10692_v36, %s9925_s19 }
  0xbf   :  { %3889 = vmatprep.subr.bf16.mxu0 %v9612_v52  ;;  %4581 = vmatprep.subr.bf16.mxu1 %v9636_v31 }
  0xc0   :  { %v10738_v59 = vpop.permute.xlu1 %513  ;;  %v512_v62 = vpop.permute.xlu0 %511 }
  0xc1   :  { %v527_v63 = vsel %vm14584_vm14, %v512_v62, %v10738_v59 }
  0xc2   :  { %338 = vrot.lane.b32.xlu1 %v10606_v20, %s14619_s17  ;;  %305 = vrot.lane.b32.xlu0 %v10692_v36, %s9926_s10  ;;  %v10746_v3 = vpack.c.bf16 %v527_v63, %v489_v57 }
  0xc4   :  { %v510_v4 = vpop.permute.xlu1 %509  ;;  %v474_v7 = vpop.permute.xlu0 %473  ;;  %3635 = vmatprep.mubr.bf16.mxu0 %v10746_v3  ;;  %4327 = vmatprep.mubr.bf16.mxu1 %v10746_v3 }
  0xc5   :  { %v526_v8 = vsel %vm14584_vm14, %v510_v4, %v512_v62  ;;  %v488_v0 = vsel %vm14646_vm13, %v474_v7, %v476_v56  ;;  %vm14667_vm14 = vcmask 588800  }
  0xc6   :  { %374 = vrot.lane.b32.xlu1 %v10692_v36, %s14598_s9  ;;  %340 = vrot.lane.b32.xlu0 %v10692_v36, %s14619_s17  ;;  %v10756_v20 = vpack.c.bf16 %v526_v8, %v488_v0  ;;  %s14841_s17 = smov 124  }
  0xc8   :  { %v10763_v10 = vpop.permute.xlu1 %561  ;;  %v560_v1 = vpop.permute.xlu0 %559  ;;  %3636 = vmatmul.mubr.bf16.gmra.mrb[24].mxu0 %v10756_v20  ;;  %4328 = vmatmul.mubr.bf16.gmra.mrb[24].mxu1 %v10756_v20 }
  0xc9   :  { %v573_v15 = vsel %vm14585_vm15, %v560_v1, %v10763_v10 }
  0xca   :  { %409 = vrot.lane.b32.xlu1 %v10692_v36, %s14595_s14  ;;  %376 = vrot.lane.b32.xlu0 %v10761_v9, %s14598_s9  ;;  %v10773_v21 = vpack.c.bf16 %v573_v15, %v9912_v16  ;;  %s14829_s9 = smov 76  }
  0xcc   :  { %v595_v22 = vpop.permute.xlu1 %594  ;;  %v558_v24 = vpop.permute.xlu0 %557  ;;  %3645 = vmatprep.mubr.bf16.mxu0 %v10773_v21  ;;  %4337 = vmatprep.mubr.bf16.mxu1 %v10773_v21 }
  0xcd   :  { %v572_v25 = vsel %vm14585_vm15, %v558_v24, %v560_v1  ;;  %vm14586_vm15 = vcmask 359424  }
  0xce   :  { %444 = vrot.lane.b32.xlu1 %v10692_v36, %s14593_s23  ;;  %411 = vrot.lane.b32.xlu0 %v10761_v9, %s14595_s14  ;;  %v10782_v29 = vpack.c.bf16 %v572_v25, %v9913_v27  ;;  %s14827_s14 = smov 104  }
  0xd0   :  { %v630_v34 = vpop.permute.xlu1 %629  ;;  %v10787_v35 = vpop.permute.xlu0 %596  ;;  %3646 = vmatmul.mubr.bf16.gmra.mrb[28].mxu0 %v10782_v29  ;;  %4338 = vmatmul.mubr.bf16.gmra.mrb[28].mxu1 %v10782_v29 }
  0xd1   :  { %v608_v39 = vsel %vm14667_vm14, %v595_v22, %v10787_v35 }
  0xd2   :  { %479 = vrot.lane.b32.xlu1 %v10692_v36, %s14590_s24  ;;  %446 = vrot.lane.b32.xlu0 %v10761_v9, %s14593_s23  ;;  %s14825_s23 = smov 4  }
  0xd4   :  { %v593_v2 = vpop.permute.xlu1 %592  ;;  %v10797_v42 = vpop.permute.xlu0 %631 }
  0xd5   :  { %v607_v43 = vsel %vm14667_vm14, %v593_v2, %v595_v22  ;;  %v643_v44 = vsel %vm14586_vm15, %v630_v34, %v10797_v42  ;;  %v10864_v2 = vld [vmem:[#allocation2 + $0x338] sm:$0xff] }
  0xd6   :  { %515 = vrot.lane.b32.xlu1 %v10692_v36, %s14813_s22  ;;  %481 = vrot.lane.b32.xlu0 %v10761_v9, %s14590_s24  ;;  %v10806_v45 = vpack.c.bf16 %v643_v44, %v608_v39  ;;  %s14824_s24 = smov 32  }
  0xd8   :  { %v665_v46 = vpop.permute.xlu1 %664  ;;  %v628_v48 = vpop.permute.xlu0 %627  ;;  %3655 = vmatprep.mubr.bf16.mxu0 %v10806_v45  ;;  %4347 = vmatprep.mubr.bf16.mxu1 %v10806_v45 }
  0xd9   :  { %v642_v51 = vsel %vm14586_vm15, %v628_v48, %v630_v34  ;;  %vm14588_vm15 = vcmask 949248  }
  0xda   :  { %563 = vrot.lane.b32.xlu1 %v10419_v40, %s14814_s12  ;;  %517 = vrot.lane.b32.xlu0 %v10761_v9, %s14813_s22  ;;  %v10815_v52 = vpack.c.bf16 %v642_v51, %v607_v43 }
  0xdc   :  { %v699_v56 = vpop.permute.xlu1 %698  ;;  %v10817_v57 = vpop.permute.xlu0 %666  ;;  %3656 = vmatmul.mubr.bf16.gmra.mrb[32].mxu0 %v10815_v52  ;;  %4348 = vmatmul.mubr.bf16.gmra.mrb[32].mxu1 %v10815_v52 }
  0xdd   :  { %v677_v62 = vsel %vm14587_vm0, %v665_v46, %v10817_v57 }
  0xde   :  { %598 = vrot.lane.b32.xlu1 %v10419_v40, %s14815_s25  ;;  %565 = vrot.lane.b32.xlu0 %v10470_v58, %s14814_s12 }
  0xe0   :  { %v663_v63 = vpop.permute.xlu1 %662  ;;  %v10827_v4 = vpop.permute.xlu0 %700 }
  0xe1   :  { %v676_v7 = vsel %vm14587_vm0, %v663_v63, %v665_v46  ;;  %v712_v8 = vsel %vm14588_vm15, %v699_v56, %v10827_v4  ;;  %vm14589_vm0 = vcmask 719872  }
  0xe2   :  { %633 = vrot.lane.b32.xlu1 %v10419_v40, %s14816_s26  ;;  %600 = vrot.lane.b32.xlu0 %v10470_v58, %s14815_s25  ;;  %v10836_v0 = vpack.c.bf16 %v712_v8, %v677_v62 }
  0xe4   :  { %v734_v1 = vpop.permute.xlu1 %733  ;;  %v697_v15 = vpop.permute.xlu0 %696  ;;  %3665 = vmatprep.mubr.bf16.mxu0 %v10836_v0  ;;  %4357 = vmatprep.mubr.bf16.mxu1 %v10836_v0 }
  0xe5   :  { %v711_v16 = vsel %vm14588_vm15, %v697_v15, %v699_v56  ;;  %vm14592_vm15 = vcmask 490496  }
  0xe6   :  { %668 = vrot.lane.b32.xlu1 %v10419_v40, %s14817_s11  ;;  %635 = vrot.lane.b32.xlu0 %v10470_v58, %s14816_s26  ;;  %v10845_v22 = vpack.c.bf16 %v711_v16, %v676_v7 }
  0xe8   :  { %14818 = vst [vmem:[#allocation3_spill] sm:$0xff] %v10845_v22  ;;  %v769_v24 = vpop.permute.xlu1 %768  ;;  %v10847_v25 = vpop.permute.xlu0 %735  ;;  %3666 = vmatmul.mubr.bf16.gmra.mrb[36].mxu0 %v10845_v22  ;;  %4358 = vmatmul.mubr.bf16.gmra.mrb[36].mxu1 %v10845_v22  ;;  %v9682_v22 = vld [vmem:[%s14553_s1 + $0x9d8] ss:$28 sps:$4 sm:$0xff]  }
  0xe9   :  { %v747_v27 = vsel %vm14589_vm0, %v734_v1, %v10847_v25 }
  0xea   :  { %702 = vrot.lane.b32.xlu1 %v10470_v58, %s14819_s21  ;;  %670 = vrot.lane.b32.xlu0 %v10470_v58, %s14817_s11 }
  0xec   :  { %v732_v40 = vpop.permute.xlu1 %731  ;;  %v10857_v31 = vpop.permute.xlu0 %770 }
  0xed   :  { %v746_v34 = vsel %vm14589_vm0, %v732_v40, %v734_v1  ;;  %v782_v39 = vsel %vm14592_vm15, %v769_v24, %v10857_v31  ;;  %vm14597_vm0 = vcmask 261120  }
  0xee   :  { %737 = vrot.lane.b32.xlu1 %v10470_v58, %s14820_s27  ;;  %704 = vrot.lane.b32.xlu0 %v10864_v2, %s14819_s21  ;;  %v10868_v43 = vpack.c.bf16 %v782_v39, %v747_v27 }
  0xf0   :  { %14821 = vst [vmem:[#allocation4_spill] sm:$0xff] %v10868_v43  ;;  %v804_v44 = vpop.permute.xlu1 %803  ;;  %v767_v46 = vpop.permute.xlu0 %766  ;;  %3675 = vmatprep.mubr.bf16.mxu0 %v10868_v43  ;;  %4367 = vmatprep.mubr.bf16.mxu1 %v10868_v43 }
  0xf1   :  { %v781_v48 = vsel %vm14592_vm15, %v767_v46, %v769_v24  ;;  %vm14600_vm15 = vcmask 31744  }
  0xf2   :  { %772 = vrot.lane.b32.xlu1 %v10470_v58, %s14822_s13  ;;  %739 = vrot.lane.b32.xlu0 %v10864_v2, %s14820_s27  ;;  %v10877_v51 = vpack.c.bf16 %v781_v48, %v746_v34 }
  0xf4   :  { %14823 = vst [vmem:[#allocation5_spill] sm:$0xff] %v10877_v51  ;;  %v839_v56 = vpop.permute.xlu1 %838  ;;  %v10879_v62 = vpop.permute.xlu0 %805  ;;  %3676 = vmatmul.mubr.bf16.gmra.mrb[40].mxu0 %v10877_v51  ;;  %4368 = vmatmul.mubr.bf16.gmra.mrb[40].mxu1 %v10877_v51 }
  0xf5   :  { %v817_v63 = vsel %vm14597_vm0, %v804_v44, %v10879_v62 }
  0xf6   :  { %807 = vrot.lane.b32.xlu1 %v10470_v58, %s14824_s24  ;;  %774 = vrot.lane.b32.xlu0 %v10864_v2, %s14822_s13 }
  0xf8   :  { %v802_v7 = vpop.permute.xlu1 %801  ;;  %v10889_v8 = vpop.permute.xlu0 %840 }
  0xf9   :  { %v816_v1 = vsel %vm14597_vm0, %v802_v7, %v804_v44  ;;  %v854_v15 = vsel %vm14600_vm15, %v839_v56, %v10889_v8  ;;  %vm14601_vm0 = vcmask 850944  }
  0xfa   :  { %842 = vrot.lane.b32.xlu1 %v10470_v58, %s14825_s23  ;;  %809 = vrot.lane.b32.xlu0 %v10864_v2, %s14824_s24  ;;  %v10898_v16 = vpack.c.bf16 %v854_v15, %v817_v63 }
  0xfc   :  { %14826 = vst [vmem:[#allocation6_spill] sm:$0xff] %v10898_v16  ;;  %v877_v24 = vpop.permute.xlu1 %876  ;;  %v837_v27 = vpop.permute.xlu0 %836  ;;  %3685 = vmatprep.mubr.bf16.mxu0 %v10898_v16  ;;  %4377 = vmatprep.mubr.bf16.mxu1 %v10898_v16 }
  0xfd   :  { %v853_v40 = vsel %vm14600_vm15, %v837_v27, %v839_v56  ;;  %vm14602_vm15 = vcmask 621568  }
  0xfe   :  { %880 = vrot.lane.b32.xlu1 %v10864_v2, %s14827_s14  ;;  %844 = vrot.lane.b32.xlu0 %v10864_v2, %s14825_s23  ;;  %v10907_v58 = vpack.c.bf16 %v853_v40, %v816_v1 }
 0x100   :  { %14828 = vst [vmem:[#allocation7_spill] sm:$0xff] %v10907_v58  ;;  %v912_v34 = vpop.permute.xlu1 %911  ;;  %v10909_v39 = vpop.permute.xlu0 %878  ;;  %3686 = vmatmul.mubr.bf16.gmra.mrb[44].mxu0 %v10907_v58  ;;  %4378 = vmatmul.mubr.bf16.gmra.mrb[44].mxu1 %v10907_v58 }
 0x101   :  { %v890_v44 = vsel %vm14601_vm0, %v877_v24, %v10909_v39 }
 0x102   :  { %915 = vrot.lane.b32.xlu1 %v10864_v2, %s14829_s9  ;;  %882 = vrot.lane.b32.xlu0 %v10135_v32, %s14827_s14 }
 0x104   :  { %v875_v46 = vpop.permute.xlu1 %874  ;;  %v10919_v48 = vpop.permute.xlu0 %913 }
 0x105   :  { %v889_v56 = vsel %vm14601_vm0, %v875_v46, %v877_v24  ;;  %v925_v63 = vsel %vm14602_vm15, %v912_v34, %v10919_v48  ;;  %vm958_vm0 = vcmask 392192  }
 0x106   :  { %950 = vrot.lane.b32.xlu1 %v10864_v2, %s14617_s15  ;;  %917 = vrot.lane.b32.xlu0 %v10135_v32, %s14829_s9  ;;  %v10928_v7 = vpack.c.bf16 %v925_v63, %v890_v44 }
 0x108   :  { %14830 = vst [vmem:[#allocation8_spill] sm:$0xff] %v10928_v7  ;;  %v947_v1 = vpop.permute.xlu1 %946  ;;  %v910_v15 = vpop.permute.xlu0 %909  ;;  %3695 = vmatprep.mubr.bf16.mxu0 %v10928_v7  ;;  %4387 = vmatprep.mubr.bf16.mxu1 %v10928_v7 }
 0x109   :  { %v924_v27 = vsel %vm14602_vm15, %v910_v15, %v912_v34  ;;  %vm993_vm15 = vcmask 162816  }
 0x10a   :  { %985 = vrot.lane.b32.xlu1 %v10864_v2, %s14613_s18  ;;  %952 = vrot.lane.b32.xlu0 %v10135_v32, %s14617_s15  ;;  %v10937_v24 = vpack.c.bf16 %v924_v27, %v889_v56 }
 0x10c   :  { %14831 = vst [vmem:[#allocation9_spill] sm:$0xff] %v10937_v24  ;;  %v982_v40 = vpop.permute.xlu1 %981  ;;  %v10939_v44 = vpop.permute.xlu0 %948  ;;  %3696 = vmatmul.mubr.bf16.gmra.mrb[48].mxu0 %v10937_v24  ;;  %4388 = vmatmul.mubr.bf16.gmra.mrb[48].mxu1 %v10937_v24 }
 0x10d   :  { %v960_v46 = vsel %vm958_vm0, %v947_v1, %v10939_v44 }
 0x10e   :  { %57 = vrot.lane.b32.xlu1 %v10692_v36, %s9920_s8  ;;  %987 = vrot.lane.b32.xlu0 %v10135_v32, %s14613_s18 }
 0x110   :  { %v945_v34 = vpop.permute.xlu1 %944  ;;  %v10949_v56 = vpop.permute.xlu0 %983 }
 0x111   :  { %v959_v63 = vsel %vm958_vm0, %v945_v34, %v947_v1  ;;  %v995_v15 = vsel %vm993_vm15, %v982_v40, %v10949_v56 }
 0x112   :  { %93 = vrot.lane.b32.xlu1 %v10692_v36, %s9919_s30  ;;  %59 = vrot.lane.b32.xlu0 %v10761_v9, %s9920_s8  ;;  %v10958_v27 = vpack.c.bf16 %v995_v15, %v960_v46  ;;  %s14845_s8 = smov 68  }
 0x114   :  { %14832 = vst [vmem:[#allocation10_spill] sm:$0xff] %v10958_v27  ;;  %v54_v24 = vpop.permute.xlu1 %53  ;;  %v980_v7 = vpop.permute.xlu0 %979  ;;  %3705 = vmatprep.mubr.bf16.mxu0 %v10958_v27  ;;  %4397 = vmatprep.mubr.bf16.mxu1 %v10958_v27 }
 0x115   :  { %v64_v1 = vsel %vm61_vm2, %v10351_v14, %v54_v24  ;;  %v994_v34 = vsel %vm993_vm15, %v980_v7, %v982_v40 }
 0x116   :  { %128 = vrot.lane.b32.xlu1 %v10692_v36, %s9921_s16  ;;  %95 = vrot.lane.b32.xlu0 %v10761_v9, %s9919_s30  ;;  %v10969_v58 = vpack.c.bf16 %v994_v34, %v959_v63 }
 0x118   :  { %14833 = vst [vmem:[#allocation11_spill] sm:$0xff] %v10969_v58  ;;  %v90_v46 = vpop.permute.xlu1 %89  ;;  %v10971_v15 = vpop.permute.xlu0 %55  ;;  %3706 = vmatmul.mubr.bf16.gmra.mrb[52].mxu0 %v10969_v58  ;;  %4398 = vmatmul.mubr.bf16.gmra.mrb[52].mxu1 %v10969_v58 }
 0x119   :  { %v100_v14 = vsel %vm97_vm1, %v10349_v13, %v90_v46  ;;  %v65_v7 = vsel %vm61_vm2, %v54_v24, %v10971_v15  ;;  %v9610_v24 = vld [vmem:[%s14553_s1 + $0x700] ss:$28 sps:$4 sm:$0xff]  }
 0x11a   :  { %163 = vrot.lane.b32.xlu1 %v10692_v36, %s9922_s29  ;;  %130 = vrot.lane.b32.xlu0 %v10761_v9, %s9921_s16  ;;  %v10998_v27 = vpack.c.bf16 %v100_v14, %v64_v1 }
 0x11c   :  { %v125_v40 = vpop.permute.xlu1 %124  ;;  %v10983_v63 = vpop.permute.xlu0 %91  ;;  %14835 = vst [vmem:[#allocation13_spill] sm:$0xff] %v10998_v27 }
 0x11d   :  { %v135_v34 = vsel %vm132_vm3, %v10388_v30, %v125_v40  ;;  %v101_v58 = vsel %vm97_vm1, %v90_v46, %v10983_v63  ;;  %v9634_v30 = vld [vmem:[%s14553_s1 + $0x708] ss:$28 sps:$4 sm:$0xff]  }
 0x11e   :  { %199 = vrot.lane.b32.xlu1 %v10692_v36, %s9923_s28  ;;  %165 = vrot.lane.b32.xlu0 %v10761_v9, %s9922_s29  ;;  %v10993_v13 = vpack.c.bf16 %v101_v58, %v65_v7  ;;  %v9615_v36 = vld [vmem:[%s14553_s1 + $0x73c] ss:$28 sps:$4 sm:$0xff]   ;;  %v9639_v58 = vld [vmem:[%s14553_s1 + $0x744] ss:$28 sps:$4 sm:$0xff]  }
 0x11f   :  { %v11026_v7 = vld [vmem:[%s14552_s0 + $0x50] sm:$0xff] }
 0x120   :  { %14834 = vst [vmem:[#allocation12_spill] sm:$0xff] %v10993_v13  ;;  %v160_v16 = vpop.permute.xlu1 %159  ;;  %v11003_v46 = vpop.permute.xlu0 %126  ;;  %3748 = vmatprep.mubr.bf16.mxu0 %v10993_v13  ;;  %4440 = vmatprep.mubr.bf16.mxu1 %v10993_v13 }
 0x121   :  { %v170_v1 = vsel %vm167_vm4, %v10410_v38, %v160_v16  ;;  %v136_v14 = vsel %vm132_vm3, %v125_v40, %v11003_v46  ;;  %3749 = vmatmul.mubr.bf16.vlgmr.msra.gmra.mrb[0].mxu0 %v10998_v27  ;;  %4441 = vmatmul.mubr.bf16.vlgmr.msra.gmra.mrb[0].mxu1 %v10998_v27  ;;  %v9613_v38 = vld [vmem:[%s14553_s1 + $0x738] ss:$28 sps:$4 sm:$0xff]   ;;  %v9637_v40 = vld [vmem:[%s14553_s1 + $0x740] ss:$28 sps:$4 sm:$0xff]  }
 0x122   :  { %237 = vrot.lane.b32.xlu1 %v10761_v9, %s9924_s20  ;;  %201 = vrot.lane.b32.xlu0 %v10761_v9, %s9923_s28  ;;  %v11046_v43 = vpack.c.bf16 %v170_v1, %v135_v34  ;;  %v9616_v34 = vld [vmem:[%s14553_s1 + $0x770] ss:$28 sps:$4 sm:$0xff]   ;;  %v9643_v1 = vld [vmem:[%s14553_s1 + $0x778] ss:$28 sps:$4 sm:$0xff]  }
 0x123   :  { %3890 = vmatpush1.bf16.msra.mxu0 %v9610_v24  ;;  %4582 = vmatpush1.bf16.msra.mxu1 %v9634_v30 }
 0x124   :  { %v196_v27 = vpop.permute.xlu1 %195  ;;  %v11034_v13 = vpop.permute.xlu0 %161  ;;  %3891 = vmatprep.subr.bf16.mxu0 %v9615_v36  ;;  %4583 = vmatprep.subr.bf16.mxu1 %v9639_v58  ;;  %14837 = vst [vmem:[#allocation15_spill] sm:$0xff] %v11046_v43  ;;  %v9618_v36 = vld [vmem:[%s14553_s1 + $0x774] ss:$28 sps:$4 sm:$0xff]  }
 0x125   :  { %v208_v51 = vsel %vm205_vm5, %v10456_v54, %v196_v27  ;;  %v171_v24 = vsel %vm167_vm4, %v160_v16, %v11034_v13  ;;  %v9645_v54 = vld [vmem:[%s14553_s1 + $0x77c] ss:$28 sps:$4 sm:$0xff]  }
 0x126   :  { %272 = vrot.lane.b32.xlu1 %v10761_v9, %s9925_s19  ;;  %239 = vrot.lane.b32.xlu0 %v11026_v7, %s9924_s20  ;;  %v11044_v30 = vpack.c.bf16 %v171_v24, %v136_v14  ;;  %v9648_v24 = vld [vmem:[%s14553_s1 + $0x7b4] ss:$28 sps:$4 sm:$0xff]   ;;  %s14838_s20 = smov 24  }
 0x127   :  { %3892 = vmatpush1.bf16.msra.mxu0 %v9613_v38  ;;  %4584 = vmatpush1.bf16.msra.mxu1 %v9637_v40  ;;  %v9621_v40 = vld [vmem:[%s14553_s1 + $0x7ac] ss:$28 sps:$4 sm:$0xff]  }
 0x128   :  { %14836 = vst [vmem:[#allocation14_spill] sm:$0xff] %v11044_v30  ;;  %v234_v16 = vpop.permute.xlu1 %233  ;;  %v11054_v58 = vpop.permute.xlu0 %197  ;;  %3758 = vmatprep.mubr.bf16.mxu0 %v11044_v30  ;;  %4450 = vmatprep.mubr.bf16.mxu1 %v11044_v30 }
 0x129   :  { %v244_v14 = vsel %vm241_vm6, %v10480_v61, %v234_v16  ;;  %v209_v38 = vsel %vm205_vm5, %v196_v27, %v11054_v58  ;;  %3759 = vmatmul.mubr.bf16.gmra.mrb[4].mxu0 %v11046_v43  ;;  %4451 = vmatmul.mubr.bf16.gmra.mrb[4].mxu1 %v11046_v43 }
 0x12a   :  { %307 = vrot.lane.b32.xlu1 %v10761_v9, %s9926_s10  ;;  %274 = vrot.lane.b32.xlu0 %v11026_v7, %s9925_s19 }
 0x12b   :  { %3893 = vmatprep.subr.bf16.mxu0 %v9618_v36  ;;  %4585 = vmatprep.subr.bf16.mxu1 %v9645_v54  ;;  %v11092_v54 = vpack.c.bf16 %v244_v14, %v208_v51  ;;  %v9654_v51 = vld [vmem:[%s14553_s1 + $0x7ec] ss:$28 sps:$4 sm:$0xff]  }
 0x12c   :  { %v269_v61 = vpop.permute.xlu1 %268  ;;  %v11080_v27 = vpop.permute.xlu0 %235  ;;  %3894 = vmatpush1.bf16.msra.mxu0 %v9616_v34  ;;  %4586 = vmatpush1.bf16.msra.mxu1 %v9643_v1  ;;  %v9619_v34 = vld [vmem:[%s14553_s1 + $0x7a8] ss:$28 sps:$4 sm:$0xff]  }
 0x12d   :  { %v279_v43 = vsel %vm276_vm7, %v10523_v18, %v269_v61  ;;  %v245_v30 = vsel %vm241_vm6, %v234_v16, %v11080_v27  ;;  %3895 = vmatprep.subr.bf16.mxu0 %v9621_v40  ;;  %4587 = vmatprep.subr.bf16.mxu1 %v9648_v24  ;;  %14840 = vst [vmem:[#allocation17_spill] sm:$0xff] %v11092_v54  ;;  %v9646_v18 = vld [vmem:[%s14553_s1 + $0x7b0] ss:$28 sps:$4 sm:$0xff]   ;;  %v9652_v40 = vld [vmem:[%s14553_s1 + $0x7e8] ss:$28 sps:$4 sm:$0xff]  }
 0x12e   :  { %342 = vrot.lane.b32.xlu1 %v10761_v9, %s14838_s20  ;;  %309 = vrot.lane.b32.xlu0 %v11026_v7, %s9926_s10  ;;  %v11090_v36 = vpack.c.bf16 %v245_v30, %v209_v38  ;;  %v9624_v9 = vld [vmem:[%s14553_s1 + $0x7e4] ss:$28 sps:$4 sm:$0xff]   ;;  %v11123_v38 = vld [vmem:[%s14552_s0 + $0x58] sm:$0xff] }
 0x130   :  { %14839 = vst [vmem:[#allocation16_spill] sm:$0xff] %v11090_v36  ;;  %v304_v16 = vpop.permute.xlu1 %303  ;;  %v11100_v1 = vpop.permute.xlu0 %270  ;;  %3768 = vmatprep.mubr.bf16.mxu0 %v11090_v36  ;;  %4460 = vmatprep.mubr.bf16.mxu1 %v11090_v36 }
 0x131   :  { %v314_v30 = vsel %vm311_vm8, %v10545_v28, %v304_v16  ;;  %v280_v14 = vsel %vm276_vm7, %v269_v61, %v11100_v1  ;;  %3769 = vmatmul.mubr.bf16.gmra.mrb[8].mxu0 %v11092_v54  ;;  %4461 = vmatmul.mubr.bf16.gmra.mrb[8].mxu1 %v11092_v54  ;;  %v9622_v28 = vld [vmem:[%s14553_s1 + $0x7e0] ss:$28 sps:$4 sm:$0xff]  }
 0x132   :  { %378 = vrot.lane.b32.xlu1 %v11026_v7, %s14841_s17  ;;  %344 = vrot.lane.b32.xlu0 %v11026_v7, %s14838_s20  ;;  %s14842_s20 = smov 96   ;;  %v11143_v36 = vpack.c.bf16 %v314_v30, %v279_v43  ;;  %v9625_v43 = vld [vmem:[%s14553_s1 + $0x818] ss:$28 sps:$4 sm:$0xff]   ;;  %v9655_v30 = vld [vmem:[%s14553_s1 + $0x820] ss:$28 sps:$4 sm:$0xff]  }
 0x133   :  { %3896 = vmatpush1.bf16.msra.mxu0 %v9619_v34  ;;  %4588 = vmatpush1.bf16.msra.mxu1 %v9646_v18 }
 0x134   :  { %v339_v24 = vpop.permute.xlu1 %338  ;;  %v11131_v61 = vpop.permute.xlu0 %305  ;;  %3897 = vmatprep.subr.bf16.mxu0 %v9624_v9  ;;  %4589 = vmatprep.subr.bf16.mxu1 %v9654_v51  ;;  %14844 = vst [vmem:[#allocation19_spill] sm:$0xff] %v11143_v36  ;;  %v9627_v9 = vld [vmem:[%s14553_s1 + $0x81c] ss:$28 sps:$4 sm:$0xff]  }
 0x135   :  { %v349_v54 = vsel %vm346_vm9, %v10592_v49, %v339_v24  ;;  %v315_v34 = vsel %vm311_vm8, %v304_v16, %v11131_v61  ;;  %v9657_v49 = vld [vmem:[%s14553_s1 + $0x824] ss:$28 sps:$4 sm:$0xff]  }
 0x136   :  { %413 = vrot.lane.b32.xlu1 %v11026_v7, %s14842_s20  ;;  %380 = vrot.lane.b32.xlu0 %v11123_v38, %s14841_s17  ;;  %v11141_v18 = vpack.c.bf16 %v315_v34, %v280_v14  ;;  %v9663_v34 = vld [vmem:[%s14553_s1 + $0x85c] ss:$28 sps:$4 sm:$0xff]   ;;  %s14846_s17 = smov 40  }
 0x137   :  { %3898 = vmatpush1.bf16.msra.mxu0 %v9622_v28  ;;  %4590 = vmatpush1.bf16.msra.mxu1 %v9652_v40  ;;  %v9630_v40 = vld [vmem:[%s14553_s1 + $0x854] ss:$28 sps:$4 sm:$0xff]  }
 0x138   :  { %14843 = vst [vmem:[#allocation18_spill] sm:$0xff] %v11141_v18  ;;  %v375_v16 = vpop.permute.xlu1 %374  ;;  %v11151_v51 = vpop.permute.xlu0 %340  ;;  %3778 = vmatprep.mubr.bf16.mxu0 %v11141_v18  ;;  %4470 = vmatprep.mubr.bf16.mxu1 %v11141_v18 }
 0x139   :  { %v385_v14 = vsel %vm382_vm10, %v10622_v60, %v375_v16  ;;  %v350_v28 = vsel %vm346_vm9, %v339_v24, %v11151_v51  ;;  %3779 = vmatmul.mubr.bf16.gmra.mrb[12].mxu0 %v11143_v36  ;;  %4471 = vmatmul.mubr.bf16.gmra.mrb[12].mxu1 %v11143_v36 }
 0x13a   :  { %448 = vrot.lane.b32.xlu1 %v11026_v7, %s14845_s8  ;;  %415 = vrot.lane.b32.xlu0 %v11123_v38, %s14842_s20 }
 0x13b   :  { %3899 = vmatprep.subr.bf16.mxu0 %v9627_v9  ;;  %4591 = vmatprep.subr.bf16.mxu1 %v9657_v49  ;;  %v11189_v49 = vpack.c.bf16 %v385_v14, %v349_v54  ;;  %v9633_v54 = vld [vmem:[%s14553_s1 + $0x88c] ss:$28 sps:$4 sm:$0xff]  }
 0x13c   :  { %v410_v60 = vpop.permute.xlu1 %409  ;;  %v11177_v24 = vpop.permute.xlu0 %376  ;;  %3900 = vmatpush1.bf16.msra.mxu0 %v9625_v43  ;;  %4592 = vmatpush1.bf16.msra.mxu1 %v9655_v30  ;;  %v9628_v43 = vld [vmem:[%s14553_s1 + $0x850] ss:$28 sps:$4 sm:$0xff]  }
 0x13d   :  { %v420_v36 = vsel %vm417_vm11, %v10666_v23, %v410_v60  ;;  %v386_v18 = vsel %vm382_vm10, %v375_v16, %v11177_v24  ;;  %3901 = vmatprep.subr.bf16.mxu0 %v9630_v40  ;;  %4593 = vmatprep.subr.bf16.mxu1 %v9663_v34  ;;  %14848 = vst [vmem:[#allocation21_spill] sm:$0xff] %v11189_v49  ;;  %v9661_v23 = vld [vmem:[%s14553_s1 + $0x858] ss:$28 sps:$4 sm:$0xff]   ;;  %v9631_v40 = vld [vmem:[%s14553_s1 + $0x888] ss:$28 sps:$4 sm:$0xff]  }
 0x13e   :  { %483 = vrot.lane.b32.xlu1 %v11026_v7, %s14846_s17  ;;  %450 = vrot.lane.b32.xlu0 %v11123_v38, %s14845_s8  ;;  %v11187_v9 = vpack.c.bf16 %v386_v18, %v350_v28  ;;  %v9669_v18 = vld [vmem:[%s14553_s1 + $0x894] ss:$28 sps:$4 sm:$0xff]  }
 0x140   :  { %14847 = vst [vmem:[#allocation20_spill] sm:$0xff] %v11187_v9  ;;  %v445_v16 = vpop.permute.xlu1 %444  ;;  %v11197_v30 = vpop.permute.xlu0 %411  ;;  %3788 = vmatprep.mubr.bf16.mxu0 %v11187_v9  ;;  %4480 = vmatprep.mubr.bf16.mxu1 %v11187_v9 }
 0x141   :  { %v455_v14 = vsel %vm14645_vm12, %v10685_v33, %v445_v16  ;;  %v421_v28 = vsel %vm417_vm11, %v410_v60, %v11197_v30  ;;  %3789 = vmatmul.mubr.bf16.gmra.mrb[16].mxu0 %v11189_v49  ;;  %4481 = vmatmul.mubr.bf16.gmra.mrb[16].mxu1 %v11189_v49  ;;  %v9667_v33 = vld [vmem:[%s14553_s1 + $0x890] ss:$28 sps:$4 sm:$0xff]  }
 0x142   :  { %519 = vrot.lane.b32.xlu1 %v11026_v7, %s14813_s22  ;;  %485 = vrot.lane.b32.xlu0 %v11123_v38, %s14846_s17  ;;  %v11235_v9 = vpack.c.bf16 %v455_v14, %v420_v36  ;;  %v9640_v36 = vld [vmem:[%s14553_s1 + $0x8c0] ss:$28 sps:$4 sm:$0xff]  }
 0x143   :  { %3902 = vmatpush1.bf16.msra.mxu0 %v9628_v43  ;;  %4594 = vmatpush1.bf16.msra.mxu1 %v9661_v23 }
 0x144   :  { %v480_v34 = vpop.permute.xlu1 %479  ;;  %v11223_v60 = vpop.permute.xlu0 %446  ;;  %3903 = vmatprep.subr.bf16.mxu0 %v9633_v54  ;;  %4595 = vmatprep.subr.bf16.mxu1 %v9669_v18  ;;  %14850 = vst [vmem:[#allocation23_spill] sm:$0xff] %v11235_v9  ;;  %v9642_v54 = vld [vmem:[%s14553_s1 + $0x8c4] ss:$28 sps:$4 sm:$0xff]  }
 0x145   :  { %v490_v49 = vsel %vm14646_vm13, %v10728_v55, %v480_v34  ;;  %v456_v43 = vsel %vm14645_vm12, %v445_v16, %v11223_v60  ;;  %v9672_v55 = vld [vmem:[%s14553_s1 + $0x8cc] ss:$28 sps:$4 sm:$0xff]   ;;  %vm14851_vm12 = vcmask 97280  }
 0x146   :  { %567 = vrot.lane.b32.xlu1 %v10864_v2, %s14814_s12  ;;  %521 = vrot.lane.b32.xlu0 %v11123_v38, %s14813_s22  ;;  %v11233_v23 = vpack.c.bf16 %v456_v43, %v421_v28  ;;  %v9670_v38 = vld [vmem:[%s14553_s1 + $0x8c8] ss:$28 sps:$4 sm:$0xff]  }
 0x147   :  { %3904 = vmatpush1.bf16.msra.mxu0 %v9631_v40  ;;  %4596 = vmatpush1.bf16.msra.mxu1 %v9667_v33  ;;  %v9651_v40 = vld [vmem:[%s14553_s1 + $0x8fc] ss:$28 sps:$4 sm:$0xff]   ;;  %v9678_v33 = vld [vmem:[%s14553_s1 + $0x904] ss:$28 sps:$4 sm:$0xff]  }
 0x148   :  { %14849 = vst [vmem:[#allocation22_spill] sm:$0xff] %v11233_v23  ;;  %v516_v16 = vpop.permute.xlu1 %515  ;;  %v11243_v18 = vpop.permute.xlu0 %481  ;;  %3798 = vmatprep.mubr.bf16.mxu0 %v11233_v23  ;;  %4490 = vmatprep.mubr.bf16.mxu1 %v11233_v23  ;;  %v9664_v23 = vld [vmem:[%s14553_s1 + $0x968] ss:$28 sps:$4 sm:$0xff]  }
 0x149   :  { %v528_v14 = vsel %vm14851_vm12, %v10738_v59, %v516_v16  ;;  %v491_v28 = vsel %vm14646_vm13, %v480_v34, %v11243_v18  ;;  %3799 = vmatmul.mubr.bf16.gmra.mrb[20].mxu0 %v11235_v9  ;;  %4491 = vmatmul.mubr.bf16.gmra.mrb[20].mxu1 %v11235_v9  ;;  %vm14852_vm12 = vcmask 818176   ;;  %vm14853_vm13 = vcmask 97280  }
 0x14a   :  { %602 = vrot.lane.b32.xlu1 %v10864_v2, %s14815_s25  ;;  %569 = vrot.lane.b32.xlu0 %v10135_v32, %s14814_s12 }
 0x14b   :  { %3905 = vmatprep.subr.bf16.mxu0 %v9642_v54  ;;  %4597 = vmatprep.subr.bf16.mxu1 %v9672_v55  ;;  %v11281_v55 = vpack.c.bf16 %v528_v14, %v490_v49  ;;  %v9660_v14 = vld [vmem:[%s14553_s1 + $0x934] ss:$28 sps:$4 sm:$0xff]  }
 0x14c   :  { %v564_v59 = vpop.permute.xlu1 %563  ;;  %v11269_v34 = vpop.permute.xlu0 %517  ;;  %3906 = vmatpush1.bf16.msra.mxu0 %v9640_v36  ;;  %4598 = vmatpush1.bf16.msra.mxu1 %v9670_v38  ;;  %v1115_v36 = vld [vmem:[#allocation2 + $0x328] sm:$0xff] }
 0x14d   :  { %v574_v43 = vsel %vm14852_vm12, %v10763_v10, %v564_v59  ;;  %v529_v9 = vsel %vm14853_vm13, %v516_v16, %v11269_v34  ;;  %3907 = vmatprep.subr.bf16.mxu0 %v9651_v40  ;;  %4599 = vmatprep.subr.bf16.mxu1 %v9678_v33  ;;  %14855 = vst [vmem:[#allocation25_spill] sm:$0xff] %v11281_v55  ;;  %v9649_v10 = vld [vmem:[%s14553_s1 + $0x8f8] ss:$28 sps:$4 sm:$0xff]   ;;  %v9676_v16 = vld [vmem:[%s14553_s1 + $0x900] ss:$28 sps:$4 sm:$0xff]   ;;  %vm14856_vm13 = vmmov %vm14852_vm12  ;;  %vm14858_vm12 = vcmask 359424  }
 0x14e   :  { %637 = vrot.lane.b32.xlu1 %v10864_v2, %s14816_s26  ;;  %604 = vrot.lane.b32.xlu0 %v10135_v32, %s14815_s25  ;;  %v11279_v54 = vpack.c.bf16 %v529_v9, %v491_v28  ;;  %v9681_v28 = vld [vmem:[%s14553_s1 + $0x93c] ss:$28 sps:$4 sm:$0xff]   ;;  %v9658_v33 = vld [vmem:[%s14553_s1 + $0x930] ss:$28 sps:$4 sm:$0xff]  }
 0x150   :  { %14854 = vst [vmem:[#allocation24_spill] sm:$0xff] %v11279_v54  ;;  %v599_v38 = vpop.permute.xlu1 %598  ;;  %v11289_v40 = vpop.permute.xlu0 %565  ;;  %3808 = vmatprep.mubr.bf16.mxu0 %v11279_v54  ;;  %4500 = vmatprep.mubr.bf16.mxu1 %v11279_v54 }
 0x151   :  { %v609_v9 = vsel %vm14667_vm14, %v10787_v35, %v599_v38  ;;  %v575_v49 = vsel %vm14856_vm13, %v564_v59, %v11289_v40  ;;  %3809 = vmatmul.mubr.bf16.gmra.mrb[24].mxu0 %v11281_v55  ;;  %4501 = vmatmul.mubr.bf16.gmra.mrb[24].mxu1 %v11281_v55  ;;  %v9679_v59 = vld [vmem:[%s14553_s1 + $0x938] ss:$28 sps:$4 sm:$0xff]   ;;  %vm14860_vm13 = vcmask 130048  }
 0x152   :  { %672 = vrot.lane.b32.xlu1 %v10864_v2, %s14817_s11  ;;  %639 = vrot.lane.b32.xlu0 %v10135_v32, %s14816_s26  ;;  %v11309_v35 = vpack.c.bf16 %v575_v49, %v1115_v36  ;;  %v1114_v2 = vld [vmem:[#allocation2 + $0x320] sm:$0xff]  ;;  %v9666_v36 = vld [vmem:[%s14553_s1 + $0x96c] ss:$28 sps:$4 sm:$0xff]   ;;  %s14876_s26 = smov 48  }
 0x153   :  { %3908 = vmatpush1.bf16.msra.mxu0 %v9649_v10  ;;  %4600 = vmatpush1.bf16.msra.mxu1 %v9676_v16  ;;  %v9687_v10 = vld [vmem:[%s14553_s1 + $0x974] ss:$28 sps:$4 sm:$0xff]  }
 0x154   :  { %14857 = vst [vmem:[#allocation26_spill] sm:$0xff] %v11309_v35  ;;  %v634_v55 = vpop.permute.xlu1 %633  ;;  %v11317_v54 = vpop.permute.xlu0 %600  ;;  %3818 = vmatprep.mubr.bf16.mxu0 %v11309_v35  ;;  %4510 = vmatprep.mubr.bf16.mxu1 %v11309_v35  ;;  %v11335_v35 = vpack.c.bf16 %v574_v43, %v1114_v2  ;;  %v9673_v2 = vld [vmem:[%s14553_s1 + $0x9a0] ss:$28 sps:$4 sm:$0xff]  }
 0x155   :  { %v644_v16 = vsel %vm14858_vm12, %v10797_v42, %v634_v55  ;;  %v610_v49 = vsel %vm14667_vm14, %v599_v38, %v11317_v54  ;;  %3909 = vmatprep.subr.bf16.mxu0 %v9660_v14  ;;  %4601 = vmatprep.subr.bf16.mxu1 %v9681_v28  ;;  %v9685_v42 = vld [vmem:[%s14553_s1 + $0x970] ss:$28 sps:$4 sm:$0xff]  }
 0x156   :  { %706 = vrot.lane.b32.xlu1 %v10135_v32, %s14819_s21  ;;  %674 = vrot.lane.b32.xlu0 %v10135_v32, %s14817_s11  ;;  %14859 = vst [vmem:[#allocation27_spill] sm:$0xff] %v11335_v35 }
 0x157   :  { %3910 = vmatpush1.bf16.msra.mxu0 %v9658_v33  ;;  %4602 = vmatpush1.bf16.msra.mxu1 %v9679_v59  ;;  %v9675_v33 = vld [vmem:[%s14553_s1 + $0x9a4] ss:$28 sps:$4 sm:$0xff]   ;;  %v9690_v59 = vld [vmem:[%s14553_s1 + $0x9ac] ss:$28 sps:$4 sm:$0xff]  }
 0x158   :  { %v669_v38 = vpop.permute.xlu1 %668  ;;  %v11343_v14 = vpop.permute.xlu0 %635  ;;  %3911 = vmatprep.subr.bf16.mxu0 %v9666_v36  ;;  %4603 = vmatprep.subr.bf16.mxu1 %v9687_v10  ;;  %v9688_v36 = vld [vmem:[%s14553_s1 + $0x9a8] ss:$28 sps:$4 sm:$0xff]  }
 0x159   :  { %v678_v28 = vsel %vm14860_vm13, %v10817_v57, %v669_v38  ;;  %v645_v43 = vsel %vm14858_vm12, %v634_v55, %v11343_v14  ;;  %3819 = vmatmul.mubr.bf16.gmra.mrb[28].mxu0 %v11335_v35  ;;  %4511 = vmatmul.mubr.bf16.gmra.mrb[28].mxu1 %v11335_v35  ;;  %v11362_v57 = vld [vmem:[%s14552_s0 + $0x38] sm:$0xff]  ;;  %vm14862_vm13 = vcmask 949248   ;;  %vm14863_vm12 = vcmask 130048  }
 0x15a   :  { %741 = vrot.lane.b32.xlu1 %v10135_v32, %s14820_s27  ;;  %708 = vrot.lane.b32.xlu0 %v11362_v57, %s14819_s21  ;;  %v11366_v55 = vpack.c.bf16 %v645_v43, %v610_v49  ;;  %v9696_v49 = vld [vmem:[%s14553_s1 + $0x9e4] ss:$28 sps:$4 sm:$0xff]  }
 0x15b   :  { %3912 = vmatpush1.bf16.msra.mxu0 %v9664_v23  ;;  %4604 = vmatpush1.bf16.msra.mxu1 %v9685_v42  ;;  %v9684_v23 = vld [vmem:[%s14553_s1 + $0x9dc] ss:$28 sps:$4 sm:$0xff]  }
 0x15c   :  { %14861 = vst [vmem:[#allocation28_spill] sm:$0xff] %v11366_v55  ;;  %v703_v10 = vpop.permute.xlu1 %702  ;;  %v11374_v35 = vpop.permute.xlu0 %670  ;;  %3828 = vmatprep.mubr.bf16.mxu0 %v11366_v55  ;;  %4520 = vmatprep.mubr.bf16.mxu1 %v11366_v55  ;;  %v11392_v55 = vpack.c.bf16 %v644_v16, %v609_v9  ;;  %v9693_v16 = vld [vmem:[%s14553_s1 + $0xa14] ss:$28 sps:$4 sm:$0xff]  }
 0x15d   :  { %v713_v42 = vsel %vm14862_vm13, %v10827_v4, %v703_v10  ;;  %v679_v43 = vsel %vm14863_vm12, %v669_v38, %v11374_v35  ;;  %3913 = vmatprep.subr.bf16.mxu0 %v9675_v33  ;;  %4605 = vmatprep.subr.bf16.mxu1 %v9690_v59  ;;  %v9694_v4 = vld [vmem:[%s14553_s1 + $0x9e0] ss:$28 sps:$4 sm:$0xff]   ;;  %vm14865_vm13 = vcmask 719872   ;;  %vm14866_vm12 = vcmask 949248  }
 0x15e   :  { %776 = vrot.lane.b32.xlu1 %v10135_v32, %s14822_s13  ;;  %743 = vrot.lane.b32.xlu0 %v11362_v57, %s14820_s27  ;;  %14864 = vst [vmem:[#allocation29_spill] sm:$0xff] %v11392_v55 }
 0x15f   :  { %3914 = vmatpush1.bf16.msra.mxu0 %v9673_v2  ;;  %4606 = vmatpush1.bf16.msra.mxu1 %v9688_v36  ;;  %v9702_v2 = vld [vmem:[%s14553_s1 + $0xa1c] ss:$28 sps:$4 sm:$0xff]   ;;  %v9691_v36 = vld [vmem:[%s14553_s1 + $0xa10] ss:$28 sps:$4 sm:$0xff]  }
 0x160   :  { %v738_v38 = vpop.permute.xlu1 %737  ;;  %v11400_v33 = vpop.permute.xlu0 %704  ;;  %3915 = vmatprep.subr.bf16.mxu0 %v9684_v23  ;;  %4607 = vmatprep.subr.bf16.mxu1 %v9696_v49 }
 0x161   :  { %v748_v59 = vsel %vm14865_vm13, %v10847_v25, %v738_v38  ;;  %v714_v9 = vsel %vm14866_vm12, %v703_v10, %v11400_v33  ;;  %3829 = vmatmul.mubr.bf16.gmra.mrb[32].mxu0 %v11392_v55  ;;  %4521 = vmatmul.mubr.bf16.gmra.mrb[32].mxu1 %v11392_v55  ;;  %v9700_v10 = vld [vmem:[%s14553_s1 + $0xa18] ss:$28 sps:$4 sm:$0xff]   ;;  %vm14868_vm13 = vcmask 490496   ;;  %vm14869_vm12 = vcmask 719872   ;;  %v9697_v55 = vld [vmem:[%s14553_s1 + $0xa48] ss:$28 sps:$4 sm:$0xff]  }
 0x162   :  { %811 = vrot.lane.b32.xlu1 %v10135_v32, %s14824_s24  ;;  %778 = vrot.lane.b32.xlu0 %v11362_v57, %s14822_s13  ;;  %v11418_v25 = vpack.c.bf16 %v714_v9, %v679_v43  ;;  %v9705_v43 = vld [vmem:[%s14553_s1 + $0xa54] ss:$28 sps:$4 sm:$0xff]  }
 0x163   :  { %3916 = vmatpush1.bf16.msra.mxu0 %v9682_v22  ;;  %4608 = vmatpush1.bf16.msra.mxu1 %v9694_v4  ;;  %v9699_v22 = vld [vmem:[%s14553_s1 + $0xa4c] ss:$28 sps:$4 sm:$0xff]  }
 0x164   :  { %14867 = vst [vmem:[#allocation30_spill] sm:$0xff] %v11418_v25  ;;  %v773_v23 = vpop.permute.xlu1 %772  ;;  %v11426_v49 = vpop.permute.xlu0 %739  ;;  %3838 = vmatprep.mubr.bf16.mxu0 %v11418_v25  ;;  %4530 = vmatprep.mubr.bf16.mxu1 %v11418_v25  ;;  %v11444_v25 = vpack.c.bf16 %v713_v42, %v678_v28  ;;  %v9708_v42 = vld [vmem:[%s14553_s1 + $0xa84] ss:$28 sps:$4 sm:$0xff]  }
 0x165   :  { %v783_v4 = vsel %vm14868_vm13, %v10857_v31, %v773_v23  ;;  %v749_v9 = vsel %vm14869_vm12, %v738_v38, %v11426_v49  ;;  %3917 = vmatprep.subr.bf16.mxu0 %v9693_v16  ;;  %4609 = vmatprep.subr.bf16.mxu1 %v9702_v2  ;;  %v9703_v31 = vld [vmem:[%s14553_s1 + $0xa50] ss:$28 sps:$4 sm:$0xff]   ;;  %vm14870_vm13 = vcmask 261120   ;;  %vm14871_vm12 = vcmask 490496  }
 0x166   :  { %846 = vrot.lane.b32.xlu1 %v10135_v32, %s14825_s23  ;;  %813 = vrot.lane.b32.xlu0 %v11362_v57, %s14824_s24  ;;  %v9711_v2 = vld [vmem:[%s14553_s1 + $0xa8c] ss:$28 sps:$4 sm:$0xff]  }
 0x167   :  { %3918 = vmatpush1.bf16.msra.mxu0 %v9691_v36  ;;  %4610 = vmatpush1.bf16.msra.mxu1 %v9700_v10 }
 0x168   :  { %v808_v38 = vpop.permute.xlu1 %807  ;;  %v11452_v16 = vpop.permute.xlu0 %774  ;;  %3919 = vmatprep.subr.bf16.mxu0 %v9699_v22  ;;  %4611 = vmatprep.subr.bf16.mxu1 %v9705_v43  ;;  %v11486_v43 = vpack.c.bf16 %v783_v4, %v748_v59 }
 0x169   :  { %v818_v32 = vsel %vm14870_vm13, %v10879_v62, %v808_v38  ;;  %v784_v28 = vsel %vm14871_vm12, %v773_v23, %v11452_v16  ;;  %3839 = vmatmul.mubr.bf16.gmra.mrb[36].mxu0 %v11444_v25  ;;  %4531 = vmatmul.mubr.bf16.gmra.mrb[36].mxu1 %v11444_v25  ;;  %vm14872_vm13 = vcmask 31744   ;;  %vm14873_vm12 = vcmask 261120  }
 0x16a   :  { %884 = vrot.lane.b32.xlu1 %v11362_v57, %s14827_s14  ;;  %848 = vrot.lane.b32.xlu0 %v11362_v57, %s14825_s23  ;;  %v11470_v62 = vpack.c.bf16 %v784_v28, %v749_v9 }
 0x16b   :  { %3920 = vmatpush1.bf16.msra.mxu0 %v9697_v55  ;;  %4612 = vmatpush1.bf16.msra.mxu1 %v9703_v31  ;;  %v9916_v55 = vld [vmem:[%s14552_s0 + $0x40] sm:$0xff] }
 0x16c   :  { %v843_v36 = vpop.permute.xlu1 %842  ;;  %v11472_v10 = vpop.permute.xlu0 %809  ;;  %3848 = vmatprep.mubr.bf16.mxu0 %v11470_v62  ;;  %4540 = vmatprep.mubr.bf16.mxu1 %v11470_v62 }
 0x16d   :  { %v855_v23 = vsel %vm14872_vm13, %v10889_v8, %v843_v36  ;;  %v819_v22 = vsel %vm14873_vm12, %v808_v38, %v11472_v10  ;;  %4062 = vmatprep.subr.bf16.mxu0 %v9708_v42  ;;  %4754 = vmatprep.subr.bf16.mxu1 %v9711_v2  ;;  %vm14874_vm13 = vcmask 850944   ;;  %vm14875_vm12 = vcmask 31744  }
 0x16e   :  { %919 = vrot.lane.b32.xlu1 %v11362_v57, %s14829_s9  ;;  %886 = vrot.lane.b32.xlu0 %v9916_v55, %s14827_s14  ;;  %s14880_s14 = smov 20   ;;  %v11512_v2 = vpack.c.bf16 %v855_v23, %v818_v32 }
 0x170   :  { %v881_v9 = vpop.permute.xlu1 %880  ;;  %v11488_v31 = vpop.permute.xlu0 %844 }
 0x171   :  { %v891_v8 = vsel %vm14874_vm13, %v10909_v39, %v881_v9  ;;  %v856_v38 = vsel %vm14875_vm12, %v843_v36, %v11488_v31  ;;  %3849 = vmatmul.mubr.bf16.gmra.mrb[40].mxu0 %v11486_v43  ;;  %4541 = vmatmul.mubr.bf16.gmra.mrb[40].mxu1 %v11486_v43  ;;  %vm14878_vm13 = vcmask 621568   ;;  %vm14879_vm12 = vcmask 850944  }
 0x172   :  { %954 = vrot.lane.b32.xlu1 %v11362_v57, %s14876_s26  ;;  %921 = vrot.lane.b32.xlu0 %v9916_v55, %s14829_s9  ;;  %v11499_v59 = vpack.c.bf16 %v856_v38, %v819_v22  ;;  %vm14881_vm14 = vmmov %vm14878_vm13 }
 0x174   :  { %14877 = vst [vmem:[#allocation31_spill] sm:$0xff] %v11499_v59  ;;  %v916_v4 = vpop.permute.xlu1 %915  ;;  %v11501_v28 = vpop.permute.xlu0 %882  ;;  %3858 = vmatprep.mubr.bf16.mxu0 %v11499_v59  ;;  %4550 = vmatprep.mubr.bf16.mxu1 %v11499_v59 }
 0x175   :  { %v926_v39 = vsel %vm14878_vm13, %v10919_v48, %v916_v4  ;;  %v892_v42 = vsel %vm14879_vm12, %v881_v9, %v11501_v28  ;;  %vm14896_vm12 = vcmask 326656  }
 0x176   :  { %989 = vrot.lane.b32.xlu1 %v11362_v57, %s14880_s14  ;;  %956 = vrot.lane.b32.xlu0 %v9916_v55, %s14876_s26  ;;  %v39_v57 = vld [vmem:[%s14552_s0 + $0x60] sm:$0xff]  ;;  %v11540_v9 = vpack.c.bf16 %v926_v39, %v891_v8 }
 0x178   :  { %v951_v36 = vpop.permute.xlu1 %950  ;;  %v11514_v22 = vpop.permute.xlu0 %917 }
 0x179   :  { %v961_v38 = vsel %vm958_vm0, %v10939_v44, %v951_v36  ;;  %v927_v59 = vsel %vm14881_vm14, %v916_v4, %v11514_v22  ;;  %3859 = vmatmul.mubr.bf16.gmra.mrb[44].mxu0 %v11512_v2  ;;  %4551 = vmatmul.mubr.bf16.gmra.mrb[44].mxu1 %v11512_v2  ;;  %vm14884_vm14 = vcmask 130048  }
 0x17a   :  { %203 = vrot.lane.b32.xlu1 %v11026_v7, %s9923_s28  ;;  %991 = vrot.lane.b32.xlu0 %v9916_v55, %s14880_s14  ;;  %v11525_v48 = vpack.c.bf16 %v927_v59, %v892_v42  ;;  %vm14885_vm13 = vmmov %vm14884_vm14 }
 0x17c   :  { %14882 = vst [vmem:[#allocation32_spill] sm:$0xff] %v11525_v48  ;;  %v986_v32 = vpop.permute.xlu1 %985  ;;  %v11530_v44 = vpop.permute.xlu0 %952  ;;  %3868 = vmatprep.mubr.bf16.mxu0 %v11525_v48  ;;  %4560 = vmatprep.mubr.bf16.mxu1 %v11525_v48 }
 0x17d   :  { %v996_v23 = vsel %vm993_vm15, %v10949_v56, %v986_v32  ;;  %v962_v7 = vsel %vm958_vm0, %v951_v36, %v11530_v44 }
 0x17e   :  { %850 = vrot.lane.b32.xlu1 %v9916_v55, %s14825_s23  ;;  %523 = vrot.lane.b32.xlu0 %v39_v57, %s14813_s22  ;;  %v11558_v39 = vpack.c.bf16 %v996_v23, %v961_v38  ;;  %v9706_v23 = vld [vmem:[%s14553_s1 + $0xa80] ss:$28 sps:$4 sm:$0xff]  }
 0x180   :  { %v58_v59 = vpop.permute.xlu1 %57  ;;  %v11542_v4 = vpop.permute.xlu0 %987 }
 0x181   :  { %v66_v42 = vsel %vm61_vm2, %v10971_v15, %v58_v59  ;;  %v997_v48 = vsel %vm993_vm15, %v986_v32, %v11542_v4  ;;  %3869 = vmatmul.mubr.bf16.gmra.mrb[48].mxu0 %v11540_v9  ;;  %4561 = vmatmul.mubr.bf16.gmra.mrb[48].mxu1 %v11540_v9 }
 0x182   :  { %v11550_v56 = vpack.c.bf16 %v997_v48, %v962_v7 }
 0x184   :  { %14883 = vst [vmem:[#allocation33_spill] sm:$0xff] %v11550_v56  ;;  %v94_v55 = vpop.permute.xlu1 %93  ;;  %v60_v36 = vpop.permute.xlu0 %59  ;;  %3878 = vmatprep.mubr.bf16.mxu0 %v11550_v56  ;;  %4570 = vmatprep.mubr.bf16.mxu1 %v11550_v56 }
 0x185   :  { %v102_v8 = vsel %vm97_vm1, %v10983_v63, %v94_v55  ;;  %v67_v15 = vsel %vm61_vm2, %v58_v59, %v60_v36  ;;  %82 = vst.msk [vmem:[#allocation2 + $0x30] sm:$0xff] %vm14884_vm14, %v60_v36 }
 0x186   :  { %v11580_v36 = vpack.c.bf16 %v102_v8, %v66_v42 }
 0x188   :  { %v129_v57 = vpop.permute.xlu1 %128  ;;  %v96_v32 = vpop.permute.xlu0 %95 }
 0x189   :  { %v137_v48 = vsel %vm132_vm3, %v11003_v46, %v129_v57  ;;  %v103_v7 = vsel %vm97_vm1, %v94_v55, %v96_v32  ;;  %117 = vst.msk [vmem:[#allocation2 + $0x68] sm:$0xff] %vm14885_vm13, %v96_v32  ;;  %3879 = vmatmul.mubr.bf16.gmra.mrb[52].mxu0 %v11558_v39  ;;  %4571 = vmatmul.mubr.bf16.gmra.mrb[52].mxu1 %v11558_v39  ;;  %vm14886_vm1 = vmmov %vm14885_vm13  ;;  %v9709_v55 = vld [vmem:[%s14553_s1 + $0xa88] ss:$28 sps:$4 sm:$0xff]  }
 0x18a   :  { %v11566_v63 = vpack.c.bf16 %v103_v7, %v67_v15  ;;  %v9714_v15 = vld [vmem:[%s14553_s1 + $0x14] ss:$28 sps:$4 sm:$0xff]   ;;  %vm14887_vm2 = vmmov %vm14886_vm1 }
 0x18b   :  { %vm14898_vm13 = vmmov %vm14886_vm1 }
 0x18c   :  { %v164_v59 = vpop.permute.xlu1 %163  ;;  %v131_v56 = vpop.permute.xlu0 %130  ;;  %3921 = vmatprep.mubr.bf16.mxu0 %v11566_v63  ;;  %4613 = vmatprep.mubr.bf16.mxu1 %v11566_v63 }
 0x18d   :  { %v172_v38 = vsel %vm167_vm4, %v11034_v13, %v164_v59  ;;  %v138_v46 = vsel %vm132_vm3, %v129_v57, %v131_v56  ;;  %152 = vst.msk [vmem:[#allocation2 + $0xa0] sm:$0xff] %vm14886_vm1, %v131_v56  ;;  %vm14889_vm3 = vmmov %vm14886_vm1 }
 0x190   :  { %v200_v32 = vpop.permute.xlu1 %199  ;;  %v166_v13 = vpop.permute.xlu0 %165 }
 0x191   :  { %v210_v57 = vsel %vm205_vm5, %v11054_v58, %v200_v32  ;;  %v173_v56 = vsel %vm167_vm4, %v164_v59, %v166_v13  ;;  %187 = vst.msk [vmem:[#allocation2 + $0xd8] sm:$0xff] %vm14887_vm2, %v166_v13  ;;  %3922 = vmatmul.mubr.bf16.vlgmr.msra.gmra.mrb[0].mxu0 %v11580_v36  ;;  %4614 = vmatmul.mubr.bf16.vlgmr.msra.gmra.mrb[0].mxu1 %v11580_v36  ;;  %vm14890_vm4 = vmmov %vm14886_vm1 }
 0x192   :  { %4063 = vmatpush1.bf16.msra.mxu0 %v9706_v23  ;;  %v11591_v42 = vpack.c.bf16 %v173_v56, %v138_v46  ;;  %4755 = vmatpush1.bf16.msra.mxu1 %v9709_v55  ;;  %v11601_v13 = vpack.c.bf16 %v172_v38, %v137_v48  ;;  %vm14901_vm2 = vmmov %vm14896_vm12 }
 0x193   :  { %4927 = vmatprep.subr.bf16.mxu0 %v9714_v15 }
 0x194   :  { %14888 = vst [vmem:[#allocation34_spill] sm:$0xff] %v11591_v42  ;;  %v238_v8 = vpop.permute.xlu1 %237  ;;  %v11593_v7 = vpop.permute.xlu0 %201  ;;  %3931 = vmatprep.mubr.bf16.mxu0 %v11591_v42  ;;  %4623 = vmatprep.mubr.bf16.mxu1 %v11591_v42 }
 0x195   :  { %v246_v58 = vsel %vm241_vm6, %v11080_v27, %v238_v8  ;;  %v211_v59 = vsel %vm205_vm5, %v200_v32, %v11593_v7 }
 0x196   :  { %v11617_v38 = vpack.c.bf16 %v246_v58, %v210_v57 }
 0x198   :  { %v273_v23 = vpop.permute.xlu1 %272  ;;  %v240_v46 = vpop.permute.xlu0 %239 }
 0x199   :  { %v281_v55 = vsel %vm276_vm7, %v11100_v1, %v273_v23  ;;  %v247_v15 = vsel %vm241_vm6, %v238_v8, %v240_v46  ;;  %261 = vst.msk [vmem:[#allocation2 + $0x148] sm:$0xff] %vm14889_vm3, %v240_v46  ;;  %3932 = vmatmul.mubr.bf16.gmra.mrb[4].mxu0 %v11601_v13  ;;  %4624 = vmatmul.mubr.bf16.gmra.mrb[4].mxu1 %v11601_v13  ;;  %vm14891_vm6 = vmmov %vm14886_vm1 }
 0x19a   :  { %v11609_v56 = vpack.c.bf16 %v247_v15, %v211_v59 }
 0x19c   :  { %v308_v27 = vpop.permute.xlu1 %307  ;;  %v275_v42 = vpop.permute.xlu0 %274  ;;  %3941 = vmatprep.mubr.bf16.mxu0 %v11609_v56  ;;  %4633 = vmatprep.mubr.bf16.mxu1 %v11609_v56 }
 0x19d   :  { %v316_v48 = vsel %vm311_vm8, %v11131_v61, %v308_v27  ;;  %v282_v1 = vsel %vm276_vm7, %v273_v23, %v275_v42  ;;  %296 = vst.msk [vmem:[#allocation2 + $0x180] sm:$0xff] %vm14890_vm4, %v275_v42  ;;  %vm14892_vm7 = vmmov %vm14886_vm1  ;;  %vm14903_vm4 = vcmask 818176  }
 0x19e   :  { %v11633_v42 = vpack.c.bf16 %v316_v48, %v281_v55 }
 0x1a0   :  { %v343_v32 = vpop.permute.xlu1 %342  ;;  %v310_v8 = vpop.permute.xlu0 %309 }
 0x1a1   :  { %v351_v59 = vsel %vm346_vm9, %v11151_v51, %v343_v32  ;;  %v317_v46 = vsel %vm311_vm8, %v308_v27, %v310_v8  ;;  %331 = vst.msk [vmem:[#allocation2 + $0x1b8] sm:$0xff] %vm14891_vm6, %v310_v8  ;;  %3942 = vmatmul.mubr.bf16.gmra.mrb[8].mxu0 %v11617_v38  ;;  %4634 = vmatmul.mubr.bf16.gmra.mrb[8].mxu1 %v11617_v38  ;;  %vm14893_vm8 = vmmov %vm14886_vm1 }
 0x1a2   :  { %v11625_v61 = vpack.c.bf16 %v317_v46, %v282_v1 }
 0x1a4   :  { %v379_v23 = vpop.permute.xlu1 %378  ;;  %v345_v15 = vpop.permute.xlu0 %344  ;;  %3951 = vmatprep.mubr.bf16.mxu0 %v11625_v61  ;;  %4643 = vmatprep.mubr.bf16.mxu1 %v11625_v61 }
 0x1a5   :  { %v387_v57 = vsel %vm382_vm10, %v11177_v24, %v379_v23  ;;  %v352_v51 = vsel %vm346_vm9, %v343_v32, %v345_v15  ;;  %366 = vst.msk [vmem:[#allocation2 + $0x1f0] sm:$0xff] %vm14892_vm7, %v345_v15  ;;  %vm14894_vm9 = vcmask 556032   ;;  %vm14905_vm7 = vcmask 588800  }
 0x1a6   :  { %v11649_v48 = vpack.c.bf16 %v387_v57, %v351_v59  ;;  %vm14897_vm14 = vmmov %vm14894_vm9 }
 0x1a8   :  { %v414_v58 = vpop.permute.xlu1 %413  ;;  %v381_v27 = vpop.permute.xlu0 %380 }
 0x1a9   :  { %v422_v1 = vsel %vm417_vm11, %v11197_v30, %v414_v58  ;;  %v388_v8 = vsel %vm382_vm10, %v379_v23, %v381_v27  ;;  %402 = vst.msk [vmem:[#allocation2 + $0x228] sm:$0xff] %vm14893_vm8, %v381_v27  ;;  %3952 = vmatmul.mubr.bf16.gmra.mrb[12].mxu0 %v11633_v42  ;;  %4644 = vmatmul.mubr.bf16.gmra.mrb[12].mxu1 %v11633_v42  ;;  %vm14895_vm10 = vmmov %vm14886_vm1  ;;  %vm14900_vm1 = vcmask 97280  }
 0x1aa   :  { %v11641_v24 = vpack.c.bf16 %v388_v8, %v352_v51  ;;  %vm14904_vm6 = vmmov %vm14900_vm1 }
 0x1ab   :  { %vm14906_vm8 = vmmov %vm14903_vm4 }
 0x1ac   :  { %v449_v32 = vpop.permute.xlu1 %448  ;;  %v416_v46 = vpop.permute.xlu0 %415  ;;  %3961 = vmatprep.mubr.bf16.mxu0 %v11641_v24  ;;  %4653 = vmatprep.mubr.bf16.mxu1 %v11641_v24 }
 0x1ad   :  { %v457_v55 = vsel %vm14894_vm9, %v11223_v60, %v449_v32  ;;  %v423_v30 = vsel %vm417_vm11, %v414_v58, %v416_v46  ;;  %437 = vst.msk [vmem:[#allocation2 + $0x260] sm:$0xff] %vm14895_vm10, %v416_v46  ;;  %vm14907_vm9 = vmmov %vm14889_vm3  ;;  %vm14909_vm10 = vcmask 359424  }
 0x1ae   :  { %v11665_v57 = vpack.c.bf16 %v457_v55, %v422_v1  ;;  %v1117_v1 = vld [vmem:[#allocation2 + $0x338] sm:$0xff] }
 0x1b0   :  { %v484_v23 = vpop.permute.xlu1 %483  ;;  %v451_v15 = vpop.permute.xlu0 %450  ;;  %14902 = vst [vmem:[#allocation36_spill] sm:$0xff] %v11665_v57 }
 0x1b1   :  { %v492_v51 = vsel %vm14896_vm12, %v11243_v18, %v484_v23  ;;  %v458_v27 = vsel %vm14897_vm14, %v449_v32, %v451_v15  ;;  %472 = vst.msk [vmem:[#allocation2 + $0x298] sm:$0xff] %vm14898_vm13, %v451_v15  ;;  %3962 = vmatmul.mubr.bf16.gmra.mrb[16].mxu0 %v11649_v48  ;;  %4654 = vmatmul.mubr.bf16.gmra.mrb[16].mxu1 %v11649_v48  ;;  %vm14910_vm12 = vmmov %vm14905_vm7 }
 0x1b2   :  { %v11657_v60 = vpack.c.bf16 %v458_v27, %v423_v30  ;;  %vm14911_vm14 = vmmov %vm14889_vm3 }
 0x1b3   :  { %vm14912_vm13 = vmmov %vm14889_vm3 }
 0x1b4   :  { %14899 = vst [vmem:[#allocation35_spill] sm:$0xff] %v11657_v60  ;;  %v520_v58 = vpop.permute.xlu1 %519  ;;  %v486_v8 = vpop.permute.xlu0 %485  ;;  %3971 = vmatprep.mubr.bf16.mxu0 %v11657_v60  ;;  %4663 = vmatprep.mubr.bf16.mxu1 %v11657_v60 }
 0x1b5   :  { %v530_v59 = vsel %vm14900_vm1, %v11269_v34, %v520_v58  ;;  %v493_v18 = vsel %vm14901_vm2, %v484_v23, %v486_v8  ;;  %507 = vst.msk [vmem:[#allocation2 + $0x2d0] sm:$0xff] %vm14889_vm3, %v486_v8  ;;  %v9739_v34 = vld [vmem:[%s14553_s1 + $0x1d8] ss:$28 sps:$4 sm:$0xff]   ;;  %vm14913_vm1 = vmmov %vm14909_vm10 }
 0x1b6   :  { %7883 = vmatprep.subr.bf16.mxu1 %v9739_v34  ;;  %vm14914_vm2 = vmmov %vm14889_vm3  ;;  %vm14915_vm3 = vcmask 949248  }
 0x1b8   :  { %v568_v32 = vpop.permute.xlu1 %567  ;;  %v11667_v46 = vpop.permute.xlu0 %521 }
 0x1b9   :  { %v576_v30 = vsel %vm14903_vm4, %v11289_v40, %v568_v32  ;;  %v531_v15 = vsel %vm14904_vm6, %v520_v58, %v11667_v46  ;;  %3972 = vmatmul.mubr.bf16.gmra.mrb[20].mxu0 %v11665_v57  ;;  %4664 = vmatmul.mubr.bf16.gmra.mrb[20].mxu1 %v11665_v57  ;;  %v11688_v57 = vpack.c.bf16 %v530_v59, %v492_v51  ;;  %v1116_v59 = vld [vmem:[#allocation2 + $0x330] sm:$0xff]  ;;  %vm14916_vm4 = vmmov %vm14914_vm2 }
 0x1ba   :  { %v11678_v23 = vpack.c.bf16 %v531_v15, %v493_v18  ;;  %vm14917_vm6 = vmmov %vm14914_vm2 }
 0x1bc   :  { %v603_v55 = vpop.permute.xlu1 %602  ;;  %v570_v27 = vpop.permute.xlu0 %569  ;;  %3981 = vmatprep.mubr.bf16.mxu0 %v11678_v23  ;;  %4673 = vmatprep.mubr.bf16.mxu1 %v11678_v23 }
 0x1bd   :  { %v611_v40 = vsel %vm14905_vm7, %v11317_v54, %v603_v55  ;;  %v577_v58 = vsel %vm14906_vm8, %v568_v32, %v570_v27  ;;  %591 = vst.msk [vmem:[#allocation2 + $0x378] sm:$0xff] %vm14907_vm9, %v570_v27  ;;  %vm14918_vm7 = vcmask 719872   ;;  %vm14919_vm8 = vmmov %vm14915_vm3 }
 0x1be   :  { %v11686_v8 = vpack.c.bf16 %v577_v58, %v1117_v1  ;;  %vm14920_vm9 = vmmov %vm14914_vm2 }
 0x1c0   :  { %14908 = vst [vmem:[#allocation37_spill] sm:$0xff] %v11686_v8  ;;  %v638_v18 = vpop.permute.xlu1 %637  ;;  %v605_v15 = vpop.permute.xlu0 %604 }
 0x1c1   :  { %v646_v34 = vsel %vm14909_vm10, %v11343_v14, %v638_v18  ;;  %v612_v60 = vsel %vm14910_vm12, %v603_v55, %v605_v15  ;;  %626 = vst.msk [vmem:[#allocation2 + $0x3b0] sm:$0xff] %vm14911_vm14, %v605_v15  ;;  %3982 = vmatmul.mubr.bf16.gmra.mrb[24].mxu0 %v11688_v57  ;;  %4674 = vmatmul.mubr.bf16.gmra.mrb[24].mxu1 %v11688_v57  ;;  %vm14921_vm10 = vcmask 490496   ;;  %vm14922_vm12 = vmmov %vm14918_vm7 }
 0x1c2   :  { %3991 = vmatprep.mubr.bf16.mxu0 %v11686_v8  ;;  %4683 = vmatprep.mubr.bf16.mxu1 %v11686_v8  ;;  %v11704_v55 = vpack.c.bf16 %v576_v30, %v1116_v59  ;;  %vm14923_vm14 = vmmov %vm14914_vm2 }
 0x1c4   :  { %v673_v54 = vpop.permute.xlu1 %672  ;;  %v640_v51 = vpop.permute.xlu0 %639 }
 0x1c5   :  { %v680_v32 = vsel %vm14912_vm13, %v11374_v35, %v673_v54  ;;  %v647_v14 = vsel %vm14913_vm1, %v638_v18, %v640_v51  ;;  %661 = vst.msk [vmem:[#allocation2 + $0x3e8] sm:$0xff] %vm14914_vm2, %v640_v51  ;;  %vm14924_vm13 = vcmask 261120   ;;  %vm14925_vm1 = vmmov %vm14921_vm10 }
 0x1c6   :  { %v11702_v1 = vpack.c.bf16 %v647_v14, %v612_v60 }
 0x1c8   :  { %v707_v27 = vpop.permute.xlu1 %706  ;;  %v675_v58 = vpop.permute.xlu0 %674 }
 0x1c9   :  { %v715_v15 = vsel %vm14915_vm3, %v11400_v33, %v707_v27  ;;  %v681_v8 = vsel %vm14916_vm4, %v673_v54, %v675_v58  ;;  %695 = vst.msk [vmem:[#allocation2 + $0x420] sm:$0xff] %vm14917_vm6, %v675_v58  ;;  %3992 = vmatmul.mubr.bf16.gmra.mrb[28].mxu0 %v11704_v55  ;;  %4684 = vmatmul.mubr.bf16.gmra.mrb[28].mxu1 %v11704_v55  ;;  %vm14926_vm3 = vcmask 31744   ;;  %vm14927_vm4 = vmmov %vm14924_vm13 }
 0x1ca   :  { %4001 = vmatprep.mubr.bf16.mxu0 %v11702_v1  ;;  %4693 = vmatprep.mubr.bf16.mxu1 %v11702_v1  ;;  %v11720_v54 = vpack.c.bf16 %v646_v34, %v611_v40  ;;  %vm14928_vm6 = vmmov %vm14914_vm2 }
 0x1cc   :  { %v742_v35 = vpop.permute.xlu1 %741  ;;  %v709_v60 = vpop.permute.xlu0 %708 }
 0x1cd   :  { %v750_v30 = vsel %vm14918_vm7, %v11426_v49, %v742_v35  ;;  %v716_v18 = vsel %vm14919_vm8, %v707_v27, %v709_v60  ;;  %730 = vst.msk [vmem:[#allocation2 + $0x458] sm:$0xff] %vm14920_vm9, %v709_v60  ;;  %v11736_v27 = vpack.c.bf16 %v715_v15, %v680_v32  ;;  %vm14929_vm7 = vcmask 850944   ;;  %vm14930_vm8 = vmmov %vm14926_vm3 }
 0x1ce   :  { %v11718_v33 = vpack.c.bf16 %v716_v18, %v681_v8  ;;  %vm14932_vm9 = vcmask 621568  }
 0x1d0   :  { %v777_v51 = vpop.permute.xlu1 %776  ;;  %v744_v59 = vpop.permute.xlu0 %743 }
 0x1d1   :  { %v785_v14 = vsel %vm14921_vm10, %v11452_v16, %v777_v51  ;;  %v751_v58 = vsel %vm14922_vm12, %v742_v35, %v744_v59  ;;  %765 = vst.msk [vmem:[#allocation2 + $0x490] sm:$0xff] %vm14923_vm14, %v744_v59  ;;  %4002 = vmatmul.mubr.bf16.gmra.mrb[32].mxu0 %v11720_v54  ;;  %4694 = vmatmul.mubr.bf16.gmra.mrb[32].mxu1 %v11720_v54  ;;  %vm14933_vm10 = vmmov %vm14929_vm7 }
 0x1d2   :  { %4011 = vmatprep.mubr.bf16.mxu0 %v11718_v33  ;;  %4703 = vmatprep.mubr.bf16.mxu1 %v11718_v33  ;;  %vm14934_vm12 = vmmov %vm14914_vm2 }
 0x1d3   :  { %vm14935_vm14 = vmmov %vm14932_vm9 }
 0x1d4   :  { %v812_v49 = vpop.permute.xlu1 %811  ;;  %v779_v40 = vpop.permute.xlu0 %778 }
 0x1d5   :  { %v820_v8 = vsel %vm14924_vm13, %v11472_v10, %v812_v49  ;;  %v786_v34 = vsel %vm14925_vm1, %v777_v51, %v779_v40  ;;  %800 = vst.msk [vmem:[#allocation2 + $0x4c8] sm:$0xff] %vm14914_vm2, %v779_v40  ;;  %vm14936_vm13 = vmmov %vm14914_vm2 }
 0x1d6   :  { %v11734_v16 = vpack.c.bf16 %v786_v34, %v751_v58  ;;  %v11751_v58 = vpack.c.bf16 %v785_v14, %v750_v30  ;;  %vm14937_vm1 = vmmov %vm14914_vm2 }
 0x1d7   :  { %vm14938_vm2 = vmmov %vm14937_vm1 }
 0x1d8   :  { %v847_v35 = vpop.permute.xlu1 %846  ;;  %v814_v60 = vpop.permute.xlu0 %813 }
 0x1d9   :  { %v857_v18 = vsel %vm14926_vm3, %v11488_v31, %v847_v35  ;;  %v821_v59 = vsel %vm14927_vm4, %v812_v49, %v814_v60  ;;  %835 = vst.msk [vmem:[#allocation2 + $0x500] sm:$0xff] %vm14928_vm6, %v814_v60  ;;  %4012 = vmatmul.mubr.bf16.gmra.mrb[36].mxu0 %v11736_v27  ;;  %4704 = vmatmul.mubr.bf16.gmra.mrb[36].mxu1 %v11736_v27  ;;  %vm14942_vm4 = vcmask 97280  }
 0x1da   :  { %4021 = vmatprep.mubr.bf16.mxu0 %v11734_v16  ;;  %4713 = vmatprep.mubr.bf16.mxu1 %v11734_v16 }
 0x1dc   :  { %v885_v10 = vpop.permute.xlu1 %884  ;;  %v849_v32 = vpop.permute.xlu0 %848 }
 0x1dd   :  { %v893_v15 = vsel %vm14929_vm7, %v11501_v28, %v885_v10  ;;  %v858_v51 = vsel %vm14930_vm8, %v847_v35, %v849_v32 }
 0x1de   :  { %v11749_v31 = vpack.c.bf16 %v858_v51, %v821_v59  ;;  %v11767_v59 = vpack.c.bf16 %v857_v18, %v820_v8 }
 0x1e0   :  { %14931 = vst [vmem:[#allocation38_spill] sm:$0xff] %v11749_v31  ;;  %v920_v49 = vpop.permute.xlu1 %919  ;;  %v887_v40 = vpop.permute.xlu0 %886 }
 0x1e1   :  { %v928_v34 = vsel %vm14932_vm9, %v11514_v22, %v920_v49  ;;  %v894_v60 = vsel %vm14933_vm10, %v885_v10, %v887_v40  ;;  %908 = vst.msk [vmem:[#allocation2 + $0x570] sm:$0xff] %vm14934_vm12, %v887_v40  ;;  %4022 = vmatmul.mubr.bf16.gmra.mrb[40].mxu0 %v11751_v58  ;;  %4714 = vmatmul.mubr.bf16.gmra.mrb[40].mxu1 %v11751_v58 }
 0x1e2   :  { %4031 = vmatprep.mubr.bf16.mxu0 %v11749_v31  ;;  %4723 = vmatprep.mubr.bf16.mxu1 %v11749_v31 }
 0x1e4   :  { %v955_v28 = vpop.permute.xlu1 %954  ;;  %v922_v30 = vpop.permute.xlu0 %921 }
 0x1e5   :  { %v963_v14 = vsel %vm958_vm0, %v11530_v44, %v955_v28  ;;  %v929_v35 = vsel %vm14935_vm14, %v920_v49, %v922_v30  ;;  %943 = vst.msk [vmem:[#allocation2 + $0x5a8] sm:$0xff] %vm14936_vm13, %v922_v30 }
 0x1e6   :  { %v11765_v22 = vpack.c.bf16 %v929_v35, %v894_v60  ;;  %v11784_v60 = vpack.c.bf16 %v928_v34, %v893_v15  ;;  %v1027_v15 = vld [vmem:[#allocation2 + $0x68] sm:$0xff] }
 0x1e8   :  { %v990_v10 = vpop.permute.xlu1 %989  ;;  %v957_v51 = vpop.permute.xlu0 %956  ;;  %14941 = vst [vmem:[#allocation40_spill] sm:$0xff] %v11784_v60 }
 0x1e9   :  { %v998_v40 = vsel %vm993_vm15, %v11542_v4, %v990_v10  ;;  %v964_v31 = vsel %vm958_vm0, %v955_v28, %v957_v51  ;;  %978 = vst.msk [vmem:[#allocation2 + $0x5e0] sm:$0xff] %vm14937_vm1, %v957_v51  ;;  %4032 = vmatmul.mubr.bf16.gmra.mrb[44].mxu0 %v11767_v59  ;;  %4724 = vmatmul.mubr.bf16.gmra.mrb[44].mxu1 %v11767_v59  ;;  %vm14939_vm0 = vmmov %vm14937_vm1 }
 0x1ea   :  { %4041 = vmatprep.mubr.bf16.mxu0 %v11765_v22  ;;  %4733 = vmatprep.mubr.bf16.mxu1 %v11765_v22  ;;  %vm14947_vm6 = vmmov %vm14939_vm0 }
 0x1eb   :  { %vm14948_vm7 = vmmov %vm14939_vm0 }
 0x1ec   :  { %v204_v44 = vpop.permute.xlu1 %203  ;;  %v992_v8 = vpop.permute.xlu0 %991  ;;  %vm14950_vm8 = vmmov %vm14939_vm0 }
 0x1ed   :  { %v212_v18 = vsel %vm205_vm5, %v11593_v7, %v204_v44  ;;  %v999_v49 = vsel %vm993_vm15, %v990_v10, %v992_v8  ;;  %1013 = vst.msk [vmem:[#allocation2 + $0x618] sm:$0xff] %vm14938_vm2, %v992_v8  ;;  %vm14943_vm5 = vmmov %vm14939_vm0  ;;  %v11795_v7 = vpack.c.bf16 %v998_v40, %v963_v14  ;;  %v9717_v14 = vld [vmem:[%s14553_s1 + $0x4c] ss:$28 sps:$4 sm:$0xff]   ;;  %v9740_v10 = vld [vmem:[%s14553_s1 + $0x18] ss:$28 sps:$4 sm:$0xff]  }
 0x1ee   :  { %226 = vst.msk [vmem:[#allocation2 + $0x110] sm:$0xff] %vm14939_vm0, %v212_v18  ;;  %v11782_v4 = vpack.c.bf16 %v999_v49, %v964_v31  ;;  %vm14944_vm15 = vmmov %vm14939_vm0  ;;  %v9712_v31 = vld [vmem:[%s14553_s1 + $0x10] ss:$28 sps:$4 sm:$0xff]   ;;  %v9715_v44 = vld [vmem:[%s14553_s1 + $0x48] ss:$28 sps:$4 sm:$0xff]  }
 0x1ef   :  { %14945 = vst [vmem:[#allocation41_spill] sm:$0xff] %v11795_v7  ;;  %v9747_v40 = vld [vmem:[%s14553_s1 + $0x210] ss:$28 sps:$4 sm:$0xff]   ;;  %v9720_v8 = vld [vmem:[%s14553_s1 + $0x84] ss:$28 sps:$4 sm:$0xff]   ;;  %v1041_v49 = vld [vmem:[#allocation2 + $0xd8] sm:$0xff] }
 0x1f0   :  { %14940 = vst [vmem:[#allocation39_spill] sm:$0xff] %v11782_v4  ;;  %v851_v28 = vpop.permute.xlu1 %850  ;;  %v524_v30 = vpop.permute.xlu0 %523  ;;  %v1034_v18 = vld [vmem:[#allocation2 + $0xa0] sm:$0xff]  ;;  %vm14951_vm9 = vmmov %vm14939_vm0 }
 0x1f1   :  { %v859_v35 = vsel %vm14926_vm3, %v849_v32, %v851_v28  ;;  %v532_v51 = vsel %vm14942_vm4, %v11667_v46, %v524_v30  ;;  %4042 = vmatmul.mubr.bf16.gmra.mrb[48].mxu0 %v11784_v60  ;;  %4734 = vmatmul.mubr.bf16.gmra.mrb[48].mxu1 %v11784_v60  ;;  %v14690_v32 = vmov 0   ;;  %v1020_v46 = vld [vmem:[#allocation2 + $0x30] sm:$0xff]  ;;  %v9718_v30 = vld [vmem:[%s14553_s1 + $0x80] ss:$28 sps:$4 sm:$0xff]   ;;  %vm14953_vm10 = vmmov %vm14939_vm0 }
 0x1f2   :  { %873 = vst.msk [vmem:[#allocation2 + $0x538] sm:$0xff] %vm14943_vm5, %v859_v35  ;;  %4051 = vmatprep.mubr.bf16.mxu0 %v11782_v4  ;;  %4743 = vmatprep.mubr.bf16.mxu1 %v11782_v4  ;;  %v11804_v34 = vpack.c.bf16 %v1027_v15, %v1020_v46  ;;  %v9748_v28 = vld [vmem:[%s14553_s1 + $0x50] ss:$28 sps:$4 sm:$0xff]   ;;  %v11833_v35 = vpack.c.bf16 %v1041_v49, %v1034_v18  ;;  %v9755_v46 = vld [vmem:[%s14553_s1 + $0x248] ss:$28 sps:$4 sm:$0xff]   ;;  %vm14954_vm12 = vmmov %vm14939_vm0 }
 0x1f3   :  { %546 = vst.msk [vmem:[#allocation2 + $0x308] sm:$0xff] %vm14944_vm15, %v532_v51  ;;  %v9723_v51 = vld [vmem:[%s14553_s1 + $0xbc] ss:$28 sps:$4 sm:$0xff]   ;;  %v9756_v15 = vld [vmem:[%s14553_s1 + $0x88] ss:$28 sps:$4 sm:$0xff]   ;;  %vm14956_vm14 = vmmov %vm14939_vm0 }
 0x1f4   :  { %14946 = vst [vmem:[#allocation42_spill] sm:$0xff] %v11804_v34  ;;  %14949 = vst [vmem:[#allocation43_spill] sm:$0xff] %v11833_v35  ;;  %v9724_v18 = vld [vmem:[%s14553_s1 + $0xf0] ss:$28 sps:$4 sm:$0xff]   ;;  %v9761_v49 = vld [vmem:[%s14553_s1 + $0xc0] ss:$28 sps:$4 sm:$0xff]  }
 0x1f5   :  { %vm14957_vm13 = vmmov %vm14939_vm0 }
 0x1f6   :  { %vm14959_vm1 = vmmov %vm14939_vm0 }
 0x1f7   :  { %vm14960_vm2 = vmmov %vm14939_vm0 }
 0x1f8   :  { %vm14962_vm3 = vmmov %vm14939_vm0 }
 0x1f9   :  { %4052 = vmatmul.mubr.bf16.gmra.mrb[52].mxu0 %v11795_v7  ;;  %4744 = vmatmul.mubr.bf16.gmra.mrb[52].mxu1 %v11795_v7  ;;  %vm14964_vm4 = vmmov %vm14939_vm0 }
 0x1fa   :  { %4094 = vmatprep.mubr.bf16.mxu0 %v14690_v32  ;;  %4786 = vmatprep.mubr.bf16.mxu1 %v14690_v32  ;;  %vm14965_vm5 = vmmov %vm14939_vm0 }
 0x1fb   :  { %vm14967_vm15 = vmmov %vm14939_vm0 }
 0x201   :  { %7822 = vmatmul.mubr.msk.bf16.vlgmr.msra.gmra.mrb[0].mxu0 %vm14947_vm6, %v11804_v34  ;;  %7836 = vmatmul.mubr.msk.bf16.vlgmr.msra.gmra.mrb[0].mxu1 %vm14948_vm7, %v11804_v34  ;;  %vm14968_vm6 = vmmov %vm14939_vm0  ;;  %v9843_v34 = vld [vmem:[%s14553_s1 + $0x748] ss:$28 sps:$4 sm:$0xff]  }
 0x202   :  { %4928 = vmatpush1.bf16.msra.mxu0 %v9712_v31  ;;  %4104 = vmatprep.mubr.bf16.mxu0 %v14690_v32  ;;  %v9721_v31 = vld [vmem:[%s14553_s1 + $0xb8] ss:$28 sps:$4 sm:$0xff]   ;;  %vm14970_vm7 = vmmov %vm14939_vm0 }
 0x203   :  { %4929 = vmatprep.subr.bf16.mxu0 %v9717_v14  ;;  %4796 = vmatprep.mubr.bf16.mxu1 %v14690_v32  ;;  %v9760_v14 = vld [vmem:[%s14553_s1 + $0x280] ss:$28 sps:$4 sm:$0xff]  }
 0x204   :  { %7884 = vmatpush3.bf16.msra.mxu1 %v9740_v10  ;;  %v9726_v10 = vld [vmem:[%s14553_s1 + $0xf4] ss:$28 sps:$4 sm:$0xff]  }
 0x205   :  { %7885 = vmatprep.subr.bf16.mxu1 %v9747_v40  ;;  %v1048_v40 = vld [vmem:[#allocation2 + $0x110] sm:$0xff] }
 0x206   :  { %4930 = vmatpush1.bf16.msra.mxu0 %v9715_v44  ;;  %v1055_v44 = vld [vmem:[#allocation2 + $0x148] sm:$0xff] }
 0x207   :  { %4931 = vmatprep.subr.bf16.mxu0 %v9720_v8  ;;  %v11859_v8 = vpack.c.bf16 %v1055_v44, %v1048_v40  ;;  %v9730_v44 = vld [vmem:[%s14553_s1 + $0x160] ss:$28 sps:$4 sm:$0xff]  }
 0x208   :  { %7886 = vmatpush3.bf16.msra.mxu1 %v9748_v28  ;;  %v9729_v28 = vld [vmem:[%s14553_s1 + $0x12c] ss:$28 sps:$4 sm:$0xff]  }
 0x209   :  { %7823 = vmatmul.mubr.msk.bf16.gmra.mrb[4].mxu0 %vm14950_vm8, %v11833_v35  ;;  %7837 = vmatmul.mubr.msk.bf16.gmra.mrb[4].mxu1 %vm14951_vm9, %v11833_v35  ;;  %14952 = vst [vmem:[#allocation44_spill] sm:$0xff] %v11859_v8  ;;  %vm14971_vm8 = vmmov %vm14939_vm0  ;;  %v15003_v35 = vld [vmem:[#allocation14_spill] sm:$0xff] }
 0x20a   :  { %4932 = vmatpush1.bf16.msra.mxu0 %v9718_v30  ;;  %4114 = vmatprep.mubr.bf16.mxu0 %v14690_v32  ;;  %v9762_v30 = vld [vmem:[%s14553_s1 + $0x2b8] ss:$28 sps:$4 sm:$0xff]   ;;  %vm14973_vm9 = vmmov %vm14939_vm0 }
 0x20b   :  { %4806 = vmatprep.mubr.bf16.mxu1 %v14690_v32  ;;  %4933 = vmatprep.subr.bf16.mxu0 %v9723_v51  ;;  %v1062_v51 = vld [vmem:[#allocation2 + $0x180] sm:$0xff] }
 0x20c   :  { %7887 = vmatprep.subr.bf16.mxu1 %v9755_v46  ;;  %v9727_v46 = vld [vmem:[%s14553_s1 + $0x128] ss:$28 sps:$4 sm:$0xff]  }
 0x20d   :  { %7888 = vmatpush3.bf16.msra.mxu1 %v9756_v15  ;;  %v9766_v15 = vld [vmem:[%s14553_s1 + $0xf8] ss:$28 sps:$4 sm:$0xff]  }
 0x20e   :  { %4934 = vmatpush1.bf16.msra.mxu0 %v9721_v31  ;;  %7889 = vmatprep.subr.bf16.mxu1 %v9760_v14  ;;  %v1069_v31 = vld [vmem:[#allocation2 + $0x1b8] sm:$0xff]  ;;  %v9732_v14 = vld [vmem:[%s14553_s1 + $0x164] ss:$28 sps:$4 sm:$0xff]  }
 0x20f   :  { %4935 = vmatprep.subr.bf16.mxu0 %v9726_v10  ;;  %v9767_v10 = vld [vmem:[%s14553_s1 + $0x2f0] ss:$28 sps:$4 sm:$0xff]   ;;  %v11891_v40 = vpack.c.bf16 %v1069_v31, %v1062_v51  ;;  %v9733_v51 = vld [vmem:[%s14553_s1 + $0x198] ss:$28 sps:$4 sm:$0xff]  }
 0x210   :  { %v9738_v31 = vld [vmem:[%s14553_s1 + $0x1d4] ss:$28 sps:$4 sm:$0xff]  }
 0x211   :  { %7824 = vmatmul.mubr.msk.bf16.gmra.mrb[8].mxu0 %vm14953_vm10, %v11859_v8  ;;  %7838 = vmatmul.mubr.msk.bf16.gmra.mrb[8].mxu1 %vm14954_vm12, %v11859_v8  ;;  %14955 = vst [vmem:[#allocation45_spill] sm:$0xff] %v11891_v40  ;;  %vm14974_vm10 = vmmov %vm14939_vm0  ;;  %v9845_v8 = vld [vmem:[%s14553_s1 + $0x74c] ss:$28 sps:$4 sm:$0xff]  }
 0x212   :  { %4124 = vmatprep.mubr.bf16.mxu0 %v14690_v32  ;;  %4816 = vmatprep.mubr.bf16.mxu1 %v14690_v32  ;;  %vm14976_vm12 = vmmov %vm14939_vm0 }
 0x213   :  { %4936 = vmatpush1.bf16.msra.mxu0 %v9724_v18  ;;  %7890 = vmatpush3.bf16.msra.mxu1 %v9761_v49  ;;  %v9768_v18 = vld [vmem:[%s14553_s1 + $0x130] ss:$28 sps:$4 sm:$0xff]   ;;  %v9735_v49 = vld [vmem:[%s14553_s1 + $0x19c] ss:$28 sps:$4 sm:$0xff]  }
 0x214   :  { %4937 = vmatprep.subr.bf16.mxu0 %v9729_v28  ;;  %7891 = vmatprep.subr.bf16.mxu1 %v9762_v30  ;;  %v9772_v28 = vld [vmem:[%s14553_s1 + $0x328] ss:$28 sps:$4 sm:$0xff]   ;;  %v1076_v30 = vld [vmem:[#allocation2 + $0x1f0] sm:$0xff] }
 0x217   :  { %4938 = vmatpush1.bf16.msra.mxu0 %v9727_v46  ;;  %7892 = vmatpush3.bf16.msra.mxu1 %v9766_v15  ;;  %v9773_v46 = vld [vmem:[%s14553_s1 + $0x168] ss:$28 sps:$4 sm:$0xff]  }
 0x218   :  { %4939 = vmatprep.subr.bf16.mxu0 %v9732_v14  ;;  %7893 = vmatprep.subr.bf16.mxu1 %v9767_v10  ;;  %v1083_v15 = vld [vmem:[#allocation2 + $0x228] sm:$0xff]  ;;  %v9774_v14 = vld [vmem:[%s14553_s1 + $0x360] ss:$28 sps:$4 sm:$0xff]  }
 0x219   :  { %7825 = vmatmul.mubr.msk.bf16.gmra.mrb[12].mxu0 %vm14956_vm14, %v11891_v40  ;;  %7839 = vmatmul.mubr.msk.bf16.gmra.mrb[12].mxu1 %vm14957_vm13, %v11891_v40  ;;  %v11923_v10 = vpack.c.bf16 %v1083_v15, %v1076_v30  ;;  %v1090_v30 = vld [vmem:[#allocation2 + $0x260] sm:$0xff]  ;;  %vm14977_vm14 = vmmov %vm14939_vm0 }
 0x21a   :  { %4134 = vmatprep.mubr.bf16.mxu0 %v14690_v32  ;;  %4826 = vmatprep.mubr.bf16.mxu1 %v14690_v32  ;;  %vm14979_vm13 = vmmov %vm14939_vm0 }
 0x21b   :  { %4940 = vmatpush1.bf16.msra.mxu0 %v9730_v44  ;;  %7894 = vmatpush3.bf16.msra.mxu1 %v9768_v18  ;;  %14958 = vst [vmem:[#allocation46_spill] sm:$0xff] %v11923_v10  ;;  %v9736_v44 = vld [vmem:[%s14553_s1 + $0x1d0] ss:$28 sps:$4 sm:$0xff]   ;;  %v9775_v18 = vld [vmem:[%s14553_s1 + $0x1a0] ss:$28 sps:$4 sm:$0xff]  }
 0x21c   :  { %4941 = vmatprep.subr.bf16.mxu0 %v9735_v49  ;;  %7895 = vmatprep.subr.bf16.mxu1 %v9772_v28  ;;  %v9743_v49 = vld [vmem:[%s14553_s1 + $0x20c] ss:$28 sps:$4 sm:$0xff]  }
 0x21d   :  { %v9741_v28 = vld [vmem:[%s14553_s1 + $0x208] ss:$28 sps:$4 sm:$0xff]  }
 0x21f   :  { %4942 = vmatpush1.bf16.msra.mxu0 %v9733_v51  ;;  %7896 = vmatpush3.bf16.msra.mxu1 %v9773_v46  ;;  %v1097_v51 = vld [vmem:[#allocation2 + $0x298] sm:$0xff]  ;;  %v9746_v46 = vld [vmem:[%s14553_s1 + $0x244] ss:$28 sps:$4 sm:$0xff]  }
 0x220   :  { %4943 = vmatprep.subr.bf16.mxu0 %v9738_v31  ;;  %7897 = vmatprep.subr.bf16.mxu1 %v9774_v14  ;;  %v11946_v15 = vpack.c.bf16 %v1097_v51, %v1090_v30  ;;  %v9744_v31 = vld [vmem:[%s14553_s1 + $0x240] ss:$28 sps:$4 sm:$0xff]   ;;  %v1104_v30 = vld [vmem:[#allocation2 + $0x2d0] sm:$0xff] }
 0x221   :  { %7826 = vmatmul.mubr.msk.bf16.gmra.mrb[16].mxu0 %vm14959_vm1, %v11923_v10  ;;  %7840 = vmatmul.mubr.msk.bf16.gmra.mrb[16].mxu1 %vm14960_vm2, %v11923_v10  ;;  %v9751_v14 = vld [vmem:[%s14553_s1 + $0x27c] ss:$28 sps:$4 sm:$0xff]   ;;  %vm14980_vm1 = vmmov %vm14939_vm0 }
 0x222   :  { %4144 = vmatprep.mubr.bf16.mxu0 %v14690_v32  ;;  %4836 = vmatprep.mubr.bf16.mxu1 %v14690_v32  ;;  %14961 = vst [vmem:[#allocation47_spill] sm:$0xff] %v11946_v15  ;;  %vm14982_vm2 = vmmov %vm14939_vm0 }
 0x223   :  { %4944 = vmatpush1.bf16.msra.mxu0 %v9736_v44  ;;  %7898 = vmatpush3.bf16.msra.mxu1 %v9775_v18  ;;  %v9803_v44 = vld [vmem:[%s14553_s1 + $0x558] ss:$28 sps:$4 sm:$0xff]  }
 0x224   :  { %4945 = vmatprep.subr.bf16.mxu0 %v9743_v49  ;;  %v9749_v18 = vld [vmem:[%s14553_s1 + $0x278] ss:$28 sps:$4 sm:$0xff]   ;;  %v1111_v49 = vld [vmem:[#allocation2 + $0x308] sm:$0xff]  ;;  %7983 = vmatprep.subr.bf16.mxu1 %v9803_v44  ;;  %v1118_v44 = vld [vmem:[#allocation2 + $0x340] sm:$0xff] }
 0x225   :  { %v11969_v51 = vpack.c.bf16 %v1111_v49, %v1104_v30  ;;  %v9765_v49 = vld [vmem:[%s14553_s1 + $0x324] ss:$28 sps:$4 sm:$0xff]  }
 0x226   :  { %v9763_v30 = vld [vmem:[%s14553_s1 + $0x320] ss:$28 sps:$4 sm:$0xff]  }
 0x227   :  { %4946 = vmatpush1.bf16.msra.mxu0 %v9741_v28  ;;  %v9754_v28 = vld [vmem:[%s14553_s1 + $0x2b4] ss:$28 sps:$4 sm:$0xff]   ;;  %14963 = vst [vmem:[#allocation48_spill] sm:$0xff] %v11969_v51 }
 0x228   :  { %4947 = vmatprep.subr.bf16.mxu0 %v9746_v46  ;;  %v9752_v46 = vld [vmem:[%s14553_s1 + $0x2b0] ss:$28 sps:$4 sm:$0xff]  }
 0x229   :  { %7827 = vmatmul.mubr.msk.bf16.gmra.mrb[20].mxu0 %vm14939_vm0, %v11946_v15  ;;  %7841 = vmatmul.mubr.msk.bf16.gmra.mrb[20].mxu1 %vm14962_vm3, %v11946_v15  ;;  %vm14984_vm3 = vmmov %vm14939_vm0 }
 0x22a   :  { %4154 = vmatprep.mubr.bf16.mxu0 %v14690_v32  ;;  %4846 = vmatprep.mubr.bf16.mxu1 %v14690_v32 }
 0x22b   :  { %4948 = vmatpush1.bf16.msra.mxu0 %v9744_v31  ;;  %v9759_v31 = vld [vmem:[%s14553_s1 + $0x2ec] ss:$28 sps:$4 sm:$0xff]  }
 0x22c   :  { %4949 = vmatprep.subr.bf16.mxu0 %v9751_v14  ;;  %v9757_v14 = vld [vmem:[%s14553_s1 + $0x2e8] ss:$28 sps:$4 sm:$0xff]  }
 0x22f   :  { %4950 = vmatpush1.bf16.msra.mxu0 %v9749_v18  ;;  %v1125_v18 = vld [vmem:[#allocation2 + $0x378] sm:$0xff] }
 0x230   :  { %4951 = vmatprep.subr.bf16.mxu0 %v9754_v28  ;;  %v11989_v28 = vpack.c.bf16 %v1125_v18, %v1118_v44  ;;  %v1139_v44 = vld [vmem:[#allocation2 + $0x3e8] sm:$0xff]  ;;  %v9778_v18 = vld [vmem:[%s14553_s1 + $0x394] ss:$28 sps:$4 sm:$0xff]  }
 0x231   :  { %7828 = vmatmul.mubr.msk.bf16.gmra.mrb[24].mxu0 %vm14964_vm4, %v11969_v51  ;;  %7842 = vmatmul.mubr.msk.bf16.gmra.mrb[24].mxu1 %vm14965_vm5, %v11969_v51  ;;  %vm14985_vm4 = vmmov %vm14939_vm0 }
 0x232   :  { %4164 = vmatprep.mubr.bf16.mxu0 %v14690_v32  ;;  %4856 = vmatprep.mubr.bf16.mxu1 %v14690_v32  ;;  %14966 = vst [vmem:[#allocation49_spill] sm:$0xff] %v11989_v28  ;;  %vm15123_vm5 = vmmov %vm14939_vm0 }
 0x233   :  { %4952 = vmatpush1.bf16.msra.mxu0 %v9752_v46  ;;  %v9771_v46 = vld [vmem:[%s14553_s1 + $0x35c] ss:$28 sps:$4 sm:$0xff]  }
 0x234   :  { %4953 = vmatprep.subr.bf16.mxu0 %v9759_v31  ;;  %v9769_v31 = vld [vmem:[%s14553_s1 + $0x358] ss:$28 sps:$4 sm:$0xff]  }
 0x237   :  { %4954 = vmatpush1.bf16.msra.mxu0 %v9757_v14  ;;  %v1132_v14 = vld [vmem:[#allocation2 + $0x3b0] sm:$0xff] }
 0x238   :  { %4955 = vmatprep.subr.bf16.mxu0 %v9765_v49  ;;  %v12009_v49 = vpack.c.bf16 %v1139_v44, %v1132_v14  ;;  %v1167_v14 = vld [vmem:[#allocation2 + $0x4c8] sm:$0xff] }
 0x239   :  { %7829 = vmatmul.mubr.msk.bf16.gmra.mrb[28].mxu0 %vm14967_vm15, %v11989_v28  ;;  %7843 = vmatmul.mubr.msk.bf16.gmra.mrb[28].mxu1 %vm14968_vm6, %v11989_v28  ;;  %vm15126_vm15 = vmmov %vm14939_vm0 }
 0x23a   :  { %4174 = vmatprep.mubr.bf16.mxu0 %v14690_v32  ;;  %4866 = vmatprep.mubr.bf16.mxu1 %v14690_v32  ;;  %14969 = vst [vmem:[#allocation50_spill] sm:$0xff] %v12009_v49  ;;  %vm15128_vm6 = vmmov %vm14939_vm0 }
 0x23b   :  { %4956 = vmatpush1.bf16.msra.mxu0 %v9763_v30  ;;  %v1146_v30 = vld [vmem:[#allocation2 + $0x420] sm:$0xff] }
 0x23c   :  { %4957 = vmatprep.subr.bf16.mxu0 %v9771_v46  ;;  %v1153_v46 = vld [vmem:[#allocation2 + $0x458] sm:$0xff] }
 0x23d   :  { %v12017_v28 = vpack.c.bf16 %v1153_v46, %v1146_v30  ;;  %v1174_v30 = vld [vmem:[#allocation2 + $0x500] sm:$0xff] }
 0x23f   :  { %4958 = vmatpush1.bf16.msra.mxu0 %v9769_v31  ;;  %14972 = vst [vmem:[#allocation51_spill] sm:$0xff] %v12017_v28  ;;  %v1160_v31 = vld [vmem:[#allocation2 + $0x490] sm:$0xff] }
 0x240   :  { %5100 = vmatprep.subr.bf16.mxu0 %v9778_v18  ;;  %v12025_v44 = vpack.c.bf16 %v1167_v14, %v1160_v31  ;;  %v1181_v18 = vld [vmem:[#allocation2 + $0x538] sm:$0xff]  ;;  %v1188_v31 = vld [vmem:[#allocation2 + $0x570] sm:$0xff]  ;;  %v1195_v14 = vld [vmem:[#allocation2 + $0x5a8] sm:$0xff] }
 0x241   :  { %7830 = vmatmul.mubr.msk.bf16.gmra.mrb[32].mxu0 %vm14970_vm7, %v12009_v49  ;;  %7844 = vmatmul.mubr.msk.bf16.gmra.mrb[32].mxu1 %vm14971_vm8, %v12009_v49  ;;  %v12033_v46 = vpack.c.bf16 %v1181_v18, %v1174_v30  ;;  %v1202_v18 = vld [vmem:[#allocation2 + $0x5e0] sm:$0xff]  ;;  %v1209_v30 = vld [vmem:[#allocation2 + $0x618] sm:$0xff]  ;;  %vm15137_vm7 = vmmov %vm14939_vm0 }
 0x242   :  { %4184 = vmatprep.mubr.bf16.mxu0 %v14690_v32  ;;  %4876 = vmatprep.mubr.bf16.mxu1 %v14690_v32  ;;  %14975 = vst [vmem:[#allocation52_spill] sm:$0xff] %v12025_v44  ;;  %vm15156_vm8 = vmmov %vm14939_vm0 }
 0x243   :  { %14978 = vst [vmem:[#allocation53_spill] sm:$0xff] %v12033_v46 }
 0x249   :  { %7831 = vmatmul.mubr.msk.bf16.gmra.mrb[36].mxu0 %vm14973_vm9, %v12017_v28  ;;  %7845 = vmatmul.mubr.msk.bf16.gmra.mrb[36].mxu1 %vm14974_vm10, %v12017_v28  ;;  %vm15158_vm9 = vmmov %vm14939_vm0 }
 0x24a   :  { %4194 = vmatprep.mubr.bf16.mxu0 %v14690_v32  ;;  %4886 = vmatprep.mubr.bf16.mxu1 %v14690_v32  ;;  %vm15166_vm10 = vmmov %vm14939_vm0 }
 0x251   :  { %7832 = vmatmul.mubr.msk.bf16.gmra.mrb[40].mxu0 %vm14976_vm12, %v12025_v44  ;;  %7846 = vmatmul.mubr.msk.bf16.gmra.mrb[40].mxu1 %vm14977_vm14, %v12025_v44  ;;  %v12041_v44 = vpack.c.bf16 %v1195_v14, %v1188_v31  ;;  %v9776_v31 = vld [vmem:[%s14553_s1 + $0x390] ss:$28 sps:$4 sm:$0xff]   ;;  %vm15183_vm12 = vmmov %vm14939_vm0 }
 0x252   :  { %4204 = vmatprep.mubr.bf16.mxu0 %v14690_v32  ;;  %4896 = vmatprep.mubr.bf16.mxu1 %v14690_v32  ;;  %v9781_v14 = vld [vmem:[%s14553_s1 + $0x3cc] ss:$28 sps:$4 sm:$0xff]   ;;  %vm15185_vm14 = vmmov %vm14939_vm0 }
 0x253   :  { %14981 = vst [vmem:[#allocation54_spill] sm:$0xff] %v12041_v44 }
 0x259   :  { %7833 = vmatmul.mubr.msk.bf16.gmra.mrb[44].mxu0 %vm14979_vm13, %v12033_v46  ;;  %7847 = vmatmul.mubr.msk.bf16.gmra.mrb[44].mxu1 %vm14980_vm1, %v12033_v46  ;;  %v12049_v46 = vpack.c.bf16 %v1209_v30, %v1202_v18  ;;  %v9804_v18 = vld [vmem:[%s14553_s1 + $0x398] ss:$28 sps:$4 sm:$0xff]   ;;  %v9779_v30 = vld [vmem:[%s14553_s1 + $0x3c8] ss:$28 sps:$4 sm:$0xff]   ;;  %vm15193_vm13 = vmmov %vm14939_vm0 }
 0x25a   :  { %4214 = vmatprep.mubr.bf16.mxu0 %v14690_v32  ;;  %4906 = vmatprep.mubr.bf16.mxu1 %v14690_v32  ;;  %vm15212_vm1 = vmmov %vm14939_vm0 }
 0x25b   :  { %14983 = vst [vmem:[#allocation55_spill] sm:$0xff] %v12049_v46 }
 0x261   :  { %7834 = vmatmul.mubr.msk.bf16.gmra.mrb[48].mxu0 %vm14982_vm2, %v12041_v44  ;;  %7848 = vmatmul.mubr.msk.bf16.gmra.mrb[48].mxu1 %vm14939_vm0, %v12041_v44  ;;  %vm15214_vm2 = vmmov %vm14939_vm0 }
 0x262   :  { %4224 = vmatprep.mubr.bf16.mxu0 %v14690_v32  ;;  %4916 = vmatprep.mubr.bf16.mxu1 %v14690_v32  ;;  %v9784_v32 = vld [vmem:[%s14553_s1 + $0x404] ss:$28 sps:$4 sm:$0xff]  }
 0x269   :  { %7835 = vmatmul.mubr.msk.bf16.gmra.mrb[52].mxu0 %vm14984_vm3, %v12049_v46  ;;  %7849 = vmatmul.mubr.msk.bf16.gmra.mrb[52].mxu1 %vm14985_vm4, %v12049_v46  ;;  %v14995_v46 = vld [vmem:[#allocation11_spill] sm:$0xff]  ;;  %vm15241_vm3 = vmmov %vm14939_vm0 }
 0x26a   :  { %4959 = vmatprep.mubr.bf16.mxu0 %v10361_v17  ;;  %5651 = vmatprep.mubr.bf16.mxu1 %v10361_v17  ;;  %v9811_v17 = vld [vmem:[%s14553_s1 + $0x590] ss:$28 sps:$4 sm:$0xff]   ;;  %vm15243_vm4 = vmmov %vm14939_vm0 }
 0x271   :  { %4960 = vmatmul.mubr.bf16.vlgmr.msra.gmra.mrb[56].mxu0 %v10377_v26  ;;  %5652 = vmatmul.mubr.bf16.vlgmr.msra.gmra.mrb[56].mxu1 %v10377_v26  ;;  %v9812_v26 = vld [vmem:[%s14553_s1 + $0x3d0] ss:$28 sps:$4 sm:$0xff]  }
 0x272   :  { %5101 = vmatpush1.bf16.msra.mxu0 %v9776_v31  ;;  %4969 = vmatprep.mubr.bf16.mxu0 %v10423_v41  ;;  %v9782_v31 = vld [vmem:[%s14553_s1 + $0x400] ss:$28 sps:$4 sm:$0xff]  }
 0x273   :  { %5659 = vmatprep.mubr.bf16.mxu1 %v10423_v41  ;;  %5102 = vmatprep.subr.bf16.mxu0 %v9781_v14  ;;  %v9819_v41 = vld [vmem:[%s14553_s1 + $0x5c8] ss:$28 sps:$4 sm:$0xff]   ;;  %v9787_v14 = vld [vmem:[%s14553_s1 + $0x43c] ss:$28 sps:$4 sm:$0xff]  }
 0x274   :  { %7984 = vmatpush3.bf16.msra.mxu1 %v9804_v18  ;;  %v9820_v18 = vld [vmem:[%s14553_s1 + $0x408] ss:$28 sps:$4 sm:$0xff]  }
 0x275   :  { %7985 = vmatprep.subr.bf16.mxu1 %v9811_v17  ;;  %v9785_v17 = vld [vmem:[%s14553_s1 + $0x438] ss:$28 sps:$4 sm:$0xff]  }
 0x276   :  { %5103 = vmatpush1.bf16.msra.mxu0 %v9779_v30  ;;  %v9790_v30 = vld [vmem:[%s14553_s1 + $0x474] ss:$28 sps:$4 sm:$0xff]  }
 0x277   :  { %5104 = vmatprep.subr.bf16.mxu0 %v9784_v32  ;;  %v9824_v32 = vld [vmem:[%s14553_s1 + $0x600] ss:$28 sps:$4 sm:$0xff]  }
 0x278   :  { %7986 = vmatpush3.bf16.msra.mxu1 %v9812_v26  ;;  %v9826_v26 = vld [vmem:[%s14553_s1 + $0x638] ss:$28 sps:$4 sm:$0xff]  }
 0x279   :  { %4970 = vmatmul.mubr.bf16.gmra.mrb[60].mxu0 %v10445_v50  ;;  %5660 = vmatmul.mubr.bf16.gmra.mrb[60].mxu1 %v10445_v50  ;;  %v9825_v50 = vld [vmem:[%s14553_s1 + $0x440] ss:$28 sps:$4 sm:$0xff]  }
 0x27a   :  { %4979 = vmatprep.mubr.bf16.mxu0 %v10493_v5  ;;  %5667 = vmatprep.mubr.bf16.mxu1 %v10493_v5  ;;  %v9788_v5 = vld [vmem:[%s14553_s1 + $0x470] ss:$28 sps:$4 sm:$0xff]  }
 0x27b   :  { %5105 = vmatpush1.bf16.msra.mxu0 %v9782_v31  ;;  %7987 = vmatprep.subr.bf16.mxu1 %v9819_v41  ;;  %v9793_v31 = vld [vmem:[%s14553_s1 + $0x4ac] ss:$28 sps:$4 sm:$0xff]   ;;  %v9830_v41 = vld [vmem:[%s14553_s1 + $0x478] ss:$28 sps:$4 sm:$0xff]  }
 0x27c   :  { %5106 = vmatprep.subr.bf16.mxu0 %v9787_v14  ;;  %7988 = vmatpush3.bf16.msra.mxu1 %v9820_v18  ;;  %v9831_v14 = vld [vmem:[%s14553_s1 + $0x670] ss:$28 sps:$4 sm:$0xff]   ;;  %v9791_v18 = vld [vmem:[%s14553_s1 + $0x4a8] ss:$28 sps:$4 sm:$0xff]  }
 0x27d   :  { %7989 = vmatprep.subr.bf16.mxu1 %v9824_v32  ;;  %v9796_v32 = vld [vmem:[%s14553_s1 + $0x4e4] ss:$28 sps:$4 sm:$0xff]  }
 0x27f   :  { %5107 = vmatpush1.bf16.msra.mxu0 %v9785_v17  ;;  %v9836_v17 = vld [vmem:[%s14553_s1 + $0x6a8] ss:$28 sps:$4 sm:$0xff]  }
 0x280   :  { %5108 = vmatprep.subr.bf16.mxu0 %v9790_v30  ;;  %7990 = vmatpush3.bf16.msra.mxu1 %v9825_v50  ;;  %v9799_v30 = vld [vmem:[%s14553_s1 + $0x51c] ss:$28 sps:$4 sm:$0xff]   ;;  %v9837_v50 = vld [vmem:[%s14553_s1 + $0x4e8] ss:$28 sps:$4 sm:$0xff]  }
 0x281   :  { %4980 = vmatmul.mubr.bf16.gmra.mrb[64].mxu0 %v10515_v12  ;;  %5668 = vmatmul.mubr.bf16.gmra.mrb[64].mxu1 %v10515_v12  ;;  %v9832_v12 = vld [vmem:[%s14553_s1 + $0x4b0] ss:$28 sps:$4 sm:$0xff]  }
 0x282   :  { %4989 = vmatprep.mubr.bf16.mxu0 %v10565_v37  ;;  %5675 = vmatprep.mubr.bf16.mxu1 %v10565_v37  ;;  %v9794_v37 = vld [vmem:[%s14553_s1 + $0x4e0] ss:$28 sps:$4 sm:$0xff]  }
 0x283   :  { %5109 = vmatpush1.bf16.msra.mxu0 %v9788_v5  ;;  %7991 = vmatprep.subr.bf16.mxu1 %v9826_v26  ;;  %v9838_v5 = vld [vmem:[%s14553_s1 + $0x6e0] ss:$28 sps:$4 sm:$0xff]   ;;  %v9797_v26 = vld [vmem:[%s14553_s1 + $0x518] ss:$28 sps:$4 sm:$0xff]  }
 0x284   :  { %5110 = vmatprep.subr.bf16.mxu0 %v9793_v31  ;;  %7992 = vmatpush3.bf16.msra.mxu1 %v9830_v41  ;;  %v9802_v31 = vld [vmem:[%s14553_s1 + $0x554] ss:$28 sps:$4 sm:$0xff]   ;;  %v9807_v41 = vld [vmem:[%s14553_s1 + $0x58c] ss:$28 sps:$4 sm:$0xff]  }
 0x285   :  { %7993 = vmatprep.subr.bf16.mxu1 %v9831_v14  ;;  %v9805_v14 = vld [vmem:[%s14553_s1 + $0x588] ss:$28 sps:$4 sm:$0xff]  }
 0x287   :  { %5111 = vmatpush1.bf16.msra.mxu0 %v9791_v18  ;;  %v9810_v18 = vld [vmem:[%s14553_s1 + $0x5c4] ss:$28 sps:$4 sm:$0xff]  }
 0x288   :  { %5112 = vmatprep.subr.bf16.mxu0 %v9796_v32  ;;  %7994 = vmatpush3.bf16.msra.mxu1 %v9832_v12  ;;  %v9808_v32 = vld [vmem:[%s14553_s1 + $0x5c0] ss:$28 sps:$4 sm:$0xff]   ;;  %v9818_v12 = vld [vmem:[%s14553_s1 + $0x634] ss:$28 sps:$4 sm:$0xff]  }
 0x289   :  { %4990 = vmatmul.mubr.bf16.gmra.mrb[68].mxu0 %v10587_v47  ;;  %5676 = vmatmul.mubr.bf16.gmra.mrb[68].mxu1 %v10587_v47  ;;  %v9839_v47 = vld [vmem:[%s14553_s1 + $0x520] ss:$28 sps:$4 sm:$0xff]  }
 0x28a   :  { %4999 = vmatprep.mubr.bf16.mxu0 %v10636_v6  ;;  %5683 = vmatprep.mubr.bf16.mxu1 %v10636_v6  ;;  %v9800_v6 = vld [vmem:[%s14553_s1 + $0x550] ss:$28 sps:$4 sm:$0xff]  }
 0x28b   :  { %5113 = vmatpush1.bf16.msra.mxu0 %v9794_v37  ;;  %7995 = vmatprep.subr.bf16.mxu1 %v9836_v17  ;;  %v9816_v37 = vld [vmem:[%s14553_s1 + $0x630] ss:$28 sps:$4 sm:$0xff]   ;;  %v9821_v17 = vld [vmem:[%s14553_s1 + $0x668] ss:$28 sps:$4 sm:$0xff]  }
 0x28c   :  { %5114 = vmatprep.subr.bf16.mxu0 %v9799_v30  ;;  %7996 = vmatpush3.bf16.msra.mxu1 %v9837_v50  ;;  %v9829_v30 = vld [vmem:[%s14553_s1 + $0x6a4] ss:$28 sps:$4 sm:$0xff]   ;;  %v9833_v50 = vld [vmem:[%s14553_s1 + $0x6d8] ss:$28 sps:$4 sm:$0xff]  }
 0x28d   :  { %7997 = vmatprep.subr.bf16.mxu1 %v9838_v5  ;;  %v9842_v5 = vld [vmem:[%s14553_s1 + $0x714] ss:$28 sps:$4 sm:$0xff]  }
 0x28f   :  { %5115 = vmatpush1.bf16.msra.mxu0 %v9797_v26  ;;  %v14988_v26 = vld [vmem:[#allocation5_spill] sm:$0xff] }
 0x290   :  { %5116 = vmatprep.subr.bf16.mxu0 %v9802_v31  ;;  %7998 = vmatpush3.bf16.msra.mxu1 %v9839_v47  ;;  %v14989_v31 = vld [vmem:[#allocation6_spill] sm:$0xff]  ;;  %v14990_v47 = vld [vmem:[#allocation7_spill] sm:$0xff] }
 0x291   :  { %5000 = vmatmul.mubr.bf16.gmra.mrb[72].mxu0 %v10652_v11  ;;  %5684 = vmatmul.mubr.bf16.gmra.mrb[72].mxu1 %v10652_v11  ;;  %v9815_v11 = vld [vmem:[%s14553_s1 + $0x5fc] ss:$28 sps:$4 sm:$0xff]  }
 0x292   :  { %5009 = vmatprep.mubr.bf16.mxu0 %v10701_v19  ;;  %5691 = vmatprep.mubr.bf16.mxu1 %v10701_v19  ;;  %v9813_v19 = vld [vmem:[%s14553_s1 + $0x5f8] ss:$28 sps:$4 sm:$0xff]  }
 0x293   :  { %5117 = vmatpush1.bf16.msra.mxu0 %v9800_v6  ;;  %v14992_v6 = vld [vmem:[#allocation8_spill] sm:$0xff] }
 0x294   :  { %5118 = vmatprep.subr.bf16.mxu0 %v9807_v41 }
 0x297   :  { %5119 = vmatpush1.bf16.msra.mxu0 %v9805_v14 }
 0x298   :  { %5120 = vmatprep.subr.bf16.mxu0 %v9810_v18  ;;  %v1700_v18 = vld [vmem:[%s14554_s2] sm:$0xff] }
 0x299   :  { %5010 = vmatmul.mubr.bf16.gmra.mrb[76].mxu0 %v10726_v53  ;;  %5692 = vmatmul.mubr.bf16.gmra.mrb[76].mxu1 %v10726_v53  ;;  %v9823_v53 = vld [vmem:[%s14553_s1 + $0x66c] ss:$28 sps:$4 sm:$0xff]  }
 0x29a   :  { %5019 = vmatprep.mubr.bf16.mxu0 %v10746_v3  ;;  %5699 = vmatprep.mubr.bf16.mxu1 %v10746_v3  ;;  %v9867_v3 = vld [vmem:[%s14553_s1 + $0x8d8] ss:$28 sps:$4 sm:$0xff]  }
 0x29b   :  { %5121 = vmatpush1.bf16.msra.mxu0 %v9808_v32  ;;  %8083 = vmatprep.subr.bf16.mxu1 %v9867_v3 }
 0x29c   :  { %5122 = vmatprep.subr.bf16.mxu0 %v9815_v11 }
 0x29f   :  { %5123 = vmatpush1.bf16.msra.mxu0 %v9813_v19  ;;  %v14993_v19 = vld [vmem:[#allocation9_spill] sm:$0xff] }
 0x2a0   :  { %5124 = vmatprep.subr.bf16.mxu0 %v9818_v12 }
 0x2a1   :  { %5020 = vmatmul.mubr.bf16.gmra.mrb[80].mxu0 %v10756_v20  ;;  %5700 = vmatmul.mubr.bf16.gmra.mrb[80].mxu1 %v10756_v20  ;;  %v9827_v20 = vld [vmem:[%s14553_s1 + $0x6a0] ss:$28 sps:$4 sm:$0xff]  }
 0x2a2   :  { %5029 = vmatprep.mubr.bf16.mxu0 %v10773_v21  ;;  %5707 = vmatprep.mubr.bf16.mxu1 %v10773_v21  ;;  %v9835_v21 = vld [vmem:[%s14553_s1 + $0x6dc] ss:$28 sps:$4 sm:$0xff]  }
 0x2a3   :  { %5125 = vmatpush1.bf16.msra.mxu0 %v9816_v37 }
 0x2a4   :  { %5126 = vmatprep.subr.bf16.mxu0 %v9823_v53  ;;  %v14994_v53 = vld [vmem:[#allocation10_spill] sm:$0xff] }
 0x2a7   :  { %5127 = vmatpush1.bf16.msra.mxu0 %v9821_v17 }
 0x2a8   :  { %5128 = vmatprep.subr.bf16.mxu0 %v9829_v30 }
 0x2a9   :  { %5030 = vmatmul.mubr.bf16.gmra.mrb[84].mxu0 %v10782_v29  ;;  %5708 = vmatmul.mubr.bf16.gmra.mrb[84].mxu1 %v10782_v29  ;;  %v14986_v29 = vld [vmem:[#allocation3_spill] sm:$0xff] }
 0x2aa   :  { %5039 = vmatprep.mubr.bf16.mxu0 %v10806_v45  ;;  %5715 = vmatprep.mubr.bf16.mxu1 %v10806_v45  ;;  %v14987_v45 = vld [vmem:[#allocation4_spill] sm:$0xff] }
 0x2ab   :  { %5129 = vmatpush1.bf16.msra.mxu0 %v9827_v20 }
 0x2ac   :  { %5130 = vmatprep.subr.bf16.mxu0 %v9835_v21 }
 0x2af   :  { %5131 = vmatpush1.bf16.msra.mxu0 %v9833_v50 }
 0x2b0   :  { %5273 = vmatprep.subr.bf16.mxu0 %v9842_v5 }
 0x2b1   :  { %5040 = vmatmul.mubr.bf16.gmra.mrb[88].mxu0 %v10815_v52  ;;  %5716 = vmatmul.mubr.bf16.gmra.mrb[88].mxu1 %v10815_v52  ;;  %v1702_v52 = vlaneseq }
 0x2b2   :  { %5049 = vmatprep.mubr.bf16.mxu0 %v10836_v0  ;;  %5723 = vmatprep.mubr.bf16.mxu1 %v10836_v0 }
 0x2b3   :  { %v12247_v0 = vshrl.u32 %v1702_v52, 7 }
 0x2b5   :  { %14991 = vst [vmem:[#allocation3_spill] sm:$0xff] %v12247_v0  ;;  %v1704_v41 = vsub.s32 0, %v12247_v0  ;;  %v1712_v14 = vsub.s32 2, %v12247_v0  ;;  %v1708_v32 = vsub.s32 1, %v12247_v0  ;;  %v1716_v11 = vsub.s32 3, %v12247_v0 }
 0x2b7   :  { %v12260_v12 = vrot.slane %v1700_v18, %v1704_v41  ;;  %v12262_v37 = vrot.slane %v1700_v18, %v1712_v14  ;;  %v12266_v3 = vrot.slane %v1700_v18, %v1708_v32  ;;  %v12268_v17 = vrot.slane %v1700_v18, %v1716_v11  ;;  %v6397_v14 = vld [vmem:[%s14555_s3 + $0x10] sm:$0xff] }
 0x2b9   :  { %5050 = vmatmul.mubr.bf16.gmra.mrb[92].mxu0 %v14986_v29  ;;  %5724 = vmatmul.mubr.bf16.gmra.mrb[92].mxu1 %v14986_v29 }
 0x2ba   :  { %5059 = vmatprep.mubr.bf16.mxu0 %v14987_v45  ;;  %5731 = vmatprep.mubr.bf16.mxu1 %v14987_v45 }
 0x2c1   :  { %5060 = vmatmul.mubr.bf16.gmra.mrb[96].mxu0 %v14988_v26  ;;  %5732 = vmatmul.mubr.bf16.gmra.mrb[96].mxu1 %v14988_v26 }
 0x2c2   :  { %5069 = vmatprep.mubr.bf16.mxu0 %v14989_v31  ;;  %5739 = vmatprep.mubr.bf16.mxu1 %v14989_v31 }
 0x2c9   :  { %5070 = vmatmul.mubr.bf16.gmra.mrb[100].mxu0 %v14990_v47  ;;  %5740 = vmatmul.mubr.bf16.gmra.mrb[100].mxu1 %v14990_v47 }
 0x2ca   :  { %5079 = vmatprep.mubr.bf16.mxu0 %v14992_v6  ;;  %5747 = vmatprep.mubr.bf16.mxu1 %v14992_v6  ;;  %v6395_v6 = vld [vmem:[%s14555_s3] sm:$0xff] }
 0x2d1   :  { %5080 = vmatmul.mubr.bf16.gmra.mrb[104].mxu0 %v14993_v19  ;;  %5748 = vmatmul.mubr.bf16.gmra.mrb[104].mxu1 %v14993_v19 }
 0x2d2   :  { %5089 = vmatprep.mubr.bf16.mxu0 %v14994_v53  ;;  %5755 = vmatprep.mubr.bf16.mxu1 %v14994_v53 }
 0x2d4   :  { %v4096_v30 = vpop.f32.mrb[0].mxu0  ;;  %v4788_v20 = vpop.f32.mrb[0].mxu1 }
 0x2d5   :  { %v8715_v21 = vadd.f32 %v4096_v30, %v12260_v12  ;;  %v8771_v50 = vadd.f32 %v4788_v20, %v12262_v37  ;;  %v4098_v5 = vpop.f32.mrb[1].mxu0  ;;  %v4790_v29 = vpop.f32.mrb[1].mxu1  ;;  %v6396_v30 = vld [vmem:[%s14555_s3 + $0x8] sm:$0xff] }
 0x2d6   :  { %v8716_v45 = vadd.f32 %v4098_v5, %v12266_v3  ;;  %v8772_v26 = vadd.f32 %v4790_v29, %v12268_v17  ;;  %v4100_v31 = vpop.f32.mrb[2].mxu0  ;;  %v4792_v52 = vpop.f32.mrb[2].mxu1 }
 0x2d7   :  { %v6199_v47 = vmax.f32 %v8715_v21, 0.0  ;;  %v6201_v41 = vmax.f32 %v8771_v50, 0.0  ;;  %v8717_v18 = vadd.f32 %v4100_v31, %v12260_v12  ;;  %v8773_v32 = vadd.f32 %v4792_v52, %v12262_v37  ;;  %v4102_v11 = vpop.f32.mrb[3].mxu0  ;;  %v4794_v19 = vpop.f32.mrb[3].mxu1  ;;  %v6402_v21 = vld [vmem:[%s14555_s3 + $0x38] sm:$0xff]  ;;  %v6404_v50 = vld [vmem:[%s14555_s3 + $0x48] sm:$0xff] }
 0x2d8   :  { %v6200_v53 = vmax.f32 %v8716_v45, 0.0  ;;  %v6202_v20 = vmax.f32 %v8772_v26, 0.0  ;;  %v8718_v5 = vadd.f32 %v4102_v11, %v12266_v3  ;;  %v8774_v29 = vadd.f32 %v4794_v19, %v12268_v17  ;;  %v6403_v45 = vld [vmem:[%s14555_s3 + $0x40] sm:$0xff]  ;;  %v6398_v26 = vld [vmem:[%s14555_s3 + $0x18] sm:$0xff]  ;;  %v6405_v11 = vld [vmem:[%s14555_s3 + $0x50] sm:$0xff] }
 0x2d9   :  { %v6206_v31 = vmax.f32 %v8717_v18, 0.0  ;;  %v6208_v52 = vmax.f32 %v8773_v32, 0.0  ;;  %5090 = vmatmul.mubr.bf16.gmra.mrb[108].mxu0 %v14995_v46  ;;  %5756 = vmatmul.mubr.bf16.gmra.mrb[108].mxu1 %v14995_v46  ;;  %v14996_v18 = vld [vmem:[#allocation12_spill] sm:$0xff]  ;;  %v12306_v32 = vmul.f32 %v6395_v6, %v6199_v47  ;;  %v12308_v28 = vmul.f32 %v6397_v14, %v6201_v41  ;;  %v6409_v41 = vld [vmem:[%s14555_s3 + $0x70] sm:$0xff] }
 0x2da   :  { %v6207_v44 = vmax.f32 %v8718_v5, 0.0  ;;  %v6209_v19 = vmax.f32 %v8774_v29, 0.0  ;;  %5132 = vmatprep.mubr.bf16.mxu0 %v14996_v18  ;;  %5796 = vmatprep.mubr.bf16.mxu1 %v14996_v18  ;;  %v12314_v51 = vmul.f32 %v6396_v30, %v6200_v53  ;;  %v12318_v5 = vmul.f32 %v6398_v26, %v6202_v20  ;;  %v6411_v20 = vld [vmem:[%s14555_s3 + $0x80] sm:$0xff]  ;;  %v6410_v18 = vld [vmem:[%s14555_s3 + $0x78] sm:$0xff] }
 0x2db   :  { %14997 = vst [vmem:[#allocation4_spill] sm:$0xff] %v12306_v32  ;;  %14998 = vst [vmem:[#allocation5_spill] sm:$0xff] %v12308_v28  ;;  %v12310_v49 = vmul.f32 %v6402_v21, %v6206_v31  ;;  %v12312_v46 = vmul.f32 %v6404_v50, %v6208_v52  ;;  %v6416_v31 = vld [vmem:[%s14555_s3 + $0xa8] sm:$0xff] }
 0x2dc   :  { %v12316_v15 = vmul.f32 %v6403_v45, %v6207_v44  ;;  %v4106_v10 = vpop.f32.mrb[4].mxu0  ;;  %v4798_v40 = vpop.f32.mrb[4].mxu1  ;;  %v12320_v29 = vmul.f32 %v6405_v11, %v6209_v19 }
 0x2dd   :  { %14999 = vst [vmem:[#allocation6_spill] sm:$0xff] %v12310_v49  ;;  %15000 = vst [vmem:[#allocation7_spill] sm:$0xff] %v12312_v46  ;;  %v8719_v6 = vadd.f32 %v4106_v10, %v12260_v12  ;;  %v8775_v14 = vadd.f32 %v4798_v40, %v12262_v37  ;;  %v4108_v53 = vpop.f32.mrb[5].mxu0  ;;  %v4800_v44 = vpop.f32.mrb[5].mxu1  ;;  %v9840_v40 = vld [vmem:[%s14553_s1 + $0x710] ss:$28 sps:$4 sm:$0xff]  }
 0x2de   :  { %v8720_v21 = vadd.f32 %v4108_v53, %v12266_v3  ;;  %v8776_v50 = vadd.f32 %v4800_v44, %v12268_v17  ;;  %v4110_v10 = vpop.f32.mrb[6].mxu0  ;;  %v4802_v52 = vpop.f32.mrb[6].mxu1 }
 0x2df   :  { %v6213_v11 = vmax.f32 %v8719_v6, 0.0  ;;  %v6215_v19 = vmax.f32 %v8775_v14, 0.0  ;;  %v8721_v53 = vadd.f32 %v4110_v10, %v12260_v12  ;;  %v8777_v44 = vadd.f32 %v4802_v52, %v12262_v37  ;;  %v4112_v30 = vpop.f32.mrb[7].mxu0  ;;  %v4804_v47 = vpop.f32.mrb[7].mxu1  ;;  %v6418_v6 = vld [vmem:[%s14555_s3 + $0xb8] sm:$0xff]  ;;  %v6412_v52 = vld [vmem:[%s14555_s3 + $0x88] sm:$0xff] }
 0x2e0   :  { %v6214_v45 = vmax.f32 %v8720_v21, 0.0  ;;  %v6216_v28 = vmax.f32 %v8776_v50, 0.0  ;;  %v8722_v14 = vadd.f32 %v4112_v30, %v12266_v3  ;;  %v8778_v26 = vadd.f32 %v4804_v47, %v12268_v17  ;;  %v9868_v10 = vld [vmem:[%s14553_s1 + $0x718] ss:$28 sps:$4 sm:$0xff]   ;;  %v6419_v30 = vld [vmem:[%s14555_s3 + $0xc0] sm:$0xff] }
 0x2e1   :  { %v6220_v46 = vmax.f32 %v8721_v53, 0.0  ;;  %v6222_v32 = vmax.f32 %v8777_v44, 0.0  ;;  %v6417_v21 = vld [vmem:[%s14555_s3 + $0xb0] sm:$0xff]  ;;  %v12376_v49 = vmul.f32 %v6409_v41, %v6213_v11  ;;  %v12382_v7 = vmul.f32 %v6411_v20, %v6215_v19  ;;  %v9848_v41 = vld [vmem:[%s14553_s1 + $0x784] ss:$28 sps:$4 sm:$0xff]  }
 0x2e2   :  { %v15001_v50 = vld [vmem:[#allocation13_spill] sm:$0xff]  ;;  %v6221_v53 = vmax.f32 %v8722_v14, 0.0  ;;  %v6223_v44 = vmax.f32 %v8778_v26, 0.0 }
 0x2e3   :  { %5133 = vmatmul.mubr.bf16.vlgmr.msra.gmra.mrb[56].mxu0 %v15001_v50  ;;  %5797 = vmatmul.mubr.bf16.vlgmr.msra.gmra.mrb[112].mxu1 %v15001_v50  ;;  %v9875_v47 = vld [vmem:[%s14553_s1 + $0x910] ss:$28 sps:$4 sm:$0xff]   ;;  %15002 = vst [vmem:[#allocation8_spill] sm:$0xff] %v12376_v49  ;;  %15004 = vst [vmem:[#allocation9_spill] sm:$0xff] %v12382_v7  ;;  %v12384_v4 = vmul.f32 %v6416_v31, %v6220_v46  ;;  %v12386_v50 = vmul.f32 %v6418_v6, %v6222_v32 }
 0x2e4   :  { %5274 = vmatpush1.bf16.msra.mxu0 %v9840_v40  ;;  %5142 = vmatprep.mubr.bf16.mxu0 %v15003_v35  ;;  %v12392_v40 = vmul.f32 %v6410_v18, %v6214_v45  ;;  %v12394_v26 = vmul.f32 %v6417_v21, %v6221_v53  ;;  %v12396_v11 = vmul.f32 %v6419_v30, %v6223_v44  ;;  %v4116_v14 = vpop.f32.mrb[8].mxu0  ;;  %v4808_v20 = vpop.f32.mrb[8].mxu1  ;;  %v9876_v32 = vld [vmem:[%s14553_s1 + $0x750] ss:$28 sps:$4 sm:$0xff]   ;;  %v6423_v45 = vld [vmem:[%s14555_s3 + $0xe0] sm:$0xff]  ;;  %v6430_v53 = vld [vmem:[%s14555_s3 + $0x118] sm:$0xff] }
 0x2e5   :  { %15005 = vst [vmem:[#allocation10_spill] sm:$0xff] %v12384_v4  ;;  %15006 = vst [vmem:[#allocation11_spill] sm:$0xff] %v12386_v50  ;;  %5804 = vmatprep.mubr.bf16.mxu1 %v15003_v35  ;;  %5275 = vmatprep.subr.bf16.mxu0 %v9845_v8  ;;  %v12401_v46 = vmul.f32 %v6412_v52, %v6216_v28  ;;  %v8723_v31 = vadd.f32 %v4116_v14, %v12260_v12  ;;  %v6425_v18 = vld [vmem:[%s14555_s3 + $0xf0] sm:$0xff]  ;;  %v4118_v28 = vpop.f32.mrb[9].mxu0  ;;  %v4810_v6 = vpop.f32.mrb[9].mxu1  ;;  %v6424_v52 = vld [vmem:[%s14555_s3 + $0xe8] sm:$0xff] }
 0x2e6   :  { %15007 = vst [vmem:[#allocation12_spill] sm:$0xff] %v12392_v40  ;;  %15008 = vst [vmem:[#allocation13_spill] sm:$0xff] %v12394_v26  ;;  %8084 = vmatpush3.bf16.msra.mxu1 %v9868_v10  ;;  %v8779_v19 = vadd.f32 %v4808_v20, %v12262_v37  ;;  %v8724_v10 = vadd.f32 %v4118_v28, %v12266_v3  ;;  %v8780_v21 = vadd.f32 %v4810_v6, %v12268_v17  ;;  %v4120_v30 = vpop.f32.mrb[10].mxu0  ;;  %v4812_v44 = vpop.f32.mrb[10].mxu1  ;;  %v6432_v14 = vld [vmem:[%s14555_s3 + $0x128] sm:$0xff]  ;;  %v6426_v35 = vld [vmem:[%s14555_s3 + $0xf8] sm:$0xff] }
 0x2e7   :  { %15009 = vst [vmem:[#allocation14_spill] sm:$0xff] %v12396_v11  ;;  %15010 = vst [vmem:[#allocation56_spill] sm:$0xff] %v12401_v46  ;;  %8085 = vmatprep.subr.bf16.mxu1 %v9875_v47  ;;  %v9846_v47 = vld [vmem:[%s14553_s1 + $0x780] ss:$28 sps:$4 sm:$0xff]   ;;  %v6227_v6 = vmax.f32 %v8723_v31, 0.0  ;;  %v8725_v7 = vadd.f32 %v4120_v30, %v12260_v12  ;;  %v4122_v50 = vpop.f32.mrb[11].mxu0 }
 0x2e8   :  { %5276 = vmatpush1.bf16.msra.mxu0 %v9843_v34  ;;  %v6229_v8 = vmax.f32 %v8779_v19, 0.0  ;;  %v8781_v34 = vadd.f32 %v4812_v44, %v12262_v37  ;;  %v4814_v49 = vpop.f32.mrb[11].mxu1  ;;  %v9883_v20 = vld [vmem:[%s14553_s1 + $0x948] ss:$28 sps:$4 sm:$0xff]   ;;  %v6228_v4 = vmax.f32 %v8724_v10, 0.0  ;;  %v6230_v40 = vmax.f32 %v8780_v21, 0.0 }
 0x2e9   :  { %5277 = vmatprep.subr.bf16.mxu0 %v9848_v41  ;;  %v8726_v31 = vadd.f32 %v4122_v50, %v12266_v3  ;;  %v8782_v19 = vadd.f32 %v4814_v49, %v12268_v17  ;;  %v9851_v28 = vld [vmem:[%s14553_s1 + $0x7bc] ss:$28 sps:$4 sm:$0xff]   ;;  %v9884_v30 = vld [vmem:[%s14553_s1 + $0x788] ss:$28 sps:$4 sm:$0xff]   ;;  %v6234_v41 = vmax.f32 %v8725_v7, 0.0  ;;  %v6433_v50 = vld [vmem:[%s14555_s3 + $0x130] sm:$0xff]  ;;  %v12460_v21 = vmul.f32 %v6423_v45, %v6227_v6 }
 0x2ea   :  { %8086 = vmatpush3.bf16.msra.mxu1 %v9876_v32  ;;  %v6236_v44 = vmax.f32 %v8781_v34, 0.0  ;;  %v6431_v10 = vld [vmem:[%s14555_s3 + $0x120] sm:$0xff]  ;;  %v12462_v7 = vmul.f32 %v6425_v18, %v6229_v8  ;;  %v15014_v11 = vld [vmem:[#allocation16_spill] sm:$0xff]  ;;  %v12466_v26 = vmul.f32 %v6424_v52, %v6228_v4  ;;  %v9849_v45 = vld [vmem:[%s14553_s1 + $0x7b8] ss:$28 sps:$4 sm:$0xff]   ;;  %v12475_v8 = vmul.f32 %v6426_v35, %v6230_v40 }
 0x2eb   :  { %v15011_v49 = vld [vmem:[#allocation15_spill] sm:$0xff]  ;;  %v6235_v34 = vmax.f32 %v8726_v31, 0.0  ;;  %v6237_v46 = vmax.f32 %v8782_v19, 0.0  ;;  %v12468_v60 = vmul.f32 %v6430_v53, %v6234_v41  ;;  %8087 = vmatprep.subr.bf16.mxu1 %v9883_v20  ;;  %v9854_v4 = vld [vmem:[%s14553_s1 + $0x7f4] ss:$28 sps:$4 sm:$0xff]  }
 0x2ec   :  { %5143 = vmatmul.mubr.bf16.gmra.mrb[60].mxu0 %v15011_v49  ;;  %5805 = vmatmul.mubr.bf16.gmra.mrb[116].mxu1 %v15011_v49  ;;  %v9888_v32 = vld [vmem:[%s14553_s1 + $0x980] ss:$28 sps:$4 sm:$0xff]   ;;  %15012 = vst [vmem:[#allocation15_spill] sm:$0xff] %v12460_v21  ;;  %15013 = vst [vmem:[#allocation57_spill] sm:$0xff] %v12462_v7  ;;  %v12470_v0 = vmul.f32 %v6432_v14, %v6236_v44  ;;  %v4126_v31 = vpop.f32.mrb[12].mxu0  ;;  %v6437_v53 = vld [vmem:[%s14555_s3 + $0x150] sm:$0xff] }
 0x2ed   :  { %5152 = vmatprep.mubr.bf16.mxu0 %v15014_v11  ;;  %5812 = vmatprep.mubr.bf16.mxu1 %v15014_v11  ;;  %15015 = vst [vmem:[#allocation16_spill] sm:$0xff] %v12466_v26  ;;  %15016 = vst [vmem:[#allocation58_spill] sm:$0xff] %v12468_v60  ;;  %v12477_v18 = vmul.f32 %v6431_v10, %v6235_v34  ;;  %v12479_v6 = vmul.f32 %v6433_v50, %v6237_v46  ;;  %v4818_v11 = vpop.f32.mrb[12].mxu1  ;;  %v9889_v52 = vld [vmem:[%s14553_s1 + $0x7c0] ss:$28 sps:$4 sm:$0xff]   ;;  %v4128_v20 = vpop.f32.mrb[13].mxu0 }
 0x2ee   :  { %15017 = vst [vmem:[#allocation59_spill] sm:$0xff] %v12470_v0  ;;  %5278 = vmatpush1.bf16.msra.mxu0 %v9846_v47  ;;  %15018 = vst [vmem:[#allocation60_spill] sm:$0xff] %v12475_v8  ;;  %8088 = vmatpush3.bf16.msra.mxu1 %v9884_v30  ;;  %v8727_v46 = vadd.f32 %v4126_v31, %v12260_v12  ;;  %v8783_v14 = vadd.f32 %v4818_v11, %v12262_v37  ;;  %v6439_v47 = vld [vmem:[%s14555_s3 + $0x160] sm:$0xff]  ;;  %v6438_v30 = vld [vmem:[%s14555_s3 + $0x158] sm:$0xff]  ;;  %v4130_v44 = vpop.f32.mrb[14].mxu0 }
 0x2ef   :  { %15019 = vst [vmem:[#allocation61_spill] sm:$0xff] %v12477_v18  ;;  %15020 = vst [vmem:[#allocation62_spill] sm:$0xff] %v12479_v6  ;;  %5279 = vmatprep.subr.bf16.mxu0 %v9851_v28  ;;  %v4820_v28 = vpop.f32.mrb[13].mxu1  ;;  %8089 = vmatprep.subr.bf16.mxu1 %v9888_v32  ;;  %v8728_v19 = vadd.f32 %v4128_v20, %v12266_v3  ;;  %v6444_v10 = vld [vmem:[%s14555_s3 + $0x188] sm:$0xff]  ;;  %v6446_v49 = vld [vmem:[%s14555_s3 + $0x198] sm:$0xff]  ;;  %v8729_v35 = vadd.f32 %v4130_v44, %v12260_v12  ;;  %v4132_v7 = vpop.f32.mrb[15].mxu0 }
 0x2f0   :  { %v8784_v41 = vadd.f32 %v4820_v28, %v12268_v17  ;;  %v4822_v50 = vpop.f32.mrb[14].mxu1  ;;  %v9852_v32 = vld [vmem:[%s14553_s1 + $0x7f0] ss:$28 sps:$4 sm:$0xff]   ;;  %v6241_v11 = vmax.f32 %v8727_v46, 0.0  ;;  %v6243_v20 = vmax.f32 %v8783_v14, 0.0  ;;  %v8730_v46 = vadd.f32 %v4132_v7, %v12266_v3  ;;  %v15024_v8 = vld [vmem:[#allocation18_spill] sm:$0xff] }
 0x2f1   :  { %v6440_v28 = vld [vmem:[%s14555_s3 + $0x168] sm:$0xff]  ;;  %v8785_v40 = vadd.f32 %v4822_v50, %v12262_v37  ;;  %v4824_v0 = vpop.f32.mrb[15].mxu1  ;;  %v9890_v34 = vld [vmem:[%s14553_s1 + $0x9b8] ss:$28 sps:$4 sm:$0xff]   ;;  %v6242_v21 = vmax.f32 %v8728_v19, 0.0  ;;  %v6248_v50 = vmax.f32 %v8729_v35, 0.0 }
 0x2f2   :  { %5280 = vmatpush1.bf16.msra.mxu0 %v9849_v45  ;;  %v6244_v60 = vmax.f32 %v8784_v41, 0.0  ;;  %v8786_v14 = vadd.f32 %v4824_v0, %v12268_v17  ;;  %v9857_v44 = vld [vmem:[%s14553_s1 + $0x82c] ss:$28 sps:$4 sm:$0xff]   ;;  %8090 = vmatpush3.bf16.msra.mxu1 %v9889_v52  ;;  %v9891_v45 = vld [vmem:[%s14553_s1 + $0x7f8] ss:$28 sps:$4 sm:$0xff]   ;;  %v6447_v0 = vld [vmem:[%s14555_s3 + $0x1a0] sm:$0xff]  ;;  %v12544_v52 = vmul.f32 %v6437_v53, %v6241_v11  ;;  %v12546_v35 = vmul.f32 %v6439_v47, %v6243_v20 }
 0x2f3   :  { %5281 = vmatprep.subr.bf16.mxu0 %v9854_v4  ;;  %v6250_v31 = vmax.f32 %v8785_v40, 0.0  ;;  %v6445_v19 = vld [vmem:[%s14555_s3 + $0x190] sm:$0xff]  ;;  %v6249_v40 = vmax.f32 %v8730_v46, 0.0  ;;  %v12550_v6 = vmul.f32 %v6438_v30, %v6242_v21  ;;  %v12552_v26 = vmul.f32 %v6444_v10, %v6248_v50  ;;  %v9855_v53 = vld [vmem:[%s14553_s1 + $0x828] ss:$28 sps:$4 sm:$0xff]   ;;  %8091 = vmatprep.subr.bf16.mxu1 %v9890_v34 }
 0x2f4   :  { %v15021_v7 = vld [vmem:[#allocation17_spill] sm:$0xff]  ;;  %15023 = vst [vmem:[#allocation63_spill] sm:$0xff] %v12546_v35  ;;  %v6251_v41 = vmax.f32 %v8786_v14, 0.0  ;;  %v12559_v47 = vmul.f32 %v6440_v28, %v6244_v60  ;;  %v4136_v46 = vpop.f32.mrb[16].mxu0  ;;  %v9860_v21 = vld [vmem:[%s14553_s1 + $0x864] ss:$28 sps:$4 sm:$0xff]  }
 0x2f5   :  { %5153 = vmatmul.mubr.bf16.gmra.mrb[64].mxu0 %v15021_v7  ;;  %5813 = vmatmul.mubr.bf16.gmra.mrb[120].mxu1 %v15021_v7  ;;  %v9895_v4 = vld [vmem:[%s14553_s1 + $0x9f0] ss:$28 sps:$4 sm:$0xff]   ;;  %15022 = vst [vmem:[#allocation17_spill] sm:$0xff] %v12544_v52  ;;  %15025 = vst [vmem:[#allocation18_spill] sm:$0xff] %v12550_v6  ;;  %v12554_v18 = vmul.f32 %v6446_v49, %v6250_v31  ;;  %v12561_v11 = vmul.f32 %v6445_v19, %v6249_v40  ;;  %v4138_v28 = vpop.f32.mrb[17].mxu0 }
 0x2f6   :  { %5162 = vmatprep.mubr.bf16.mxu0 %v15024_v8  ;;  %5820 = vmatprep.mubr.bf16.mxu1 %v15024_v8  ;;  %15026 = vst [vmem:[#allocation64_spill] sm:$0xff] %v12552_v26  ;;  %15028 = vst [vmem:[#allocation66_spill] sm:$0xff] %v12559_v47  ;;  %v12563_v20 = vmul.f32 %v6447_v0, %v6251_v41  ;;  %v4828_v8 = vpop.f32.mrb[16].mxu1  ;;  %v9896_v30 = vld [vmem:[%s14553_s1 + $0x830] ss:$28 sps:$4 sm:$0xff]   ;;  %v8731_v49 = vadd.f32 %v4136_v46, %v12260_v12  ;;  %v4140_v19 = vpop.f32.mrb[18].mxu0 }
 0x2f7   :  { %15027 = vst [vmem:[#allocation65_spill] sm:$0xff] %v12554_v18  ;;  %5282 = vmatpush1.bf16.msra.mxu0 %v9852_v32  ;;  %15029 = vst [vmem:[#allocation67_spill] sm:$0xff] %v12561_v11  ;;  %8092 = vmatpush3.bf16.msra.mxu1 %v9891_v45  ;;  %v6451_v32 = vld [vmem:[%s14555_s3 + $0x1c0] sm:$0xff]  ;;  %v8787_v34 = vadd.f32 %v4828_v8, %v12262_v37  ;;  %v6453_v31 = vld [vmem:[%s14555_s3 + $0x1d0] sm:$0xff]  ;;  %v4830_v14 = vpop.f32.mrb[17].mxu1  ;;  %v8733_v10 = vadd.f32 %v4140_v19, %v12260_v12  ;;  %v4142_v35 = vpop.f32.mrb[19].mxu0 }
 0x2f8   :  { %15030 = vst [vmem:[#allocation68_spill] sm:$0xff] %v12563_v20  ;;  %5283 = vmatprep.subr.bf16.mxu0 %v9857_v44  ;;  %8093 = vmatprep.subr.bf16.mxu1 %v9895_v4  ;;  %v8732_v44 = vadd.f32 %v4138_v28, %v12266_v3  ;;  %v6452_v45 = vld [vmem:[%s14555_s3 + $0x1c8] sm:$0xff]  ;;  %v8788_v50 = vadd.f32 %v4830_v14, %v12268_v17  ;;  %v6458_v0 = vld [vmem:[%s14555_s3 + $0x1f8] sm:$0xff]  ;;  %v4832_v7 = vpop.f32.mrb[18].mxu1  ;;  %v6255_v8 = vmax.f32 %v8731_v49, 0.0 }
 0x2f9   :  { %v6460_v40 = vld [vmem:[%s14555_s3 + $0x208] sm:$0xff]  ;;  %v9858_v4 = vld [vmem:[%s14553_s1 + $0x860] ss:$28 sps:$4 sm:$0xff]   ;;  %v6257_v28 = vmax.f32 %v8787_v34, 0.0  ;;  %v8789_v60 = vadd.f32 %v4832_v7, %v12262_v37  ;;  %v4834_v18 = vpop.f32.mrb[19].mxu1  ;;  %v8734_v49 = vadd.f32 %v4142_v35, %v12266_v3  ;;  %v6262_v7 = vmax.f32 %v8733_v10, 0.0 }
 0x2fa   :  { %v6454_v14 = vld [vmem:[%s14555_s3 + $0x1d8] sm:$0xff]  ;;  %v9897_v41 = vld [vmem:[%s14553_s1 + $0xa28] ss:$28 sps:$4 sm:$0xff]   ;;  %v6256_v52 = vmax.f32 %v8732_v44, 0.0  ;;  %v6258_v26 = vmax.f32 %v8788_v50, 0.0  ;;  %v8790_v34 = vadd.f32 %v4834_v18, %v12268_v17  ;;  %v6461_v18 = vld [vmem:[%s14555_s3 + $0x210] sm:$0xff] }
 0x2fb   :  { %5284 = vmatpush1.bf16.msra.mxu0 %v9855_v53  ;;  %v9863_v19 = vld [vmem:[%s14553_s1 + $0x89c] ss:$28 sps:$4 sm:$0xff]   ;;  %8094 = vmatpush3.bf16.msra.mxu1 %v9896_v30  ;;  %v9901_v53 = vld [vmem:[%s14553_s1 + $0x868] ss:$28 sps:$4 sm:$0xff]   ;;  %v6264_v46 = vmax.f32 %v8789_v60, 0.0  ;;  %v12628_v30 = vmul.f32 %v6451_v32, %v6255_v8  ;;  %v12630_v10 = vmul.f32 %v6453_v31, %v6257_v28  ;;  %v6263_v60 = vmax.f32 %v8734_v49, 0.0 }
 0x2fc   :  { %5285 = vmatprep.subr.bf16.mxu0 %v9860_v21  ;;  %v6459_v44 = vld [vmem:[%s14555_s3 + $0x200] sm:$0xff]  ;;  %v6265_v50 = vmax.f32 %v8790_v34, 0.0  ;;  %v15034_v47 = vld [vmem:[#allocation20_spill] sm:$0xff]  ;;  %v12634_v20 = vmul.f32 %v6452_v45, %v6256_v52  ;;  %v12636_v6 = vmul.f32 %v6458_v0, %v6262_v7  ;;  %v9861_v32 = vld [vmem:[%s14553_s1 + $0x898] ss:$28 sps:$4 sm:$0xff]   ;;  %8095 = vmatprep.subr.bf16.mxu1 %v9897_v41  ;;  %v12643_v31 = vmul.f32 %v6454_v14, %v6258_v26  ;;  %v4146_v49 = vpop.f32.mrb[20].mxu0 }
 0x2fd   :  { %v15031_v35 = vld [vmem:[#allocation19_spill] sm:$0xff]  ;;  %15033 = vst [vmem:[#allocation69_spill] sm:$0xff] %v12630_v10  ;;  %v12638_v11 = vmul.f32 %v6460_v40, %v6264_v46  ;;  %v12645_v8 = vmul.f32 %v6459_v44, %v6263_v60  ;;  %v9866_v52 = vld [vmem:[%s14553_s1 + $0x8d4] ss:$28 sps:$4 sm:$0xff]   ;;  %v8735_v40 = vadd.f32 %v4146_v49, %v12260_v12  ;;  %v4148_v41 = vpop.f32.mrb[21].mxu0  ;;  %v6466_v49 = vld [vmem:[%s14555_s3 + $0x238] sm:$0xff] }
 0x2fe   :  { %5163 = vmatmul.mubr.bf16.gmra.mrb[68].mxu0 %v15031_v35  ;;  %5821 = vmatmul.mubr.bf16.gmra.mrb[124].mxu1 %v15031_v35  ;;  %v9902_v21 = vld [vmem:[%s14553_s1 + $0xa60] ss:$28 sps:$4 sm:$0xff]   ;;  %15032 = vst [vmem:[#allocation19_spill] sm:$0xff] %v12628_v30  ;;  %15035 = vst [vmem:[#allocation20_spill] sm:$0xff] %v12636_v6  ;;  %v12647_v28 = vmul.f32 %v6461_v18, %v6265_v50  ;;  %v6465_v14 = vld [vmem:[%s14555_s3 + $0x230] sm:$0xff]  ;;  %v4150_v7 = vpop.f32.mrb[22].mxu0 }
 0x2ff   :  { %5172 = vmatprep.mubr.bf16.mxu0 %v15034_v47  ;;  %5828 = vmatprep.mubr.bf16.mxu1 %v15034_v47  ;;  %15036 = vst [vmem:[#allocation70_spill] sm:$0xff] %v12638_v11  ;;  %15037 = vst [vmem:[#allocation71_spill] sm:$0xff] %v12643_v31  ;;  %v4838_v47 = vpop.f32.mrb[20].mxu1  ;;  %v9903_v45 = vld [vmem:[%s14553_s1 + $0x8a0] ss:$28 sps:$4 sm:$0xff]   ;;  %v6269_v60 = vmax.f32 %v8735_v40, 0.0 }
 0x300   :  { %5286 = vmatpush1.bf16.msra.mxu0 %v9858_v4  ;;  %15038 = vst [vmem:[#allocation72_spill] sm:$0xff] %v12647_v28  ;;  %8096 = vmatpush3.bf16.msra.mxu1 %v9901_v53  ;;  %v8791_v4 = vadd.f32 %v4838_v47, %v12262_v37  ;;  %v4840_v46 = vpop.f32.mrb[21].mxu1  ;;  %v6467_v34 = vld [vmem:[%s14555_s3 + $0x240] sm:$0xff]  ;;  %v9864_v18 = vld [vmem:[%s14553_s1 + $0x8d0] ss:$28 sps:$4 sm:$0xff]   ;;  %v8737_v47 = vadd.f32 %v4150_v7, %v12260_v12  ;;  %v15041_v6 = vld [vmem:[#allocation22_spill] sm:$0xff] }
 0x301   :  { %5287 = vmatprep.subr.bf16.mxu0 %v9863_v19  ;;  %8097 = vmatprep.subr.bf16.mxu1 %v9902_v21  ;;  %v8736_v19 = vadd.f32 %v4148_v41, %v12266_v3  ;;  %v8792_v53 = vadd.f32 %v4840_v46, %v12268_v17  ;;  %v4842_v44 = vpop.f32.mrb[22].mxu1  ;;  %v4152_v46 = vpop.f32.mrb[23].mxu0  ;;  %v12684_v26 = vld [vmem:[%s14553_s1 + $0xa98] ss:$28 sps:$4 sm:$0xff]   ;;  %v6472_v40 = vld [vmem:[%s14555_s3 + $0x268] sm:$0xff] }
 0x302   :  { %v6271_v50 = vmax.f32 %v8791_v4, 0.0  ;;  %v8793_v41 = vadd.f32 %v4842_v44, %v12262_v37  ;;  %v4844_v0 = vpop.f32.mrb[23].mxu1  ;;  %v6474_v4 = vld [vmem:[%s14555_s3 + $0x278] sm:$0xff]  ;;  %v8738_v7 = vadd.f32 %v4152_v46, %v12266_v3  ;;  %v6473_v11 = vld [vmem:[%s14555_s3 + $0x270] sm:$0xff]  ;;  %v12708_v46 = vmul.f32 %v6465_v14, %v6269_v60  ;;  %v9869_v28 = vld [vmem:[%s14553_s1 + $0x908] ss:$28 sps:$4 sm:$0xff]  }
 0x303   :  { %v6270_v35 = vmax.f32 %v8736_v19, 0.0  ;;  %v6272_v21 = vmax.f32 %v8792_v53, 0.0  ;;  %v8794_v44 = vadd.f32 %v4844_v0, %v12268_v17  ;;  %v6468_v19 = vld [vmem:[%s14555_s3 + $0x248] sm:$0xff]  ;;  %v6276_v53 = vmax.f32 %v8737_v47, 0.0  ;;  %v6475_v0 = vld [vmem:[%s14555_s3 + $0x280] sm:$0xff] }
 0x304   :  { %5288 = vmatpush1.bf16.msra.mxu0 %v9861_v32  ;;  %v9871_v32 = vld [vmem:[%s14553_s1 + $0x90c] ss:$28 sps:$4 sm:$0xff]   ;;  %8098 = vmatpush3.bf16.msra.mxu1 %v9903_v45  ;;  %v6278_v10 = vmax.f32 %v8793_v41, 0.0  ;;  %v6277_v45 = vmax.f32 %v8738_v7, 0.0  ;;  %v12712_v47 = vmul.f32 %v6467_v34, %v6271_v50  ;;  %v4156_v34 = vpop.f32.mrb[24].mxu0  ;;  %v4848_v50 = vpop.f32.mrb[24].mxu1 }
 0x305   :  { %5289 = vmatprep.subr.bf16.mxu0 %v9866_v52  ;;  %v15039_v52 = vld [vmem:[#allocation21_spill] sm:$0xff]  ;;  %v6279_v30 = vmax.f32 %v8794_v44, 0.0  ;;  %v12714_v41 = vmul.f32 %v6472_v40, %v6276_v53  ;;  %8320 = vmatprep.subr.bf16.mxu1 %v12684_v26  ;;  %v12722_v14 = vmul.f32 %v6466_v49, %v6270_v35  ;;  %v12724_v60 = vmul.f32 %v6468_v19, %v6272_v21  ;;  %v4158_v49 = vpop.f32.mrb[25].mxu0  ;;  %v6479_v40 = vld [vmem:[%s14555_s3 + $0x2a0] sm:$0xff] }
 0x306   :  { %5173 = vmatmul.mubr.bf16.gmra.mrb[72].mxu0 %v15039_v52  ;;  %5829 = vmatmul.mubr.bf16.gmra.mrb[128].mxu1 %v15039_v52  ;;  %15040 = vst [vmem:[#allocation21_spill] sm:$0xff] %v12708_v46  ;;  %15042 = vst [vmem:[#allocation22_spill] sm:$0xff] %v12712_v47  ;;  %v12716_v31 = vmul.f32 %v6474_v4, %v6278_v10  ;;  %v12726_v7 = vmul.f32 %v6473_v11, %v6277_v45  ;;  %v9874_v10 = vld [vmem:[%s14553_s1 + $0x944] ss:$28 sps:$4 sm:$0xff]   ;;  %v6481_v4 = vld [vmem:[%s14555_s3 + $0x2b0] sm:$0xff]  ;;  %v4160_v19 = vpop.f32.mrb[26].mxu0 }
 0x307   :  { %5182 = vmatprep.mubr.bf16.mxu0 %v15041_v6  ;;  %5836 = vmatprep.mubr.bf16.mxu1 %v15041_v6  ;;  %15043 = vst [vmem:[#allocation73_spill] sm:$0xff] %v12714_v41  ;;  %15045 = vst [vmem:[#allocation75_spill] sm:$0xff] %v12722_v14  ;;  %v12728_v6 = vmul.f32 %v6475_v0, %v6279_v30  ;;  %v8739_v21 = vadd.f32 %v4156_v34, %v12260_v12  ;;  %v4850_v30 = vpop.f32.mrb[25].mxu1  ;;  %v9872_v0 = vld [vmem:[%s14553_s1 + $0x940] ss:$28 sps:$4 sm:$0xff]  }
 0x308   :  { %15044 = vst [vmem:[#allocation74_spill] sm:$0xff] %v12716_v31  ;;  %5290 = vmatpush1.bf16.msra.mxu0 %v9864_v18  ;;  %15046 = vst [vmem:[#allocation76_spill] sm:$0xff] %v12724_v60  ;;  %v8795_v11 = vadd.f32 %v4848_v50, %v12262_v37  ;;  %v8740_v44 = vadd.f32 %v4158_v49, %v12266_v3  ;;  %v4852_v53 = vpop.f32.mrb[26].mxu1  ;;  %v6480_v50 = vld [vmem:[%s14555_s3 + $0x2a8] sm:$0xff]  ;;  %v8741_v35 = vadd.f32 %v4160_v19, %v12260_v12  ;;  %v4162_v18 = vpop.f32.mrb[27].mxu0  ;;  %v6487_v46 = vld [vmem:[%s14555_s3 + $0x2e0] sm:$0xff] }
 0x309   :  { %15047 = vst [vmem:[#allocation77_spill] sm:$0xff] %v12726_v7  ;;  %15048 = vst [vmem:[#allocation78_spill] sm:$0xff] %v12728_v6  ;;  %5291 = vmatprep.subr.bf16.mxu0 %v9871_v32  ;;  %v8796_v32 = vadd.f32 %v4850_v30, %v12268_v17  ;;  %v6283_v45 = vmax.f32 %v8739_v21, 0.0  ;;  %v8797_v49 = vadd.f32 %v4852_v53, %v12262_v37  ;;  %v4854_v30 = vpop.f32.mrb[27].mxu1  ;;  %v6486_v21 = vld [vmem:[%s14555_s3 + $0x2d8] sm:$0xff]  ;;  %v15050_v60 = vld [vmem:[#allocation24_spill] sm:$0xff] }
 0x30a   :  { %v6285_v34 = vmax.f32 %v8795_v11, 0.0  ;;  %v6284_v47 = vmax.f32 %v8740_v44, 0.0  ;;  %v6488_v11 = vld [vmem:[%s14555_s3 + $0x2e8] sm:$0xff]  ;;  %v8742_v19 = vadd.f32 %v4162_v18, %v12266_v3  ;;  %v8798_v53 = vadd.f32 %v4854_v30, %v12268_v17  ;;  %v6482_v44 = vld [vmem:[%s14555_s3 + $0x2b8] sm:$0xff]  ;;  %v6489_v18 = vld [vmem:[%s14555_s3 + $0x2f0] sm:$0xff] }
 0x30b   :  { %v6286_v31 = vmax.f32 %v8796_v32, 0.0  ;;  %v6290_v32 = vmax.f32 %v8741_v35, 0.0  ;;  %v6292_v52 = vmax.f32 %v8797_v49, 0.0  ;;  %v15049_v30 = vld [vmem:[#allocation23_spill] sm:$0xff]  ;;  %v12783_v35 = vmul.f32 %v6479_v40, %v6283_v45  ;;  %v9877_v7 = vld [vmem:[%s14553_s1 + $0x978] ss:$28 sps:$4 sm:$0xff]  }
 0x30c   :  { %5292 = vmatpush1.bf16.msra.mxu0 %v9869_v28  ;;  %v9879_v28 = vld [vmem:[%s14553_s1 + $0x97c] ss:$28 sps:$4 sm:$0xff]   ;;  %v6293_v41 = vmax.f32 %v8798_v53, 0.0  ;;  %v12785_v49 = vmul.f32 %v6481_v4, %v6285_v34  ;;  %v4166_v40 = vpop.f32.mrb[28].mxu0  ;;  %v4858_v4 = vpop.f32.mrb[28].mxu1  ;;  %v6493_v34 = vld [vmem:[%s14555_s3 + $0x310] sm:$0xff] }
 0x30d   :  { %5293 = vmatprep.subr.bf16.mxu0 %v9874_v10  ;;  %v6291_v10 = vmax.f32 %v8742_v19, 0.0  ;;  %15051 = vst [vmem:[#allocation23_spill] sm:$0xff] %v12783_v35  ;;  %v12787_v6 = vmul.f32 %v6486_v21, %v6290_v32  ;;  %v12789_v14 = vmul.f32 %v6488_v11, %v6292_v52  ;;  %v12796_v19 = vmul.f32 %v6482_v44, %v6286_v31  ;;  %v9882_v52 = vld [vmem:[%s14553_s1 + $0x9b4] ss:$28 sps:$4 sm:$0xff]   ;;  %v4168_v45 = vpop.f32.mrb[29].mxu0 }
 0x30e   :  { %5183 = vmatmul.mubr.bf16.gmra.mrb[76].mxu0 %v15049_v30  ;;  %5837 = vmatmul.mubr.bf16.gmra.mrb[132].mxu1 %v15049_v30  ;;  %15052 = vst [vmem:[#allocation24_spill] sm:$0xff] %v12785_v49  ;;  %v12794_v30 = vmul.f32 %v6480_v50, %v6284_v47  ;;  %v8743_v31 = vadd.f32 %v4166_v40, %v12260_v12  ;;  %v6495_v50 = vld [vmem:[%s14555_s3 + $0x320] sm:$0xff]  ;;  %v9880_v32 = vld [vmem:[%s14553_s1 + $0x9b0] ss:$28 sps:$4 sm:$0xff]  }
 0x30f   :  { %5192 = vmatprep.mubr.bf16.mxu0 %v15050_v60  ;;  %5844 = vmatprep.mubr.bf16.mxu1 %v15050_v60  ;;  %15053 = vst [vmem:[#allocation79_spill] sm:$0xff] %v12787_v6  ;;  %15054 = vst [vmem:[#allocation80_spill] sm:$0xff] %v12789_v14  ;;  %v12798_v53 = vmul.f32 %v6487_v46, %v6291_v10  ;;  %v12800_v60 = vmul.f32 %v6489_v18, %v6293_v41  ;;  %v4860_v41 = vpop.f32.mrb[29].mxu1  ;;  %v6501_v35 = vld [vmem:[%s14555_s3 + $0x350] sm:$0xff] }
 0x310   :  { %5294 = vmatpush1.bf16.msra.mxu0 %v9872_v0  ;;  %15055 = vst [vmem:[#allocation81_spill] sm:$0xff] %v12794_v30  ;;  %15056 = vst [vmem:[#allocation82_spill] sm:$0xff] %v12796_v19  ;;  %v8799_v46 = vadd.f32 %v4858_v4, %v12262_v37  ;;  %v8744_v21 = vadd.f32 %v4168_v45, %v12266_v3  ;;  %v8800_v11 = vadd.f32 %v4860_v41, %v12268_v17  ;;  %v4862_v44 = vpop.f32.mrb[30].mxu1  ;;  %v6494_v4 = vld [vmem:[%s14555_s3 + $0x318] sm:$0xff] }
 0x311   :  { %15057 = vst [vmem:[#allocation83_spill] sm:$0xff] %v12798_v53  ;;  %15058 = vst [vmem:[#allocation84_spill] sm:$0xff] %v12800_v60  ;;  %5295 = vmatprep.subr.bf16.mxu0 %v9879_v28  ;;  %v4170_v28 = vpop.f32.mrb[30].mxu0  ;;  %v6297_v10 = vmax.f32 %v8743_v31, 0.0  ;;  %v8801_v45 = vadd.f32 %v4862_v44, %v12262_v37  ;;  %v4864_v41 = vpop.f32.mrb[31].mxu1  ;;  %v6500_v31 = vld [vmem:[%s14555_s3 + $0x348] sm:$0xff] }
 0x312   :  { %v6299_v40 = vmax.f32 %v8799_v46, 0.0  ;;  %v8745_v47 = vadd.f32 %v4170_v28, %v12260_v12  ;;  %v4172_v0 = vpop.f32.mrb[31].mxu0  ;;  %v6298_v49 = vmax.f32 %v8744_v21, 0.0  ;;  %v6300_v14 = vmax.f32 %v8800_v11, 0.0  ;;  %v6502_v46 = vld [vmem:[%s14555_s3 + $0x358] sm:$0xff]  ;;  %v6496_v21 = vld [vmem:[%s14555_s3 + $0x328] sm:$0xff] }
 0x313   :  { %v8746_v28 = vadd.f32 %v4172_v0, %v12266_v3  ;;  %v8802_v44 = vadd.f32 %v4864_v41, %v12268_v17  ;;  %v6306_v18 = vmax.f32 %v8801_v45, 0.0  ;;  %v6503_v0 = vld [vmem:[%s14555_s3 + $0x360] sm:$0xff]  ;;  %v15059_v41 = vld [vmem:[#allocation25_spill] sm:$0xff]  ;;  %v15060_v19 = vld [vmem:[#allocation26_spill] sm:$0xff] }
 0x314   :  { %5296 = vmatpush1.bf16.msra.mxu0 %v9877_v7  ;;  %v9887_v7 = vld [vmem:[%s14553_s1 + $0x9ec] ss:$28 sps:$4 sm:$0xff]   ;;  %v6304_v11 = vmax.f32 %v8745_v47, 0.0  ;;  %v12855_v47 = vmul.f32 %v6493_v34, %v6297_v10  ;;  %v12857_v45 = vmul.f32 %v6495_v50, %v6299_v40  ;;  %v4176_v34 = vpop.f32.mrb[32].mxu0  ;;  %v4868_v50 = vpop.f32.mrb[32].mxu1  ;;  %v6507_v40 = vld [vmem:[%s14555_s3 + $0x380] sm:$0xff] }
 0x315   :  { %5297 = vmatprep.subr.bf16.mxu0 %v9882_v52  ;;  %v6305_v52 = vmax.f32 %v8746_v28, 0.0  ;;  %v6307_v6 = vmax.f32 %v8802_v44, 0.0  ;;  %v12861_v30 = vmul.f32 %v6502_v46, %v6306_v18  ;;  %v9885_v53 = vld [vmem:[%s14553_s1 + $0x9e8] ss:$28 sps:$4 sm:$0xff]   ;;  %v12868_v28 = vmul.f32 %v6496_v21, %v6300_v14  ;;  %v4178_v10 = vpop.f32.mrb[33].mxu0 }
 0x316   :  { %5193 = vmatmul.mubr.bf16.gmra.mrb[80].mxu0 %v15059_v41  ;;  %5845 = vmatmul.mubr.bf16.gmra.mrb[136].mxu1 %v15059_v41  ;;  %15061 = vst [vmem:[#allocation25_spill] sm:$0xff] %v12855_v47  ;;  %15062 = vst [vmem:[#allocation26_spill] sm:$0xff] %v12857_v45  ;;  %v12859_v60 = vmul.f32 %v6500_v31, %v6304_v11  ;;  %v12866_v41 = vmul.f32 %v6494_v4, %v6298_v49  ;;  %v9894_v18 = vld [vmem:[%s14553_s1 + $0xa24] ss:$28 sps:$4 sm:$0xff]   ;;  %v6509_v4 = vld [vmem:[%s14555_s3 + $0x390] sm:$0xff] }
 0x317   :  { %5202 = vmatprep.mubr.bf16.mxu0 %v15060_v19  ;;  %5852 = vmatprep.mubr.bf16.mxu1 %v15060_v19  ;;  %15064 = vst [vmem:[#allocation86_spill] sm:$0xff] %v12861_v30  ;;  %15066 = vst [vmem:[#allocation88_spill] sm:$0xff] %v12868_v28  ;;  %v12870_v44 = vmul.f32 %v6501_v35, %v6305_v52  ;;  %v12872_v19 = vmul.f32 %v6503_v0, %v6307_v6  ;;  %v4870_v6 = vpop.f32.mrb[33].mxu1  ;;  %v9892_v11 = vld [vmem:[%s14553_s1 + $0xa20] ss:$28 sps:$4 sm:$0xff]   ;;  %v15070_v28 = vld [vmem:[#allocation28_spill] sm:$0xff] }
 0x318   :  { %15063 = vst [vmem:[#allocation85_spill] sm:$0xff] %v12859_v60  ;;  %5298 = vmatpush1.bf16.msra.mxu0 %v9880_v32  ;;  %15065 = vst [vmem:[#allocation87_spill] sm:$0xff] %v12866_v41  ;;  %v8747_v14 = vadd.f32 %v4176_v34, %v12260_v12  ;;  %v8803_v35 = vadd.f32 %v4868_v50, %v12262_v37  ;;  %v8748_v31 = vadd.f32 %v4178_v10, %v12266_v3  ;;  %v4872_v21 = vpop.f32.mrb[34].mxu1  ;;  %v6508_v50 = vld [vmem:[%s14555_s3 + $0x388] sm:$0xff]  ;;  %v6515_v47 = vld [vmem:[%s14555_s3 + $0x3c0] sm:$0xff] }
 0x319   :  { %15067 = vst [vmem:[#allocation89_spill] sm:$0xff] %v12870_v44  ;;  %15068 = vst [vmem:[#allocation90_spill] sm:$0xff] %v12872_v19  ;;  %5299 = vmatprep.subr.bf16.mxu0 %v9887_v7  ;;  %v8804_v46 = vadd.f32 %v4870_v6, %v12268_v17  ;;  %v4180_v7 = vpop.f32.mrb[34].mxu0  ;;  %v8805_v10 = vadd.f32 %v4872_v21, %v12262_v37  ;;  %v4874_v6 = vpop.f32.mrb[35].mxu1  ;;  %v9898_v44 = vld [vmem:[%s14553_s1 + $0xa58] ss:$28 sps:$4 sm:$0xff]  }
 0x31a   :  { %v6311_v52 = vmax.f32 %v8747_v14, 0.0  ;;  %v6313_v34 = vmax.f32 %v8803_v35, 0.0  ;;  %v8749_v49 = vadd.f32 %v4180_v7, %v12260_v12  ;;  %v4182_v32 = vpop.f32.mrb[35].mxu0  ;;  %v6312_v45 = vmax.f32 %v8748_v31, 0.0  ;;  %v6514_v14 = vld [vmem:[%s14555_s3 + $0x3b8] sm:$0xff]  ;;  %v6516_v35 = vld [vmem:[%s14555_s3 + $0x3c8] sm:$0xff] }
 0x31b   :  { %v6314_v30 = vmax.f32 %v8804_v46, 0.0  ;;  %v8750_v7 = vadd.f32 %v4182_v32, %v12266_v3  ;;  %v8806_v21 = vadd.f32 %v4874_v6, %v12268_v17  ;;  %v6510_v31 = vld [vmem:[%s14555_s3 + $0x398] sm:$0xff]  ;;  %v6320_v0 = vmax.f32 %v8805_v10, 0.0  ;;  %v6517_v32 = vld [vmem:[%s14555_s3 + $0x3d0] sm:$0xff]  ;;  %v15069_v6 = vld [vmem:[#allocation27_spill] sm:$0xff] }
 0x31c   :  { %5300 = vmatpush1.bf16.msra.mxu0 %v9885_v53  ;;  %v9900_v53 = vld [vmem:[%s14553_s1 + $0xa5c] ss:$28 sps:$4 sm:$0xff]   ;;  %v6318_v46 = vmax.f32 %v8749_v49, 0.0  ;;  %v12927_v49 = vmul.f32 %v6507_v40, %v6311_v52  ;;  %v12929_v10 = vmul.f32 %v6509_v4, %v6313_v34  ;;  %v4186_v40 = vpop.f32.mrb[36].mxu0  ;;  %v4878_v4 = vpop.f32.mrb[36].mxu1 }
 0x31d   :  { %5301 = vmatprep.subr.bf16.mxu0 %v9894_v18  ;;  %v6319_v18 = vmax.f32 %v8750_v7, 0.0  ;;  %v6321_v60 = vmax.f32 %v8806_v21, 0.0  ;;  %v12933_v41 = vmul.f32 %v6516_v35, %v6320_v0  ;;  %v12940_v7 = vmul.f32 %v6510_v31, %v6314_v30  ;;  %v9906_v0 = vld [vmem:[%s14553_s1 + $0xa94] ss:$28 sps:$4 sm:$0xff]   ;;  %v4188_v52 = vpop.f32.mrb[37].mxu0 }
 0x31e   :  { %5203 = vmatmul.mubr.bf16.gmra.mrb[84].mxu0 %v15069_v6  ;;  %5853 = vmatmul.mubr.bf16.gmra.mrb[140].mxu1 %v15069_v6  ;;  %15071 = vst [vmem:[#allocation27_spill] sm:$0xff] %v12927_v49  ;;  %15072 = vst [vmem:[#allocation28_spill] sm:$0xff] %v12929_v10  ;;  %v12931_v19 = vmul.f32 %v6514_v14, %v6318_v46  ;;  %v12938_v6 = vmul.f32 %v6508_v50, %v6312_v45  ;;  %v4190_v14 = vpop.f32.mrb[38].mxu0  ;;  %v15079_v49 = vld [vmem:[#allocation29_spill] sm:$0xff] }
 0x31f   :  { %5212 = vmatprep.mubr.bf16.mxu0 %v15070_v28  ;;  %5860 = vmatprep.mubr.bf16.mxu1 %v15070_v28  ;;  %15074 = vst [vmem:[#allocation92_spill] sm:$0xff] %v12933_v41  ;;  %15076 = vst [vmem:[#allocation94_spill] sm:$0xff] %v12940_v7  ;;  %v12942_v21 = vmul.f32 %v6515_v47, %v6319_v18  ;;  %v12944_v28 = vmul.f32 %v6517_v32, %v6321_v60  ;;  %v4880_v60 = vpop.f32.mrb[37].mxu1  ;;  %v6521_v32 = vld [vmem:[%s14555_s3 + $0x3f0] sm:$0xff]  ;;  %v6531_v41 = vld [vmem:[%s14555_s3 + $0x440] sm:$0xff] }
 0x320   :  { %15073 = vst [vmem:[#allocation91_spill] sm:$0xff] %v12931_v19  ;;  %5302 = vmatpush1.bf16.msra.mxu0 %v9892_v11  ;;  %15075 = vst [vmem:[#allocation93_spill] sm:$0xff] %v12938_v6  ;;  %v8751_v30 = vadd.f32 %v4186_v40, %v12260_v12  ;;  %v8807_v47 = vadd.f32 %v4878_v4, %v12262_v37  ;;  %v8752_v34 = vadd.f32 %v4188_v52, %v12266_v3  ;;  %v4882_v35 = vpop.f32.mrb[38].mxu1  ;;  %v6523_v40 = vld [vmem:[%s14555_s3 + $0x400] sm:$0xff] }
 0x321   :  { %15077 = vst [vmem:[#allocation95_spill] sm:$0xff] %v12942_v21  ;;  %15078 = vst [vmem:[#allocation96_spill] sm:$0xff] %v12944_v28  ;;  %5303 = vmatprep.subr.bf16.mxu0 %v9900_v53  ;;  %v8808_v50 = vadd.f32 %v4880_v60, %v12268_v17  ;;  %v8753_v4 = vadd.f32 %v4190_v14, %v12260_v12  ;;  %v8809_v52 = vadd.f32 %v4882_v35, %v12262_v37  ;;  %v4192_v60 = vpop.f32.mrb[39].mxu0  ;;  %v4884_v45 = vpop.f32.mrb[39].mxu1  ;;  %v6530_v53 = vld [vmem:[%s14555_s3 + $0x438] sm:$0xff] }
 0x322   :  { %v6325_v46 = vmax.f32 %v8751_v30, 0.0  ;;  %v6327_v18 = vmax.f32 %v8807_v47, 0.0  ;;  %v6326_v11 = vmax.f32 %v8752_v34, 0.0  ;;  %v6522_v30 = vld [vmem:[%s14555_s3 + $0x3f8] sm:$0xff]  ;;  %v6528_v47 = vld [vmem:[%s14555_s3 + $0x428] sm:$0xff]  ;;  %v8754_v14 = vadd.f32 %v4192_v60, %v12266_v3 }
 0x323   :  { %v6328_v31 = vmax.f32 %v8808_v50, 0.0  ;;  %v8810_v35 = vadd.f32 %v4884_v45, %v12268_v17  ;;  %v6332_v34 = vmax.f32 %v8753_v4, 0.0  ;;  %v6334_v10 = vmax.f32 %v8809_v52, 0.0  ;;  %v6529_v50 = vld [vmem:[%s14555_s3 + $0x430] sm:$0xff]  ;;  %v15080_v60 = vld [vmem:[#allocation30_spill] sm:$0xff] }
 0x324   :  { %5304 = vmatpush1.bf16.msra.mxu0 %v9898_v44  ;;  %v6524_v44 = vld [vmem:[%s14555_s3 + $0x408] sm:$0xff]  ;;  %v6333_v45 = vmax.f32 %v8754_v14, 0.0  ;;  %v12993_v4 = vmul.f32 %v6521_v32, %v6325_v46  ;;  %v12995_v52 = vmul.f32 %v6523_v40, %v6327_v18  ;;  %v13001_v28 = vmul.f32 %v6522_v30, %v6326_v11  ;;  %v4196_v14 = vpop.f32.mrb[40].mxu0 }
 0x325   :  { %5446 = vmatprep.subr.bf16.mxu0 %v9906_v0  ;;  %v6335_v0 = vmax.f32 %v8810_v35, 0.0  ;;  %v12997_v19 = vmul.f32 %v6528_v47, %v6332_v34  ;;  %v12999_v7 = vmul.f32 %v6530_v53, %v6334_v10  ;;  %v13003_v6 = vmul.f32 %v6524_v44, %v6328_v31  ;;  %v4888_v35 = vpop.f32.mrb[40].mxu1  ;;  %v4198_v11 = vpop.f32.mrb[41].mxu0  ;;  %v6544_v46 = vld [vmem:[%s14555_s3 + $0x4a8] sm:$0xff] }
 0x326   :  { %5213 = vmatmul.mubr.bf16.gmra.mrb[88].mxu0 %v15079_v49  ;;  %5861 = vmatmul.mubr.bf16.gmra.mrb[144].mxu1 %v15079_v49  ;;  %15081 = vst [vmem:[#allocation29_spill] sm:$0xff] %v12993_v4  ;;  %15082 = vst [vmem:[#allocation30_spill] sm:$0xff] %v12995_v52  ;;  %v13005_v21 = vmul.f32 %v6529_v50, %v6333_v45  ;;  %v8755_v18 = vadd.f32 %v4196_v14, %v12260_v12  ;;  %v4890_v53 = vpop.f32.mrb[41].mxu1  ;;  %v6535_v50 = vld [vmem:[%s14555_s3 + $0x460] sm:$0xff]  ;;  %v6545_v52 = vld [vmem:[%s14555_s3 + $0x4b0] sm:$0xff] }
 0x327   :  { %5222 = vmatprep.mubr.bf16.mxu0 %v15080_v60  ;;  %5868 = vmatprep.mubr.bf16.mxu1 %v15080_v60  ;;  %15083 = vst [vmem:[#allocation97_spill] sm:$0xff] %v12997_v19  ;;  %15084 = vst [vmem:[#allocation98_spill] sm:$0xff] %v12999_v7  ;;  %v13007_v49 = vmul.f32 %v6531_v41, %v6335_v0  ;;  %v8811_v10 = vadd.f32 %v4888_v35, %v12262_v37  ;;  %v4200_v41 = vpop.f32.mrb[42].mxu0  ;;  %v4892_v30 = vpop.f32.mrb[42].mxu1  ;;  %v6537_v0 = vld [vmem:[%s14555_s3 + $0x470] sm:$0xff] }
 0x328   :  { %15085 = vst [vmem:[#allocation99_spill] sm:$0xff] %v13003_v6  ;;  %v8756_v31 = vadd.f32 %v4198_v11, %v12266_v3  ;;  %v8812_v40 = vadd.f32 %v4890_v53, %v12268_v17  ;;  %v6339_v34 = vmax.f32 %v8755_v18, 0.0  ;;  %v8757_v60 = vadd.f32 %v4200_v41, %v12260_v12  ;;  %v4202_v35 = vpop.f32.mrb[43].mxu0  ;;  %v4894_v11 = vpop.f32.mrb[43].mxu1  ;;  %v6536_v18 = vld [vmem:[%s14555_s3 + $0x468] sm:$0xff] }
 0x329   :  { %15086 = vst [vmem:[#allocation100_spill] sm:$0xff] %v13007_v49  ;;  %v6341_v45 = vmax.f32 %v8811_v10, 0.0  ;;  %v8813_v14 = vadd.f32 %v4892_v30, %v12262_v37  ;;  %v6542_v10 = vld [vmem:[%s14555_s3 + $0x498] sm:$0xff]  ;;  %v8758_v41 = vadd.f32 %v4202_v35, %v12266_v3  ;;  %v8814_v30 = vadd.f32 %v4894_v11, %v12268_v17 }
 0x32a   :  { %v6340_v53 = vmax.f32 %v8756_v31, 0.0  ;;  %v6342_v32 = vmax.f32 %v8812_v40, 0.0  ;;  %v6538_v31 = vld [vmem:[%s14555_s3 + $0x478] sm:$0xff]  ;;  %v6346_v44 = vmax.f32 %v8757_v60, 0.0  ;;  %v6543_v40 = vld [vmem:[%s14555_s3 + $0x4a0] sm:$0xff]  ;;  %v13053_v60 = vmul.f32 %v6535_v50, %v6339_v34 }
 0x32b   :  { %v6348_v47 = vmax.f32 %v8813_v14, 0.0  ;;  %v6347_v35 = vmax.f32 %v8758_v41, 0.0  ;;  %v6349_v11 = vmax.f32 %v8814_v30, 0.0  ;;  %v13055_v14 = vmul.f32 %v6537_v0, %v6341_v45 }
 0x32c   :  { %15087 = vst [vmem:[#allocation101_spill] sm:$0xff] %v13053_v60  ;;  %v13057_v7 = vmul.f32 %v6542_v10, %v6346_v44  ;;  %v13061_v19 = vmul.f32 %v6536_v18, %v6340_v53  ;;  %v13063_v6 = vmul.f32 %v6538_v31, %v6342_v32  ;;  %v4206_v41 = vpop.f32.mrb[44].mxu0  ;;  %v4898_v30 = vpop.f32.mrb[44].mxu1  ;;  %v6549_v31 = vld [vmem:[%s14555_s3 + $0x4d0] sm:$0xff] }
 0x32d   :  { %15088 = vst [vmem:[#allocation102_spill] sm:$0xff] %v13055_v14  ;;  %v13059_v4 = vmul.f32 %v6544_v46, %v6348_v47  ;;  %v13065_v49 = vmul.f32 %v6543_v40, %v6347_v35  ;;  %v8759_v44 = vadd.f32 %v4206_v41, %v12260_v12  ;;  %v8815_v46 = vadd.f32 %v4898_v30, %v12262_v37  ;;  %v4208_v47 = vpop.f32.mrb[45].mxu0  ;;  %v4900_v50 = vpop.f32.mrb[45].mxu1  ;;  %v6551_v35 = vld [vmem:[%s14555_s3 + $0x4e0] sm:$0xff] }
 0x32e   :  { %5223 = vmatmul.mubr.bf16.gmra.mrb[92].mxu0 %v11444_v25  ;;  %5869 = vmatmul.mubr.bf16.gmra.mrb[148].mxu1 %v11444_v25  ;;  %15089 = vst [vmem:[#allocation103_spill] sm:$0xff] %v13057_v7  ;;  %15091 = vst [vmem:[#allocation105_spill] sm:$0xff] %v13061_v19  ;;  %v13067_v25 = vmul.f32 %v6545_v52, %v6349_v11  ;;  %v8760_v32 = vadd.f32 %v4208_v47, %v12266_v3  ;;  %v4210_v52 = vpop.f32.mrb[46].mxu0  ;;  %v4902_v0 = vpop.f32.mrb[46].mxu1  ;;  %v6559_v14 = vld [vmem:[%s14555_s3 + $0x520] sm:$0xff] }
 0x32f   :  { %5232 = vmatprep.mubr.bf16.mxu0 %v11470_v62  ;;  %5876 = vmatprep.mubr.bf16.mxu1 %v11470_v62  ;;  %15090 = vst [vmem:[#allocation104_spill] sm:$0xff] %v13059_v4  ;;  %15092 = vst [vmem:[#allocation106_spill] sm:$0xff] %v13063_v6  ;;  %v8816_v45 = vadd.f32 %v4900_v50, %v12268_v17  ;;  %v6353_v10 = vmax.f32 %v8759_v44, 0.0  ;;  %v6355_v40 = vmax.f32 %v8815_v46, 0.0  ;;  %v4212_v30 = vpop.f32.mrb[47].mxu0  ;;  %v4904_v47 = vpop.f32.mrb[47].mxu1 }
 0x330   :  { %15093 = vst [vmem:[#allocation107_spill] sm:$0xff] %v13067_v25  ;;  %v8761_v11 = vadd.f32 %v4210_v52, %v12260_v12  ;;  %v8817_v41 = vadd.f32 %v4902_v0, %v12262_v37  ;;  %v6354_v50 = vmax.f32 %v8760_v32, 0.0  ;;  %v6550_v44 = vld [vmem:[%s14555_s3 + $0x4d8] sm:$0xff]  ;;  %v6556_v46 = vld [vmem:[%s14555_s3 + $0x508] sm:$0xff]  ;;  %v8762_v52 = vadd.f32 %v4212_v30, %v12266_v3  ;;  %v15094_v4 = vld [vmem:[#allocation31_spill] sm:$0xff] }
 0x331   :  { %v6356_v34 = vmax.f32 %v8816_v45, 0.0  ;;  %v6558_v62 = vld [vmem:[%s14555_s3 + $0x518] sm:$0xff]  ;;  %v8818_v0 = vadd.f32 %v4904_v47, %v12268_v17  ;;  %v6552_v32 = vld [vmem:[%s14555_s3 + $0x4e8] sm:$0xff]  ;;  %v6557_v45 = vld [vmem:[%s14555_s3 + $0x510] sm:$0xff] }
 0x332   :  { %v6360_v18 = vmax.f32 %v8761_v11, 0.0  ;;  %v6362_v53 = vmax.f32 %v8817_v41, 0.0  ;;  %v6361_v30 = vmax.f32 %v8762_v52, 0.0  ;;  %v13113_v11 = vmul.f32 %v6549_v31, %v6353_v10 }
 0x333   :  { %v6363_v47 = vmax.f32 %v8818_v0, 0.0  ;;  %v13115_v41 = vmul.f32 %v6551_v35, %v6355_v40  ;;  %v13121_v6 = vmul.f32 %v6550_v44, %v6354_v50  ;;  %v13123_v25 = vmul.f32 %v6552_v32, %v6356_v34  ;;  %v6563_v32 = vld [vmem:[%s14555_s3 + $0x540] sm:$0xff] }
 0x334   :  { %15095 = vst [vmem:[#allocation31_spill] sm:$0xff] %v13113_v11  ;;  %v13117_v60 = vmul.f32 %v6556_v46, %v6360_v18  ;;  %v13119_v7 = vmul.f32 %v6558_v62, %v6362_v53  ;;  %v13125_v19 = vmul.f32 %v6557_v45, %v6361_v30  ;;  %v4216_v52 = vpop.f32.mrb[48].mxu0  ;;  %v4908_v0 = vpop.f32.mrb[48].mxu1  ;;  %v6565_v30 = vld [vmem:[%s14555_s3 + $0x550] sm:$0xff] }
 0x335   :  { %15096 = vst [vmem:[#allocation108_spill] sm:$0xff] %v13115_v41  ;;  %15099 = vst [vmem:[#allocation111_spill] sm:$0xff] %v13121_v6  ;;  %v8763_v18 = vadd.f32 %v4216_v52, %v12260_v12  ;;  %v8819_v62 = vadd.f32 %v4908_v0, %v12262_v37  ;;  %v4218_v53 = vpop.f32.mrb[49].mxu0  ;;  %v4910_v31 = vpop.f32.mrb[49].mxu1  ;;  %v6573_v41 = vld [vmem:[%s14555_s3 + $0x590] sm:$0xff] }
 0x336   :  { %5233 = vmatmul.mubr.bf16.gmra.mrb[96].mxu0 %v11486_v43  ;;  %5877 = vmatmul.mubr.bf16.gmra.mrb[152].mxu1 %v11486_v43  ;;  %15097 = vst [vmem:[#allocation109_spill] sm:$0xff] %v13117_v60  ;;  %15098 = vst [vmem:[#allocation110_spill] sm:$0xff] %v13119_v7  ;;  %v13127_v43 = vmul.f32 %v6559_v14, %v6363_v47  ;;  %v8764_v34 = vadd.f32 %v4218_v53, %v12266_v3  ;;  %v4220_v14 = vpop.f32.mrb[50].mxu0  ;;  %v4912_v35 = vpop.f32.mrb[50].mxu1  ;;  %v15102_v7 = vld [vmem:[#allocation32_spill] sm:$0xff] }
 0x337   :  { %5242 = vmatprep.mubr.bf16.mxu0 %v15094_v4  ;;  %5884 = vmatprep.mubr.bf16.mxu1 %v15094_v4  ;;  %15100 = vst [vmem:[#allocation112_spill] sm:$0xff] %v13123_v25  ;;  %v8820_v40 = vadd.f32 %v4910_v31, %v12268_v17  ;;  %v6367_v46 = vmax.f32 %v8763_v18, 0.0  ;;  %v6369_v45 = vmax.f32 %v8819_v62, 0.0  ;;  %v8765_v47 = vadd.f32 %v4220_v14, %v12260_v12  ;;  %v4222_v0 = vpop.f32.mrb[51].mxu0  ;;  %v4914_v53 = vpop.f32.mrb[51].mxu1  ;;  %v6564_v18 = vld [vmem:[%s14555_s3 + $0x548] sm:$0xff] }
 0x338   :  { %15101 = vst [vmem:[#allocation113_spill] sm:$0xff] %v13127_v43  ;;  %v8821_v52 = vadd.f32 %v4912_v35, %v12262_v37  ;;  %v6368_v31 = vmax.f32 %v8764_v34, 0.0  ;;  %v6570_v62 = vld [vmem:[%s14555_s3 + $0x578] sm:$0xff]  ;;  %v6572_v4 = vld [vmem:[%s14555_s3 + $0x588] sm:$0xff]  ;;  %v8766_v14 = vadd.f32 %v4222_v0, %v12266_v3  ;;  %v8822_v35 = vadd.f32 %v4914_v53, %v12268_v17 }
 0x339   :  { %v6370_v10 = vmax.f32 %v8820_v40, 0.0  ;;  %v6566_v34 = vld [vmem:[%s14555_s3 + $0x558] sm:$0xff]  ;;  %v6374_v44 = vmax.f32 %v8765_v47, 0.0  ;;  %v6571_v40 = vld [vmem:[%s14555_s3 + $0x580] sm:$0xff]  ;;  %v13173_v47 = vmul.f32 %v6563_v32, %v6367_v46 }
 0x33a   :  { %v6376_v50 = vmax.f32 %v8821_v52, 0.0  ;;  %v6375_v0 = vmax.f32 %v8766_v14, 0.0  ;;  %v6377_v53 = vmax.f32 %v8822_v35, 0.0  ;;  %v13175_v52 = vmul.f32 %v6565_v30, %v6369_v45 }
 0x33b   :  { %15103 = vst [vmem:[#allocation32_spill] sm:$0xff] %v13173_v47  ;;  %v13177_v11 = vmul.f32 %v6570_v62, %v6374_v44  ;;  %v13181_v25 = vmul.f32 %v6564_v18, %v6368_v31  ;;  %v13183_v43 = vmul.f32 %v6566_v34, %v6370_v10  ;;  %v6577_v34 = vld [vmem:[%s14555_s3 + $0x5b0] sm:$0xff]  ;;  %v6587_v18 = vld [vmem:[%s14555_s3 + $0x600] sm:$0xff] }
 0x33c   :  { %15104 = vst [vmem:[#allocation114_spill] sm:$0xff] %v13175_v52  ;;  %v13179_v60 = vmul.f32 %v6572_v4, %v6376_v50  ;;  %v13185_v6 = vmul.f32 %v6571_v40, %v6375_v0  ;;  %v4226_v14 = vpop.f32.mrb[52].mxu0  ;;  %v4918_v35 = vpop.f32.mrb[52].mxu1  ;;  %v6579_v0 = vld [vmem:[%s14555_s3 + $0x5c0] sm:$0xff] }
 0x33d   :  { %v8767_v44 = vadd.f32 %v4226_v14, %v12260_v12  ;;  %v8823_v4 = vadd.f32 %v4918_v35, %v12262_v37  ;;  %v4228_v50 = vpop.f32.mrb[53].mxu0  ;;  %v4920_v32 = vpop.f32.mrb[53].mxu1 }
 0x33e   :  { %5243 = vmatmul.mubr.bf16.gmra.mrb[100].mxu0 %v11512_v2  ;;  %5885 = vmatmul.mubr.bf16.gmra.mrb[156].mxu1 %v11512_v2  ;;  %15105 = vst [vmem:[#allocation115_spill] sm:$0xff] %v13179_v60  ;;  %v13187_v2 = vmul.f32 %v6573_v41, %v6377_v53  ;;  %v8768_v10 = vadd.f32 %v4228_v50, %v12266_v3  ;;  %v4230_v41 = vpop.f32.mrb[54].mxu0  ;;  %v4922_v30 = vpop.f32.mrb[54].mxu1 }
 0x33f   :  { %5252 = vmatprep.mubr.bf16.mxu0 %v15102_v7  ;;  %5892 = vmatprep.mubr.bf16.mxu1 %v15102_v7  ;;  %v8824_v45 = vadd.f32 %v4920_v32, %v12268_v17  ;;  %v6381_v62 = vmax.f32 %v8767_v44, 0.0  ;;  %v6383_v40 = vmax.f32 %v8823_v4, 0.0  ;;  %v8769_v53 = vadd.f32 %v4230_v41, %v12260_v12  ;;  %v4232_v35 = vpop.f32.mrb[55].mxu0  ;;  %v4924_v50 = vpop.f32.mrb[55].mxu1  ;;  %v6578_v44 = vld [vmem:[%s14555_s3 + $0x5b8] sm:$0xff]  ;;  %v6584_v4 = vld [vmem:[%s14555_s3 + $0x5e8] sm:$0xff] }
 0x340   :  { %v8825_v14 = vadd.f32 %v4922_v30, %v12262_v37  ;;  %v6382_v32 = vmax.f32 %v8768_v10, 0.0  ;;  %v6586_v7 = vld [vmem:[%s14555_s3 + $0x5f8] sm:$0xff]  ;;  %v8770_v12 = vadd.f32 %v4232_v35, %v12266_v3  ;;  %v8826_v37 = vadd.f32 %v4924_v50, %v12268_v17  ;;  %v6580_v10 = vld [vmem:[%s14555_s3 + $0x5c8] sm:$0xff]  ;;  %v15106_v35 = vld [vmem:[#allocation33_spill] sm:$0xff] }
 0x341   :  { %v6384_v46 = vmax.f32 %v8824_v45, 0.0  ;;  %v6388_v41 = vmax.f32 %v8769_v53, 0.0  ;;  %v6585_v45 = vld [vmem:[%s14555_s3 + $0x5f0] sm:$0xff]  ;;  %v13233_v53 = vmul.f32 %v6577_v34, %v6381_v62 }
 0x342   :  { %v6390_v30 = vmax.f32 %v8825_v14, 0.0  ;;  %v6389_v3 = vmax.f32 %v8770_v12, 0.0  ;;  %v6391_v17 = vmax.f32 %v8826_v37, 0.0  ;;  %v13235_v14 = vmul.f32 %v6579_v0, %v6383_v40  ;;  %v15130_v0 = vld [vmem:[#allocation6_spill] sm:$0xff] }
 0x343   :  { %v13237_v50 = vmul.f32 %v6584_v4, %v6388_v41  ;;  %v13241_v52 = vmul.f32 %v6578_v44, %v6382_v32  ;;  %v13243_v60 = vmul.f32 %v6580_v10, %v6384_v46  ;;  %v15124_v46 = vmov 0  }
 0x344   :  { %v13239_v31 = vmul.f32 %v6586_v7, %v6390_v30  ;;  %v13245_v47 = vmul.f32 %v6585_v45, %v6389_v3  ;;  %v7899_v12 = vpop.f32.mrb[56].mxu1  ;;  %v9904_v30 = vld [vmem:[%s14553_s1 + $0xa90] ss:$28 sps:$4 sm:$0xff]  }
 0x345   :  { %v7900_v34 = vpop.f32.mrb[57].mxu1 }
 0x346   :  { %5253 = vmatmul.mubr.bf16.gmra.mrb[104].mxu0 %v11540_v9  ;;  %5893 = vmatmul.mubr.bf16.gmra.mrb[160].mxu1 %v11540_v9  ;;  %v13247_v9 = vmul.f32 %v6587_v18, %v6391_v17  ;;  %v13253_v40 = vadd.f32 %v7900_v34, %v7899_v12  ;;  %v7902_v7 = vpop.f32.mrb[58].mxu1  ;;  %v15109_v17 = vpack.c.bf16 %v12320_v29, %v12318_v5 }
 0x347   :  { %5262 = vmatprep.mubr.bf16.mxu0 %v15106_v35  ;;  %5900 = vmatprep.mubr.bf16.mxu1 %v15106_v35  ;;  %v7903_v32 = vpop.f32.mrb[59].mxu1 }
 0x348   :  { %v13259_v18 = vadd.f32 %v7903_v32, %v7902_v7 }
 0x34c   :  { %v7905_v44 = vpop.f32.mrb[60].mxu1 }
 0x34d   :  { %v7906_v4 = vpop.f32.mrb[61].mxu1 }
 0x34e   :  { %5263 = vmatmul.mubr.bf16.gmra.mrb[108].mxu0 %v11558_v39  ;;  %5901 = vmatmul.mubr.bf16.gmra.mrb[164].mxu1 %v11558_v39  ;;  %v13265_v10 = vadd.f32 %v7906_v4, %v7905_v44  ;;  %v7908_v41 = vpop.f32.mrb[62].mxu1  ;;  %v15107_v39 = vld [vmem:[#allocation34_spill] sm:$0xff] }
 0x34f   :  { %5305 = vmatprep.mubr.bf16.mxu0 %v11566_v63  ;;  %5941 = vmatprep.mubr.bf16.mxu1 %v11566_v63  ;;  %v7909_v45 = vpop.f32.mrb[63].mxu1  ;;  %v15108_v63 = vpack.c.bf16 %v12316_v15, %v12314_v51 }
 0x350   :  { %v13270_v3 = vadd.f32 %v7909_v45, %v7908_v41 }
 0x354   :  { %v7911_v35 = vpop.f32.mrb[64].mxu1 }
 0x355   :  { %v7912_v12 = vpop.f32.mrb[65].mxu1 }
 0x356   :  { %5306 = vmatmul.mubr.bf16.vlgmr.msra.gmra.mrb[56].mxu0 %v11580_v36  ;;  %5942 = vmatmul.mubr.bf16.vlgmr.msra.gmra.mrb[168].mxu1 %v11580_v36  ;;  %v13283_v34 = vadd.f32 %v7912_v12, %v7911_v35  ;;  %v7914_v36 = vpop.f32.mrb[66].mxu1  ;;  %v15110_v12 = vld [vmem:[#allocation35_spill] sm:$0xff] }
 0x357   :  { %5447 = vmatpush1.bf16.msra.mxu0 %v9904_v30  ;;  %8321 = vmatpush3.bf16.msra.mxu1 %v12684_v26  ;;  %v7915_v7 = vpop.f32.mrb[67].mxu1 }
 0x358   :  { %5315 = vmatprep.mubr.bf16.mxu0 %v15107_v39  ;;  %5949 = vmatprep.mubr.bf16.mxu1 %v15107_v39  ;;  %v13285_v32 = vadd.f32 %v7915_v7, %v7914_v36 }
 0x359   :  { %8386 = vmatprep.subr.bf16.mxu1 %v15108_v63  ;;  %8442 = vmatprep.subr.bf16.mxu0 %v15109_v17 }
 0x35c   :  { %v7917_v15 = vpop.f32.mrb[68].mxu1 }
 0x35d   :  { %v7918_v51 = vpop.f32.mrb[69].mxu1 }
 0x35e   :  { %5316 = vmatmul.mubr.bf16.gmra.mrb[60].mxu0 %v11601_v13  ;;  %5950 = vmatmul.mubr.bf16.gmra.mrb[172].mxu1 %v11601_v13  ;;  %v13291_v5 = vadd.f32 %v7918_v51, %v7917_v15  ;;  %v7920_v29 = vpop.f32.mrb[70].mxu1 }
 0x35f   :  { %5325 = vmatprep.mubr.bf16.mxu0 %v11609_v56  ;;  %5957 = vmatprep.mubr.bf16.mxu1 %v11609_v56  ;;  %v7921_v26 = vpop.f32.mrb[71].mxu1 }
 0x360   :  { %v13293_v44 = vadd.f32 %v7921_v26, %v7920_v29  ;;  %v15111_v29 = vld [vmem:[#allocation36_spill] sm:$0xff] }
 0x364   :  { %v7923_v13 = vpop.f32.mrb[72].mxu1 }
 0x365   :  { %v7924_v4 = vpop.f32.mrb[73].mxu1 }
 0x366   :  { %5326 = vmatmul.mubr.bf16.gmra.mrb[64].mxu0 %v11617_v38  ;;  %5958 = vmatmul.mubr.bf16.gmra.mrb[176].mxu1 %v11617_v38  ;;  %v13299_v41 = vadd.f32 %v7924_v4, %v7923_v13  ;;  %v7926_v56 = vpop.f32.mrb[74].mxu1 }
 0x367   :  { %5335 = vmatprep.mubr.bf16.mxu0 %v11625_v61  ;;  %5965 = vmatprep.mubr.bf16.mxu1 %v11625_v61  ;;  %v7927_v30 = vpop.f32.mrb[75].mxu1 }
 0x368   :  { %v13301_v45 = vadd.f32 %v7927_v30, %v7926_v56 }
 0x36c   :  { %v7929_v38 = vpop.f32.mrb[76].mxu1 }
 0x36d   :  { %v7930_v39 = vpop.f32.mrb[77].mxu1 }
 0x36e   :  { %5336 = vmatmul.mubr.bf16.gmra.mrb[68].mxu0 %v11633_v42  ;;  %5966 = vmatmul.mubr.bf16.gmra.mrb[180].mxu1 %v11633_v42  ;;  %v13307_v63 = vadd.f32 %v7930_v39, %v7929_v38  ;;  %v7932_v61 = vpop.f32.mrb[78].mxu1  ;;  %v15112_v38 = vld [vmem:[#allocation37_spill] sm:$0xff] }
 0x36f   :  { %5345 = vmatprep.mubr.bf16.mxu0 %v11641_v24  ;;  %5973 = vmatprep.mubr.bf16.mxu1 %v11641_v24  ;;  %v7933_v17 = vpop.f32.mrb[79].mxu1 }
 0x370   :  { %v13309_v35 = vadd.f32 %v7933_v17, %v7932_v61 }
 0x374   :  { %v7935_v42 = vpop.f32.mrb[80].mxu1 }
 0x375   :  { %v7936_v36 = vpop.f32.mrb[81].mxu1 }
 0x376   :  { %5346 = vmatmul.mubr.bf16.gmra.mrb[72].mxu0 %v11649_v48  ;;  %5974 = vmatmul.mubr.bf16.gmra.mrb[184].mxu1 %v11649_v48  ;;  %v13315_v7 = vadd.f32 %v7936_v36, %v7935_v42  ;;  %v7938_v24 = vpop.f32.mrb[82].mxu1 }
 0x377   :  { %5355 = vmatprep.mubr.bf16.mxu0 %v15110_v12  ;;  %5981 = vmatprep.mubr.bf16.mxu1 %v15110_v12  ;;  %v7939_v15 = vpop.f32.mrb[83].mxu1 }
 0x378   :  { %v13317_v51 = vadd.f32 %v7939_v15, %v7938_v24 }
 0x37c   :  { %v7941_v48 = vpop.f32.mrb[84].mxu1 }
 0x37d   :  { %v7942_v26 = vpop.f32.mrb[85].mxu1 }
 0x37e   :  { %5356 = vmatmul.mubr.bf16.gmra.mrb[76].mxu0 %v15111_v29  ;;  %5982 = vmatmul.mubr.bf16.gmra.mrb[188].mxu1 %v15111_v29  ;;  %v13323_v13 = vadd.f32 %v7942_v26, %v7941_v48  ;;  %v7944_v4 = vpop.f32.mrb[86].mxu1 }
 0x37f   :  { %5365 = vmatprep.mubr.bf16.mxu0 %v11678_v23  ;;  %5989 = vmatprep.mubr.bf16.mxu1 %v11678_v23  ;;  %v7945_v56 = vpop.f32.mrb[87].mxu1 }
 0x380   :  { %v13325_v30 = vadd.f32 %v7945_v56, %v7944_v4 }
 0x384   :  { %v7947_v39 = vpop.f32.mrb[88].mxu1 }
 0x385   :  { %v7948_v61 = vpop.f32.mrb[89].mxu1 }
 0x386   :  { %5366 = vmatmul.mubr.bf16.gmra.mrb[80].mxu0 %v11688_v57  ;;  %5990 = vmatmul.mubr.bf16.gmra.mrb[192].mxu1 %v11688_v57  ;;  %v13331_v17 = vadd.f32 %v7948_v61, %v7947_v39  ;;  %v7950_v23 = vpop.f32.mrb[90].mxu1 }
 0x387   :  { %5375 = vmatprep.mubr.bf16.mxu0 %v15112_v38  ;;  %5997 = vmatprep.mubr.bf16.mxu1 %v15112_v38  ;;  %v7951_v12 = vpop.f32.mrb[91].mxu1 }
 0x388   :  { %v13333_v42 = vadd.f32 %v7951_v12, %v7950_v23 }
 0x38c   :  { %v7953_v57 = vpop.f32.mrb[92].mxu1 }
 0x38d   :  { %v7954_v36 = vpop.f32.mrb[93].mxu1 }
 0x38e   :  { %5376 = vmatmul.mubr.bf16.gmra.mrb[84].mxu0 %v11704_v55  ;;  %5998 = vmatmul.mubr.bf16.gmra.mrb[196].mxu1 %v11704_v55  ;;  %v13339_v24 = vadd.f32 %v7954_v36, %v7953_v57  ;;  %v7956_v15 = vpop.f32.mrb[94].mxu1  ;;  %v15113_v57 = vld [vmem:[#allocation38_spill] sm:$0xff] }
 0x38f   :  { %5385 = vmatprep.mubr.bf16.mxu0 %v11702_v1  ;;  %6005 = vmatprep.mubr.bf16.mxu1 %v11702_v1  ;;  %v7957_v29 = vpop.f32.mrb[95].mxu1 }
 0x390   :  { %v13341_v48 = vadd.f32 %v7957_v29, %v7956_v15 }
 0x394   :  { %v7959_v55 = vpop.f32.mrb[96].mxu1 }
 0x395   :  { %v7960_v26 = vpop.f32.mrb[97].mxu1 }
 0x396   :  { %5386 = vmatmul.mubr.bf16.gmra.mrb[88].mxu0 %v11720_v54  ;;  %6006 = vmatmul.mubr.bf16.gmra.mrb[200].mxu1 %v11720_v54  ;;  %v13347_v4 = vadd.f32 %v7960_v26, %v7959_v55  ;;  %v7962_v1 = vpop.f32.mrb[98].mxu1 }
 0x397   :  { %5395 = vmatprep.mubr.bf16.mxu0 %v11718_v33  ;;  %6013 = vmatprep.mubr.bf16.mxu1 %v11718_v33  ;;  %v7963_v56 = vpop.f32.mrb[99].mxu1 }
 0x398   :  { %v13349_v38 = vadd.f32 %v7963_v56, %v7962_v1  ;;  %v15114_v1 = vld [vmem:[#allocation3_spill] sm:$0xff] }
 0x399   :  { %v1728_v56 = vsub.s32 6, %v15114_v1 }
 0x39c   :  { %v7965_v54 = vpop.f32.mrb[100].mxu1 }
 0x39d   :  { %v7966_v39 = vpop.f32.mrb[101].mxu1 }
 0x39e   :  { %5396 = vmatmul.mubr.bf16.gmra.mrb[92].mxu0 %v11736_v27  ;;  %6014 = vmatmul.mubr.bf16.gmra.mrb[204].mxu1 %v11736_v27  ;;  %v13355_v61 = vadd.f32 %v7966_v39, %v7965_v54  ;;  %v7968_v33 = vpop.f32.mrb[102].mxu1 }
 0x39f   :  { %5405 = vmatprep.mubr.bf16.mxu0 %v11734_v16  ;;  %6021 = vmatprep.mubr.bf16.mxu1 %v11734_v16  ;;  %v7969_v23 = vpop.f32.mrb[103].mxu1 }
 0x3a0   :  { %v13357_v12 = vadd.f32 %v7969_v23, %v7968_v33 }
 0x3a4   :  { %v7971_v27 = vpop.f32.mrb[104].mxu1 }
 0x3a5   :  { %v7972_v36 = vpop.f32.mrb[105].mxu1 }
 0x3a6   :  { %5406 = vmatmul.mubr.bf16.gmra.mrb[96].mxu0 %v11751_v58  ;;  %6022 = vmatmul.mubr.bf16.gmra.mrb[208].mxu1 %v11751_v58  ;;  %v13363_v15 = vadd.f32 %v7972_v36, %v7971_v27  ;;  %v7974_v16 = vpop.f32.mrb[106].mxu1  ;;  %v15118_v27 = vld [vmem:[#allocation39_spill] sm:$0xff] }
 0x3a7   :  { %5415 = vmatprep.mubr.bf16.mxu0 %v15113_v57  ;;  %6029 = vmatprep.mubr.bf16.mxu1 %v15113_v57  ;;  %v7975_v29 = vpop.f32.mrb[107].mxu1  ;;  %v15116_v57 = vld [vmem:[#allocation40_spill] sm:$0xff] }
 0x3a8   :  { %v13365_v55 = vadd.f32 %v7975_v29, %v7974_v16 }
 0x3ac   :  { %v7977_v58 = vpop.f32.mrb[108].mxu1 }
 0x3ad   :  { %v7978_v26 = vpop.f32.mrb[109].mxu1 }
 0x3ae   :  { %5416 = vmatmul.mubr.bf16.gmra.mrb[100].mxu0 %v11767_v59  ;;  %6030 = vmatmul.mubr.bf16.gmra.mrb[212].mxu1 %v11767_v59  ;;  %v13372_v54 = vadd.f32 %v7978_v26, %v7977_v58  ;;  %v7980_v39 = vpop.f32.mrb[110].mxu1  ;;  %v13381_v59 = vld [vmem:[%s14554_s2] sm:$0xff] }
 0x3af   :  { %5425 = vmatprep.mubr.bf16.mxu0 %v11765_v22  ;;  %6037 = vmatprep.mubr.bf16.mxu1 %v11765_v22  ;;  %v7981_v33 = vpop.f32.mrb[111].mxu1  ;;  %15117 = vst [vmem:[#allocation34_spill] sm:$0xff] %v13381_v59  ;;  %v13384_v22 = vrot.slane %v13381_v59, %v1728_v56  ;;  %v15120_v56 = vld [vmem:[#allocation41_spill] sm:$0xff]  ;;  %v15131_v59 = vld [vmem:[#allocation4_spill] sm:$0xff] }
 0x3b0   :  { %v13374_v23 = vadd.f32 %v7981_v33, %v7980_v39 }
 0x3b1   :  { %v5654_v29 = vadd.f32 %v13253_v40, %v13384_v22  ;;  %v5657_v33 = vadd.f32 %v13259_v18, %v13384_v22 }
 0x3b2   :  { %15115 = vst [vmem:[#allocation33_spill] sm:$0xff] %v13374_v23 }
 0x3b6   :  { %5426 = vmatmul.mubr.bf16.gmra.mrb[104].mxu0 %v15116_v57  ;;  %6038 = vmatmul.mubr.bf16.gmra.mrb[216].mxu1 %v15116_v57  ;;  %v7999_v36 = vpop.f32.mrb[112].mxu1 }
 0x3b7   :  { %5435 = vmatprep.mubr.bf16.mxu0 %v15118_v27  ;;  %6045 = vmatprep.mubr.bf16.mxu1 %v15118_v27  ;;  %v8000_v16 = vpop.f32.mrb[113].mxu1  ;;  %v15122_v27 = vld [vmem:[#allocation42_spill] sm:$0xff] }
 0x3b8   :  { %v8001_v58 = vadd.f32 %v8000_v16, %v7999_v36  ;;  %v8002_v26 = vpop.f32.mrb[114].mxu1  ;;  %v5662_v16 = vadd.f32 %v13265_v10, %v13384_v22  ;;  %v15132_v10 = vpack.c.bf16 %v15130_v0, %v15131_v59  ;;  %v5670_v59 = vadd.f32 %v13283_v34, %v13384_v22 }
 0x3b9   :  { %v8003_v39 = vpop.f32.mrb[115].mxu1  ;;  %v5673_v34 = vadd.f32 %v13285_v32, %v13384_v22  ;;  %v15165_v32 = vld [vmem:[#allocation46_spill] sm:$0xff] }
 0x3ba   :  { %v13392_v57 = vadd.f32 %v8001_v58, %v5654_v29  ;;  %v8004_v62 = vadd.f32 %v8003_v39, %v8002_v26  ;;  %v5665_v26 = vadd.f32 %v13270_v3, %v13384_v22  ;;  %v15136_v3 = vld [vmem:[#allocation44_spill] sm:$0xff] }
 0x3bc   :  { %15119 = vst [vmem:[#allocation35_spill] sm:$0xff] %v13392_v57  ;;  %v13396_v37 = vadd.f32 %v8004_v62, %v5657_v33  ;;  %v15127_v33 = vld [vmem:[#allocation43_spill] sm:$0xff] }
 0x3be   :  { %5436 = vmatmul.mubr.bf16.gmra.mrb[108].mxu0 %v15120_v56  ;;  %6046 = vmatmul.mubr.bf16.gmra.mrb[220].mxu1 %v15120_v56  ;;  %15121 = vst [vmem:[#allocation36_spill] sm:$0xff] %v13396_v37  ;;  %v15154_v37 = vld [vmem:[#allocation60_spill] sm:$0xff] }
 0x3bf   :  { %8322 = vmatprep.mubr.msk.bf16.mxu1 %vm15123_vm5, %v15122_v27  ;;  %5478 = vmatprep.mubr.bf16.mxu0 %v15124_v46  ;;  %v8005_v40 = vpop.f32.mrb[116].mxu1  ;;  %vm15251_vm5 = vmmov %vm14939_vm0 }
 0x3c0   :  { %v8006_v36 = vpop.f32.mrb[117].mxu1 }
 0x3c1   :  { %v8007_v18 = vadd.f32 %v8006_v36, %v8005_v40  ;;  %v8008_v29 = vpop.f32.mrb[118].mxu1  ;;  %v15133_v40 = vld [vmem:[#allocation7_spill] sm:$0xff]  ;;  %v15134_v36 = vld [vmem:[#allocation5_spill] sm:$0xff] }
 0x3c2   :  { %v8009_v58 = vpop.f32.mrb[119].mxu1  ;;  %v15135_v1 = vpack.c.bf16 %v15133_v40, %v15134_v36  ;;  %v15147_v36 = vld [vmem:[#allocation11_spill] sm:$0xff] }
 0x3c3   :  { %v13405_v39 = vadd.f32 %v8007_v18, %v5662_v16  ;;  %v8010_v62 = vadd.f32 %v8009_v58, %v8008_v29  ;;  %v15138_v16 = vld [vmem:[#allocation13_spill] sm:$0xff]  ;;  %v15139_v18 = vld [vmem:[#allocation12_spill] sm:$0xff] }
 0x3c4   :  { %v15140_v29 = vpack.c.bf16 %v15138_v16, %v15139_v18  ;;  %v15142_v58 = vld [vmem:[#allocation56_spill] sm:$0xff] }
 0x3c5   :  { %15125 = vst [vmem:[#allocation37_spill] sm:$0xff] %v13405_v39  ;;  %v13411_v56 = vadd.f32 %v8010_v62, %v5665_v26 }
 0x3c6   :  { %7850 = vmatmul.mubr.msk.bf16.vlgmr.msra.gmra.mrb[56].mxu0 %vm15126_vm15, %v15122_v27  ;;  %8323 = vmatmul.mubr.msk.bf16.vlgmr.msra.gmra.mrb[224].mxu1 %vm15128_vm6, %v15127_v33  ;;  %v15141_v27 = vld [vmem:[#allocation14_spill] sm:$0xff]  ;;  %vm15267_vm15 = vmmov %vm14939_vm0 }
 0x3c7   :  { %15129 = vst [vmem:[#allocation38_spill] sm:$0xff] %v13411_v56  ;;  %8388 = vmatpush1.bf16.msra.mxu1 %v15132_v10  ;;  %8444 = vmatpush1.bf16.msra.mxu0 %v15135_v1  ;;  %v15143_v39 = vpack.c.bf16 %v15141_v27, %v15142_v58  ;;  %v15144_v1 = vld [vmem:[#allocation10_spill] sm:$0xff]  ;;  %v15145_v10 = vld [vmem:[#allocation8_spill] sm:$0xff]  ;;  %v15148_v56 = vld [vmem:[#allocation9_spill] sm:$0xff] }
 0x3c8   :  { %8326 = vmatprep.mubr.msk.bf16.mxu1 %vm15137_vm7, %v15136_v3  ;;  %8390 = vmatprep.subr.bf16.mxu1 %v15140_v29  ;;  %v8011_v26 = vpop.f32.mrb[120].mxu1  ;;  %v15146_v40 = vpack.c.bf16 %v15144_v1, %v15145_v10  ;;  %v15149_v16 = vpack.c.bf16 %v15147_v36, %v15148_v56  ;;  %v15150_v29 = vld [vmem:[#allocation61_spill] sm:$0xff]  ;;  %v15151_v27 = vld [vmem:[#allocation16_spill] sm:$0xff]  ;;  %v15153_v58 = vld [vmem:[#allocation62_spill] sm:$0xff] }
 0x3c9   :  { %8446 = vmatprep.subr.bf16.mxu0 %v15143_v39  ;;  %5488 = vmatprep.mubr.bf16.mxu0 %v15124_v46  ;;  %v8012_v0 = vpop.f32.mrb[121].mxu1  ;;  %v15152_v39 = vpack.c.bf16 %v15150_v29, %v15151_v27  ;;  %v15155_v57 = vpack.c.bf16 %v15153_v58, %v15154_v37  ;;  %v15157_v56 = vld [vmem:[#allocation45_spill] sm:$0xff]  ;;  %v15159_v10 = vld [vmem:[#allocation58_spill] sm:$0xff]  ;;  %v15162_v37 = vld [vmem:[#allocation59_spill] sm:$0xff]  ;;  %v5678_v58 = vadd.f32 %v13291_v5, %v13384_v22 }
 0x3ca   :  { %v8013_v62 = vadd.f32 %v8012_v0, %v8011_v26  ;;  %v8014_v18 = vpop.f32.mrb[122].mxu1  ;;  %v5681_v5 = vadd.f32 %v13293_v44, %v13384_v22  ;;  %v15192_v44 = vld [vmem:[#allocation48_spill] sm:$0xff]  ;;  %vm15269_vm6 = vmmov %vm14939_vm0 }
 0x3cb   :  { %8392 = vmatpush1.bf16.msra.mxu1 %v15146_v40  ;;  %8448 = vmatpush1.bf16.msra.mxu0 %v15149_v16  ;;  %v8015_v23 = vpop.f32.mrb[123].mxu1  ;;  %v15160_v40 = vld [vmem:[#allocation15_spill] sm:$0xff]  ;;  %vm15277_vm7 = vmmov %vm14939_vm0 }
 0x3cc   :  { %8394 = vmatprep.subr.bf16.mxu1 %v15152_v39  ;;  %8450 = vmatprep.subr.bf16.mxu0 %v15155_v57  ;;  %v13444_v26 = vadd.f32 %v8013_v62, %v5670_v59  ;;  %v8016_v0 = vadd.f32 %v8015_v23, %v8014_v18  ;;  %v15161_v36 = vpack.c.bf16 %v15159_v10, %v15160_v40  ;;  %v15163_v57 = vld [vmem:[#allocation57_spill] sm:$0xff]  ;;  %v15167_v23 = vld [vmem:[#allocation67_spill] sm:$0xff]  ;;  %v15168_v59 = vld [vmem:[#allocation18_spill] sm:$0xff] }
 0x3cd   :  { %v15164_v16 = vpack.c.bf16 %v15162_v37, %v15163_v57  ;;  %v15169_v62 = vpack.c.bf16 %v15167_v23, %v15168_v59  ;;  %v15171_v18 = vld [vmem:[#allocation66_spill] sm:$0xff]  ;;  %v15174_v10 = vld [vmem:[#allocation17_spill] sm:$0xff]  ;;  %v15177_v37 = vld [vmem:[#allocation63_spill] sm:$0xff]  ;;  %v15179_v23 = vpack.c.bf16 %v12645_v8, %v12634_v20 }
 0x3ce   :  { %7851 = vmatmul.mubr.msk.bf16.gmra.mrb[60].mxu0 %vm15156_vm8, %v15127_v33  ;;  %8327 = vmatmul.mubr.msk.bf16.gmra.mrb[228].mxu1 %vm15158_vm9, %v15157_v56  ;;  %v13450_v1 = vadd.f32 %v8016_v0, %v5673_v34  ;;  %v15170_v33 = vld [vmem:[#allocation68_spill] sm:$0xff]  ;;  %v15187_v8 = vld [vmem:[#allocation19_spill] sm:$0xff]  ;;  %vm15291_vm8 = vmmov %vm14939_vm0 }
 0x3cf   :  { %8396 = vmatpush1.bf16.msra.mxu1 %v15161_v36  ;;  %8452 = vmatpush1.bf16.msra.mxu0 %v15164_v16  ;;  %v15172_v29 = vpack.c.bf16 %v15170_v33, %v15171_v18  ;;  %v15173_v0 = vld [vmem:[#allocation64_spill] sm:$0xff]  ;;  %v15176_v36 = vld [vmem:[#allocation65_spill] sm:$0xff]  ;;  %vm15293_vm9 = vmmov %vm14939_vm0 }
 0x3d0   :  { %8330 = vmatprep.mubr.msk.bf16.mxu1 %vm15166_vm10, %v15165_v32  ;;  %8398 = vmatprep.subr.bf16.mxu1 %v15169_v62  ;;  %v15175_v40 = vpack.c.bf16 %v15173_v0, %v15174_v10  ;;  %v15178_v57 = vpack.c.bf16 %v15176_v36, %v15177_v37  ;;  %v15180_v59 = vld [vmem:[#allocation72_spill] sm:$0xff]  ;;  %v15181_v62 = vld [vmem:[#allocation71_spill] sm:$0xff]  ;;  %v15190_v36 = vld [vmem:[#allocation69_spill] sm:$0xff] }
 0x3d1   :  { %8454 = vmatprep.subr.bf16.mxu0 %v15172_v29  ;;  %v8017_v27 = vpop.f32.mrb[124].mxu1  ;;  %5498 = vmatprep.mubr.bf16.mxu0 %v15124_v46  ;;  %v15182_v33 = vpack.c.bf16 %v15180_v59, %v15181_v62  ;;  %v15186_v20 = vld [vmem:[#allocation20_spill] sm:$0xff]  ;;  %vm15303_vm10 = vmmov %vm14939_vm0 }
 0x3d2   :  { %v8018_v39 = vpop.f32.mrb[125].mxu1  ;;  %v15188_v10 = vpack.c.bf16 %v15186_v20, %v15187_v8  ;;  %v15203_v8 = vld [vmem:[#allocation74_spill] sm:$0xff] }
 0x3d3   :  { %v8019_v34 = vadd.f32 %v8018_v39, %v8017_v27  ;;  %8400 = vmatpush1.bf16.msra.mxu1 %v15175_v40  ;;  %8456 = vmatpush1.bf16.msra.mxu0 %v15178_v57  ;;  %v8020_v16 = vpop.f32.mrb[126].mxu1  ;;  %v15184_v39 = vld [vmem:[#allocation47_spill] sm:$0xff]  ;;  %v15189_v40 = vld [vmem:[#allocation70_spill] sm:$0xff] }
 0x3d4   :  { %8402 = vmatprep.subr.bf16.mxu1 %v15179_v23  ;;  %8458 = vmatprep.subr.bf16.mxu0 %v15182_v33  ;;  %v8021_v18 = vpop.f32.mrb[127].mxu1  ;;  %v15191_v37 = vpack.c.bf16 %v15189_v40, %v15190_v36  ;;  %v5686_v33 = vadd.f32 %v13299_v41, %v13384_v22  ;;  %v5689_v41 = vadd.f32 %v13301_v45, %v13384_v22  ;;  %v15222_v45 = vld [vmem:[#allocation50_spill] sm:$0xff] }
 0x3d5   :  { %v13483_v29 = vadd.f32 %v8019_v34, %v5678_v58  ;;  %v8022_v27 = vadd.f32 %v8021_v18, %v8020_v16  ;;  %v15194_v58 = vld [vmem:[#allocation77_spill] sm:$0xff]  ;;  %v15195_v34 = vld [vmem:[#allocation75_spill] sm:$0xff]  ;;  %v15198_v16 = vld [vmem:[#allocation76_spill] sm:$0xff] }
 0x3d6   :  { %7852 = vmatmul.mubr.msk.bf16.gmra.mrb[64].mxu0 %vm15183_vm12, %v15136_v3  ;;  %8331 = vmatmul.mubr.msk.bf16.gmra.mrb[232].mxu1 %vm15185_vm14, %v15184_v39  ;;  %v15196_v57 = vpack.c.bf16 %v15194_v58, %v15195_v34  ;;  %v15197_v3 = vld [vmem:[#allocation78_spill] sm:$0xff]  ;;  %v15207_v58 = vld [vmem:[#allocation81_spill] sm:$0xff]  ;;  %vm15304_vm12 = vmmov %vm14939_vm0 }
 0x3d7   :  { %v13489_v0 = vadd.f32 %v8022_v27, %v5681_v5  ;;  %8404 = vmatpush1.bf16.msra.mxu1 %v15188_v10  ;;  %8460 = vmatpush1.bf16.msra.mxu0 %v15191_v37  ;;  %v15199_v23 = vpack.c.bf16 %v15197_v3, %v15198_v16  ;;  %v15200_v5 = vld [vmem:[#allocation73_spill] sm:$0xff]  ;;  %v15204_v10 = vld [vmem:[#allocation22_spill] sm:$0xff]  ;;  %v15206_v37 = vld [vmem:[#allocation83_spill] sm:$0xff] }
 0x3d8   :  { %8334 = vmatprep.mubr.msk.bf16.mxu1 %vm15193_vm13, %v15192_v44  ;;  %8406 = vmatprep.subr.bf16.mxu1 %v15196_v57  ;;  %v15201_v27 = vld [vmem:[#allocation21_spill] sm:$0xff]  ;;  %v15205_v40 = vpack.c.bf16 %v15203_v8, %v15204_v10  ;;  %v15208_v34 = vpack.c.bf16 %v15206_v37, %v15207_v58  ;;  %v15209_v57 = vld [vmem:[#allocation84_spill] sm:$0xff]  ;;  %v15210_v3 = vld [vmem:[#allocation82_spill] sm:$0xff] }
 0x3d9   :  { %8462 = vmatprep.subr.bf16.mxu0 %v15199_v23  ;;  %v8023_v59 = vpop.f32.mrb[128].mxu1  ;;  %5508 = vmatprep.mubr.bf16.mxu0 %v15124_v46  ;;  %v15202_v20 = vpack.c.bf16 %v15200_v5, %v15201_v27  ;;  %v15211_v16 = vpack.c.bf16 %v15209_v57, %v15210_v3  ;;  %v15213_v5 = vld [vmem:[#allocation49_spill] sm:$0xff]  ;;  %v15217_v8 = vld [vmem:[#allocation23_spill] sm:$0xff]  ;;  %v15220_v37 = vld [vmem:[#allocation24_spill] sm:$0xff] }
 0x3da   :  { %v8024_v62 = vpop.f32.mrb[129].mxu1  ;;  %vm15305_vm14 = vmmov %vm14939_vm0 }
 0x3db   :  { %v8025_v18 = vadd.f32 %v8024_v62, %v8023_v59  ;;  %8408 = vmatpush1.bf16.msra.mxu1 %v15202_v20  ;;  %8464 = vmatpush1.bf16.msra.mxu0 %v15205_v40  ;;  %v8026_v36 = vpop.f32.mrb[130].mxu1  ;;  %v15216_v20 = vld [vmem:[#allocation79_spill] sm:$0xff]  ;;  %v15219_v40 = vld [vmem:[#allocation80_spill] sm:$0xff]  ;;  %vm15306_vm13 = vmmov %vm14939_vm0 }
 0x3dc   :  { %8410 = vmatprep.subr.bf16.mxu1 %v15208_v34  ;;  %8466 = vmatprep.subr.bf16.mxu0 %v15211_v16  ;;  %v8027_v23 = vpop.f32.mrb[131].mxu1  ;;  %v15218_v10 = vpack.c.bf16 %v15216_v20, %v15217_v8  ;;  %v15221_v58 = vpack.c.bf16 %v15219_v40, %v15220_v37  ;;  %v15227_v34 = vld [vmem:[#allocation88_spill] sm:$0xff]  ;;  %v15230_v20 = vld [vmem:[#allocation25_spill] sm:$0xff]  ;;  %v15233_v40 = vld [vmem:[#allocation26_spill] sm:$0xff] }
 0x3dd   :  { %v13522_v59 = vadd.f32 %v8025_v18, %v5686_v33  ;;  %v8028_v62 = vadd.f32 %v8027_v23, %v8026_v36  ;;  %v15223_v33 = vld [vmem:[#allocation89_spill] sm:$0xff]  ;;  %v15224_v18 = vld [vmem:[#allocation87_spill] sm:$0xff]  ;;  %v5694_v23 = vadd.f32 %v13307_v63, %v13384_v22  ;;  %v5697_v63 = vadd.f32 %v13309_v35, %v13384_v22  ;;  %v15250_v35 = vld [vmem:[#allocation52_spill] sm:$0xff] }
 0x3de   :  { %7853 = vmatmul.mubr.msk.bf16.gmra.mrb[68].mxu0 %vm15212_vm1, %v15157_v56  ;;  %8335 = vmatmul.mubr.msk.bf16.gmra.mrb[236].mxu1 %vm15214_vm2, %v15213_v5  ;;  %v15225_v36 = vpack.c.bf16 %v15223_v33, %v15224_v18  ;;  %v15226_v56 = vld [vmem:[#allocation90_spill] sm:$0xff]  ;;  %v15235_v33 = vld [vmem:[#allocation95_spill] sm:$0xff]  ;;  %v15236_v18 = vld [vmem:[#allocation93_spill] sm:$0xff] }
 0x3df   :  { %v13528_v27 = vadd.f32 %v8028_v62, %v5689_v41  ;;  %8412 = vmatpush1.bf16.msra.mxu1 %v15218_v10  ;;  %8468 = vmatpush1.bf16.msra.mxu0 %v15221_v58  ;;  %v15228_v57 = vpack.c.bf16 %v15226_v56, %v15227_v34  ;;  %v15229_v62 = vld [vmem:[#allocation85_spill] sm:$0xff]  ;;  %v15232_v10 = vld [vmem:[#allocation86_spill] sm:$0xff]  ;;  %v15238_v56 = vld [vmem:[#allocation96_spill] sm:$0xff] }
 0x3e0   :  { %8338 = vmatprep.mubr.msk.bf16.mxu1 %vm14939_vm0, %v15222_v45  ;;  %8414 = vmatprep.subr.bf16.mxu1 %v15225_v36  ;;  %v15231_v8 = vpack.c.bf16 %v15229_v62, %v15230_v20  ;;  %v15234_v37 = vpack.c.bf16 %v15232_v10, %v15233_v40  ;;  %v15237_v36 = vpack.c.bf16 %v15235_v33, %v15236_v18  ;;  %v15239_v34 = vld [vmem:[#allocation94_spill] sm:$0xff]  ;;  %v15242_v62 = vld [vmem:[#allocation51_spill] sm:$0xff]  ;;  %v15248_v33 = vld [vmem:[#allocation28_spill] sm:$0xff] }
 0x3e1   :  { %15215 = vst [vmem:[#allocation40_spill] sm:$0xff] %v13528_v27  ;;  %8470 = vmatprep.subr.bf16.mxu0 %v15228_v57  ;;  %v8029_v3 = vpop.f32.mrb[132].mxu1  ;;  %5518 = vmatprep.mubr.bf16.mxu0 %v15124_v46  ;;  %v15240_v57 = vpack.c.bf16 %v15238_v56, %v15239_v34  ;;  %v15245_v10 = vld [vmem:[#allocation27_spill] sm:$0xff]  ;;  %v5702_v56 = vadd.f32 %v13315_v7, %v13384_v22  ;;  %vm15307_vm1 = vmmov %vm14939_vm0 }
 0x3e2   :  { %v8030_v16 = vpop.f32.mrb[133].mxu1  ;;  %v5705_v7 = vadd.f32 %v13317_v51, %v13384_v22  ;;  %v15276_v51 = vld [vmem:[#allocation54_spill] sm:$0xff]  ;;  %vm15309_vm2 = vmmov %vm14939_vm0 }
 0x3e3   :  { %v8031_v41 = vadd.f32 %v8030_v16, %v8029_v3  ;;  %8416 = vmatpush1.bf16.msra.mxu1 %v15231_v8  ;;  %8472 = vmatpush1.bf16.msra.mxu0 %v15234_v37  ;;  %v8032_v58 = vpop.f32.mrb[134].mxu1  ;;  %v15244_v8 = vld [vmem:[#allocation91_spill] sm:$0xff]  ;;  %v15247_v37 = vld [vmem:[#allocation92_spill] sm:$0xff] }
 0x3e4   :  { %8418 = vmatprep.subr.bf16.mxu1 %v15237_v36  ;;  %8474 = vmatprep.subr.bf16.mxu0 %v15240_v57  ;;  %v8033_v27 = vpop.f32.mrb[135].mxu1  ;;  %v15246_v40 = vpack.c.bf16 %v15244_v8, %v15245_v10  ;;  %v15249_v18 = vpack.c.bf16 %v15247_v37, %v15248_v33  ;;  %v15256_v57 = vld [vmem:[#allocation97_spill] sm:$0xff]  ;;  %v15259_v8 = vld [vmem:[#allocation98_spill] sm:$0xff]  ;;  %v15264_v33 = vld [vmem:[#allocation107_spill] sm:$0xff] }
 0x3e5   :  { %v13561_v3 = vadd.f32 %v8031_v41, %v5694_v23  ;;  %v8034_v16 = vadd.f32 %v8033_v27, %v8032_v58  ;;  %v15252_v27 = vpack.c.bf16 %v13005_v21, %v13001_v28  ;;  %v15254_v23 = vld [vmem:[#allocation99_spill] sm:$0xff]  ;;  %v15260_v10 = vld [vmem:[#allocation30_spill] sm:$0xff] }
 0x3e6   :  { %7854 = vmatmul.mubr.msk.bf16.gmra.mrb[72].mxu0 %vm15241_vm3, %v15165_v32  ;;  %8339 = vmatmul.mubr.msk.bf16.gmra.mrb[240].mxu1 %vm15243_vm4, %v15242_v62  ;;  %v15253_v32 = vld [vmem:[#allocation100_spill] sm:$0xff]  ;;  %v15261_v21 = vpack.c.bf16 %v15259_v8, %v15260_v10  ;;  %v15274_v8 = vld [vmem:[#allocation102_spill] sm:$0xff] }
 0x3e7   :  { %v13567_v20 = vadd.f32 %v8034_v16, %v5697_v63  ;;  %8420 = vmatpush1.bf16.msra.mxu1 %v15246_v40  ;;  %8476 = vmatpush1.bf16.msra.mxu0 %v15249_v18  ;;  %v15255_v41 = vpack.c.bf16 %v15253_v32, %v15254_v23  ;;  %v15257_v63 = vld [vmem:[#allocation29_spill] sm:$0xff]  ;;  %v15265_v18 = vld [vmem:[#allocation106_spill] sm:$0xff] }
 0x3e8   :  { %8342 = vmatprep.mubr.msk.bf16.mxu1 %vm15251_vm5, %v15250_v35  ;;  %8422 = vmatprep.subr.bf16.mxu1 %v15252_v27  ;;  %v15258_v16 = vpack.c.bf16 %v15256_v57, %v15257_v63  ;;  %v15262_v40 = vld [vmem:[#allocation105_spill] sm:$0xff]  ;;  %v15266_v27 = vpack.c.bf16 %v15264_v33, %v15265_v18  ;;  %v5710_v33 = vadd.f32 %v13323_v13, %v13384_v22 }
 0x3e9   :  { %8478 = vmatprep.subr.bf16.mxu0 %v15255_v41  ;;  %v8035_v58 = vpop.f32.mrb[136].mxu1  ;;  %5528 = vmatprep.mubr.bf16.mxu0 %v15124_v46  ;;  %v15263_v37 = vpack.c.bf16 %v13065_v49, %v15262_v40  ;;  %v15270_v49 = vld [vmem:[#allocation103_spill] sm:$0xff]  ;;  %v15271_v57 = vld [vmem:[#allocation101_spill] sm:$0xff]  ;;  %v5713_v13 = vadd.f32 %v13325_v30, %v13384_v22  ;;  %v15299_v30 = vpack.c.bf16 %v13245_v47, %v13241_v52 }
 0x3ea   :  { %v8036_v36 = vpop.f32.mrb[137].mxu1  ;;  %v15272_v63 = vpack.c.bf16 %v15270_v49, %v15271_v57  ;;  %v15287_v49 = vld [vmem:[#allocation108_spill] sm:$0xff]  ;;  %v15302_v47 = vpack.c.bf16 %v13239_v31, %v13235_v14  ;;  %v5726_v31 = vadd.f32 %v13339_v24, %v13384_v22  ;;  %v5734_v24 = vadd.f32 %v13347_v4, %v13384_v22 }
 0x3eb   :  { %v8037_v34 = vadd.f32 %v8036_v36, %v8035_v58  ;;  %8424 = vmatpush1.bf16.msra.mxu1 %v15258_v16  ;;  %8480 = vmatpush1.bf16.msra.mxu0 %v15261_v21  ;;  %v8038_v28 = vpop.f32.mrb[138].mxu1  ;;  %v15268_v58 = vld [vmem:[#allocation53_spill] sm:$0xff]  ;;  %v15273_v16 = vld [vmem:[#allocation104_spill] sm:$0xff]  ;;  %v5742_v4 = vadd.f32 %v13355_v61, %v13384_v22  ;;  %v5750_v61 = vadd.f32 %v13363_v15, %v13384_v22 }
 0x3ec   :  { %8426 = vmatprep.subr.bf16.mxu1 %v15263_v37  ;;  %8482 = vmatprep.subr.bf16.mxu0 %v15266_v27  ;;  %v8039_v32 = vpop.f32.mrb[139].mxu1  ;;  %v15275_v10 = vpack.c.bf16 %v15273_v16, %v15274_v8  ;;  %v15281_v21 = vld [vmem:[#allocation112_spill] sm:$0xff]  ;;  %v15283_v27 = vld [vmem:[#allocation109_spill] sm:$0xff]  ;;  %v15290_v16 = vpack.c.bf16 %v13187_v2, %v13183_v43  ;;  %v15296_v43 = vld [vmem:[#allocation115_spill] sm:$0xff]  ;;  %v5758_v15 = vadd.f32 %v13372_v54, %v13384_v22 }
 0x3ed   :  { %v13600_v23 = vadd.f32 %v8037_v34, %v5702_v56  ;;  %v8040_v41 = vadd.f32 %v8039_v32, %v8038_v28  ;;  %v15278_v56 = vld [vmem:[#allocation111_spill] sm:$0xff]  ;;  %v15297_v2 = vld [vmem:[#allocation114_spill] sm:$0xff] }
 0x3ee   :  { %7855 = vmatmul.mubr.msk.bf16.gmra.mrb[76].mxu0 %vm15267_vm15, %v15184_v39  ;;  %8343 = vmatmul.mubr.msk.bf16.gmra.mrb[244].mxu1 %vm15269_vm6, %v15268_v58  ;;  %v15279_v34 = vpack.c.bf16 %v13125_v19, %v15278_v56  ;;  %v15280_v39 = vld [vmem:[#allocation113_spill] sm:$0xff]  ;;  %v15284_v32 = vld [vmem:[#allocation31_spill] sm:$0xff] }
 0x3ef   :  { %v13606_v36 = vadd.f32 %v8040_v41, %v5705_v7  ;;  %8428 = vmatpush1.bf16.msra.mxu1 %v15272_v63  ;;  %8484 = vmatpush1.bf16.msra.mxu0 %v15275_v10  ;;  %v15282_v28 = vpack.c.bf16 %v15280_v39, %v15281_v21  ;;  %v15285_v7 = vpack.c.bf16 %v15283_v27, %v15284_v32  ;;  %v15286_v41 = vld [vmem:[#allocation110_spill] sm:$0xff]  ;;  %v6787_v54 = vld [vmem:[%s14556_s4] sm:$0xff] }
 0x3f0   :  { %8346 = vmatprep.mubr.msk.bf16.mxu1 %vm15277_vm7, %v15276_v51  ;;  %8430 = vmatprep.subr.bf16.mxu1 %v15279_v34  ;;  %v15288_v19 = vpack.c.bf16 %v15286_v41, %v15287_v49  ;;  %v15289_v63 = vpack.c.bf16 %v13185_v6, %v13181_v25  ;;  %v15292_v34 = vld [vmem:[#allocation55_spill] sm:$0xff]  ;;  %v15294_v6 = vld [vmem:[#allocation32_spill] sm:$0xff]  ;;  %v15298_v21 = vpack.c.bf16 %v15296_v43, %v15297_v2 }
 0x3f1   :  { %8486 = vmatprep.subr.bf16.mxu0 %v15282_v28  ;;  %v8041_v40 = vpop.f32.mrb[140].mxu1  ;;  %5538 = vmatprep.mubr.bf16.mxu0 %v15124_v46  ;;  %v15295_v25 = vpack.c.bf16 %v13177_v11, %v15294_v6  ;;  %v5718_v11 = vadd.f32 %v13331_v17, %v13384_v22 }
 0x3f2   :  { %v8042_v37 = vpop.f32.mrb[141].mxu1 }
 0x3f3   :  { %v8043_v18 = vadd.f32 %v8042_v37, %v8041_v40  ;;  %8432 = vmatpush1.bf16.msra.mxu1 %v15285_v7  ;;  %8488 = vmatpush1.bf16.msra.mxu0 %v15288_v19  ;;  %v8044_v57 = vpop.f32.mrb[142].mxu1 }
 0x3f4   :  { %8434 = vmatprep.subr.bf16.mxu1 %v15289_v63  ;;  %8490 = vmatprep.subr.bf16.mxu0 %v15290_v16  ;;  %v8045_v8 = vpop.f32.mrb[143].mxu1 }
 0x3f5   :  { %v13639_v10 = vadd.f32 %v8043_v18, %v5710_v33  ;;  %v8046_v56 = vadd.f32 %v8045_v8, %v8044_v57  ;;  %v15301_v33 = vpack.c.bf16 %v13237_v50, %v13233_v53 }
 0x3f6   :  { %7856 = vmatmul.mubr.msk.bf16.gmra.mrb[80].mxu0 %vm15291_vm8, %v15192_v44  ;;  %8347 = vmatmul.mubr.msk.bf16.gmra.mrb[248].mxu1 %vm15293_vm9, %v15292_v34  ;;  %v15300_v44 = vpack.c.bf16 %v13247_v9, %v13243_v60  ;;  %v5721_v60 = vadd.f32 %v13333_v42, %v13384_v22  ;;  %v5729_v42 = vadd.f32 %v13341_v48, %v13384_v22 }
 0x3f7   :  { %v13645_v39 = vadd.f32 %v8046_v56, %v5713_v13  ;;  %8436 = vmatpush1.bf16.msra.mxu1 %v15295_v25  ;;  %8492 = vmatpush1.bf16.msra.mxu0 %v15298_v21  ;;  %v5737_v48 = vadd.f32 %v13349_v38, %v13384_v22  ;;  %v5745_v38 = vadd.f32 %v13357_v12, %v13384_v22 }
 0x3f8   :  { %8438 = vmatprep.subr.bf16.mxu1 %v15299_v30  ;;  %8494 = vmatprep.subr.bf16.mxu0 %v15300_v44  ;;  %v5753_v12 = vadd.f32 %v13365_v55, %v13384_v22  ;;  %v15308_v55 = vld [vmem:[#allocation33_spill] sm:$0xff] }
 0x3f9   :  { %v8047_v28 = vpop.f32.mrb[144].mxu1  ;;  %5548 = vmatprep.mubr.bf16.mxu0 %v15124_v46 }
 0x3fa   :  { %v8048_v40 = vpop.f32.mrb[145].mxu1 }
 0x3fb   :  { %v8049_v37 = vadd.f32 %v8048_v40, %v8047_v28  ;;  %8440 = vmatpush1.bf16.msra.mxu1 %v15301_v33  ;;  %8496 = vmatpush1.bf16.msra.mxu0 %v15302_v47  ;;  %v8050_v52 = vpop.f32.mrb[146].mxu1 }
 0x3fc   :  { %v8051_v18 = vpop.f32.mrb[147].mxu1 }
 0x3fd   :  { %v13670_v9 = vadd.f32 %v8049_v37, %v5718_v11  ;;  %v8052_v27 = vadd.f32 %v8051_v18, %v8050_v52 }
 0x3fe   :  { %7857 = vmatmul.mubr.msk.bf16.gmra.mrb[84].mxu0 %vm15303_vm10, %v15213_v5 }
 0x3ff   :  { %v13674_v17 = vadd.f32 %v8052_v27, %v5721_v60  ;;  %5558 = vmatprep.mubr.bf16.mxu0 %v15124_v46 }
 0x401   :  { %v8053_v53 = vpop.f32.mrb[148].mxu1 }
 0x402   :  { %v8054_v50 = vpop.f32.mrb[149].mxu1 }
 0x403   :  { %v8055_v14 = vadd.f32 %v8054_v50, %v8053_v53  ;;  %v8056_v32 = vpop.f32.mrb[150].mxu1 }
 0x404   :  { %v8057_v7 = vpop.f32.mrb[151].mxu1 }
 0x405   :  { %v13681_v41 = vadd.f32 %v8055_v14, %v5726_v31  ;;  %v8058_v49 = vadd.f32 %v8057_v7, %v8056_v32  ;;  %v5761_v31 = vadd.f32 %v15308_v55, %v13384_v22  ;;  %v9947_v7 = vmov 0.0|0.0  }
 0x406   :  { %7858 = vmatmul.mubr.msk.bf16.gmra.mrb[88].mxu0 %vm15304_vm12, %v15222_v45  ;;  %8553 = vmatprep.subr.bf16.mxu0 %v9947_v7 }
 0x407   :  { %v13685_v5 = vadd.f32 %v8058_v49, %v5729_v42  ;;  %5568 = vmatprep.mubr.bf16.mxu0 %v15124_v46 }
 0x409   :  { %v8059_v19 = vpop.f32.mrb[152].mxu1 }
 0x40a   :  { %v8060_v57 = vpop.f32.mrb[153].mxu1 }
 0x40b   :  { %v8061_v63 = vadd.f32 %v8060_v57, %v8059_v19  ;;  %v8062_v16 = vpop.f32.mrb[154].mxu1 }
 0x40c   :  { %v8063_v8 = vpop.f32.mrb[155].mxu1 }
 0x40d   :  { %v13692_v13 = vadd.f32 %v8061_v63, %v5734_v24  ;;  %v8064_v56 = vadd.f32 %v8063_v8, %v8062_v16  ;;  %v15310_v63 = vld [vmem:[#allocation35_spill] sm:$0xff]  ;;  %v15311_v8 = vld [vmem:[#allocation36_spill] sm:$0xff] }
 0x40e   :  { %7859 = vmatmul.mubr.msk.bf16.gmra.mrb[92].mxu0 %vm15305_vm14, %v15242_v62 }
 0x40f   :  { %v13696_v45 = vadd.f32 %v8064_v56, %v5737_v48  ;;  %5578 = vmatprep.mubr.bf16.mxu0 %v15124_v46 }
 0x411   :  { %v8065_v6 = vpop.f32.mrb[156].mxu1 }
 0x412   :  { %v8066_v25 = vpop.f32.mrb[157].mxu1 }
 0x413   :  { %v8067_v43 = vadd.f32 %v8066_v25, %v8065_v6  ;;  %v8068_v2 = vpop.f32.mrb[158].mxu1 }
 0x414   :  { %v8069_v21 = vpop.f32.mrb[159].mxu1 }
 0x415   :  { %v13703_v30 = vadd.f32 %v8067_v43, %v5742_v4  ;;  %v8070_v44 = vadd.f32 %v8069_v21, %v8068_v2  ;;  %v15312_v2 = vld [vmem:[#allocation37_spill] sm:$0xff] }
 0x416   :  { %7860 = vmatmul.mubr.msk.bf16.gmra.mrb[96].mxu0 %vm15306_vm13, %v15250_v35 }
 0x417   :  { %v13707_v62 = vadd.f32 %v8070_v44, %v5745_v38  ;;  %5588 = vmatprep.mubr.bf16.mxu0 %v15124_v46  ;;  %v15313_v38 = vld [vmem:[#allocation38_spill] sm:$0xff] }
 0x419   :  { %v8071_v28 = vpop.f32.mrb[160].mxu1 }
 0x41a   :  { %v8072_v40 = vpop.f32.mrb[161].mxu1 }
 0x41b   :  { %v8073_v11 = vadd.f32 %v8072_v40, %v8071_v28  ;;  %v8074_v37 = vpop.f32.mrb[162].mxu1 }
 0x41c   :  { %v8075_v33 = vpop.f32.mrb[163].mxu1 }
 0x41d   :  { %v13714_v47 = vadd.f32 %v8073_v11, %v5750_v61  ;;  %v8076_v52 = vadd.f32 %v8075_v33, %v8074_v37 }
 0x41e   :  { %7861 = vmatmul.mubr.msk.bf16.gmra.mrb[100].mxu0 %vm15307_vm1, %v15268_v58  ;;  %v6788_v58 = vld [vmem:[%s14556_s4 + $0x8] sm:$0xff] }
 0x41f   :  { %v13718_v35 = vadd.f32 %v8076_v52, %v5753_v12  ;;  %5598 = vmatprep.mubr.bf16.mxu0 %v15124_v46  ;;  %7878 = vmatprep.mubr.msk.f32.mxu1 %vm417_vm11, %v6788_v58 }
 0x420   :  { %6857 = vmatmul.mubr.f32.vlgmr.msra.gmra.mrb[252].mxu1 %v6787_v54 }
 0x421   :  { %v8077_v18 = vpop.f32.mrb[164].mxu1  ;;  %7880 = vmatprep.mubr.msk.f32.mxu1 %vm417_vm11, %v6788_v58 }
 0x422   :  { %v8078_v60 = vpop.f32.mrb[165].mxu1 }
 0x423   :  { %v8079_v27 = vadd.f32 %v8078_v60, %v8077_v18  ;;  %v8080_v53 = vpop.f32.mrb[166].mxu1 }
 0x424   :  { %v8081_v50 = vpop.f32.mrb[167].mxu1 }
 0x425   :  { %v13725_v14 = vadd.f32 %v8079_v27, %v5758_v15  ;;  %v8082_v32 = vadd.f32 %v8081_v50, %v8080_v53 }
 0x426   :  { %7862 = vmatmul.mubr.msk.bf16.gmra.mrb[104].mxu0 %vm15309_vm2, %v15276_v51 }
 0x427   :  { %v13736_v42 = vadd.f32 %v8082_v32, %v5761_v31  ;;  %5608 = vmatprep.mubr.bf16.mxu0 %v15124_v46 }
 0x429   :  { %v8099_v22 = vpop.f32.mrb[168].mxu1 }
 0x42a   :  { %v8100_v49 = vpop.f32.mrb[169].mxu1 }
 0x42b   :  { %v8101_v19 = vadd.f32 %v8100_v49, %v8099_v22  ;;  %v8102_v51 = vpop.f32.mrb[170].mxu1  ;;  %v15314_v49 = vld [vmem:[#allocation40_spill] sm:$0xff] }
 0x42c   :  { %v8103_v57 = vpop.f32.mrb[171].mxu1 }
 0x42d   :  { %v8104_v24 = vadd.f32 %v8103_v57, %v8102_v51  ;;  %v13742_v16 = vadd.f32 %v8101_v19, %v15310_v63 }
 0x42e   :  { %7863 = vmatmul.mubr.msk.bf16.gmra.mrb[108].mxu0 %vm14939_vm0, %v15292_v34 }
 0x42f   :  { %v13747_v48 = vadd.f32 %v8104_v24, %v15311_v8  ;;  %7879 = vmatprep.mubr.msk.f32.mxu0 %vm417_vm11, %v6788_v58 }
 0x431   :  { %v8105_v46 = vpop.f32.mrb[172].mxu1 }
 0x432   :  { %v8106_v56 = vpop.f32.mrb[173].mxu1 }
 0x433   :  { %v8107_v6 = vadd.f32 %v8106_v56, %v8105_v46  ;;  %v8108_v25 = vpop.f32.mrb[174].mxu1 }
 0x434   :  { %v8109_v4 = vpop.f32.mrb[175].mxu1 }
 0x435   :  { %v8110_v43 = vadd.f32 %v8109_v4, %v8108_v25  ;;  %v13751_v21 = vadd.f32 %v8107_v6, %v15312_v2 }
 0x436   :  { %6928 = vmatmul.mubr.f32.vlgmr.msra.gmra.mrb[112].mxu0 %v6787_v54 }
 0x437   :  { %v13754_v44 = vadd.f32 %v8110_v43, %v15313_v38  ;;  %7881 = vmatprep.mubr.msk.f32.mxu0 %vm417_vm11, %v6788_v58  ;;  %vm9948_vm11 = vmmov 0  }
 0x439   :  { %v8111_v34 = vpop.f32.mrb[176].mxu1 }
 0x43a   :  { %v8112_v28 = vpop.f32.mrb[177].mxu1 }
 0x43b   :  { %v8113_v40 = vadd.f32 %v8112_v28, %v8111_v34  ;;  %v8114_v61 = vpop.f32.mrb[178].mxu1 }
 0x43c   :  { %v8115_v11 = vpop.f32.mrb[179].mxu1 }
 0x43d   :  { %v8116_v37 = vadd.f32 %v8115_v11, %v8114_v61  ;;  %v13758_v33 = vadd.f32 %v8113_v40, %v13444_v26 }
 0x43f   :  { %v13761_v12 = vadd.f32 %v8116_v37, %v13450_v1 }
 0x441   :  { %v8117_v52 = vpop.f32.mrb[180].mxu1 }
 0x442   :  { %v8118_v18 = vpop.f32.mrb[181].mxu1 }
 0x443   :  { %v8119_v60 = vadd.f32 %v8118_v18, %v8117_v52  ;;  %v8120_v15 = vpop.f32.mrb[182].mxu1 }
 0x444   :  { %v8121_v27 = vpop.f32.mrb[183].mxu1 }
 0x445   :  { %v8122_v53 = vadd.f32 %v8121_v27, %v8120_v15  ;;  %v13764_v50 = vadd.f32 %v8119_v60, %v13483_v29 }
 0x447   :  { %v13767_v55 = vadd.f32 %v8122_v53, %v13489_v0 }
 0x449   :  { %v8123_v31 = vpop.f32.mrb[184].mxu1 }
 0x44a   :  { %v8124_v32 = vpop.f32.mrb[185].mxu1 }
 0x44b   :  { %v8125_v58 = vadd.f32 %v8124_v32, %v8123_v31  ;;  %v8126_v26 = vpop.f32.mrb[186].mxu1 }
 0x44c   :  { %v8127_v54 = vpop.f32.mrb[187].mxu1 }
 0x44d   :  { %v8128_v22 = vadd.f32 %v8127_v54, %v8126_v26  ;;  %v13770_v1 = vadd.f32 %v8125_v58, %v13522_v59 }
 0x44f   :  { %v13773_v19 = vadd.f32 %v8128_v22, %v15314_v49 }
 0x451   :  { %v8129_v51 = vpop.f32.mrb[188].mxu1 }
 0x452   :  { %v8130_v57 = vpop.f32.mrb[189].mxu1 }
 0x453   :  { %v8131_v24 = vadd.f32 %v8130_v57, %v8129_v51  ;;  %v8132_v29 = vpop.f32.mrb[190].mxu1 }
 0x454   :  { %v8133_v63 = vpop.f32.mrb[191].mxu1 }
 0x455   :  { %v8134_v8 = vadd.f32 %v8133_v63, %v8132_v29  ;;  %v13776_v0 = vadd.f32 %v8131_v24, %v13561_v3 }
 0x457   :  { %v13779_v46 = vadd.f32 %v8134_v8, %v13567_v20 }
 0x459   :  { %v8135_v56 = vpop.f32.mrb[192].mxu1 }
 0x45a   :  { %v8136_v6 = vpop.f32.mrb[193].mxu1 }
 0x45b   :  { %v8137_v25 = vadd.f32 %v8136_v6, %v8135_v56  ;;  %v8138_v59 = vpop.f32.mrb[194].mxu1 }
 0x45c   :  { %v8139_v4 = vpop.f32.mrb[195].mxu1 }
 0x45d   :  { %v8140_v43 = vadd.f32 %v8139_v4, %v8138_v59  ;;  %v13782_v2 = vadd.f32 %v8137_v25, %v13600_v23 }
 0x45f   :  { %v13785_v38 = vadd.f32 %v8140_v43, %v13606_v36 }
 0x461   :  { %v8141_v34 = vpop.f32.mrb[196].mxu1 }
 0x462   :  { %v8142_v28 = vpop.f32.mrb[197].mxu1 }
 0x463   :  { %v8143_v40 = vadd.f32 %v8142_v28, %v8141_v34  ;;  %v8144_v3 = vpop.f32.mrb[198].mxu1 }
 0x464   :  { %v8145_v61 = vpop.f32.mrb[199].mxu1 }
 0x465   :  { %v8146_v11 = vadd.f32 %v8145_v61, %v8144_v3  ;;  %v13788_v20 = vadd.f32 %v8143_v40, %v13639_v10 }
 0x467   :  { %v13791_v37 = vadd.f32 %v8146_v11, %v13645_v39 }
 0x469   :  { %v8147_v52 = vpop.f32.mrb[200].mxu1 }
 0x46a   :  { %v8148_v18 = vpop.f32.mrb[201].mxu1 }
 0x46b   :  { %v8149_v60 = vadd.f32 %v8148_v18, %v8147_v52  ;;  %v8150_v23 = vpop.f32.mrb[202].mxu1  ;;  %v15315_v18 = vld [vmem:[#allocation3_spill] sm:$0xff] }
 0x46c   :  { %v8151_v15 = vpop.f32.mrb[203].mxu1 }
 0x46d   :  { %v8152_v27 = vadd.f32 %v8151_v15, %v8150_v23  ;;  %v13794_v36 = vadd.f32 %v8149_v60, %v13670_v9 }
 0x46f   :  { %v13797_v53 = vadd.f32 %v8152_v27, %v13674_v17 }
 0x471   :  { %v8153_v31 = vpop.f32.mrb[204].mxu1 }
 0x472   :  { %v8154_v32 = vpop.f32.mrb[205].mxu1 }
 0x473   :  { %v8155_v58 = vadd.f32 %v8154_v32, %v8153_v31  ;;  %v8156_v10 = vpop.f32.mrb[206].mxu1  ;;  %v15316_v32 = vld [vmem:[#allocation34_spill] sm:$0xff] }
 0x474   :  { %v8157_v26 = vpop.f32.mrb[207].mxu1 }
 0x475   :  { %v8158_v54 = vadd.f32 %v8157_v26, %v8156_v10  ;;  %v13800_v39 = vadd.f32 %v8155_v58, %v13681_v41 }
 0x477   :  { %v13803_v22 = vadd.f32 %v8158_v54, %v13685_v5 }
 0x479   :  { %v8159_v49 = vpop.f32.mrb[208].mxu1 }
 0x47a   :  { %v8160_v51 = vpop.f32.mrb[209].mxu1 }
 0x47b   :  { %v8161_v57 = vadd.f32 %v8160_v51, %v8159_v49  ;;  %v8162_v9 = vpop.f32.mrb[210].mxu1 }
 0x47c   :  { %v8163_v24 = vpop.f32.mrb[211].mxu1 }
 0x47d   :  { %v8164_v29 = vadd.f32 %v8163_v24, %v8162_v9  ;;  %v13806_v17 = vadd.f32 %v8161_v57, %v13692_v13 }
 0x47f   :  { %v13809_v63 = vadd.f32 %v8164_v29, %v13696_v45 }
 0x481   :  { %v8165_v8 = vpop.f32.mrb[212].mxu1 }
 0x482   :  { %v8166_v56 = vpop.f32.mrb[213].mxu1 }
 0x483   :  { %v8167_v6 = vadd.f32 %v8166_v56, %v8165_v8  ;;  %v8168_v41 = vpop.f32.mrb[214].mxu1 }
 0x484   :  { %v8169_v25 = vpop.f32.mrb[215].mxu1 }
 0x485   :  { %v8170_v59 = vadd.f32 %v8169_v25, %v8168_v41  ;;  %v13812_v5 = vadd.f32 %v8167_v6, %v13703_v30  ;;  %v1720_v30 = vsub.s32 4, %v15315_v18  ;;  %v6415_v6 = vld [vmem:[%s14555_s3 + $0xa0] sm:$0xff] }
 0x487   :  { %v13815_v4 = vadd.f32 %v8170_v59, %v13707_v62  ;;  %v1724_v62 = vsub.s32 5, %v15315_v18  ;;  %v13829_v58 = vrot.slane %v15316_v32, %v1720_v30  ;;  %v6407_v18 = vld [vmem:[%s14555_s3 + $0x60] sm:$0xff]  ;;  %v6408_v30 = vld [vmem:[%s14555_s3 + $0x68] sm:$0xff] }
 0x489   :  { %v8171_v43 = vpop.f32.mrb[216].mxu1 }
 0x48a   :  { %v8172_v34 = vpop.f32.mrb[217].mxu1 }
 0x48b   :  { %v8173_v28 = vadd.f32 %v8172_v34, %v8171_v43  ;;  %v8174_v13 = vpop.f32.mrb[218].mxu1 }
 0x48c   :  { %v8175_v40 = vpop.f32.mrb[219].mxu1 }
 0x48d   :  { %v8176_v3 = vadd.f32 %v8175_v40, %v8174_v13  ;;  %v13818_v45 = vadd.f32 %v8173_v28, %v13714_v47  ;;  %v13832_v47 = vrot.slane %v15316_v32, %v1724_v62  ;;  %v6406_v28 = vld [vmem:[%s14555_s3 + $0x58] sm:$0xff] }
 0x48e   :  { %v6422_v13 = vld [vmem:[%s14555_s3 + $0xd8] sm:$0xff] }
 0x48f   :  { %v13821_v61 = vadd.f32 %v8176_v3, %v13718_v35  ;;  %v6401_v3 = vld [vmem:[%s14555_s3 + $0x30] sm:$0xff] }
 0x491   :  { %v8177_v11 = vpop.f32.mrb[220].mxu1 }
 0x492   :  { %v8178_v52 = vpop.f32.mrb[221].mxu1 }
 0x493   :  { %v8179_v60 = vadd.f32 %v8178_v52, %v8177_v11  ;;  %v8180_v23 = vpop.f32.mrb[222].mxu1 }
 0x494   :  { %v8181_v15 = vpop.f32.mrb[223].mxu1 }
 0x495   :  { %v8182_v27 = vadd.f32 %v8181_v15, %v8180_v23  ;;  %v13826_v31 = vadd.f32 %v8179_v60, %v13725_v14 }
 0x497   :  { %v13835_v35 = vadd.f32 %v8182_v27, %v13736_v42  ;;  %v6399_v42 = vld [vmem:[%s14555_s3 + $0x20] sm:$0xff] }
 0x499   :  { %v5480_v10 = vpop.f32.mrb[56].mxu0  ;;  %v8324_v26 = vpop.f32.mrb[224].mxu1 }
 0x49a   :  { %v8827_v54 = vadd.f32 %v5480_v10, %v13829_v58  ;;  %v6097_v49 = vadd.f32 %v8324_v26, %v13751_v21  ;;  %v5482_v51 = vpop.f32.mrb[57].mxu0  ;;  %v6088_v57 = vpop.f32.mrb[225].mxu1 }
 0x49b   :  { %v8828_v14 = vadd.f32 %v5482_v51, %v13832_v47  ;;  %v6089_v9 = vadd.f32 %v6088_v57, %v13742_v16  ;;  %v5484_v24 = vpop.f32.mrb[58].mxu0  ;;  %v8325_v29 = vpop.f32.mrb[226].mxu1  ;;  %v6400_v16 = vld [vmem:[%s14555_s3 + $0x28] sm:$0xff] }
 0x49c   :  { %v6203_v8 = vmax.f32 %v8827_v54, 0.0  ;;  %v6219_v56 = vmax.f32 %v6097_v49, 0.0  ;;  %v8829_v21 = vadd.f32 %v5484_v24, %v13829_v58  ;;  %v6100_v41 = vadd.f32 %v8325_v29, %v13754_v44  ;;  %v5486_v25 = vpop.f32.mrb[59].mxu0  ;;  %v6091_v59 = vpop.f32.mrb[227].mxu1 }
 0x49d   :  { %v6204_v43 = vmax.f32 %v8828_v14, 0.0  ;;  %v6205_v34 = vmax.f32 %v6089_v9, 0.0  ;;  %v8830_v40 = vadd.f32 %v5486_v25, %v13832_v47  ;;  %v6092_v44 = vadd.f32 %v6091_v59, %v13747_v48 }
 0x49e   :  { %v6210_v11 = vmax.f32 %v8829_v21, 0.0  ;;  %v6226_v52 = vmax.f32 %v6100_v41, 0.0  ;;  %v6595_v62 = vmul.f32 %v6399_v42, %v6203_v8  ;;  %v6611_v15 = vmul.f32 %v6415_v6, %v6219_v56 }
 0x49f   :  { %v6211_v60 = vmax.f32 %v8830_v40, 0.0  ;;  %v6212_v23 = vmax.f32 %v6092_v44, 0.0  ;;  %v6596_v32 = vmul.f32 %v6400_v16, %v6204_v43  ;;  %v6597_v10 = vmul.f32 %v6401_v3, %v6205_v34  ;;  %v6413_v43 = vld [vmem:[%s14555_s3 + $0x90] sm:$0xff]  ;;  %v6414_v44 = vld [vmem:[%s14555_s3 + $0x98] sm:$0xff] }
 0x4a0   :  { %v6602_v27 = vmul.f32 %v6406_v28, %v6210_v11  ;;  %v6618_v48 = vmul.f32 %v6422_v13, %v6226_v52  ;;  %v6420_v11 = vld [vmem:[%s14555_s3 + $0xc8] sm:$0xff]  ;;  %v6450_v52 = vld [vmem:[%s14555_s3 + $0x1b8] sm:$0xff] }
 0x4a1   :  { %v6603_v26 = vmul.f32 %v6407_v18, %v6211_v60  ;;  %v6604_v54 = vmul.f32 %v6408_v30, %v6212_v23  ;;  %v5490_v49 = vpop.f32.mrb[60].mxu0  ;;  %v8328_v51 = vpop.f32.mrb[228].mxu1  ;;  %v6429_v30 = vld [vmem:[%s14555_s3 + $0x110] sm:$0xff] }
 0x4a2   :  { %v8499_v57 = vpack.c.bf16 %v6602_v27, %v6595_v62  ;;  %v8557_v14 = vpack.c.bf16 %v6618_v48, %v6611_v15  ;;  %v8831_v9 = vadd.f32 %v5490_v49, %v13829_v58  ;;  %v6113_v24 = vadd.f32 %v8328_v51, %v13764_v50  ;;  %v5492_v29 = vpop.f32.mrb[61].mxu0  ;;  %v6104_v21 = vpop.f32.mrb[229].mxu1  ;;  %v6443_v50 = vld [vmem:[%s14555_s3 + $0x180] sm:$0xff]  ;;  %v6421_v62 = vld [vmem:[%s14555_s3 + $0xd0] sm:$0xff]  ;;  %v6436_v15 = vld [vmem:[%s14555_s3 + $0x148] sm:$0xff] }
 0x4a3   :  { %v8554_v41 = vpack.c.bf16 %v6604_v54, %v6597_v10  ;;  %v8832_v8 = vadd.f32 %v5492_v29, %v13832_v47  ;;  %v6105_v42 = vadd.f32 %v6104_v21, %v13758_v33  ;;  %v5494_v56 = vpop.f32.mrb[62].mxu0  ;;  %v8329_v6 = vpop.f32.mrb[230].mxu1  ;;  %v8497_v25 = vpack.c.bf16 %v6603_v26, %v6596_v32 }
 0x4a4   :  { %v6217_v59 = vmax.f32 %v8831_v9, 0.0  ;;  %v6247_v16 = vmax.f32 %v6113_v24, 0.0  ;;  %v8833_v34 = vadd.f32 %v5494_v56, %v13829_v58  ;;  %v6116_v28 = vadd.f32 %v8329_v6, %v13767_v55  ;;  %v5496_v13 = vpop.f32.mrb[63].mxu0  ;;  %v6107_v40 = vpop.f32.mrb[231].mxu1 }
 0x4a5   :  { %v6218_v33 = vmax.f32 %v8832_v8, 0.0  ;;  %v6233_v3 = vmax.f32 %v6105_v42, 0.0  ;;  %v8834_v18 = vadd.f32 %v5496_v13, %v13832_v47  ;;  %v6108_v55 = vadd.f32 %v6107_v40, %v13761_v12  ;;  %8498 = vmatprep.subr.bf16.mxu1 %v8497_v25  ;;  %8555 = vmatpush1.bf16.msra.mxu0 %v8554_v41 }
 0x4a6   :  { %v6224_v60 = vmax.f32 %v8833_v34, 0.0  ;;  %v6254_v23 = vmax.f32 %v6116_v28, 0.0  ;;  %8500 = vmatpush1.bf16.msra.mxu1 %v8499_v57  ;;  %8556 = vmatprep.subr.bf16.mxu0 %v9947_v7  ;;  %v6609_v48 = vmul.f32 %v6413_v43, %v6217_v59  ;;  %v6639_v32 = vmul.f32 %v6443_v50, %v6247_v16 }
 0x4a7   :  { %v6225_v12 = vmax.f32 %v8834_v18, 0.0  ;;  %v6240_v27 = vmax.f32 %v6108_v55, 0.0  ;;  %v6610_v54 = vmul.f32 %v6414_v44, %v6218_v33  ;;  %v6625_v49 = vmul.f32 %v6429_v30, %v6233_v3  ;;  %v6428_v3 = vld [vmem:[%s14555_s3 + $0x108] sm:$0xff]  ;;  %v6478_v18 = vld [vmem:[%s14555_s3 + $0x298] sm:$0xff]  ;;  %v6457_v30 = vld [vmem:[%s14555_s3 + $0x1f0] sm:$0xff] }
 0x4a8   :  { %v6616_v10 = vmul.f32 %v6420_v11, %v6224_v60  ;;  %v6646_v26 = vmul.f32 %v6450_v52, %v6254_v23  ;;  %v6434_v52 = vld [vmem:[%s14555_s3 + $0x138] sm:$0xff] }
 0x4a9   :  { %v6617_v51 = vmul.f32 %v6421_v62, %v6225_v12  ;;  %v6632_v9 = vmul.f32 %v6436_v15, %v6240_v27  ;;  %v5500_v24 = vpop.f32.mrb[64].mxu0  ;;  %v8332_v29 = vpop.f32.mrb[232].mxu1  ;;  %8558 = vmatpush1.bf16.msra.mxu0 %v8557_v14  ;;  %v6427_v14 = vld [vmem:[%s14555_s3 + $0x100] sm:$0xff]  ;;  %v6464_v15 = vld [vmem:[%s14555_s3 + $0x228] sm:$0xff] }
 0x4aa   :  { %v8503_v21 = vpack.c.bf16 %v6616_v10, %v6609_v48  ;;  %v8563_v41 = vpack.c.bf16 %v6646_v26, %v6639_v32  ;;  %v8835_v8 = vadd.f32 %v5500_v24, %v13829_v58  ;;  %v6129_v57 = vadd.f32 %v8332_v29, %v13776_v0  ;;  %v5502_v42 = vpop.f32.mrb[65].mxu0  ;;  %v6120_v56 = vpop.f32.mrb[233].mxu1  ;;  %8559 = vmatprep.subr.bf16.mxu0 %v9947_v7  ;;  %v6471_v0 = vld [vmem:[%s14555_s3 + $0x260] sm:$0xff] }
 0x4ab   :  { %v8560_v6 = vpack.c.bf16 %v6632_v9, %v6625_v49  ;;  %v8836_v25 = vadd.f32 %v5502_v42, %v13832_v47  ;;  %v6121_v59 = vadd.f32 %v6120_v56, %v13770_v1  ;;  %v5504_v43 = vpop.f32.mrb[66].mxu0  ;;  %v8333_v16 = vpop.f32.mrb[234].mxu1  ;;  %v8501_v50 = vpack.c.bf16 %v6617_v51, %v6610_v54  ;;  %v6435_v62 = vld [vmem:[%s14555_s3 + $0x140] sm:$0xff] }
 0x4ac   :  { %v6231_v34 = vmax.f32 %v8835_v8, 0.0  ;;  %v6275_v28 = vmax.f32 %v6129_v57, 0.0  ;;  %v8837_v13 = vadd.f32 %v5504_v43, %v13829_v58  ;;  %v6132_v40 = vadd.f32 %v8333_v16, %v13779_v46  ;;  %v5506_v33 = vpop.f32.mrb[67].mxu0  ;;  %v6123_v44 = vpop.f32.mrb[235].mxu1 }
 0x4ad   :  { %v6232_v1 = vmax.f32 %v8836_v25, 0.0  ;;  %v6261_v11 = vmax.f32 %v6121_v59, 0.0  ;;  %v8838_v55 = vadd.f32 %v5506_v33, %v13832_v47  ;;  %v6124_v46 = vadd.f32 %v6123_v44, %v13773_v19  ;;  %8502 = vmatprep.subr.bf16.mxu1 %v8501_v50  ;;  %8561 = vmatpush1.bf16.msra.mxu0 %v8560_v6  ;;  %v6442_v33 = vld [vmem:[%s14555_s3 + $0x178] sm:$0xff] }
 0x4ae   :  { %v6238_v60 = vmax.f32 %v8837_v13, 0.0  ;;  %v6282_v23 = vmax.f32 %v6132_v40, 0.0  ;;  %8504 = vmatpush1.bf16.msra.mxu1 %v8503_v21  ;;  %8562 = vmatprep.subr.bf16.mxu0 %v9947_v7  ;;  %v6623_v27 = vmul.f32 %v6427_v14, %v6231_v34  ;;  %v6667_v48 = vmul.f32 %v6471_v0, %v6275_v28 }
 0x4af   :  { %v6239_v19 = vmax.f32 %v8838_v55, 0.0  ;;  %v6268_v12 = vmax.f32 %v6124_v46, 0.0  ;;  %v6624_v26 = vmul.f32 %v6428_v3, %v6232_v1  ;;  %v6653_v54 = vmul.f32 %v6457_v30, %v6261_v11  ;;  %v6448_v1 = vld [vmem:[%s14555_s3 + $0x1a8] sm:$0xff]  ;;  %v6506_v3 = vld [vmem:[%s14555_s3 + $0x378] sm:$0xff]  ;;  %v6449_v46 = vld [vmem:[%s14555_s3 + $0x1b0] sm:$0xff] }
 0x4b0   :  { %v6630_v32 = vmul.f32 %v6434_v52, %v6238_v60  ;;  %v6674_v10 = vmul.f32 %v6478_v18, %v6282_v23  ;;  %v6485_v52 = vld [vmem:[%s14555_s3 + $0x2d0] sm:$0xff]  ;;  %v6492_v30 = vld [vmem:[%s14555_s3 + $0x308] sm:$0xff] }
 0x4b1   :  { %v6631_v49 = vmul.f32 %v6435_v62, %v6239_v19  ;;  %v6660_v51 = vmul.f32 %v6464_v15, %v6268_v12  ;;  %v5510_v9 = vpop.f32.mrb[68].mxu0  ;;  %v8336_v24 = vpop.f32.mrb[236].mxu1  ;;  %8564 = vmatpush1.bf16.msra.mxu0 %v8563_v41  ;;  %v6441_v41 = vld [vmem:[%s14555_s3 + $0x170] sm:$0xff] }
 0x4b2   :  { %v8507_v29 = vpack.c.bf16 %v6630_v32, %v6623_v27  ;;  %v8569_v8 = vpack.c.bf16 %v6674_v10, %v6667_v48  ;;  %v8839_v57 = vadd.f32 %v5510_v9, %v13829_v58  ;;  %v6145_v21 = vadd.f32 %v8336_v24, %v13788_v20  ;;  %v5512_v42 = vpop.f32.mrb[69].mxu0  ;;  %v6136_v56 = vpop.f32.mrb[237].mxu1  ;;  %8565 = vmatprep.subr.bf16.mxu0 %v9947_v7  ;;  %v6499_v20 = vld [vmem:[%s14555_s3 + $0x340] sm:$0xff] }
 0x4b3   :  { %v8566_v6 = vpack.c.bf16 %v6660_v51, %v6653_v54  ;;  %v8840_v25 = vadd.f32 %v5512_v42, %v13832_v47  ;;  %v6137_v59 = vadd.f32 %v6136_v56, %v13782_v2  ;;  %v5514_v43 = vpop.f32.mrb[70].mxu0  ;;  %v8337_v16 = vpop.f32.mrb[238].mxu1  ;;  %v8505_v50 = vpack.c.bf16 %v6631_v49, %v6624_v26 }
 0x4b4   :  { %v6245_v34 = vmax.f32 %v8839_v57, 0.0  ;;  %v6303_v14 = vmax.f32 %v6145_v21, 0.0  ;;  %v8841_v28 = vadd.f32 %v5514_v43, %v13829_v58  ;;  %v6148_v0 = vadd.f32 %v8337_v16, %v13791_v37  ;;  %v5516_v13 = vpop.f32.mrb[71].mxu0  ;;  %v6139_v40 = vpop.f32.mrb[239].mxu1 }
 0x4b5   :  { %v6246_v2 = vmax.f32 %v8840_v25, 0.0  ;;  %v6289_v44 = vmax.f32 %v6137_v59, 0.0  ;;  %v8842_v11 = vadd.f32 %v5516_v13, %v13832_v47  ;;  %v6140_v37 = vadd.f32 %v6139_v40, %v13785_v38  ;;  %8506 = vmatprep.subr.bf16.mxu1 %v8505_v50  ;;  %8567 = vmatpush1.bf16.msra.mxu0 %v8566_v6  ;;  %v6513_v40 = vld [vmem:[%s14555_s3 + $0x3b0] sm:$0xff] }
 0x4b6   :  { %v6252_v18 = vmax.f32 %v8841_v28, 0.0  ;;  %v6310_v55 = vmax.f32 %v6148_v0, 0.0  ;;  %8508 = vmatpush1.bf16.msra.mxu1 %v8507_v29  ;;  %8568 = vmatprep.subr.bf16.mxu0 %v9947_v7  ;;  %v6637_v23 = vmul.f32 %v6441_v41, %v6245_v34  ;;  %v6695_v62 = vmul.f32 %v6499_v20, %v6303_v14  ;;  %v6456_v14 = vld [vmem:[%s14555_s3 + $0x1e8] sm:$0xff]  ;;  %v6462_v28 = vld [vmem:[%s14555_s3 + $0x218] sm:$0xff] }
 0x4b7   :  { %v6253_v38 = vmax.f32 %v8842_v11, 0.0  ;;  %v6296_v60 = vmax.f32 %v6140_v37, 0.0  ;;  %v6638_v12 = vmul.f32 %v6442_v33, %v6246_v2  ;;  %v6681_v27 = vmul.f32 %v6485_v52, %v6289_v44  ;;  %v6534_v0 = vld [vmem:[%s14555_s3 + $0x458] sm:$0xff]  ;;  %v6463_v44 = vld [vmem:[%s14555_s3 + $0x220] sm:$0xff] }
 0x4b8   :  { %v6644_v15 = vmul.f32 %v6448_v1, %v6252_v18  ;;  %v6702_v19 = vmul.f32 %v6506_v3, %v6310_v55  ;;  %v6520_v1 = vld [vmem:[%s14555_s3 + $0x3e8] sm:$0xff] }
 0x4b9   :  { %v6645_v48 = vmul.f32 %v6449_v46, %v6253_v38  ;;  %v6688_v32 = vmul.f32 %v6492_v30, %v6296_v60  ;;  %v5520_v10 = vpop.f32.mrb[72].mxu0  ;;  %v8340_v26 = vpop.f32.mrb[240].mxu1  ;;  %8570 = vmatpush1.bf16.msra.mxu0 %v8569_v8  ;;  %v6455_v8 = vld [vmem:[%s14555_s3 + $0x1e0] sm:$0xff] }
 0x4ba   :  { %v8511_v54 = vpack.c.bf16 %v6644_v15, %v6637_v23  ;;  %v8575_v49 = vpack.c.bf16 %v6702_v19, %v6695_v62  ;;  %v8843_v51 = vadd.f32 %v5520_v10, %v13829_v58  ;;  %v6161_v9 = vadd.f32 %v8340_v26, %v13800_v39  ;;  %v5522_v24 = vpop.f32.mrb[73].mxu0  ;;  %v6152_v29 = vpop.f32.mrb[241].mxu1  ;;  %8571 = vmatprep.subr.bf16.mxu0 %v9947_v7  ;;  %v6527_v39 = vld [vmem:[%s14555_s3 + $0x420] sm:$0xff] }
 0x4bb   :  { %v8572_v57 = vpack.c.bf16 %v6688_v32, %v6681_v27  ;;  %v8844_v21 = vadd.f32 %v5522_v24, %v13832_v47  ;;  %v6153_v42 = vadd.f32 %v6152_v29, %v13794_v36  ;;  %v5524_v56 = vpop.f32.mrb[74].mxu0  ;;  %v8341_v6 = vpop.f32.mrb[242].mxu1  ;;  %v8509_v25 = vpack.c.bf16 %v6645_v48, %v6638_v12 }
 0x4bc   :  { %v6259_v59 = vmax.f32 %v8843_v51, 0.0  ;;  %v6331_v43 = vmax.f32 %v6161_v9, 0.0  ;;  %v8845_v16 = vadd.f32 %v5524_v56, %v13829_v58  ;;  %v6164_v50 = vadd.f32 %v8341_v6, %v13803_v22  ;;  %v5526_v34 = vpop.f32.mrb[75].mxu0  ;;  %v6155_v41 = vpop.f32.mrb[243].mxu1  ;;  %v6470_v6 = vld [vmem:[%s14555_s3 + $0x258] sm:$0xff] }
 0x4bd   :  { %v6260_v36 = vmax.f32 %v8844_v21, 0.0  ;;  %v6317_v20 = vmax.f32 %v6153_v42, 0.0  ;;  %v8846_v13 = vadd.f32 %v5526_v34, %v13832_v47  ;;  %v6156_v22 = vadd.f32 %v6155_v41, %v13797_v53  ;;  %8510 = vmatprep.subr.bf16.mxu1 %v8509_v25  ;;  %8573 = vmatpush1.bf16.msra.mxu0 %v8572_v57  ;;  %v6477_v34 = vld [vmem:[%s14555_s3 + $0x290] sm:$0xff]  ;;  %v6548_v41 = vld [vmem:[%s14555_s3 + $0x4c8] sm:$0xff] }
 0x4be   :  { %v6266_v2 = vmax.f32 %v8845_v16, 0.0  ;;  %v6338_v33 = vmax.f32 %v6164_v50, 0.0  ;;  %8512 = vmatpush1.bf16.msra.mxu1 %v8511_v54  ;;  %8574 = vmatprep.subr.bf16.mxu0 %v9947_v7  ;;  %v6651_v11 = vmul.f32 %v6455_v8, %v6259_v59  ;;  %v6723_v37 = vmul.f32 %v6527_v39, %v6331_v43  ;;  %v6476_v59 = vld [vmem:[%s14555_s3 + $0x288] sm:$0xff]  ;;  %v6562_v8 = vld [vmem:[%s14555_s3 + $0x538] sm:$0xff]  ;;  %v6541_v39 = vld [vmem:[%s14555_s3 + $0x490] sm:$0xff] }
 0x4bf   :  { %v6267_v53 = vmax.f32 %v8846_v13, 0.0  ;;  %v6324_v3 = vmax.f32 %v6156_v22, 0.0  ;;  %v6652_v55 = vmul.f32 %v6456_v14, %v6260_v36  ;;  %v6709_v46 = vmul.f32 %v6513_v40, %v6317_v20 }
 0x4c0   :  { %v6658_v52 = vmul.f32 %v6462_v28, %v6266_v2  ;;  %v6730_v18 = vmul.f32 %v6534_v0, %v6338_v33 }
 0x4c1   :  { %v6659_v30 = vmul.f32 %v6463_v44, %v6267_v53  ;;  %v6716_v38 = vmul.f32 %v6520_v1, %v6324_v3  ;;  %v5530_v60 = vpop.f32.mrb[76].mxu0  ;;  %v8344_v23 = vpop.f32.mrb[244].mxu1  ;;  %8576 = vmatpush1.bf16.msra.mxu0 %v8575_v49  ;;  %v6469_v49 = vld [vmem:[%s14555_s3 + $0x250] sm:$0xff] }
 0x4c2   :  { %v8515_v62 = vpack.c.bf16 %v6658_v52, %v6651_v11  ;;  %v8581_v15 = vpack.c.bf16 %v6730_v18, %v6723_v37  ;;  %v8847_v19 = vadd.f32 %v5530_v60, %v13829_v58  ;;  %v6177_v12 = vadd.f32 %v8344_v23, %v13812_v5  ;;  %v5532_v27 = vpop.f32.mrb[77].mxu0  ;;  %v6168_v48 = vpop.f32.mrb[245].mxu1  ;;  %8577 = vmatprep.subr.bf16.mxu0 %v9947_v7  ;;  %v6555_v5 = vld [vmem:[%s14555_s3 + $0x500] sm:$0xff] }
 0x4c3   :  { %v8578_v32 = vpack.c.bf16 %v6716_v38, %v6709_v46  ;;  %v8848_v10 = vadd.f32 %v5532_v27, %v13832_v47  ;;  %v6169_v26 = vadd.f32 %v6168_v48, %v13806_v17  ;;  %v5534_v54 = vpop.f32.mrb[78].mxu0  ;;  %v8345_v51 = vpop.f32.mrb[246].mxu1  ;;  %v8513_v9 = vpack.c.bf16 %v6659_v30, %v6652_v55 }
 0x4c4   :  { %v6273_v24 = vmax.f32 %v8847_v19, 0.0  ;;  %v6359_v29 = vmax.f32 %v6177_v12, 0.0  ;;  %v8849_v57 = vadd.f32 %v5534_v54, %v13829_v58  ;;  %v6180_v21 = vadd.f32 %v8345_v51, %v13815_v4  ;;  %v5536_v42 = vpop.f32.mrb[79].mxu0  ;;  %v6171_v56 = vpop.f32.mrb[247].mxu1  ;;  %v6590_v54 = vld [vmem:[%s14555_s3 + $0x618] sm:$0xff] }
 0x4c5   :  { %v6274_v17 = vmax.f32 %v8848_v10, 0.0  ;;  %v6345_v25 = vmax.f32 %v6169_v26, 0.0  ;;  %v8850_v43 = vadd.f32 %v5536_v42, %v13832_v47  ;;  %v6172_v4 = vadd.f32 %v6171_v56, %v13809_v63  ;;  %8514 = vmatprep.subr.bf16.mxu1 %v8513_v9  ;;  %8579 = vmatpush1.bf16.msra.mxu0 %v8578_v32  ;;  %v6484_v32 = vld [vmem:[%s14555_s3 + $0x2c8] sm:$0xff]  ;;  %v6490_v26 = vld [vmem:[%s14555_s3 + $0x2f8] sm:$0xff]  ;;  %v6569_v9 = vld [vmem:[%s14555_s3 + $0x570] sm:$0xff] }
 0x4c6   :  { %v6280_v16 = vmax.f32 %v8849_v57, 0.0  ;;  %v6366_v50 = vmax.f32 %v6180_v21, 0.0  ;;  %8516 = vmatpush1.bf16.msra.mxu1 %v8515_v62  ;;  %8580 = vmatprep.subr.bf16.mxu0 %v9947_v7  ;;  %v6665_v14 = vmul.f32 %v6469_v49, %v6273_v24  ;;  %v6751_v20 = vmul.f32 %v6555_v5, %v6359_v29  ;;  %v6483_v62 = vld [vmem:[%s14555_s3 + $0x2c0] sm:$0xff]  ;;  %v6576_v5 = vld [vmem:[%s14555_s3 + $0x5a8] sm:$0xff] }
 0x4c7   :  { %v6281_v63 = vmax.f32 %v8850_v43, 0.0  ;;  %v6352_v36 = vmax.f32 %v6172_v4, 0.0  ;;  %v6666_v13 = vmul.f32 %v6470_v6, %v6274_v17  ;;  %v6737_v22 = vmul.f32 %v6541_v39, %v6345_v25  ;;  %v6491_v29 = vld [vmem:[%s14555_s3 + $0x300] sm:$0xff] }
 0x4c8   :  { %v6672_v28 = vmul.f32 %v6476_v59, %v6280_v16  ;;  %v6758_v0 = vmul.f32 %v6562_v8, %v6366_v50 }
 0x4c9   :  { %v6673_v40 = vmul.f32 %v6477_v34, %v6281_v63  ;;  %v6744_v2 = vmul.f32 %v6548_v41, %v6352_v36  ;;  %v5540_v33 = vpop.f32.mrb[80].mxu0  ;;  %v8348_v44 = vpop.f32.mrb[248].mxu1  ;;  %8582 = vmatpush1.bf16.msra.mxu0 %v8581_v15 }
 0x4ca   :  { %v8519_v1 = vpack.c.bf16 %v6672_v28, %v6665_v14  ;;  %v8587_v53 = vpack.c.bf16 %v6758_v0, %v6751_v20  ;;  %v8851_v3 = vadd.f32 %v5540_v33, %v13829_v58  ;;  %v6193_v11 = vadd.f32 %v8348_v44, %v13826_v31  ;;  %v5542_v37 = vpop.f32.mrb[81].mxu0  ;;  %v6184_v52 = vpop.f32.mrb[249].mxu1  ;;  %8583 = vmatprep.subr.bf16.mxu0 %v9947_v7  ;;  %v6583_v31 = vld [vmem:[%s14555_s3 + $0x5e0] sm:$0xff]  ;;  %v7156_v20 = vld [vmem:[%s14557_s5 + $0x288] sm:$0xff] }
 0x4cb   :  { %v8584_v18 = vpack.c.bf16 %v6744_v2, %v6737_v22  ;;  %v8852_v55 = vadd.f32 %v5542_v37, %v13832_v47  ;;  %v6185_v46 = vadd.f32 %v6184_v52, %v13818_v45  ;;  %v5544_v30 = vpop.f32.mrb[82].mxu0  ;;  %v8349_v38 = vpop.f32.mrb[250].mxu1  ;;  %v8517_v60 = vpack.c.bf16 %v6673_v40, %v6666_v13  ;;  %v7155_v14 = vld [vmem:[%s14557_s5 + $0x280] sm:$0xff]  ;;  %v6497_v22 = vld [vmem:[%s14555_s3 + $0x330] sm:$0xff]  ;;  %v6498_v2 = vld [vmem:[%s14555_s3 + $0x338] sm:$0xff] }
 0x4cc   :  { %v6287_v23 = vmax.f32 %v8851_v3, 0.0  ;;  %v6387_v15 = vmax.f32 %v6193_v11, 0.0  ;;  %v8853_v19 = vadd.f32 %v5544_v30, %v13829_v58  ;;  %v6196_v12 = vadd.f32 %v8349_v38, %v13835_v35  ;;  %v5546_v27 = vpop.f32.mrb[83].mxu0  ;;  %v6187_v48 = vpop.f32.mrb[251].mxu1  ;;  %v6504_v33 = vld [vmem:[%s14555_s3 + $0x368] sm:$0xff]  ;;  %v7139_v11 = vld [vmem:[%s14557_s5 + $0x200] sm:$0xff] }
 0x4cd   :  { %v6288_v45 = vmax.f32 %v8852_v55, 0.0  ;;  %v6373_v10 = vmax.f32 %v6185_v46, 0.0  ;;  %v8854_v51 = vadd.f32 %v5546_v27, %v13832_v47  ;;  %v6188_v35 = vadd.f32 %v6187_v48, %v13821_v61  ;;  %8518 = vmatprep.subr.bf16.mxu1 %v8517_v60  ;;  %8585 = vmatpush1.bf16.msra.mxu0 %v8584_v18  ;;  %v7140_v37 = vld [vmem:[%s14557_s5 + $0x208] sm:$0xff]  ;;  %v7157_v18 = vld [vmem:[%s14557_s5 + $0x290] sm:$0xff]  ;;  %v7158_v55 = vld [vmem:[%s14557_s5 + $0x298] sm:$0xff] }
 0x4ce   :  { %v6294_v24 = vmax.f32 %v8853_v19, 0.0  ;;  %v6394_v49 = vmax.f32 %v6196_v12, 0.0  ;;  %8520 = vmatpush1.bf16.msra.mxu1 %v8519_v1  ;;  %8586 = vmatprep.subr.bf16.mxu0 %v9947_v7  ;;  %v6679_v21 = vmul.f32 %v6483_v62, %v6287_v23  ;;  %v6779_v42 = vmul.f32 %v6583_v31, %v6387_v15  ;;  %v7141_v27 = vld [vmem:[%s14557_s5 + $0x210] sm:$0xff]  ;;  %v7142_v48 = vld [vmem:[%s14557_s5 + $0x218] sm:$0xff] }
 0x4cf   :  { %v6295_v61 = vmax.f32 %v8854_v51, 0.0  ;;  %v6380_v57 = vmax.f32 %v6188_v35, 0.0  ;;  %v6680_v6 = vmul.f32 %v6484_v32, %v6288_v45  ;;  %v6765_v25 = vmul.f32 %v6569_v9, %v6373_v10 }
 0x4d0   :  { %v6686_v56 = vmul.f32 %v6490_v26, %v6294_v24  ;;  %v6786_v17 = vmul.f32 %v6590_v54, %v6394_v49  ;;  %v8659_v3 = vpack.c.bf16 %v7156_v20, %v7155_v14  ;;  %v8661_v62 = vpack.c.bf16 %v7140_v37, %v7139_v11  ;;  %v7159_v26 = vld [vmem:[%s14557_s5 + $0x2a0] sm:$0xff]  ;;  %v7160_v54 = vld [vmem:[%s14557_s5 + $0x2a8] sm:$0xff]  ;;  %v6526_v37 = vld [vmem:[%s14555_s3 + $0x418] sm:$0xff] }
 0x4d1   :  { %v6687_v59 = vmul.f32 %v6491_v29, %v6295_v61  ;;  %v6772_v8 = vmul.f32 %v6576_v5, %v6380_v57  ;;  %v5550_v43 = vpop.f32.mrb[84].mxu0  ;;  %8588 = vmatpush1.bf16.msra.mxu0 %v8587_v53  ;;  %v6505_v53 = vld [vmem:[%s14555_s3 + $0x370] sm:$0xff]  ;;  %v8663_v12 = vpack.c.bf16 %v7158_v55, %v7157_v18  ;;  %v14126_v24 = vld [vmem:[%s14556_s4] sm:$0xff]  ;;  %v6512_v5 = vld [vmem:[%s14555_s3 + $0x3a8] sm:$0xff] }
 0x4d2   :  { %v8523_v4 = vpack.c.bf16 %v6686_v56, %v6679_v21  ;;  %v8593_v39 = vpack.c.bf16 %v6786_v17, %v6779_v42  ;;  %v8855_v16 = vadd.f32 %v5550_v43, %v13829_v58  ;;  %v5552_v50 = vpop.f32.mrb[85].mxu0  ;;  %8589 = vmatprep.subr.bf16.mxu0 %v9947_v7  ;;  %v6511_v49 = vld [vmem:[%s14555_s3 + $0x3a0] sm:$0xff]  ;;  %v6518_v61 = vld [vmem:[%s14555_s3 + $0x3d8] sm:$0xff]  ;;  %v8665_v21 = vpack.c.bf16 %v7142_v48, %v7141_v27 }
 0x4d3   :  { %v8590_v34 = vpack.c.bf16 %v6772_v8, %v6765_v25  ;;  %v8856_v41 = vadd.f32 %v5552_v50, %v13832_v47  ;;  %v5554_v63 = vpop.f32.mrb[86].mxu0  ;;  %v8521_v36 = vpack.c.bf16 %v6687_v59, %v6680_v6  ;;  %v6519_v56 = vld [vmem:[%s14555_s3 + $0x3e0] sm:$0xff]  ;;  %v8667_v17 = vpack.c.bf16 %v7160_v54, %v7159_v26  ;;  %v7144_v25 = vld [vmem:[%s14557_s5 + $0x228] sm:$0xff]  ;;  %v7161_v8 = vld [vmem:[%s14557_s5 + $0x2b0] sm:$0xff] }
 0x4d4   :  { %v6301_v28 = vmax.f32 %v8855_v16, 0.0  ;;  %v8857_v0 = vadd.f32 %v5554_v63, %v13829_v58  ;;  %v5556_v13 = vpop.f32.mrb[87].mxu0  ;;  %v7143_v6 = vld [vmem:[%s14557_s5 + $0x220] sm:$0xff]  ;;  %v7162_v43 = vld [vmem:[%s14557_s5 + $0x2b8] sm:$0xff] }
 0x4d5   :  { %v6302_v40 = vmax.f32 %v8856_v41, 0.0  ;;  %v8858_v44 = vadd.f32 %v5556_v13, %v13832_v47  ;;  %8522 = vmatprep.subr.bf16.mxu1 %v8521_v36  ;;  %8591 = vmatpush1.bf16.msra.mxu0 %v8590_v34  ;;  %v8669_v41 = vpack.c.bf16 %v7144_v25, %v7143_v6  ;;  %v8671_v20 = vpack.c.bf16 %v7162_v43, %v7161_v8  ;;  %v6540_v25 = vld [vmem:[%s14555_s3 + $0x488] sm:$0xff] }
 0x4d6   :  { %v6308_v1 = vmax.f32 %v8857_v0, 0.0  ;;  %8524 = vmatpush1.bf16.msra.mxu1 %v8523_v4  ;;  %8592 = vmatprep.subr.bf16.mxu0 %v9947_v7  ;;  %v6693_v46 = vmul.f32 %v6497_v22, %v6301_v28  ;;  %v7145_v28 = vld [vmem:[%s14557_s5 + $0x230] sm:$0xff]  ;;  %v7146_v0 = vld [vmem:[%s14557_s5 + $0x238] sm:$0xff] }
 0x4d7   :  { %v6309_v52 = vmax.f32 %v8858_v44, 0.0  ;;  %v6694_v38 = vmul.f32 %v6498_v2, %v6302_v40  ;;  %v7163_v2 = vld [vmem:[%s14557_s5 + $0x2c0] sm:$0xff]  ;;  %v8673_v55 = vpack.c.bf16 %v7146_v0, %v7145_v28 }
 0x4d8   :  { %v6700_v30 = vmul.f32 %v6504_v33, %v6308_v1  ;;  %v7164_v33 = vld [vmem:[%s14557_s5 + $0x2c8] sm:$0xff] }
 0x4d9   :  { %v6701_v60 = vmul.f32 %v6505_v53, %v6309_v52  ;;  %v5560_v23 = vpop.f32.mrb[88].mxu0  ;;  %8594 = vmatpush1.bf16.msra.mxu0 %v8593_v39  ;;  %v6532_v52 = vld [vmem:[%s14555_s3 + $0x448] sm:$0xff] }
 0x4da   :  { %v8527_v15 = vpack.c.bf16 %v6700_v30, %v6693_v46  ;;  %v8859_v31 = vadd.f32 %v5560_v23, %v13829_v58  ;;  %v5562_v19 = vpop.f32.mrb[89].mxu0  ;;  %8660 = vmatprep.subr.bf16.mxu0 %v8659_v3  ;;  %v6525_v3 = vld [vmem:[%s14555_s3 + $0x410] sm:$0xff]  ;;  %v7148_v23 = vld [vmem:[%s14557_s5 + $0x248] sm:$0xff] }
 0x4db   :  { %v8860_v45 = vadd.f32 %v5562_v19, %v13832_v47  ;;  %v5564_v32 = vpop.f32.mrb[90].mxu0  ;;  %v8525_v10 = vpack.c.bf16 %v6701_v60, %v6694_v38  ;;  %v6533_v30 = vld [vmem:[%s14555_s3 + $0x450] sm:$0xff]  ;;  %v8675_v38 = vpack.c.bf16 %v7164_v33, %v7163_v2  ;;  %v7147_v60 = vld [vmem:[%s14557_s5 + $0x240] sm:$0xff] }
 0x4dc   :  { %v6315_v51 = vmax.f32 %v8859_v31, 0.0  ;;  %v8861_v35 = vadd.f32 %v5564_v32, %v13829_v58  ;;  %v5566_v9 = vpop.f32.mrb[91].mxu0  ;;  %7070 = vmatmul.mubr.f32.vlgmr.msra.gmra.mrb[114].mxu0 %v14126_v24  ;;  %v7166_v31 = vld [vmem:[%s14557_s5 + $0x2d8] sm:$0xff]  ;;  %v8677_v32 = vpack.c.bf16 %v7148_v23, %v7147_v60  ;;  %v6561_v23 = vld [vmem:[%s14555_s3 + $0x530] sm:$0xff] }
 0x4dd   :  { %v6316_v29 = vmax.f32 %v8860_v45, 0.0  ;;  %v8862_v57 = vadd.f32 %v5566_v9, %v13832_v47  ;;  %8526 = vmatprep.subr.bf16.mxu1 %v8525_v10  ;;  %8662 = vmatpush3.bf16.msra.mxu0 %v8661_v62  ;;  %v7150_v9 = vld [vmem:[%s14557_s5 + $0x258] sm:$0xff] }
 0x4de   :  { %v6322_v42 = vmax.f32 %v8861_v35, 0.0  ;;  %8528 = vmatpush1.bf16.msra.mxu1 %v8527_v15  ;;  %8664 = vmatprep.subr.bf16.mxu0 %v8663_v12  ;;  %v6707_v4 = vmul.f32 %v6511_v49, %v6315_v51  ;;  %v7165_v15 = vld [vmem:[%s14557_s5 + $0x2d0] sm:$0xff] }
 0x4df   :  { %v6323_v59 = vmax.f32 %v8862_v57, 0.0  ;;  %v6708_v16 = vmul.f32 %v6512_v5, %v6316_v29  ;;  %v8679_v51 = vpack.c.bf16 %v7166_v31, %v7165_v15  ;;  %v7149_v35 = vld [vmem:[%s14557_s5 + $0x250] sm:$0xff]  ;;  %v7168_v57 = vld [vmem:[%s14557_s5 + $0x2e8] sm:$0xff] }
 0x4e0   :  { %v6714_v39 = vmul.f32 %v6518_v61, %v6322_v42  ;;  %v7167_v61 = vld [vmem:[%s14557_s5 + $0x2e0] sm:$0xff]  ;;  %v8681_v43 = vpack.c.bf16 %v7150_v9, %v7149_v35 }
 0x4e1   :  { %v6715_v50 = vmul.f32 %v6519_v56, %v6323_v59  ;;  %v5570_v34 = vpop.f32.mrb[92].mxu0  ;;  %8666 = vmatpush3.bf16.msra.mxu0 %v8665_v21  ;;  %v6546_v59 = vld [vmem:[%s14555_s3 + $0x4b8] sm:$0xff] }
 0x4e2   :  { %v8531_v63 = vpack.c.bf16 %v6714_v39, %v6707_v4  ;;  %v8863_v36 = vadd.f32 %v5570_v34, %v13829_v58  ;;  %v5572_v14 = vpop.f32.mrb[93].mxu0  ;;  %8668 = vmatprep.subr.bf16.mxu0 %v8667_v17  ;;  %v6539_v17 = vld [vmem:[%s14555_s3 + $0x480] sm:$0xff]  ;;  %v7152_v34 = vld [vmem:[%s14557_s5 + $0x268] sm:$0xff] }
 0x4e3   :  { %v8864_v13 = vadd.f32 %v5572_v14, %v13832_v47  ;;  %v5574_v22 = vpop.f32.mrb[94].mxu0  ;;  %v8529_v40 = vpack.c.bf16 %v6715_v50, %v6708_v16  ;;  %v6547_v39 = vld [vmem:[%s14555_s3 + $0x4c0] sm:$0xff]  ;;  %v8683_v16 = vpack.c.bf16 %v7168_v57, %v7167_v61  ;;  %v6574_v57 = vld [vmem:[%s14555_s3 + $0x598] sm:$0xff] }
 0x4e4   :  { %v6329_v44 = vmax.f32 %v8863_v36, 0.0  ;;  %v8865_v1 = vadd.f32 %v5574_v22, %v13829_v58  ;;  %v5576_v53 = vpop.f32.mrb[95].mxu0  ;;  %v7151_v50 = vld [vmem:[%s14557_s5 + $0x260] sm:$0xff]  ;;  %v7170_v36 = vld [vmem:[%s14557_s5 + $0x2f8] sm:$0xff] }
 0x4e5   :  { %v6330_v11 = vmax.f32 %v8864_v13, 0.0  ;;  %v8866_v18 = vadd.f32 %v5576_v53, %v13832_v47  ;;  %8530 = vmatprep.subr.bf16.mxu1 %v8529_v40  ;;  %8670 = vmatpush3.bf16.msra.mxu0 %v8669_v41  ;;  %v8685_v22 = vpack.c.bf16 %v7152_v34, %v7151_v50 }
 0x4e6   :  { %v6336_v46 = vmax.f32 %v8865_v1, 0.0  ;;  %8532 = vmatpush1.bf16.msra.mxu1 %v8531_v63  ;;  %8672 = vmatprep.subr.bf16.mxu0 %v8671_v20  ;;  %v6721_v19 = vmul.f32 %v6525_v3, %v6329_v44  ;;  %v7169_v63 = vld [vmem:[%s14557_s5 + $0x2f0] sm:$0xff] }
 0x4e7   :  { %v6337_v62 = vmax.f32 %v8866_v18, 0.0  ;;  %v6722_v27 = vmul.f32 %v6526_v37, %v6330_v11  ;;  %v8687_v44 = vpack.c.bf16 %v7170_v36, %v7169_v63  ;;  %v6553_v18 = vld [vmem:[%s14555_s3 + $0x4f0] sm:$0xff] }
 0x4e8   :  { %v6728_v12 = vmul.f32 %v6532_v52, %v6336_v46  ;;  %v6560_v46 = vld [vmem:[%s14555_s3 + $0x528] sm:$0xff] }
 0x4e9   :  { %v6729_v48 = vmul.f32 %v6533_v30, %v6337_v62  ;;  %v5580_v45 = vpop.f32.mrb[96].mxu0  ;;  %8674 = vmatpush3.bf16.msra.mxu0 %v8673_v55 }
 0x4ea   :  { %v8535_v10 = vpack.c.bf16 %v6728_v12, %v6721_v19  ;;  %v8867_v26 = vadd.f32 %v5580_v45, %v13829_v58  ;;  %v5582_v54 = vpop.f32.mrb[97].mxu0  ;;  %8676 = vmatprep.subr.bf16.mxu0 %v8675_v38  ;;  %v6554_v38 = vld [vmem:[%s14555_s3 + $0x4f8] sm:$0xff] }
 0x4eb   :  { %v8868_v49 = vadd.f32 %v5582_v54, %v13832_v47  ;;  %v5584_v29 = vpop.f32.mrb[98].mxu0  ;;  %v8533_v5 = vpack.c.bf16 %v6729_v48, %v6722_v27 }
 0x4ec   :  { %v6343_v21 = vmax.f32 %v8867_v26, 0.0  ;;  %v8869_v42 = vadd.f32 %v5584_v29, %v13829_v58  ;;  %v5586_v56 = vpop.f32.mrb[99].mxu0 }
 0x4ed   :  { %v6344_v6 = vmax.f32 %v8868_v49, 0.0  ;;  %v8870_v8 = vadd.f32 %v5586_v56, %v13832_v47  ;;  %8534 = vmatprep.subr.bf16.mxu1 %v8533_v5  ;;  %8678 = vmatpush3.bf16.msra.mxu0 %v8677_v32  ;;  %v6567_v5 = vld [vmem:[%s14555_s3 + $0x560] sm:$0xff] }
 0x4ee   :  { %v6350_v4 = vmax.f32 %v8869_v42, 0.0  ;;  %8536 = vmatpush1.bf16.msra.mxu1 %v8535_v10  ;;  %8680 = vmatprep.subr.bf16.mxu0 %v8679_v51  ;;  %v6735_v14 = vmul.f32 %v6539_v17, %v6343_v21  ;;  %v6568_v42 = vld [vmem:[%s14555_s3 + $0x568] sm:$0xff]  ;;  %v6575_v17 = vld [vmem:[%s14555_s3 + $0x5a0] sm:$0xff] }
 0x4ef   :  { %v6351_v41 = vmax.f32 %v8870_v8, 0.0  ;;  %v6736_v28 = vmul.f32 %v6540_v25, %v6344_v6 }
 0x4f0   :  { %v6742_v20 = vmul.f32 %v6546_v59, %v6350_v4 }
 0x4f1   :  { %v6743_v0 = vmul.f32 %v6547_v39, %v6351_v41  ;;  %v5590_v13 = vpop.f32.mrb[100].mxu0  ;;  %8682 = vmatpush3.bf16.msra.mxu0 %v8681_v43 }
 0x4f2   :  { %v8539_v40 = vpack.c.bf16 %v6742_v20, %v6735_v14  ;;  %v8871_v2 = vadd.f32 %v5590_v13, %v13829_v58  ;;  %v5592_v33 = vpop.f32.mrb[101].mxu0  ;;  %8684 = vmatprep.subr.bf16.mxu0 %v8683_v16  ;;  %v6588_v13 = vld [vmem:[%s14555_s3 + $0x608] sm:$0xff] }
 0x4f3   :  { %v8872_v1 = vadd.f32 %v5592_v33, %v13832_v47  ;;  %v5594_v53 = vpop.f32.mrb[102].mxu0  ;;  %v8537_v3 = vpack.c.bf16 %v6743_v0, %v6736_v28  ;;  %v14252_v51 = vpop.f32.mrb[252].mxu1  ;;  %v6581_v28 = vld [vmem:[%s14555_s3 + $0x5d0] sm:$0xff] }
 0x4f4   :  { %v6357_v11 = vmax.f32 %v8871_v2, 0.0  ;;  %v8873_v37 = vadd.f32 %v5594_v53, %v13829_v58  ;;  %v5596_v52 = vpop.f32.mrb[103].mxu0  ;;  %v6860_v29 = vpop.f32.mrb[253].mxu1  ;;  %v7091_v53 = vld [vmem:[%s14557_s5 + $0x80] sm:$0xff] }
 0x4f5   :  { %v6358_v55 = vmax.f32 %v8872_v1, 0.0  ;;  %v8874_v30 = vadd.f32 %v5596_v52, %v13832_v47  ;;  %8538 = vmatprep.subr.bf16.mxu1 %v8537_v3  ;;  %8686 = vmatpush3.bf16.msra.mxu0 %v8685_v22 }
 0x4f6   :  { %v6364_v60 = vmax.f32 %v8873_v37, 0.0  ;;  %8540 = vmatpush1.bf16.msra.mxu1 %v8539_v40  ;;  %8688 = vmatprep.subr.bf16.mxu0 %v8687_v44  ;;  %v6749_v15 = vmul.f32 %v6553_v18, %v6357_v11  ;;  %v6582_v40 = vld [vmem:[%s14555_s3 + $0x5d8] sm:$0xff] }
 0x4f7   :  { %v6365_v62 = vmax.f32 %v8874_v30, 0.0  ;;  %v6750_v19 = vmul.f32 %v6554_v38, %v6358_v55  ;;  %v7075_v30 = vld [vmem:[%s14557_s5] sm:$0xff]  ;;  %v7076_v38 = vld [vmem:[%s14557_s5 + $0x8] sm:$0xff] }
 0x4f8   :  { %v6756_v31 = vmul.f32 %v6560_v46, %v6364_v60  ;;  %v7093_v60 = vld [vmem:[%s14557_s5 + $0x90] sm:$0xff] }
 0x4f9   :  { %v6757_v12 = vmul.f32 %v6561_v23, %v6365_v62  ;;  %v5600_v27 = vpop.f32.mrb[104].mxu0  ;;  %v7094_v23 = vld [vmem:[%s14557_s5 + $0x98] sm:$0xff]  ;;  %v8597_v62 = vpack.c.bf16 %v7076_v38, %v7075_v30  ;;  %v7111_v30 = vld [vmem:[%s14557_s5 + $0x120] sm:$0xff]  ;;  %v7112_v38 = vld [vmem:[%s14557_s5 + $0x128] sm:$0xff] }
 0x4fa   :  { %v8543_v48 = vpack.c.bf16 %v6756_v31, %v6749_v15  ;;  %v8875_v45 = vadd.f32 %v5600_v27, %v13829_v58  ;;  %v5602_v32 = vpop.f32.mrb[105].mxu0  ;;  %v8599_v15 = vpack.c.bf16 %v7094_v23, %v7093_v60  ;;  %v7077_v31 = vld [vmem:[%s14557_s5 + $0x10] sm:$0xff]  ;;  %v7096_v27 = vld [vmem:[%s14557_s5 + $0xa8] sm:$0xff] }
 0x4fb   :  { %v8876_v10 = vadd.f32 %v5602_v32, %v13832_v47  ;;  %v5604_v26 = vpop.f32.mrb[106].mxu0  ;;  %v8541_v54 = vpack.c.bf16 %v6757_v12, %v6750_v19  ;;  %v7078_v19 = vld [vmem:[%s14557_s5 + $0x18] sm:$0xff]  ;;  %v7095_v12 = vld [vmem:[%s14557_s5 + $0xa0] sm:$0xff]  ;;  %v7129_v60 = vld [vmem:[%s14557_s5 + $0x1b0] sm:$0xff] }
 0x4fc   :  { %v6371_v35 = vmax.f32 %v8875_v45, 0.0  ;;  %v8877_v9 = vadd.f32 %v5604_v26, %v13829_v58  ;;  %v5606_v49 = vpop.f32.mrb[107].mxu0  ;;  %v8603_v45 = vpack.c.bf16 %v7096_v27, %v7095_v12  ;;  %v7079_v32 = vld [vmem:[%s14557_s5 + $0x20] sm:$0xff]  ;;  %v7097_v26 = vld [vmem:[%s14557_s5 + $0xb0] sm:$0xff] }
 0x4fd   :  { %v6372_v61 = vmax.f32 %v8876_v10, 0.0  ;;  %v8878_v21 = vadd.f32 %v5606_v49, %v13832_v47  ;;  %8542 = vmatprep.subr.bf16.mxu1 %v8541_v54  ;;  %v7080_v10 = vld [vmem:[%s14557_s5 + $0x28] sm:$0xff]  ;;  %v7082_v49 = vld [vmem:[%s14557_s5 + $0x38] sm:$0xff] }
 0x4fe   :  { %v6378_v56 = vmax.f32 %v8877_v9, 0.0  ;;  %8544 = vmatpush1.bf16.msra.mxu1 %v8543_v48  ;;  %v6763_v25 = vmul.f32 %v6567_v5, %v6371_v35  ;;  %v8601_v48 = vpack.c.bf16 %v7078_v19, %v7077_v31  ;;  %v8605_v54 = vpack.c.bf16 %v7080_v10, %v7079_v32  ;;  %v7081_v9 = vld [vmem:[%s14557_s5 + $0x30] sm:$0xff]  ;;  %v7100_v5 = vld [vmem:[%s14557_s5 + $0xc8] sm:$0xff]  ;;  %v7131_v31 = vld [vmem:[%s14557_s5 + $0x1c0] sm:$0xff] }
 0x4ff   :  { %v6379_v6 = vmax.f32 %v8878_v21, 0.0  ;;  %v6764_v8 = vmul.f32 %v6568_v42, %v6372_v61  ;;  %v8609_v61 = vpack.c.bf16 %v7082_v49, %v7081_v9  ;;  %v7083_v21 = vld [vmem:[%s14557_s5 + $0x40] sm:$0xff]  ;;  %v7084_v42 = vld [vmem:[%s14557_s5 + $0x48] sm:$0xff]  ;;  %v7133_v32 = vld [vmem:[%s14557_s5 + $0x1d0] sm:$0xff] }
 0x500   :  { %v6770_v59 = vmul.f32 %v6574_v57, %v6378_v56  ;;  %v7101_v56 = vld [vmem:[%s14557_s5 + $0xd0] sm:$0xff]  ;;  %v7132_v19 = vld [vmem:[%s14557_s5 + $0x1c8] sm:$0xff]  ;;  %v7134_v10 = vld [vmem:[%s14557_s5 + $0x1d8] sm:$0xff] }
 0x501   :  { %v6771_v43 = vmul.f32 %v6575_v17, %v6379_v6  ;;  %v5610_v4 = vpop.f32.mrb[108].mxu0  ;;  %v7102_v17 = vld [vmem:[%s14557_s5 + $0xd8] sm:$0xff]  ;;  %v8613_v6 = vpack.c.bf16 %v7084_v42, %v7083_v21  ;;  %v8643_v27 = vpack.c.bf16 %v7132_v19, %v7131_v31  ;;  %v7135_v9 = vld [vmem:[%s14557_s5 + $0x1e0] sm:$0xff]  ;;  %v7136_v49 = vld [vmem:[%s14557_s5 + $0x1e8] sm:$0xff] }
 0x502   :  { %v8547_v39 = vpack.c.bf16 %v6770_v59, %v6763_v25  ;;  %v8879_v16 = vadd.f32 %v5610_v4, %v13829_v58  ;;  %v5612_v50 = vpop.f32.mrb[109].mxu0  ;;  %v8615_v25 = vpack.c.bf16 %v7102_v17, %v7101_v56  ;;  %v7085_v59 = vld [vmem:[%s14557_s5 + $0x50] sm:$0xff]  ;;  %v7104_v4 = vld [vmem:[%s14557_s5 + $0xe8] sm:$0xff]  ;;  %v7138_v42 = vld [vmem:[%s14557_s5 + $0x1f8] sm:$0xff] }
 0x503   :  { %v8880_v34 = vadd.f32 %v5612_v50, %v13832_v47  ;;  %v5614_v41 = vpop.f32.mrb[110].mxu0  ;;  %v8545_v63 = vpack.c.bf16 %v6771_v43, %v6764_v8  ;;  %v7086_v8 = vld [vmem:[%s14557_s5 + $0x58] sm:$0xff]  ;;  %v7103_v43 = vld [vmem:[%s14557_s5 + $0xe0] sm:$0xff]  ;;  %v7137_v21 = vld [vmem:[%s14557_s5 + $0x1f0] sm:$0xff] }
 0x504   :  { %v6385_v36 = vmax.f32 %v8879_v16, 0.0  ;;  %v8881_v14 = vadd.f32 %v5614_v41, %v13829_v58  ;;  %v5616_v20 = vpop.f32.mrb[111].mxu0  ;;  %v6589_v58 = vld [vmem:[%s14555_s3 + $0x610] sm:$0xff]  ;;  %v8619_v16 = vpack.c.bf16 %v7104_v4, %v7103_v43  ;;  %v7087_v50 = vld [vmem:[%s14557_s5 + $0x60] sm:$0xff]  ;;  %v8655_v17 = vpack.c.bf16 %v7138_v42, %v7137_v21  ;;  %v7172_v43 = vld [vmem:[%s14557_s5 + $0x308] sm:$0xff] }
 0x505   :  { %v6386_v0 = vmax.f32 %v8880_v34, 0.0  ;;  %v8882_v22 = vadd.f32 %v5616_v20, %v13832_v47  ;;  %8546 = vmatprep.subr.bf16.mxu1 %v8545_v63  ;;  %v7092_v47 = vld [vmem:[%s14557_s5 + $0x88] sm:$0xff]  ;;  %v7105_v41 = vld [vmem:[%s14557_s5 + $0xf0] sm:$0xff]  ;;  %v7106_v63 = vld [vmem:[%s14557_s5 + $0xf8] sm:$0xff] }
 0x506   :  { %v6392_v2 = vmax.f32 %v8881_v14, 0.0  ;;  %8548 = vmatpush1.bf16.msra.mxu1 %v8547_v39  ;;  %v6777_v44 = vmul.f32 %v6581_v28, %v6385_v36  ;;  %v8595_v46 = vpack.c.bf16 %v7092_v47, %v7091_v53  ;;  %v8617_v39 = vpack.c.bf16 %v7086_v8, %v7085_v59  ;;  %v7088_v34 = vld [vmem:[%s14557_s5 + $0x68] sm:$0xff]  ;;  %v7089_v20 = vld [vmem:[%s14557_s5 + $0x70] sm:$0xff]  ;;  %v7090_v28 = vld [vmem:[%s14557_s5 + $0x78] sm:$0xff] }
 0x507   :  { %v6393_v33 = vmax.f32 %v8882_v22, 0.0  ;;  %v6778_v3 = vmul.f32 %v6582_v40, %v6386_v0  ;;  %v8621_v36 = vpack.c.bf16 %v7088_v34, %v7087_v50  ;;  %v8623_v14 = vpack.c.bf16 %v7106_v63, %v7105_v41  ;;  %v7123_v0 = vld [vmem:[%s14557_s5 + $0x180] sm:$0xff]  ;;  %v7109_v47 = vld [vmem:[%s14557_s5 + $0x110] sm:$0xff]  ;;  %v7176_v41 = vld [vmem:[%s14557_s5 + $0x328] sm:$0xff] }
 0x508   :  { %v6784_v1 = vmul.f32 %v6588_v13, %v6392_v2  ;;  %v7124_v13 = vld [vmem:[%s14557_s5 + $0x188] sm:$0xff]  ;;  %v8625_v22 = vpack.c.bf16 %v7090_v28, %v7089_v20  ;;  %v7107_v2 = vld [vmem:[%s14557_s5 + $0x100] sm:$0xff] }
 0x509   :  { %v6785_v11 = vmul.f32 %v6589_v58, %v6393_v33  ;;  %v14290_v37 = vpop.f32.mrb[112].mxu0  ;;  %v8627_v40 = vpack.c.bf16 %v7124_v13, %v7123_v0  ;;  %v7108_v58 = vld [vmem:[%s14557_s5 + $0x108] sm:$0xff]  ;;  %v7125_v33 = vld [vmem:[%s14557_s5 + $0x190] sm:$0xff]  ;;  %v7171_v8 = vld [vmem:[%s14557_s5 + $0x300] sm:$0xff] }
 0x50a   :  { %v8551_v52 = vpack.c.bf16 %v6784_v1, %v6777_v44  ;;  %v14292_v18 = vpop.f32.mrb[113].mxu0  ;;  %v7126_v44 = vld [vmem:[%s14557_s5 + $0x198] sm:$0xff]  ;;  %v8629_v1 = vpack.c.bf16 %v7108_v58, %v7107_v2  ;;  %v8692_v4 = vpack.c.bf16 %v7172_v43, %v7171_v8  ;;  %v7175_v34 = vld [vmem:[%s14557_s5 + $0x320] sm:$0xff]  ;;  %v7180_v28 = vld [vmem:[%s14557_s5 + $0x348] sm:$0xff] }
 0x50b   :  { %v8549_v55 = vpack.c.bf16 %v6785_v11, %v6778_v3  ;;  %v8631_v53 = vpack.c.bf16 %v7126_v44, %v7125_v33  ;;  %v7110_v3 = vld [vmem:[%s14557_s5 + $0x118] sm:$0xff]  ;;  %v7127_v11 = vld [vmem:[%s14557_s5 + $0x1a0] sm:$0xff]  ;;  %v8698_v63 = vpack.c.bf16 %v7176_v41, %v7175_v34  ;;  %v7181_v13 = vld [vmem:[%s14557_s5 + $0x350] sm:$0xff] }
 0x50c   :  { %v7179_v20 = vld [vmem:[%s14557_s5 + $0x340] sm:$0xff]  ;;  %v7153_v2 = vld [vmem:[%s14557_s5 + $0x270] sm:$0xff]  ;;  %v7154_v58 = vld [vmem:[%s14557_s5 + $0x278] sm:$0xff] }
 0x50d   :  { %8550 = vmatprep.subr.bf16.mxu1 %v8549_v55  ;;  %v8633_v55 = vpack.c.bf16 %v7110_v3, %v7109_v47  ;;  %v8704_v0 = vpack.c.bf16 %v7180_v28, %v7179_v20  ;;  %v7183_v33 = vld [vmem:[%s14557_s5 + $0x360] sm:$0xff]  ;;  %v8689_v44 = vpack.c.bf16 %v7154_v58, %v7153_v2  ;;  %v7185_v47 = vld [vmem:[%s14557_s5 + $0x370] sm:$0xff]  ;;  %v7186_v3 = vld [vmem:[%s14557_s5 + $0x378] sm:$0xff] }
 0x50e   :  { %8552 = vmatpush1.bf16.msra.mxu1 %v8551_v52  ;;  %v7128_v52 = vld [vmem:[%s14557_s5 + $0x1a8] sm:$0xff] }
 0x50f   :  { %8596 = vmatprep.subr.bf16.mxu1 %v8595_v46  ;;  %v8635_v46 = vpack.c.bf16 %v7128_v52, %v7127_v11  ;;  %8690 = vmatpush3.bf16.msra.mxu0 %v8689_v44  ;;  %v9949_v11 = vmov 0.0   ;;  %v8713_v52 = vpack.c.bf16 %v7186_v3, %v7185_v47 }
 0x511   :  { %6999 = vmatmul.mubr.f32.vlgmr.msra.gmra.mrb[254].mxu1 %v14126_v24  ;;  %v7098_v24 = vld [vmem:[%s14557_s5 + $0xb8] sm:$0xff] }
 0x512   :  { %8598 = vmatpush3.bf16.msra.mxu1 %v8597_v62  ;;  %7258 = vmatprep.mubr.f32.mxu1 %v6860_v29  ;;  %v8607_v35 = vpack.c.bf16 %v7098_v24, %v7097_v26  ;;  %v7099_v29 = vld [vmem:[%s14557_s5 + $0xc0] sm:$0xff]  ;;  %v7113_v62 = vld [vmem:[%s14557_s5 + $0x130] sm:$0xff]  ;;  %v8647_v24 = vpack.c.bf16 %v7134_v10, %v7133_v32 }
 0x513   :  { %8600 = vmatprep.subr.bf16.mxu1 %v8599_v15  ;;  %v8611_v57 = vpack.c.bf16 %v7100_v5, %v7099_v29  ;;  %v7114_v15 = vld [vmem:[%s14557_s5 + $0x138] sm:$0xff]  ;;  %v8651_v5 = vpack.c.bf16 %v7136_v49, %v7135_v9 }
 0x514   :  { %v8641_v12 = vpack.c.bf16 %v7114_v15, %v7113_v62 }
 0x516   :  { %8602 = vmatpush3.bf16.msra.mxu1 %v8601_v48  ;;  %v7115_v48 = vld [vmem:[%s14557_s5 + $0x140] sm:$0xff] }
 0x517   :  { %8604 = vmatprep.subr.bf16.mxu1 %v8603_v45  ;;  %v7116_v45 = vld [vmem:[%s14557_s5 + $0x148] sm:$0xff] }
 0x518   :  { %v8645_v26 = vpack.c.bf16 %v7116_v45, %v7115_v48 }
 0x51a   :  { %8606 = vmatpush3.bf16.msra.mxu1 %v8605_v54  ;;  %v7117_v54 = vld [vmem:[%s14557_s5 + $0x150] sm:$0xff] }
 0x51b   :  { %8608 = vmatprep.subr.bf16.mxu1 %v8607_v35  ;;  %v7118_v35 = vld [vmem:[%s14557_s5 + $0x158] sm:$0xff] }
 0x51c   :  { %v8649_v29 = vpack.c.bf16 %v7118_v35, %v7117_v54 }
 0x51e   :  { %8610 = vmatpush3.bf16.msra.mxu1 %v8609_v61  ;;  %v7119_v61 = vld [vmem:[%s14557_s5 + $0x160] sm:$0xff] }
 0x51f   :  { %8612 = vmatprep.subr.bf16.mxu1 %v8611_v57  ;;  %v7120_v57 = vld [vmem:[%s14557_s5 + $0x168] sm:$0xff] }
 0x520   :  { %v8653_v56 = vpack.c.bf16 %v7120_v57, %v7119_v61 }
 0x522   :  { %8614 = vmatpush3.bf16.msra.mxu1 %v8613_v6  ;;  %v7121_v6 = vld [vmem:[%s14557_s5 + $0x170] sm:$0xff] }
 0x523   :  { %8616 = vmatprep.subr.bf16.mxu1 %v8615_v25  ;;  %v7122_v25 = vld [vmem:[%s14557_s5 + $0x178] sm:$0xff] }
 0x524   :  { %v8657_v59 = vpack.c.bf16 %v7122_v25, %v7121_v6 }
 0x526   :  { %8618 = vmatpush3.bf16.msra.mxu1 %v8617_v39  ;;  %v7173_v39 = vld [vmem:[%s14557_s5 + $0x310] sm:$0xff] }
 0x527   :  { %8620 = vmatprep.subr.bf16.mxu1 %v8619_v16  ;;  %v7174_v16 = vld [vmem:[%s14557_s5 + $0x318] sm:$0xff] }
 0x528   :  { %v8695_v50 = vpack.c.bf16 %v7174_v16, %v7173_v39 }
 0x52a   :  { %8622 = vmatpush3.bf16.msra.mxu1 %v8621_v36  ;;  %v7178_v36 = vld [vmem:[%s14557_s5 + $0x338] sm:$0xff] }
 0x52b   :  { %8624 = vmatprep.subr.bf16.mxu1 %v8623_v14 }
 0x52e   :  { %8626 = vmatpush3.bf16.msra.mxu1 %v8625_v22  ;;  %v7182_v22 = vld [vmem:[%s14557_s5 + $0x358] sm:$0xff] }
 0x52f   :  { %8628 = vmatprep.subr.bf16.mxu1 %v8627_v40  ;;  %v8707_v40 = vpack.c.bf16 %v7182_v22, %v7181_v13 }
 0x531   :  { %7259 = vmatmul.mubr.f32.vlgmr.msra.gmra.mrb[0].mxu1 %v14252_v51  ;;  %v7130_v51 = vld [vmem:[%s14557_s5 + $0x1b8] sm:$0xff] }
 0x532   :  { %8630 = vmatpush3.bf16.msra.mxu1 %v8629_v1  ;;  %7328 = vmatprep.mubr.f32.mxu1 %v14292_v18  ;;  %v8637_v18 = vpack.c.bf16 %v7112_v38, %v7111_v30  ;;  %v8639_v23 = vpack.c.bf16 %v7130_v51, %v7129_v60  ;;  %v7184_v1 = vld [vmem:[%s14557_s5 + $0x368] sm:$0xff] }
 0x533   :  { %8632 = vmatprep.subr.bf16.mxu1 %v8631_v53  ;;  %v8710_v53 = vpack.c.bf16 %v7184_v1, %v7183_v33 }
 0x536   :  { %8634 = vmatpush3.bf16.msra.mxu1 %v8633_v55 }
 0x537   :  { %8636 = vmatprep.subr.bf16.mxu1 %v8635_v46 }
 0x53a   :  { %8638 = vmatpush3.bf16.msra.mxu1 %v8637_v18 }
 0x53b   :  { %8640 = vmatprep.subr.bf16.mxu1 %v8639_v23  ;;  %v7882_v23 = vld [vmem:[%s14558_s6] ss:$0 sm:$0xff] }
 0x53e   :  { %8642 = vmatpush3.bf16.msra.mxu1 %v8641_v12 }
 0x53f   :  { %8644 = vmatprep.subr.bf16.mxu1 %v8643_v27 }
 0x542   :  { %8646 = vmatpush3.bf16.msra.mxu1 %v8645_v26 }
 0x543   :  { %8648 = vmatprep.subr.bf16.mxu1 %v8647_v24 }
 0x546   :  { %8650 = vmatpush3.bf16.msra.mxu1 %v8649_v29 }
 0x547   :  { %8652 = vmatprep.subr.bf16.mxu1 %v8651_v5 }
 0x54a   :  { %8654 = vmatpush3.bf16.msra.mxu1 %v8653_v56 }
 0x54b   :  { %8656 = vmatprep.subr.bf16.mxu1 %v8655_v17 }
 0x54e   :  { %8658 = vmatpush3.bf16.msra.mxu1 %v8657_v59 }
 0x54f   :  { %8691 = vmatprep.subr.bf16.mxu1 %v9947_v7 }
 0x551   :  { %7329 = vmatmul.mubr.f32.vlgmr.msra.gmra.mrb[2].mxu1 %v14290_v37  ;;  %v7177_v37 = vld [vmem:[%s14557_s5 + $0x330] sm:$0xff] }
 0x552   :  { %8693 = vmatpush3.bf16.msra.mxu1 %v8692_v4  ;;  %v8701_v14 = vpack.c.bf16 %v7178_v36, %v7177_v37  ;;  %8382 = vmatprep.mubr.msk.f32.mxu1 %vm9948_vm11, %v9949_v11 }
 0x553   :  { %8694 = vmatprep.subr.bf16.mxu1 %v9947_v7 }
 0x556   :  { %8696 = vmatpush3.bf16.msra.mxu1 %v8695_v50 }
 0x557   :  { %8697 = vmatprep.subr.bf16.mxu1 %v9947_v7 }
 0x55a   :  { %8699 = vmatpush3.bf16.msra.mxu1 %v8698_v63 }
 0x55b   :  { %8700 = vmatprep.subr.bf16.mxu1 %v9947_v7 }
 0x55e   :  { %8702 = vmatpush3.bf16.msra.mxu1 %v8701_v14 }
 0x55f   :  { %8703 = vmatprep.subr.bf16.mxu1 %v9947_v7 }
 0x562   :  { %8705 = vmatpush3.bf16.msra.mxu1 %v8704_v0 }
 0x563   :  { %8706 = vmatprep.subr.bf16.mxu1 %v9947_v7 }
 0x566   :  { %8708 = vmatpush3.bf16.msra.mxu1 %v8707_v40 }
 0x567   :  { %8709 = vmatprep.subr.bf16.mxu1 %v9947_v7 }
 0x56a   :  { %8711 = vmatpush3.bf16.msra.mxu1 %v8710_v53 }
 0x56b   :  { %8712 = vmatprep.subr.bf16.mxu1 %v9947_v7 }
 0x56e   :  { %8714 = vmatpush3.bf16.msra.mxu1 %v8713_v52 }
 0x5af   :  { %v7071_v55 = vpop.f32.mrb[114].mxu0 }
 0x5b0   :  { %v7073_v46 = vpop.f32.mrb[115].mxu0  ;;  %8383 = vmatmul.mubr.f32.vlgmr.msra.gmra.mrb[4].mxu1 %v7071_v55 }
 0x5e4   :  { %v7000_v30 = vpop.f32.mrb[254].mxu1 }
 0x5e5   :  { %v7002_v38 = vpop.f32.mrb[255].mxu1 }
 0x5e6   :  { %7398 = vmatprep.mubr.f32.mxu0 %v7002_v38 }
 0x5e7   :  { %7399 = vmatmul.mubr.f32.vlgmr.msra.gmra.mrb[116].mxu0 %v7000_v30 }
 0x604   :  { %v8230_v60 = vpop.f32.mrb[0].mxu1 }
 0x605   :  { %v8231_v51 = vpop.f32.mrb[1].mxu1 }
 0x606   :  { %v8232_v18 = vadd.f32 %v8231_v51, %v8230_v60 }
 0x608   :  { %v7261_v62 = vadd.f32 %v8232_v18, %v7882_v23 }
 0x624   :  { %v8265_v15 = vpop.f32.mrb[2].mxu1 }
 0x625   :  { %v8266_v31 = vpop.f32.mrb[3].mxu1 }
 0x626   :  { %v8267_v19 = vadd.f32 %v8266_v31, %v8265_v15 }
 0x628   :  { %v7331_v7 = vadd.f32 %v8267_v19, %v7261_v62 }
 0x683   :  { %v7470_v12 = vpop.f32.mrb[4].mxu1 }
 0x684   :  { %v8384_v27 = vpop.f32.mrb[5].mxu1 }
 0x6ba   :  { %v8300_v48 = vpop.f32.mrb[116].mxu0 }
 0x6bb   :  { %v8301_v45 = vpop.f32.mrb[117].mxu0 }
 0x6bc   :  { %v8302_v32 = vadd.f32 %v8301_v45, %v8300_v48 }
 0x6be   :  { %v7401_v10 = vadd.f32 %v8302_v32, %v7331_v7 }
 0x6c0   :  { %v7471_v26 = vadd.f32 %v7470_v12, %v7401_v10 }
 0x6c2   :  { %7474 = vst [vmem:[%s14559_s7] sm:$0xff] %v7471_v26 }

</bundles_post_ra>
